<compile_context>
chip_gen: v5e
topology: v5e:2x2
jax: 0.10.0
libtpu: 0.0.40
codegen_flags: <defaults>
</compile_context>

<pallas_src>
import functools
import math

import jax
import jax.numpy as jnp
from jax.experimental import pallas as pl
from jax.experimental.pallas import tpu as pltpu


_VMEM_LIMIT = 32 * 1024 * 1024  # explicit scoped-VMEM budget, safe on v5e / v6e / v7x


# ---------------------------------------------------------------------------
# Tile-selection helpers
# ---------------------------------------------------------------------------
def _pick_tile(n, candidates):
    """Largest candidate that divides n, else the full dimension (always a valid block)."""
    for c in candidates:
        if n % c == 0:
            return c
    return n


def _pick_row_tile(m):
    """Row tile: prefer >=2 blocks so both v7x TensorCores get work; cap at 256."""
    cands = (256, 128, 64, 32, 16, 8)
    for c in cands:
        if m % c == 0 and m // c >= 2:
            return c
    for c in cands:
        if m % c == 0:
            return c
    return m


def _pick_col_tile(n):
    """Lane-dense column tile (multiple of 128); prefer an even block count >= 2 (v7x balance)."""
    cands = (1024, 768, 512, 384, 256, 128)
    for c in cands:
        if n % c == 0 and (n // c) >= 2 and (n // c) % 2 == 0:
            return c
    for c in cands:
        if n % c == 0:
            return c
    return n


# ---------------------------------------------------------------------------
# Kernel 1: tiled Linear  out = x @ W + b   (bf16 operands, f32 accumulation)
# ---------------------------------------------------------------------------
def _linear_bias_kernel(x_ref, w_ref, b_ref, o_ref, acc_ref):
    @pl.when(pl.program_id(2) == 0)
    def _():
        acc_ref[...] = jnp.zeros_like(acc_ref)

    acc_ref[...] += jnp.dot(x_ref[...].astype(jnp.bfloat16),
                            w_ref[...].astype(jnp.bfloat16),
                            preferred_element_type=jnp.float32)

    @pl.when(pl.program_id(2) == pl.num_programs(2) - 1)
    def _():
        o_ref[...] = (acc_ref[...] + b_ref[...].astype(jnp.float32)).astype(o_ref.dtype)


def linear_bias(x2d, w, b):
    """x2d: (M, K); w: (K, N); b: (1, N) -> (M, N)."""
    M, K = x2d.shape
    K2, N = w.shape
    assert K == K2 and b.shape == (1, N)
    tm = _pick_row_tile(M)
    tn = _pick_col_tile(N)
    tk = _pick_tile(K, (512, 256, 128))
    grid = (M // tm, N // tn, K // tk)

    return pl.pallas_call(
        _linear_bias_kernel,
        out_shape=jax.ShapeDtypeStruct((M, N), x2d.dtype),
        grid_spec=pltpu.PrefetchScalarGridSpec(
            num_scalar_prefetch=0,
            grid=grid,
            in_specs=[
                pl.BlockSpec((tm, tk), lambda i, j, k: (i, k)),
                pl.BlockSpec((tk, tn), lambda i, j, k: (k, j)),
                pl.BlockSpec((1, tn), lambda i, j, k: (0, j)),
            ],
            out_specs=pl.BlockSpec((tm, tn), lambda i, j, k: (i, j)),
            scratch_shapes=[pltpu.VMEM((tm, tn), jnp.float32)],
        ),
        compiler_params=pltpu.CompilerParams(
            dimension_semantics=("parallel", "parallel", "arbitrary"),
            vmem_limit_bytes=_VMEM_LIMIT),
    )(x2d, w, b)


# ---------------------------------------------------------------------------
# Kernel 2: multi-head attention; one batch element (all heads) per grid step.
# Head slices come straight out of the fused qkv block -> no split_heads transposes.
# ---------------------------------------------------------------------------
def _mha_kernel(qkv_ref, o_ref, *, n_heads, dk, scale):
    D = n_heads * dk
    qkv = qkv_ref[0]                                   # (S, 3*D) f32, one batch element
    outs = []
    for h in range(n_heads):                           # unrolled: all heads in one grid step
        q = qkv[:, h * dk:(h + 1) * dk].astype(jnp.bfloat16)
        k = qkv[:, D + h * dk:D + (h + 1) * dk].astype(jnp.bfloat16)
        v = qkv[:, 2 * D + h * dk:2 * D + (h + 1) * dk].astype(jnp.bfloat16)
        # scores[i, j] = sum_d q[i, d] * k[j, d]  (contract last dims; no transpose)
        s = jax.lax.dot_general(q, k, (((1,), (1,)), ((), ())),
                                preferred_element_type=jnp.float32) * scale
        m = jnp.max(s, axis=-1, keepdims=True)
        p = jnp.exp(s - m)
        l = jnp.sum(p, axis=-1, keepdims=True)
        p = p * pl.reciprocal(l, approx=True)           # EUP slot -> normalization ~free
        outs.append(jnp.dot(p.astype(jnp.bfloat16), v,
                            preferred_element_type=jnp.float32))
    # Single lane-dense (S, D) store instead of n_heads masked 64-lane stores.
    o_ref[0] = jnp.concatenate(outs, axis=-1).astype(o_ref.dtype)


def attention(qkv3, n_heads):
    """qkv3: (B, S, 3*D) with [Q | K | V] concatenated along the last axis -> (B, S, D)."""
    B, S, threeD = qkv3.shape
    D = threeD // 3
    dk = D // n_heads
    # TODO(synk): materializes the (S, S) scores per head; for long sequences switch to a
    # flash-style online-softmax over K/V blocks to keep VMEM O(S*dk).
    return pl.pallas_call(
        functools.partial(_mha_kernel, n_heads=n_heads, dk=dk, scale=1.0 / math.sqrt(dk)),
        out_shape=jax.ShapeDtypeStruct((B, S, D), qkv3.dtype),
        grid_spec=pltpu.PrefetchScalarGridSpec(
            num_scalar_prefetch=0,
            grid=(B,),
            in_specs=[pl.BlockSpec((1, S, threeD), lambda b: (b, 0, 0))],
            out_specs=pl.BlockSpec((1, S, D), lambda b: (b, 0, 0)),
        ),
        compiler_params=pltpu.CompilerParams(
            dimension_semantics=("parallel",),
            vmem_limit_bytes=_VMEM_LIMIT),
    )(qkv3)


# ---------------------------------------------------------------------------
# Kernel 3: output projection + residual add + LayerNorm fused in the epilogue
#   out = LN(res + a @ W + b)    (N == full LN axis, lane-dense output block)
# ---------------------------------------------------------------------------
def _proj_add_ln_kernel(a_ref, w_ref, b_ref, res_ref, g_ref, bt_ref, o_ref, acc_ref, *, eps):
    k = pl.program_id(1)

    @pl.when(k == 0)
    def _():
        acc_ref[...] = jnp.zeros_like(acc_ref)

    acc_ref[...] += jnp.dot(a_ref[...].astype(jnp.bfloat16),
                            w_ref[...].astype(jnp.bfloat16),
                            preferred_element_type=jnp.float32)

    @pl.when(k == pl.num_programs(1) - 1)
    def _():
        z = (acc_ref[...] + b_ref[...].astype(jnp.float32)
             + res_ref[...].astype(jnp.float32))
        mu = jnp.mean(z, axis=-1, keepdims=True)
        zc = z - mu
        var = jnp.mean(zc * zc, axis=-1, keepdims=True)
        inv = jax.lax.rsqrt(var + eps)
        o_ref[...] = (zc * inv * g_ref[...].astype(jnp.float32)
                      + bt_ref[...].astype(jnp.float32)).astype(o_ref.dtype)


def proj_add_layernorm(a, w, b, res, gamma, beta, *, eps=1e-5):
    M, K = a.shape
    K2, N = w.shape
    assert K == K2 and res.shape == (M, N)
    tm = _pick_row_tile(M)
    tk = _pick_tile(K, (512, 256, 128))
    grid = (M // tm, K // tk)
    return pl.pallas_call(
        functools.partial(_proj_add_ln_kernel, eps=eps),
        out_shape=jax.ShapeDtypeStruct((M, N), a.dtype),
        grid_spec=pltpu.PrefetchScalarGridSpec(
            num_scalar_prefetch=0,
            grid=grid,
            in_specs=[
                pl.BlockSpec((tm, tk), lambda i, k: (i, k)),   # activations
                pl.BlockSpec((tk, N), lambda i, k: (k, 0)),    # W_o
                pl.BlockSpec((1, N), lambda i, k: (0, 0)),     # bias
                pl.BlockSpec((tm, N), lambda i, k: (i, 0)),    # residual
                pl.BlockSpec((1, N), lambda i, k: (0, 0)),     # gamma
                pl.BlockSpec((1, N), lambda i, k: (0, 0)),     # beta
            ],
            out_specs=pl.BlockSpec((tm, N), lambda i, k: (i, 0)),
            scratch_shapes=[pltpu.VMEM((tm, N), jnp.float32)],
        ),
        compiler_params=pltpu.CompilerParams(
            dimension_semantics=("parallel", "arbitrary"),
            vmem_limit_bytes=_VMEM_LIMIT),
    )(a, w, b, res, gamma, beta)


# ---------------------------------------------------------------------------
# Kernel 4: fused FFN + residual add + LayerNorm
#   out = LN(x1 + relu(x1 @ W1 + b1) @ W2 + b2), streaming d_ff blocks so the
#   (M, d_ff) hidden activation never hits HBM.
# ---------------------------------------------------------------------------
def _ffn_add_ln_kernel(x_ref, w1_ref, b1_ref, w2_ref, b2_ref, g_ref, bt_ref,
                       o_ref, acc_ref, *, eps):
    f = pl.program_id(1)

    @pl.when(f == 0)
    def _():
        acc_ref[...] = jnp.zeros_like(acc_ref)

    h = jnp.dot(x_ref[...].astype(jnp.bfloat16), w1_ref[...].astype(jnp.bfloat16),
                preferred_element_type=jnp.float32)
    h = jnp.maximum(h + b1_ref[...].astype(jnp.float32), 0.0)       # f32 epilogue math
    acc_ref[...] += jnp.dot(h.astype(jnp.bfloat16), w2_ref[...].astype(jnp.bfloat16),
                            preferred_element_type=jnp.float32)

    @pl.when(f == pl.num_programs(1) - 1)
    def _():
        z = (acc_ref[...] + b2_ref[...].astype(jnp.float32)
             + x_ref[...].astype(jnp.float32))                       # residual = x1
        mu = jnp.mean(z, axis=-1, keepdims=True)
        zc = z - mu
        var = jnp.mean(zc * zc, axis=-1, keepdims=True)
        inv = jax.lax.rsqrt(var + eps)
        o_ref[...] = (zc * inv * g_ref[...].astype(jnp.float32)
                      + bt_ref[...].astype(jnp.float32)).astype(o_ref.dtype)


def ffn_add_layernorm(x1, w1, b1, w2, b2, gamma, beta, *, eps=1e-5):
    M, D = x1.shape
    D2, F = w1.shape
    assert D == D2 and w2.shape == (F, D)
    tm = _pick_row_tile(M)
    tf = _pick_tile(F, (512, 256, 128))
    grid = (M // tm, F // tf)
    return pl.pallas_call(
        functools.partial(_ffn_add_ln_kernel, eps=eps),
        out_shape=jax.ShapeDtypeStruct((M, D), x1.dtype),
        grid_spec=pltpu.PrefetchScalarGridSpec(
            num_scalar_prefetch=0,
            grid=grid,
            in_specs=[
                pl.BlockSpec((tm, D), lambda i, f: (i, 0)),   # x1: matmul input + residual (resident over f)
                pl.BlockSpec((D, tf), lambda i, f: (0, f)),   # W1 column block
                pl.BlockSpec((1, tf), lambda i, f: (0, f)),   # b1 block
                pl.BlockSpec((tf, D), lambda i, f: (f, 0)),   # W2 row block
                pl.BlockSpec((1, D), lambda i, f: (0, 0)),    # b2
                pl.BlockSpec((1, D), lambda i, f: (0, 0)),    # gamma
                pl.BlockSpec((1, D), lambda i, f: (0, 0)),    # beta
            ],
            out_specs=pl.BlockSpec((tm, D), lambda i, f: (i, 0)),
            scratch_shapes=[pltpu.VMEM((tm, D), jnp.float32)],
        ),
        compiler_params=pltpu.CompilerParams(
            dimension_semantics=("parallel", "arbitrary"),
            vmem_limit_bytes=_VMEM_LIMIT),
    )(x1, w1, b1, w2, b2, gamma, beta)


# ---------------------------------------------------------------------------
# Encoder forward (only contiguous reshapes between kernels -- no transposes)
# ---------------------------------------------------------------------------
@functools.partial(jax.jit, static_argnames=("n_heads",))
def encoder_forward(x, params, *, n_heads):
    B, S, D = x.shape
    x2 = x.reshape(B * S, D)

    qkv = linear_bias(x2, params["w_qkv"], params["b_qkv"])          # (B*S, 3D)
    qkv = qkv.reshape(B, S, 3 * D)                                   # contiguous view, free

    attn = attention(qkv, n_heads)                                   # (B, S, D)
    attn2 = attn.reshape(B * S, D)                                   # contiguous view, free

    # TODO(synk): nn.Dropout treated as identity (inference mode).
    x1 = proj_add_layernorm(attn2, params["w_o"], params["b_o"], x2,
                            params["g1"], params["bt1"])             # LN1(x + W_o(attn))

    x_out = ffn_add_layernorm(x1, params["w_ff1"], params["b_ff1"],
                              params["w_ff2"], params["b_ff2"],
                              params["g2"], params["bt2"])           # LN2(x1 + FFN(x1))
    return x_out.reshape(B, S, D)


# ---------------------------------------------------------------------------
# Parameter init + pure-JAX reference (same autocast-style bf16 matmul semantics)
# ---------------------------------------------------------------------------
def init_encoder_params(key, dim=512, n_heads=8, d_ff=2048, dtype=jnp.float32):
    assert dim % n_heads == 0
    ks = jax.random.split(key, 12)
    s = 0.02
    return dict(
        w_qkv=s * jax.random.normal(ks[0], (dim, 3 * dim), dtype),
        b_qkv=s * jax.random.normal(ks[1], (1, 3 * dim), dtype),
        w_o=s * jax.random.normal(ks[2], (dim, dim), dtype),
        b_o=s * jax.random.normal(ks[3], (1, dim), dtype),
        w_ff1=s * jax.random.normal(ks[4], (dim, d_ff), dtype),
        b_ff1=s * jax.random.normal(ks[5], (1, d_ff), dtype),
        w_ff2=s * jax.random.normal(ks[6], (d_ff, dim), dtype),
        b_ff2=s * jax.random.normal(ks[7], (1, dim), dtype),
        g1=1.0 + 0.1 * jax.random.normal(ks[8], (1, dim), dtype),
        bt1=0.1 * jax.random.normal(ks[9], (1, dim), dtype),
        g2=1.0 + 0.1 * jax.random.normal(ks[10], (1, dim), dtype),
        bt2=0.1 * jax.random.normal(ks[11], (1, dim), dtype),
    )


def encoder_reference(x, p, *, n_heads):
    def mm(a, b):  # autocast-style: bf16 operands, f32 accumulation
        return jnp.dot(a.astype(jnp.bfloat16), b.astype(jnp.bfloat16),
                       preferred_element_type=jnp.float32)

    B, S, D = x.shape
    H, dk = n_heads, D // n_heads
    x2 = x.reshape(B * S, D)
    qkv = mm(x2, p["w_qkv"]) + p["b_qkv"]
    q, k, v = jnp.split(qkv, 3, axis=-1)

    def sh(t):
        return t.reshape(B, S, H, dk).transpose(0, 2, 1, 3)

    qh, kh, vh = sh(q), sh(k), sh(v)
    s = jnp.einsum("bhqd,bhkd->bhqk", qh.astype(jnp.bfloat16), kh.astype(jnp.bfloat16),
                   preferred_element_type=jnp.float32) / math.sqrt(dk)
    m = jnp.max(s, axis=-1, keepdims=True)
    e = jnp.exp(s - m)
    pr = e / jnp.sum(e, axis=-1, keepdims=True)
    o = jnp.einsum("bhqk,bhkd->bhqd", pr.astype(jnp.bfloat16), vh.astype(jnp.bfloat16),
                   preferred_element_type=jnp.float32)
    o = o.transpose(0, 2, 1, 3).reshape(B * S, D)
    attn_out = mm(o, p["w_o"]) + p["b_o"]

    def ln(z, g, b, eps=1e-5):
        mu = jnp.mean(z, axis=-1, keepdims=True)
        zc = z - mu
        var = jnp.mean(zc * zc, axis=-1, keepdims=True)
        return zc * jax.lax.rsqrt(var + eps) * g + b

    x1 = ln(x2 + attn_out, p["g1"], p["bt1"])
    h = jnp.maximum(mm(x1, p["w_ff1"]) + p["b_ff1"], 0.0)
    ff = mm(h.astype(jnp.float32), p["w_ff2"]) + p["b_ff2"]
    return ln(x1 + ff, p["g2"], p["bt2"]).reshape(B, S, D)


if __name__ == "__main__":
    B, S, DIM, HEADS, D_FF = 2, 8, 512, 8, 2048   # module defaults: dim=512, n_heads=8, FFN 2048

    key = jax.random.PRNGKey(0)
    kx, kp = jax.random.split(key)
    x = jax.random.normal(kx, (B, S, DIM), dtype=jnp.float32)
    params = init_encoder_params(kp, dim=DIM, n_heads=HEADS, d_ff=D_FF)

    out = encoder_forward(x, params, n_heads=HEADS)
    out = jax.block_until_ready(out)
    assert out.shape == (B, S, DIM)

    ref = encoder_reference(x, params, n_heads=HEADS)
    max_err = float(jnp.max(jnp.abs(out - ref)))
    # Both kernel and reference use bf16 MXU operands (autocast-style); tolerance covers
    # residual ulp-level divergence (approx-reciprocal softmax, accumulation order).
    assert jnp.allclose(out, ref, atol=1e-2, rtol=1e-2), f"mismatch vs reference, max_err={max_err}"

    print("KERNEL_OK")
</pallas_src>

<mosaic_0001>
module attributes {stable_mosaic.version = 11 : i64} {
  func.func @_linear_bias_kernel(%arg0: i32, %arg1: i32, %arg2: i32, %arg3: memref<8x512xf32, #tpu.memory_space<vmem>>, %arg4: memref<512x768xf32, #tpu.memory_space<vmem>>, %arg5: memref<1x768xf32, #tpu.memory_space<vmem>>, %arg6: memref<8x768xf32, #tpu.memory_space<vmem>>, %arg7: memref<8x768xf32, #tpu.memory_space<vmem>>) attributes {dimension_semantics = [#tpu.dimension_semantics<parallel>, #tpu.dimension_semantics<parallel>, #tpu.dimension_semantics<arbitrary>], iteration_bounds = array<i64: 2, 2, 1>, scalar_prefetch = 0 : i64, scratch_operands = 1 : i64, tpu.core_type = #tpu.core_type<tc>, window_params = [{transform_indices = @transform_0, window_bounds = array<i64: 8, 512>}, {transform_indices = @transform_1, window_bounds = array<i64: 512, 768>}, {transform_indices = @transform_2, window_bounds = array<i64: 1, 768>}, {transform_indices = @transform_3, window_bounds = array<i64: 8, 768>}]} {
    %c0_i32 = arith.constant 0 : i32
    %0 = arith.cmpi eq, %arg2, %c0_i32 : i32
    %1 = arith.extui %0 : i1 to i32
    %c0_i32_0 = arith.constant 0 : i32
    %2 = arith.cmpi ne, %1, %c0_i32_0 : i32
    scf.if %2 {
      %cst_10 = arith.constant 0.000000e+00 : f32
      %14 = vector.broadcast %cst_10 : f32 to vector<8x768xf32>
      %c0_11 = arith.constant 0 : index
      %c0_12 = arith.constant 0 : index
      %15 = vector.load %arg7[%c0_11, %c0_12] : memref<8x768xf32, #tpu.memory_space<vmem>>, vector<8x768xf32>
      tpu.vector_store %arg7[%c0_11, %c0_12], %14 {strides = array<i32>} : memref<8x768xf32, #tpu.memory_space<vmem>>, vector<8x768xf32>,
    } else {
    }
    %c0 = arith.constant 0 : index
    %c0_1 = arith.constant 0 : index
    %3 = vector.load %arg7[%c0, %c0_1] : memref<8x768xf32, #tpu.memory_space<vmem>>, vector<8x768xf32>
    %c0_2 = arith.constant 0 : index
    %c0_3 = arith.constant 0 : index
    %4 = vector.load %arg3[%c0_2, %c0_3] : memref<8x512xf32, #tpu.memory_space<vmem>>, vector<8x512xf32>
    %5 = arith.truncf %4 : vector<8x512xf32> to vector<8x512xbf16>
    %c0_4 = arith.constant 0 : index
    %c0_5 = arith.constant 0 : index
    %6 = vector.load %arg4[%c0_4, %c0_5] : memref<512x768xf32, #tpu.memory_space<vmem>>, vector<512x768xf32>
    %7 = arith.truncf %6 : vector<512x768xf32> to vector<512x768xbf16>
    %cst = arith.constant dense<0.000000e+00> : vector<8x768xf32>
    %8 = tpu.matmul %5, %7, %cst {dimension_numbers = #tpu.dot_dimension_numbers<[1], [0], [0], [1], [0, 0, 1, 1], [], []>} : vector<8x512xbf16>, vector<512x768xbf16>, vector<8x768xf32> -> vector<8x768xf32>
    %9 = arith.addf %3, %8 : vector<8x768xf32>
    %c0_6 = arith.constant 0 : index
    %c0_7 = arith.constant 0 : index
    %10 = vector.load %arg7[%c0_6, %c0_7] : memref<8x768xf32, #tpu.memory_space<vmem>>, vector<8x768xf32>
    tpu.vector_store %arg7[%c0_6, %c0_7], %9 {strides = array<i32>} : memref<8x768xf32, #tpu.memory_space<vmem>>, vector<8x768xf32>,
    %c0_i32_8 = arith.constant 0 : i32
    %11 = arith.cmpi eq, %arg2, %c0_i32_8 : i32
    %12 = arith.extui %11 : i1 to i32
    %c0_i32_9 = arith.constant 0 : i32
    %13 = arith.cmpi ne, %12, %c0_i32_9 : i32
    scf.if %13 {
      %c0_10 = arith.constant 0 : index
      %c0_11 = arith.constant 0 : index
      %14 = vector.load %arg7[%c0_10, %c0_11] : memref<8x768xf32, #tpu.memory_space<vmem>>, vector<8x768xf32>
      %c0_12 = arith.constant 0 : index
      %c0_13 = arith.constant 0 : index
      %15 = vector.load %arg5[%c0_12, %c0_13] : memref<1x768xf32, #tpu.memory_space<vmem>>, vector<1x768xf32>
      %16 = vector.broadcast %15 : vector<1x768xf32> to vector<8x768xf32>
      %17 = arith.addf %14, %16 : vector<8x768xf32>
      %c0_14 = arith.constant 0 : index
      %c0_15 = arith.constant 0 : index
      %18 = vector.load %arg6[%c0_14, %c0_15] : memref<8x768xf32, #tpu.memory_space<vmem>>, vector<8x768xf32>
      tpu.vector_store %arg6[%c0_14, %c0_15], %17 {strides = array<i32>} : memref<8x768xf32, #tpu.memory_space<vmem>>, vector<8x768xf32>,
    } else {
    }
    return
  }
  func.func @transform_0(%arg0: i32, %arg1: i32, %arg2: i32) -> (i32, i32) {
    %c0_i32 = arith.constant 0 : i32
    return %arg0, %arg2 : i32, i32
  }
  func.func @transform_1(%arg0: i32, %arg1: i32, %arg2: i32) -> (i32, i32) {
    %c0_i32 = arith.constant 0 : i32
    return %arg2, %arg1 : i32, i32
  }
  func.func @transform_2(%arg0: i32, %arg1: i32, %arg2: i32) -> (i32, i32) {
    %c0_i32 = arith.constant 0 : i32
    %c0_i32_0 = arith.constant 0 : i32
    return %c0_i32, %arg1 : i32, i32
  }
  func.func @transform_3(%arg0: i32, %arg1: i32, %arg2: i32) -> (i32, i32) {
    %c0_i32 = arith.constant 0 : i32
    return %arg0, %arg1 : i32, i32
  }
}

module attributes {stable_mosaic.version = 11 : i64} {
  func.func @_ffn_add_ln_kernel(%arg0: i32, %arg1: i32, %arg2: memref<8x512xf32, #tpu.memory_space<vmem>>, %arg3: memref<512x512xf32, #tpu.memory_space<vmem>>, %arg4: memref<1x512xf32, #tpu.memory_space<vmem>>, %arg5: memref<512x512xf32, #tpu.memory_space<vmem>>, %arg6: memref<1x512xf32, #tpu.memory_space<vmem>>, %arg7: memref<1x512xf32, #tpu.memory_space<vmem>>, %arg8: memref<1x512xf32, #tpu.memory_space<vmem>>, %arg9: memref<8x512xf32, #tpu.memory_space<vmem>>, %arg10: memref<8x512xf32, #tpu.memory_space<vmem>>) attributes {dimension_semantics = [#tpu.dimension_semantics<parallel>, #tpu.dimension_semantics<arbitrary>], iteration_bounds = array<i64: 2, 4>, scalar_prefetch = 0 : i64, scratch_operands = 1 : i64, tpu.core_type = #tpu.core_type<tc>, window_params = [{transform_indices = @transform_0, window_bounds = array<i64: 8, 512>}, {transform_indices = @transform_1, window_bounds = array<i64: 512, 512>}, {transform_indices = @transform_2, window_bounds = array<i64: 1, 512>}, {transform_indices = @transform_3, window_bounds = array<i64: 512, 512>}, {pipeline_mode = #tpu.pipeline_mode<synchronous>, transform_indices = @transform_4, window_bounds = array<i64: 1, 512>}, {pipeline_mode = #tpu.pipeline_mode<synchronous>, transform_indices = @transform_5, window_bounds = array<i64: 1, 512>}, {pipeline_mode = #tpu.pipeline_mode<synchronous>, transform_indices = @transform_6, window_bounds = array<i64: 1, 512>}, {transform_indices = @transform_7, window_bounds = array<i64: 8, 512>}]} {
    %c0_i32 = arith.constant 0 : i32
    %0 = arith.cmpi eq, %arg1, %c0_i32 : i32
    %1 = arith.extui %0 : i1 to i32
    %c0_i32_0 = arith.constant 0 : i32
    %2 = arith.cmpi ne, %1, %c0_i32_0 : i32
    scf.if %2 {
      %cst_15 = arith.constant 0.000000e+00 : f32
      %23 = vector.broadcast %cst_15 : f32 to vector<8x512xf32>
      %c0_16 = arith.constant 0 : index
      %c0_17 = arith.constant 0 : index
      %24 = vector.load %arg10[%c0_16, %c0_17] : memref<8x512xf32, #tpu.memory_space<vmem>>, vector<8x512xf32>
      tpu.vector_store %arg10[%c0_16, %c0_17], %23 {strides = array<i32>} : memref<8x512xf32, #tpu.memory_space<vmem>>, vector<8x512xf32>,
    } else {
    }
    %c0 = arith.constant 0 : index
    %c0_1 = arith.constant 0 : index
    %3 = vector.load %arg2[%c0, %c0_1] : memref<8x512xf32, #tpu.memory_space<vmem>>, vector<8x512xf32>
    %4 = arith.truncf %3 : vector<8x512xf32> to vector<8x512xbf16>
    %c0_2 = arith.constant 0 : index
    %c0_3 = arith.constant 0 : index
    %5 = vector.load %arg3[%c0_2, %c0_3] : memref<512x512xf32, #tpu.memory_space<vmem>>, vector<512x512xf32>
    %6 = arith.truncf %5 : vector<512x512xf32> to vector<512x512xbf16>
    %cst = arith.constant dense<0.000000e+00> : vector<8x512xf32>
    %7 = tpu.matmul %4, %6, %cst {dimension_numbers = #tpu.dot_dimension_numbers<[1], [0], [0], [1], [0, 0, 1, 1], [], []>} : vector<8x512xbf16>, vector<512x512xbf16>, vector<8x512xf32> -> vector<8x512xf32>
    %c0_4 = arith.constant 0 : index
    %c0_5 = arith.constant 0 : index
    %8 = vector.load %arg4[%c0_4, %c0_5] : memref<1x512xf32, #tpu.memory_space<vmem>>, vector<1x512xf32>
    %9 = vector.broadcast %8 : vector<1x512xf32> to vector<8x512xf32>
    %10 = arith.addf %7, %9 : vector<8x512xf32>
    %cst_6 = arith.constant 0.000000e+00 : f32
    %11 = vector.broadcast %cst_6 : f32 to vector<8x512xf32>
    %12 = arith.maximumf %10, %11 : vector<8x512xf32>
    %c0_7 = arith.constant 0 : index
    %c0_8 = arith.constant 0 : index
    %13 = vector.load %arg10[%c0_7, %c0_8] : memref<8x512xf32, #tpu.memory_space<vmem>>, vector<8x512xf32>
    %14 = arith.truncf %12 : vector<8x512xf32> to vector<8x512xbf16>
    %c0_9 = arith.constant 0 : index
    %c0_10 = arith.constant 0 : index
    %15 = vector.load %arg5[%c0_9, %c0_10] : memref<512x512xf32, #tpu.memory_space<vmem>>, vector<512x512xf32>
    %16 = arith.truncf %15 : vector<512x512xf32> to vector<512x512xbf16>
    %cst_11 = arith.constant dense<0.000000e+00> : vector<8x512xf32>
    %17 = tpu.matmul %14, %16, %cst_11 {dimension_numbers = #tpu.dot_dimension_numbers<[1], [0], [0], [1], [0, 0, 1, 1], [], []>} : vector<8x512xbf16>, vector<512x512xbf16>, vector<8x512xf32> -> vector<8x512xf32>
    %18 = arith.addf %13, %17 : vector<8x512xf32>
    %c0_12 = arith.constant 0 : index
    %c0_13 = arith.constant 0 : index
    %19 = vector.load %arg10[%c0_12, %c0_13] : memref<8x512xf32, #tpu.memory_space<vmem>>, vector<8x512xf32>
    tpu.vector_store %arg10[%c0_12, %c0_13], %18 {strides = array<i32>} : memref<8x512xf32, #tpu.memory_space<vmem>>, vector<8x512xf32>,
    %c3_i32 = arith.constant 3 : i32
    %20 = arith.cmpi eq, %arg1, %c3_i32 : i32
    %21 = arith.extui %20 : i1 to i32
    %c0_i32_14 = arith.constant 0 : i32
    %22 = arith.cmpi ne, %21, %c0_i32_14 : i32
    scf.if %22 {
      %c0_15 = arith.constant 0 : index
      %c0_16 = arith.constant 0 : index
      %23 = vector.load %arg10[%c0_15, %c0_16] : memref<8x512xf32, #tpu.memory_space<vmem>>, vector<8x512xf32>
      %c0_17 = arith.constant 0 : index
      %c0_18 = arith.constant 0 : index
      %24 = vector.load %arg6[%c0_17, %c0_18] : memref<1x512xf32, #tpu.memory_space<vmem>>, vector<1x512xf32>
      %25 = vector.broadcast %24 : vector<1x512xf32> to vector<8x512xf32>
      %26 = arith.addf %23, %25 : vector<8x512xf32>
      %c0_19 = arith.constant 0 : index
      %c0_20 = arith.constant 0 : index
      %27 = vector.load %arg2[%c0_19, %c0_20] : memref<8x512xf32, #tpu.memory_space<vmem>>, vector<8x512xf32>
      %28 = arith.addf %26, %27 : vector<8x512xf32>
      %cst_21 = arith.constant dense<0.000000e+00> : vector<8xf32>
      %29 = vector.multi_reduction <add>, %28, %cst_21 [1] : vector<8x512xf32> to vector<8xf32>
      %30 = vector.shape_cast %29 : vector<8xf32> to vector<8x1xf32>
      %cst_22 = arith.constant 5.120000e+02 : f32
      %31 = vector.broadcast %cst_22 : f32 to vector<8x1xf32>
      %32 = arith.divf %30, %31 : vector<8x1xf32>
      %33 = vector.broadcast %32 : vector<8x1xf32> to vector<8x512xf32>
      %34 = arith.subf %28, %33 : vector<8x512xf32>
      %35 = arith.mulf %34, %34 : vector<8x512xf32>
      %cst_23 = arith.constant dense<0.000000e+00> : vector<8xf32>
      %36 = vector.multi_reduction <add>, %35, %cst_23 [1] : vector<8x512xf32> to vector<8xf32>
      %37 = vector.shape_cast %36 : vector<8xf32> to vector<8x1xf32>
      %cst_24 = arith.constant 5.120000e+02 : f32
      %38 = vector.broadcast %cst_24 : f32 to vector<8x1xf32>
      %39 = arith.divf %37, %38 : vector<8x1xf32>
      %cst_25 = arith.constant 9.99999974E-6 : f32
      %40 = vector.broadcast %cst_25 : f32 to vector<8x1xf32>
      %41 = arith.addf %39, %40 : vector<8x1xf32>
      %42 = math.rsqrt %41 : vector<8x1xf32>
      %43 = vector.broadcast %42 : vector<8x1xf32> to vector<8x512xf32>
      %44 = arith.mulf %34, %43 : vector<8x512xf32>
      %c0_26 = arith.constant 0 : index
      %c0_27 = arith.constant 0 : index
      %45 = vector.load %arg7[%c0_26, %c0_27] : memref<1x512xf32, #tpu.memory_space<vmem>>, vector<1x512xf32>
      %46 = vector.broadcast %45 : vector<1x512xf32> to vector<8x512xf32>
      %47 = arith.mulf %44, %46 : vector<8x512xf32>
      %c0_28 = arith.constant 0 : index
      %c0_29 = arith.constant 0 : index
      %48 = vector.load %arg8[%c0_28, %c0_29] : memref<1x512xf32, #tpu.memory_space<vmem>>, vector<1x512xf32>
      %49 = vector.broadcast %48 : vector<1x512xf32> to vector<8x512xf32>
      %50 = arith.addf %47, %49 : vector<8x512xf32>
      %c0_30 = arith.constant 0 : index
      %c0_31 = arith.constant 0 : index
      %51 = vector.load %arg9[%c0_30, %c0_31] : memref<8x512xf32, #tpu.memory_space<vmem>>, vector<8x512xf32>
      tpu.vector_store %arg9[%c0_30, %c0_31], %50 {strides = array<i32>} : memref<8x512xf32, #tpu.memory_space<vmem>>, vector<8x512xf32>,
    } else {
    }
    return
  }
  func.func @transform_0(%arg0: i32, %arg1: i32) -> (i32, i32) {
    %c0_i32 = arith.constant 0 : i32
    %c0_i32_0 = arith.constant 0 : i32
    return %arg0, %c0_i32 : i32, i32
  }
  func.func @transform_1(%arg0: i32, %arg1: i32) -> (i32, i32) {
    %c0_i32 = arith.constant 0 : i32
    %c0_i32_0 = arith.constant 0 : i32
    return %c0_i32, %arg1 : i32, i32
  }
  func.func @transform_2(%arg0: i32, %arg1: i32) -> (i32, i32) {
    %c0_i32 = arith.constant 0 : i32
    %c0_i32_0 = arith.constant 0 : i32
    return %c0_i32, %arg1 : i32, i32
  }
  func.func @transform_3(%arg0: i32, %arg1: i32) -> (i32, i32) {
    %c0_i32 = arith.constant 0 : i32
    %c0_i32_0 = arith.constant 0 : i32
    return %arg1, %c0_i32 : i32, i32
  }
  func.func @transform_4(%arg0: i32, %arg1: i32) -> (i32, i32) {
    %c0_i32 = arith.constant 0 : i32
    %c0_i32_0 = arith.constant 0 : i32
    %c0_i32_1 = arith.constant 0 : i32
    return %c0_i32, %c0_i32_0 : i32, i32
  }
  func.func @transform_5(%arg0: i32, %arg1: i32) -> (i32, i32) {
    %c0_i32 = arith.constant 0 : i32
    %c0_i32_0 = arith.constant 0 : i32
    %c0_i32_1 = arith.constant 0 : i32
    return %c0_i32, %c0_i32_0 : i32, i32
  }
  func.func @transform_6(%arg0: i32, %arg1: i32) -> (i32, i32) {
    %c0_i32 = arith.constant 0 : i32
    %c0_i32_0 = arith.constant 0 : i32
    %c0_i32_1 = arith.constant 0 : i32
    return %c0_i32, %c0_i32_0 : i32, i32
  }
  func.func @transform_7(%arg0: i32, %arg1: i32) -> (i32, i32) {
    %c0_i32 = arith.constant 0 : i32
    %c0_i32_0 = arith.constant 0 : i32
    return %arg0, %c0_i32 : i32, i32
  }
}

module attributes {stable_mosaic.version = 11 : i64} {
  func.func @_proj_add_ln_kernel(%arg0: i32, %arg1: i32, %arg2: memref<8x512xf32, #tpu.memory_space<vmem>>, %arg3: memref<512x512xf32, #tpu.memory_space<vmem>>, %arg4: memref<1x512xf32, #tpu.memory_space<vmem>>, %arg5: memref<8x512xf32, #tpu.memory_space<vmem>>, %arg6: memref<1x512xf32, #tpu.memory_space<vmem>>, %arg7: memref<1x512xf32, #tpu.memory_space<vmem>>, %arg8: memref<8x512xf32, #tpu.memory_space<vmem>>, %arg9: memref<8x512xf32, #tpu.memory_space<vmem>>) attributes {dimension_semantics = [#tpu.dimension_semantics<parallel>, #tpu.dimension_semantics<arbitrary>], iteration_bounds = array<i64: 2, 1>, scalar_prefetch = 0 : i64, scratch_operands = 1 : i64, tpu.core_type = #tpu.core_type<tc>, window_params = [{transform_indices = @transform_0, window_bounds = array<i64: 8, 512>}, {transform_indices = @transform_1, window_bounds = array<i64: 512, 512>}, {pipeline_mode = #tpu.pipeline_mode<synchronous>, transform_indices = @transform_2, window_bounds = array<i64: 1, 512>}, {transform_indices = @transform_3, window_bounds = array<i64: 8, 512>}, {pipeline_mode = #tpu.pipeline_mode<synchronous>, transform_indices = @transform_4, window_bounds = array<i64: 1, 512>}, {pipeline_mode = #tpu.pipeline_mode<synchronous>, transform_indices = @transform_5, window_bounds = array<i64: 1, 512>}, {transform_indices = @transform_6, window_bounds = array<i64: 8, 512>}]} {
    %c0_i32 = arith.constant 0 : i32
    %0 = arith.cmpi eq, %arg1, %c0_i32 : i32
    %1 = arith.extui %0 : i1 to i32
    %c0_i32_0 = arith.constant 0 : i32
    %2 = arith.cmpi ne, %1, %c0_i32_0 : i32
    scf.if %2 {
      %cst_10 = arith.constant 0.000000e+00 : f32
      %14 = vector.broadcast %cst_10 : f32 to vector<8x512xf32>
      %c0_11 = arith.constant 0 : index
      %c0_12 = arith.constant 0 : index
      %15 = vector.load %arg9[%c0_11, %c0_12] : memref<8x512xf32, #tpu.memory_space<vmem>>, vector<8x512xf32>
      tpu.vector_store %arg9[%c0_11, %c0_12], %14 {strides = array<i32>} : memref<8x512xf32, #tpu.memory_space<vmem>>, vector<8x512xf32>,
    } else {
    }
    %c0 = arith.constant 0 : index
    %c0_1 = arith.constant 0 : index
    %3 = vector.load %arg9[%c0, %c0_1] : memref<8x512xf32, #tpu.memory_space<vmem>>, vector<8x512xf32>
    %c0_2 = arith.constant 0 : index
    %c0_3 = arith.constant 0 : index
    %4 = vector.load %arg2[%c0_2, %c0_3] : memref<8x512xf32, #tpu.memory_space<vmem>>, vector<8x512xf32>
    %5 = arith.truncf %4 : vector<8x512xf32> to vector<8x512xbf16>
    %c0_4 = arith.constant 0 : index
    %c0_5 = arith.constant 0 : index
    %6 = vector.load %arg3[%c0_4, %c0_5] : memref<512x512xf32, #tpu.memory_space<vmem>>, vector<512x512xf32>
    %7 = arith.truncf %6 : vector<512x512xf32> to vector<512x512xbf16>
    %cst = arith.constant dense<0.000000e+00> : vector<8x512xf32>
    %8 = tpu.matmul %5, %7, %cst {dimension_numbers = #tpu.dot_dimension_numbers<[1], [0], [0], [1], [0, 0, 1, 1], [], []>} : vector<8x512xbf16>, vector<512x512xbf16>, vector<8x512xf32> -> vector<8x512xf32>
    %9 = arith.addf %3, %8 : vector<8x512xf32>
    %c0_6 = arith.constant 0 : index
    %c0_7 = arith.constant 0 : index
    %10 = vector.load %arg9[%c0_6, %c0_7] : memref<8x512xf32, #tpu.memory_space<vmem>>, vector<8x512xf32>
    tpu.vector_store %arg9[%c0_6, %c0_7], %9 {strides = array<i32>} : memref<8x512xf32, #tpu.memory_space<vmem>>, vector<8x512xf32>,
    %c0_i32_8 = arith.constant 0 : i32
    %11 = arith.cmpi eq, %arg1, %c0_i32_8 : i32
    %12 = arith.extui %11 : i1 to i32
    %c0_i32_9 = arith.constant 0 : i32
    %13 = arith.cmpi ne, %12, %c0_i32_9 : i32
    scf.if %13 {
      %c0_10 = arith.constant 0 : index
      %c0_11 = arith.constant 0 : index
      %14 = vector.load %arg9[%c0_10, %c0_11] : memref<8x512xf32, #tpu.memory_space<vmem>>, vector<8x512xf32>
      %c0_12 = arith.constant 0 : index
      %c0_13 = arith.constant 0 : index
      %15 = vector.load %arg4[%c0_12, %c0_13] : memref<1x512xf32, #tpu.memory_space<vmem>>, vector<1x512xf32>
      %16 = vector.broadcast %15 : vector<1x512xf32> to vector<8x512xf32>
      %17 = arith.addf %14, %16 : vector<8x512xf32>
      %c0_14 = arith.constant 0 : index
      %c0_15 = arith.constant 0 : index
      %18 = vector.load %arg5[%c0_14, %c0_15] : memref<8x512xf32, #tpu.memory_space<vmem>>, vector<8x512xf32>
      %19 = arith.addf %17, %18 : vector<8x512xf32>
      %cst_16 = arith.constant dense<0.000000e+00> : vector<8xf32>
      %20 = vector.multi_reduction <add>, %19, %cst_16 [1] : vector<8x512xf32> to vector<8xf32>
      %21 = vector.shape_cast %20 : vector<8xf32> to vector<8x1xf32>
      %cst_17 = arith.constant 5.120000e+02 : f32
      %22 = vector.broadcast %cst_17 : f32 to vector<8x1xf32>
      %23 = arith.divf %21, %22 : vector<8x1xf32>
      %24 = vector.broadcast %23 : vector<8x1xf32> to vector<8x512xf32>
      %25 = arith.subf %19, %24 : vector<8x512xf32>
      %26 = arith.mulf %25, %25 : vector<8x512xf32>
      %cst_18 = arith.constant dense<0.000000e+00> : vector<8xf32>
      %27 = vector.multi_reduction <add>, %26, %cst_18 [1] : vector<8x512xf32> to vector<8xf32>
      %28 = vector.shape_cast %27 : vector<8xf32> to vector<8x1xf32>
      %cst_19 = arith.constant 5.120000e+02 : f32
      %29 = vector.broadcast %cst_19 : f32 to vector<8x1xf32>
      %30 = arith.divf %28, %29 : vector<8x1xf32>
      %cst_20 = arith.constant 9.99999974E-6 : f32
      %31 = vector.broadcast %cst_20 : f32 to vector<8x1xf32>
      %32 = arith.addf %30, %31 : vector<8x1xf32>
      %33 = math.rsqrt %32 : vector<8x1xf32>
      %34 = vector.broadcast %33 : vector<8x1xf32> to vector<8x512xf32>
      %35 = arith.mulf %25, %34 : vector<8x512xf32>
      %c0_21 = arith.constant 0 : index
      %c0_22 = arith.constant 0 : index
      %36 = vector.load %arg6[%c0_21, %c0_22] : memref<1x512xf32, #tpu.memory_space<vmem>>, vector<1x512xf32>
      %37 = vector.broadcast %36 : vector<1x512xf32> to vector<8x512xf32>
      %38 = arith.mulf %35, %37 : vector<8x512xf32>
      %c0_23 = arith.constant 0 : index
      %c0_24 = arith.constant 0 : index
      %39 = vector.load %arg7[%c0_23, %c0_24] : memref<1x512xf32, #tpu.memory_space<vmem>>, vector<1x512xf32>
      %40 = vector.broadcast %39 : vector<1x512xf32> to vector<8x512xf32>
      %41 = arith.addf %38, %40 : vector<8x512xf32>
      %c0_25 = arith.constant 0 : index
      %c0_26 = arith.constant 0 : index
      %42 = vector.load %arg8[%c0_25, %c0_26] : memref<8x512xf32, #tpu.memory_space<vmem>>, vector<8x512xf32>
      tpu.vector_store %arg8[%c0_25, %c0_26], %41 {strides = array<i32>} : memref<8x512xf32, #tpu.memory_space<vmem>>, vector<8x512xf32>,
    } else {
    }
    return
  }
  func.func @transform_0(%arg0: i32, %arg1: i32) -> (i32, i32) {
    %c0_i32 = arith.constant 0 : i32
    return %arg0, %arg1 : i32, i32
  }
  func.func @transform_1(%arg0: i32, %arg1: i32) -> (i32, i32) {
    %c0_i32 = arith.constant 0 : i32
    %c0_i32_0 = arith.constant 0 : i32
    return %arg1, %c0_i32 : i32, i32
  }
  func.func @transform_2(%arg0: i32, %arg1: i32) -> (i32, i32) {
    %c0_i32 = arith.constant 0 : i32
    %c0_i32_0 = arith.constant 0 : i32
    %c0_i32_1 = arith.constant 0 : i32
    return %c0_i32, %c0_i32_0 : i32, i32
  }
  func.func @transform_3(%arg0: i32, %arg1: i32) -> (i32, i32) {
    %c0_i32 = arith.constant 0 : i32
    %c0_i32_0 = arith.constant 0 : i32
    return %arg0, %c0_i32 : i32, i32
  }
  func.func @transform_4(%arg0: i32, %arg1: i32) -> (i32, i32) {
    %c0_i32 = arith.constant 0 : i32
    %c0_i32_0 = arith.constant 0 : i32
    %c0_i32_1 = arith.constant 0 : i32
    return %c0_i32, %c0_i32_0 : i32, i32
  }
  func.func @transform_5(%arg0: i32, %arg1: i32) -> (i32, i32) {
    %c0_i32 = arith.constant 0 : i32
    %c0_i32_0 = arith.constant 0 : i32
    %c0_i32_1 = arith.constant 0 : i32
    return %c0_i32, %c0_i32_0 : i32, i32
  }
  func.func @transform_6(%arg0: i32, %arg1: i32) -> (i32, i32) {
    %c0_i32 = arith.constant 0 : i32
    %c0_i32_0 = arith.constant 0 : i32
    return %arg0, %c0_i32 : i32, i32
  }
}

module attributes {stable_mosaic.version = 11 : i64} {
  func.func @_mha_kernel(%arg0: i32, %arg1: memref<1x8x1536xf32, #tpu.memory_space<vmem>>, %arg2: memref<1x8x512xf32, #tpu.memory_space<vmem>>) attributes {dimension_semantics = [#tpu.dimension_semantics<parallel>], iteration_bounds = array<i64: 2>, scalar_prefetch = 0 : i64, scratch_operands = 0 : i64, tpu.core_type = #tpu.core_type<tc>, window_params = [{transform_indices = @transform_0, window_bounds = array<i64: 1, 8, 1536>}, {transform_indices = @transform_1, window_bounds = array<i64: 1, 8, 512>}]} {
    %c0 = arith.constant 0 : index
    %c0_0 = arith.constant 0 : index
    %c0_1 = arith.constant 0 : index
    %0 = vector.load %arg1[%c0, %c0_0, %c0_1] : memref<1x8x1536xf32, #tpu.memory_space<vmem>>, vector<1x8x1536xf32>
    %1 = vector.shape_cast %0 : vector<1x8x1536xf32> to vector<8x1536xf32>
    %2 = vector.extract_strided_slice %1 {offsets = [0, 0], sizes = [8, 64], strides = [1, 1]} : vector<8x1536xf32> to vector<8x64xf32>
    %3 = arith.truncf %2 : vector<8x64xf32> to vector<8x64xbf16>
    %4 = vector.extract_strided_slice %1 {offsets = [0, 512], sizes = [8, 64], strides = [1, 1]} : vector<8x1536xf32> to vector<8x64xf32>
    %5 = arith.truncf %4 : vector<8x64xf32> to vector<8x64xbf16>
    %6 = vector.extract_strided_slice %1 {offsets = [0, 1024], sizes = [8, 64], strides = [1, 1]} : vector<8x1536xf32> to vector<8x64xf32>
    %7 = arith.truncf %6 : vector<8x64xf32> to vector<8x64xbf16>
    %cst = arith.constant dense<0.000000e+00> : vector<8x8xf32>
    %8 = tpu.matmul %3, %5, %cst {dimension_numbers = #tpu.dot_dimension_numbers<[1], [1], [0], [0], [0, 0, 1, 0], [], []>} : vector<8x64xbf16>, vector<8x64xbf16>, vector<8x8xf32> -> vector<8x8xf32>
    %cst_2 = arith.constant 1.250000e-01 : f32
    %9 = vector.broadcast %cst_2 : f32 to vector<8x8xf32>
    %10 = arith.mulf %8, %9 : vector<8x8xf32>
    %cst_3 = arith.constant dense<0xFF800000> : vector<8xf32>
    %11 = vector.multi_reduction <maximumf>, %10, %cst_3 [1] : vector<8x8xf32> to vector<8xf32>
    %12 = vector.shape_cast %11 : vector<8xf32> to vector<8x1xf32>
    %13 = vector.broadcast %12 : vector<8x1xf32> to vector<8x8xf32>
    %14 = arith.subf %10, %13 : vector<8x8xf32>
    %15 = math.exp %14 : vector<8x8xf32>
    %cst_4 = arith.constant dense<0.000000e+00> : vector<8xf32>
    %16 = vector.multi_reduction <add>, %15, %cst_4 [1] : vector<8x8xf32> to vector<8xf32>
    %17 = vector.shape_cast %16 : vector<8xf32> to vector<8x1xf32>
    %18 = tpu.reciprocal %17 {approx = true} : vector<8x1xf32> -> vector<8x1xf32>
    %19 = vector.broadcast %18 : vector<8x1xf32> to vector<8x8xf32>
    %20 = arith.mulf %15, %19 : vector<8x8xf32>
    %21 = arith.truncf %20 : vector<8x8xf32> to vector<8x8xbf16>
    %cst_5 = arith.constant dense<0.000000e+00> : vector<8x64xf32>
    %22 = tpu.matmul %21, %7, %cst_5 {dimension_numbers = #tpu.dot_dimension_numbers<[1], [0], [0], [1], [0, 0, 1, 1], [], []>} : vector<8x8xbf16>, vector<8x64xbf16>, vector<8x64xf32> -> vector<8x64xf32>
    %23 = vector.extract_strided_slice %1 {offsets = [0, 64], sizes = [8, 64], strides = [1, 1]} : vector<8x1536xf32> to vector<8x64xf32>
    %24 = arith.truncf %23 : vector<8x64xf32> to vector<8x64xbf16>
    %25 = vector.extract_strided_slice %1 {offsets = [0, 576], sizes = [8, 64], strides = [1, 1]} : vector<8x1536xf32> to vector<8x64xf32>
    %26 = arith.truncf %25 : vector<8x64xf32> to vector<8x64xbf16>
    %27 = vector.extract_strided_slice %1 {offsets = [0, 1088], sizes = [8, 64], strides = [1, 1]} : vector<8x1536xf32> to vector<8x64xf32>
    %28 = arith.truncf %27 : vector<8x64xf32> to vector<8x64xbf16>
    %cst_6 = arith.constant dense<0.000000e+00> : vector<8x8xf32>
    %29 = tpu.matmul %24, %26, %cst_6 {dimension_numbers = #tpu.dot_dimension_numbers<[1], [1], [0], [0], [0, 0, 1, 0], [], []>} : vector<8x64xbf16>, vector<8x64xbf16>, vector<8x8xf32> -> vector<8x8xf32>
    %cst_7 = arith.constant 1.250000e-01 : f32
    %30 = vector.broadcast %cst_7 : f32 to vector<8x8xf32>
    %31 = arith.mulf %29, %30 : vector<8x8xf32>
    %cst_8 = arith.constant dense<0xFF800000> : vector<8xf32>
    %32 = vector.multi_reduction <maximumf>, %31, %cst_8 [1] : vector<8x8xf32> to vector<8xf32>
    %33 = vector.shape_cast %32 : vector<8xf32> to vector<8x1xf32>
    %34 = vector.broadcast %33 : vector<8x1xf32> to vector<8x8xf32>
    %35 = arith.subf %31, %34 : vector<8x8xf32>
    %36 = math.exp %35 : vector<8x8xf32>
    %cst_9 = arith.constant dense<0.000000e+00> : vector<8xf32>
    %37 = vector.multi_reduction <add>, %36, %cst_9 [1] : vector<8x8xf32> to vector<8xf32>
    %38 = vector.shape_cast %37 : vector<8xf32> to vector<8x1xf32>
    %39 = tpu.reciprocal %38 {approx = true} : vector<8x1xf32> -> vector<8x1xf32>
    %40 = vector.broadcast %39 : vector<8x1xf32> to vector<8x8xf32>
    %41 = arith.mulf %36, %40 : vector<8x8xf32>
    %42 = arith.truncf %41 : vector<8x8xf32> to vector<8x8xbf16>
    %cst_10 = arith.constant dense<0.000000e+00> : vector<8x64xf32>
    %43 = tpu.matmul %42, %28, %cst_10 {dimension_numbers = #tpu.dot_dimension_numbers<[1], [0], [0], [1], [0, 0, 1, 1], [], []>} : vector<8x8xbf16>, vector<8x64xbf16>, vector<8x64xf32> -> vector<8x64xf32>
    %44 = vector.extract_strided_slice %1 {offsets = [0, 128], sizes = [8, 64], strides = [1, 1]} : vector<8x1536xf32> to vector<8x64xf32>
    %45 = arith.truncf %44 : vector<8x64xf32> to vector<8x64xbf16>
    %46 = vector.extract_strided_slice %1 {offsets = [0, 640], sizes = [8, 64], strides = [1, 1]} : vector<8x1536xf32> to vector<8x64xf32>
    %47 = arith.truncf %46 : vector<8x64xf32> to vector<8x64xbf16>
    %48 = vector.extract_strided_slice %1 {offsets = [0, 1152], sizes = [8, 64], strides = [1, 1]} : vector<8x1536xf32> to vector<8x64xf32>
    %49 = arith.truncf %48 : vector<8x64xf32> to vector<8x64xbf16>
    %cst_11 = arith.constant dense<0.000000e+00> : vector<8x8xf32>
    %50 = tpu.matmul %45, %47, %cst_11 {dimension_numbers = #tpu.dot_dimension_numbers<[1], [1], [0], [0], [0, 0, 1, 0], [], []>} : vector<8x64xbf16>, vector<8x64xbf16>, vector<8x8xf32> -> vector<8x8xf32>
    %cst_12 = arith.constant 1.250000e-01 : f32
    %51 = vector.broadcast %cst_12 : f32 to vector<8x8xf32>
    %52 = arith.mulf %50, %51 : vector<8x8xf32>
    %cst_13 = arith.constant dense<0xFF800000> : vector<8xf32>
    %53 = vector.multi_reduction <maximumf>, %52, %cst_13 [1] : vector<8x8xf32> to vector<8xf32>
    %54 = vector.shape_cast %53 : vector<8xf32> to vector<8x1xf32>
    %55 = vector.broadcast %54 : vector<8x1xf32> to vector<8x8xf32>
    %56 = arith.subf %52, %55 : vector<8x8xf32>
    %57 = math.exp %56 : vector<8x8xf32>
    %cst_14 = arith.constant dense<0.000000e+00> : vector<8xf32>
    %58 = vector.multi_reduction <add>, %57, %cst_14 [1] : vector<8x8xf32> to vector<8xf32>
    %59 = vector.shape_cast %58 : vector<8xf32> to vector<8x1xf32>
    %60 = tpu.reciprocal %59 {approx = true} : vector<8x1xf32> -> vector<8x1xf32>
    %61 = vector.broadcast %60 : vector<8x1xf32> to vector<8x8xf32>
    %62 = arith.mulf %57, %61 : vector<8x8xf32>
    %63 = arith.truncf %62 : vector<8x8xf32> to vector<8x8xbf16>
    %cst_15 = arith.constant dense<0.000000e+00> : vector<8x64xf32>
    %64 = tpu.matmul %63, %49, %cst_15 {dimension_numbers = #tpu.dot_dimension_numbers<[1], [0], [0], [1], [0, 0, 1, 1], [], []>} : vector<8x8xbf16>, vector<8x64xbf16>, vector<8x64xf32> -> vector<8x64xf32>
    %65 = vector.extract_strided_slice %1 {offsets = [0, 192], sizes = [8, 64], strides = [1, 1]} : vector<8x1536xf32> to vector<8x64xf32>
    %66 = arith.truncf %65 : vector<8x64xf32> to vector<8x64xbf16>
    %67 = vector.extract_strided_slice %1 {offsets = [0, 704], sizes = [8, 64], strides = [1, 1]} : vector<8x1536xf32> to vector<8x64xf32>
    %68 = arith.truncf %67 : vector<8x64xf32> to vector<8x64xbf16>
    %69 = vector.extract_strided_slice %1 {offsets = [0, 1216], sizes = [8, 64], strides = [1, 1]} : vector<8x1536xf32> to vector<8x64xf32>
    %70 = arith.truncf %69 : vector<8x64xf32> to vector<8x64xbf16>
    %cst_16 = arith.constant dense<0.000000e+00> : vector<8x8xf32>
    %71 = tpu.matmul %66, %68, %cst_16 {dimension_numbers = #tpu.dot_dimension_numbers<[1], [1], [0], [0], [0, 0, 1, 0], [], []>} : vector<8x64xbf16>, vector<8x64xbf16>, vector<8x8xf32> -> vector<8x8xf32>
    %cst_17 = arith.constant 1.250000e-01 : f32
    %72 = vector.broadcast %cst_17 : f32 to vector<8x8xf32>
    %73 = arith.mulf %71, %72 : vector<8x8xf32>
    %cst_18 = arith.constant dense<0xFF800000> : vector<8xf32>
    %74 = vector.multi_reduction <maximumf>, %73, %cst_18 [1] : vector<8x8xf32> to vector<8xf32>
    %75 = vector.shape_cast %74 : vector<8xf32> to vector<8x1xf32>
    %76 = vector.broadcast %75 : vector<8x1xf32> to vector<8x8xf32>
    %77 = arith.subf %73, %76 : vector<8x8xf32>
    %78 = math.exp %77 : vector<8x8xf32>
    %cst_19 = arith.constant dense<0.000000e+00> : vector<8xf32>
    %79 = vector.multi_reduction <add>, %78, %cst_19 [1] : vector<8x8xf32> to vector<8xf32>
    %80 = vector.shape_cast %79 : vector<8xf32> to vector<8x1xf32>
    %81 = tpu.reciprocal %80 {approx = true} : vector<8x1xf32> -> vector<8x1xf32>
    %82 = vector.broadcast %81 : vector<8x1xf32> to vector<8x8xf32>
    %83 = arith.mulf %78, %82 : vector<8x8xf32>
    %84 = arith.truncf %83 : vector<8x8xf32> to vector<8x8xbf16>
    %cst_20 = arith.constant dense<0.000000e+00> : vector<8x64xf32>
    %85 = tpu.matmul %84, %70, %cst_20 {dimension_numbers = #tpu.dot_dimension_numbers<[1], [0], [0], [1], [0, 0, 1, 1], [], []>} : vector<8x8xbf16>, vector<8x64xbf16>, vector<8x64xf32> -> vector<8x64xf32>
    %86 = vector.extract_strided_slice %1 {offsets = [0, 256], sizes = [8, 64], strides = [1, 1]} : vector<8x1536xf32> to vector<8x64xf32>
    %87 = arith.truncf %86 : vector<8x64xf32> to vector<8x64xbf16>
    %88 = vector.extract_strided_slice %1 {offsets = [0, 768], sizes = [8, 64], strides = [1, 1]} : vector<8x1536xf32> to vector<8x64xf32>
    %89 = arith.truncf %88 : vector<8x64xf32> to vector<8x64xbf16>
    %90 = vector.extract_strided_slice %1 {offsets = [0, 1280], sizes = [8, 64], strides = [1, 1]} : vector<8x1536xf32> to vector<8x64xf32>
    %91 = arith.truncf %90 : vector<8x64xf32> to vector<8x64xbf16>
    %cst_21 = arith.constant dense<0.000000e+00> : vector<8x8xf32>
    %92 = tpu.matmul %87, %89, %cst_21 {dimension_numbers = #tpu.dot_dimension_numbers<[1], [1], [0], [0], [0, 0, 1, 0], [], []>} : vector<8x64xbf16>, vector<8x64xbf16>, vector<8x8xf32> -> vector<8x8xf32>
    %cst_22 = arith.constant 1.250000e-01 : f32
    %93 = vector.broadcast %cst_22 : f32 to vector<8x8xf32>
    %94 = arith.mulf %92, %93 : vector<8x8xf32>
    %cst_23 = arith.constant dense<0xFF800000> : vector<8xf32>
    %95 = vector.multi_reduction <maximumf>, %94, %cst_23 [1] : vector<8x8xf32> to vector<8xf32>
    %96 = vector.shape_cast %95 : vector<8xf32> to vector<8x1xf32>
    %97 = vector.broadcast %96 : vector<8x1xf32> to vector<8x8xf32>
    %98 = arith.subf %94, %97 : vector<8x8xf32>
    %99 = math.exp %98 : vector<8x8xf32>
    %cst_24 = arith.constant dense<0.000000e+00> : vector<8xf32>
    %100 = vector.multi_reduction <add>, %99, %cst_24 [1] : vector<8x8xf32> to vector<8xf32>
    %101 = vector.shape_cast %100 : vector<8xf32> to vector<8x1xf32>
    %102 = tpu.reciprocal %101 {approx = true} : vector<8x1xf32> -> vector<8x1xf32>
    %103 = vector.broadcast %102 : vector<8x1xf32> to vector<8x8xf32>
    %104 = arith.mulf %99, %103 : vector<8x8xf32>
    %105 = arith.truncf %104 : vector<8x8xf32> to vector<8x8xbf16>
    %cst_25 = arith.constant dense<0.000000e+00> : vector<8x64xf32>
    %106 = tpu.matmul %105, %91, %cst_25 {dimension_numbers = #tpu.dot_dimension_numbers<[1], [0], [0], [1], [0, 0, 1, 1], [], []>} : vector<8x8xbf16>, vector<8x64xbf16>, vector<8x64xf32> -> vector<8x64xf32>
    %107 = vector.extract_strided_slice %1 {offsets = [0, 320], sizes = [8, 64], strides = [1, 1]} : vector<8x1536xf32> to vector<8x64xf32>
    %108 = arith.truncf %107 : vector<8x64xf32> to vector<8x64xbf16>
    %109 = vector.extract_strided_slice %1 {offsets = [0, 832], sizes = [8, 64], strides = [1, 1]} : vector<8x1536xf32> to vector<8x64xf32>
    %110 = arith.truncf %109 : vector<8x64xf32> to vector<8x64xbf16>
    %111 = vector.extract_strided_slice %1 {offsets = [0, 1344], sizes = [8, 64], strides = [1, 1]} : vector<8x1536xf32> to vector<8x64xf32>
    %112 = arith.truncf %111 : vector<8x64xf32> to vector<8x64xbf16>
    %cst_26 = arith.constant dense<0.000000e+00> : vector<8x8xf32>
    %113 = tpu.matmul %108, %110, %cst_26 {dimension_numbers = #tpu.dot_dimension_numbers<[1], [1], [0], [0], [0, 0, 1, 0], [], []>} : vector<8x64xbf16>, vector<8x64xbf16>, vector<8x8xf32> -> vector<8x8xf32>
    %cst_27 = arith.constant 1.250000e-01 : f32
    %114 = vector.broadcast %cst_27 : f32 to vector<8x8xf32>
    %115 = arith.mulf %113, %114 : vector<8x8xf32>
    %cst_28 = arith.constant dense<0xFF800000> : vector<8xf32>
    %116 = vector.multi_reduction <maximumf>, %115, %cst_28 [1] : vector<8x8xf32> to vector<8xf32>
    %117 = vector.shape_cast %116 : vector<8xf32> to vector<8x1xf32>
    %118 = vector.broadcast %117 : vector<8x1xf32> to vector<8x8xf32>
    %119 = arith.subf %115, %118 : vector<8x8xf32>
    %120 = math.exp %119 : vector<8x8xf32>
    %cst_29 = arith.constant dense<0.000000e+00> : vector<8xf32>
    %121 = vector.multi_reduction <add>, %120, %cst_29 [1] : vector<8x8xf32> to vector<8xf32>
    %122 = vector.shape_cast %121 : vector<8xf32> to vector<8x1xf32>
    %123 = tpu.reciprocal %122 {approx = true} : vector<8x1xf32> -> vector<8x1xf32>
    %124 = vector.broadcast %123 : vector<8x1xf32> to vector<8x8xf32>
    %125 = arith.mulf %120, %124 : vector<8x8xf32>
    %126 = arith.truncf %125 : vector<8x8xf32> to vector<8x8xbf16>
    %cst_30 = arith.constant dense<0.000000e+00> : vector<8x64xf32>
    %127 = tpu.matmul %126, %112, %cst_30 {dimension_numbers = #tpu.dot_dimension_numbers<[1], [0], [0], [1], [0, 0, 1, 1], [], []>} : vector<8x8xbf16>, vector<8x64xbf16>, vector<8x64xf32> -> vector<8x64xf32>
    %128 = vector.extract_strided_slice %1 {offsets = [0, 384], sizes = [8, 64], strides = [1, 1]} : vector<8x1536xf32> to vector<8x64xf32>
    %129 = arith.truncf %128 : vector<8x64xf32> to vector<8x64xbf16>
    %130 = vector.extract_strided_slice %1 {offsets = [0, 896], sizes = [8, 64], strides = [1, 1]} : vector<8x1536xf32> to vector<8x64xf32>
    %131 = arith.truncf %130 : vector<8x64xf32> to vector<8x64xbf16>
    %132 = vector.extract_strided_slice %1 {offsets = [0, 1408], sizes = [8, 64], strides = [1, 1]} : vector<8x1536xf32> to vector<8x64xf32>
    %133 = arith.truncf %132 : vector<8x64xf32> to vector<8x64xbf16>
    %cst_31 = arith.constant dense<0.000000e+00> : vector<8x8xf32>
    %134 = tpu.matmul %129, %131, %cst_31 {dimension_numbers = #tpu.dot_dimension_numbers<[1], [1], [0], [0], [0, 0, 1, 0], [], []>} : vector<8x64xbf16>, vector<8x64xbf16>, vector<8x8xf32> -> vector<8x8xf32>
    %cst_32 = arith.constant 1.250000e-01 : f32
    %135 = vector.broadcast %cst_32 : f32 to vector<8x8xf32>
    %136 = arith.mulf %134, %135 : vector<8x8xf32>
    %cst_33 = arith.constant dense<0xFF800000> : vector<8xf32>
    %137 = vector.multi_reduction <maximumf>, %136, %cst_33 [1] : vector<8x8xf32> to vector<8xf32>
    %138 = vector.shape_cast %137 : vector<8xf32> to vector<8x1xf32>
    %139 = vector.broadcast %138 : vector<8x1xf32> to vector<8x8xf32>
    %140 = arith.subf %136, %139 : vector<8x8xf32>
    %141 = math.exp %140 : vector<8x8xf32>
    %cst_34 = arith.constant dense<0.000000e+00> : vector<8xf32>
    %142 = vector.multi_reduction <add>, %141, %cst_34 [1] : vector<8x8xf32> to vector<8xf32>
    %143 = vector.shape_cast %142 : vector<8xf32> to vector<8x1xf32>
    %144 = tpu.reciprocal %143 {approx = true} : vector<8x1xf32> -> vector<8x1xf32>
    %145 = vector.broadcast %144 : vector<8x1xf32> to vector<8x8xf32>
    %146 = arith.mulf %141, %145 : vector<8x8xf32>
    %147 = arith.truncf %146 : vector<8x8xf32> to vector<8x8xbf16>
    %cst_35 = arith.constant dense<0.000000e+00> : vector<8x64xf32>
    %148 = tpu.matmul %147, %133, %cst_35 {dimension_numbers = #tpu.dot_dimension_numbers<[1], [0], [0], [1], [0, 0, 1, 1], [], []>} : vector<8x8xbf16>, vector<8x64xbf16>, vector<8x64xf32> -> vector<8x64xf32>
    %149 = vector.extract_strided_slice %1 {offsets = [0, 448], sizes = [8, 64], strides = [1, 1]} : vector<8x1536xf32> to vector<8x64xf32>
    %150 = arith.truncf %149 : vector<8x64xf32> to vector<8x64xbf16>
    %151 = vector.extract_strided_slice %1 {offsets = [0, 960], sizes = [8, 64], strides = [1, 1]} : vector<8x1536xf32> to vector<8x64xf32>
    %152 = arith.truncf %151 : vector<8x64xf32> to vector<8x64xbf16>
    %153 = vector.extract_strided_slice %1 {offsets = [0, 1472], sizes = [8, 64], strides = [1, 1]} : vector<8x1536xf32> to vector<8x64xf32>
    %154 = arith.truncf %153 : vector<8x64xf32> to vector<8x64xbf16>
    %cst_36 = arith.constant dense<0.000000e+00> : vector<8x8xf32>
    %155 = tpu.matmul %150, %152, %cst_36 {dimension_numbers = #tpu.dot_dimension_numbers<[1], [1], [0], [0], [0, 0, 1, 0], [], []>} : vector<8x64xbf16>, vector<8x64xbf16>, vector<8x8xf32> -> vector<8x8xf32>
    %cst_37 = arith.constant 1.250000e-01 : f32
    %156 = vector.broadcast %cst_37 : f32 to vector<8x8xf32>
    %157 = arith.mulf %155, %156 : vector<8x8xf32>
    %cst_38 = arith.constant dense<0xFF800000> : vector<8xf32>
    %158 = vector.multi_reduction <maximumf>, %157, %cst_38 [1] : vector<8x8xf32> to vector<8xf32>
    %159 = vector.shape_cast %158 : vector<8xf32> to vector<8x1xf32>
    %160 = vector.broadcast %159 : vector<8x1xf32> to vector<8x8xf32>
    %161 = arith.subf %157, %160 : vector<8x8xf32>
    %162 = math.exp %161 : vector<8x8xf32>
    %cst_39 = arith.constant dense<0.000000e+00> : vector<8xf32>
    %163 = vector.multi_reduction <add>, %162, %cst_39 [1] : vector<8x8xf32> to vector<8xf32>
    %164 = vector.shape_cast %163 : vector<8xf32> to vector<8x1xf32>
    %165 = tpu.reciprocal %164 {approx = true} : vector<8x1xf32> -> vector<8x1xf32>
    %166 = vector.broadcast %165 : vector<8x1xf32> to vector<8x8xf32>
    %167 = arith.mulf %162, %166 : vector<8x8xf32>
    %168 = arith.truncf %167 : vector<8x8xf32> to vector<8x8xbf16>
    %cst_40 = arith.constant dense<0.000000e+00> : vector<8x64xf32>
    %169 = tpu.matmul %168, %154, %cst_40 {dimension_numbers = #tpu.dot_dimension_numbers<[1], [0], [0], [1], [0, 0, 1, 1], [], []>} : vector<8x8xbf16>, vector<8x64xbf16>, vector<8x64xf32> -> vector<8x64xf32>
    %170 = tpu.concatenate %22, %43, %64, %85, %106, %127, %148, %169 in 1 : vector<8x64xf32>, vector<8x64xf32>, vector<8x64xf32>, vector<8x64xf32>, vector<8x64xf32>, vector<8x64xf32>, vector<8x64xf32>, vector<8x64xf32> -> vector<8x512xf32>
    %c0_41 = arith.constant 0 : index
    %c0_42 = arith.constant 0 : index
    %c0_43 = arith.constant 0 : index
    %171 = vector.load %arg2[%c0_41, %c0_42, %c0_43] : memref<1x8x512xf32, #tpu.memory_space<vmem>>, vector<1x8x512xf32>
    %172 = vector.shape_cast %171 : vector<1x8x512xf32> to vector<8x512xf32>
    %173 = vector.shape_cast %170 : vector<8x512xf32> to vector<1x8x512xf32>
    tpu.vector_store %arg2[%c0_41, %c0_42, %c0_43], %173 {strides = array<i32>} : memref<1x8x512xf32, #tpu.memory_space<vmem>>, vector<1x8x512xf32>,
    return
  }
  func.func @transform_0(%arg0: i32) -> (i32, i32, i32) {
    %c0_i32 = arith.constant 0 : i32
    %c0_i32_0 = arith.constant 0 : i32
    %c0_i32_1 = arith.constant 0 : i32
    return %arg0, %c0_i32, %c0_i32_0 : i32, i32, i32
  }
  func.func @transform_1(%arg0: i32) -> (i32, i32, i32) {
    %c0_i32 = arith.constant 0 : i32
    %c0_i32_0 = arith.constant 0 : i32
    %c0_i32_1 = arith.constant 0 : i32
    return %arg0, %c0_i32, %c0_i32_0 : i32, i32, i32
  }
}

</mosaic_0001>

<bundles_post_ra>
// kernel: encoder_forward.4
= control target key start
LH: loop header
LB: loop body
LE: loop exit
PB: predicated region body
PF: predicated region fallthrough
CT: control target
= control target key end

     0   :  { %s2421_s0 = inlined_call_operand.hbm [shape: f32[16,512], index: 0, kind: input, shape index: {}]   ;;  %s2422_s1 = inlined_call_operand.hbm [shape: f32[512,1536], index: 1, kind: input, shape index: {}]   ;;  %s2423_s2 = inlined_call_operand.hbm [shape: f32[1,1536], index: 2, kind: input, shape index: {}]   ;;  %s2424_s3 = inlined_call_operand.vmem [shape: f32[16,1536], index: 3, kind: output, shape index: {}]  }
   0x1   :  { %2431 = sst [smem:[#allocation16_spill]] %s2422_s1 }
   0x2   :  { %8 = vsyncpa [#allocation4], 0 }
   0x3   :  { %10 = vsyncpa [#allocation4 + $0x1], 0 }
   0x4   :  { %11 = vsyncpa [#allocation6], 0 }
   0x5   :  { %13 = vsyncpa [#allocation6 + $0x1], 0  ;;  %s1755_s12 = smov 0   ;;  %s1757_s13 = smov 0  }
   0x6   :  { %s1759_s14 = smov 0   ;;  %s1761_s15 = smov 0  }
   0x7   :  { %s1763_s16 = smov 0   ;;  %s1765_s17 = smov 0  }
   0x8   :  { %s1767_s18 = smov 0   ;;  %s1769_s19 = smov 0  }
   0x9   :  { %s1771_s20 = smov 0   ;;  %s1773_s21 = smov 0  }
   0xa   :  { %s1775_s22 = smov 0  }
   0xb LB: > { %2432 = sst [smem:[#allocation10_spill]] %s1710_s17  ;;  %p55_p0 = scmp.eq.s32.totalorder %s1730_s22, 0  ;;  %s1730_s22 = sphi %s1775_s22, %s19_s22   ;;  %s1726_s21 = sphi %s1773_s21, %s2452_s21   ;;  %s1722_s20 = sphi %s1771_s20, %s2459_s20   ;;  %s1718_s19 = sphi %s1769_s19, %s2450_s19   ;;  %s1714_s18 = sphi %s1767_s18, %s2458_s18   ;;  %s1710_s17 = sphi %s1765_s17, %s2449_s17   ;;  %s1706_s16 = sphi %s1763_s16, %s2457_s16   ;;  %s1702_s15 = sphi %s1761_s15, %s2456_s15   ;;  %s1698_s14 = sphi %s1759_s14, %s2455_s14   ;;  %s1694_s13 = sphi %s1757_s13, %s2454_s13   ;;  %s1690_s12 = sphi %s1755_s12, %s2453_s12  }
   0xc   : > { %2433 = sst [smem:[#allocation11_spill]] %s1726_s21  ;;  %s75_s23 = sadd.s32 1, %s1698_s14 }
   0xd   : > { %p82_p1 = scmp.ne.s32.totalorder %s1698_s14, %s1694_s13  ;;  %p1454_p2 = scmp.lt.s32.totalorder %s1730_s22, 4 }
   0xe   : > { %s188_s24 = sand.u32 1, %s1730_s22   ;;  %s2426_s25 = sand.u32 1, %s1698_s14  }
   0xf   : > { %p84_p3 = por %p82_p1, %p55_p0  ;;  %s1432_s26 = smul.u32 48, %s1722_s20 }
  0x10   : > { %s1433_s27 = smul.u32 3072, %s2426_s25  ;;  %s2435_s1 = sld [smem:[#allocation16_spill]] }
  0x11   : > { %p1824_p4 = pnand %p1454_p2, %p84_p3  ;;  %s1831_s8 = scalar_lea.sflag [#allocation6], %s188_s24 }
  0x12   : > { %s192_s6 = scalar_lea.vmem [#allocation5], %s1433_s27  ;;  %s1732_s9 = smov 1536  }
  0x13   : > { %s203_s7 = sshll.u32 %s192_s6, 4  ;;  %s1733_s10 = smov 768   ;;  %s204_s7 = int_to_ptr.vmem [resolvable:$true] %s203_s7 }
  0x14   : > { %s1734_s11 = smov 48   ;;  %p1426_p5 = scmp.ge.s32.totalorder %s1730_s22, 1 }
  0x15   : > { %p230_p6 = scmp.lt.s32.totalorder %s1730_s22, 5  ;;  %s2425_s27 = sadd.s32 4294967295, %s1730_s22  }
  0x16   : > { %s200_s4 = scalar_lea.hbm %s2435_s1, %s1432_s26  ;;  %s34_s24 = sadd.s32 1, %s1722_s20 }
  0x17   : > { %s201_s5 = sshll.u32 %s200_s4, 4  ;;  %p1838_p7 = pnand %p1426_p5, %p230_p6  ;;  %s202_s5 = int_to_ptr.hbm [resolvable:$true] %s201_s5 }
  0x18   : > { %1450 = dma.hbm_to_vmem [thread:$0]  (!%p1824_p4), %s202_s5, 49152, %s204_s7, %s1831_s8, %s1732_s9, %s1733_s10, %s1734_s11  }
  0x19   : > { %s38_s29 = sadd.s32 1, %s1726_s21  ;;  %p36_p8 = scmp.ge.s32.totalorder %s34_s24, 2 }
  0x1a   : > { %s47_s30 = sadd.s32 1, %s1710_s17  ;;  %p54_p9 = scmp.ne.s32.totalorder %s1710_s17, %s1706_s16 }
  0x1b   : > { %p60_p10 = scmp.ne.s32.totalorder %s1706_s16, %s1702_s15  ;;  %s2461_s24 = smov (%p36_p8, %s34_s24), 0 }
  0x1c   : > { %2437 = sst [smem:[#allocation12_spill]] %s2461_s24  ;;  %s2463_s29 = smov (!%p36_p8, %s38_s29), %s1726_s21 }
  0x1d   : > { %p1855_p11 = por %p55_p0, %p54_p9  ;;  %p61_p12 = scmp.eq.s32.totalorder %s2425_s27, 0 }
  0x1e   : > { %p40_p13 = scmp.ge.s32.totalorder %s2463_s29, 2  ;;  %s71_s5 = ssub.s32 %s1722_s20, %s2461_s24 }
  0x1f   : > { %p1863_p1 = por %p61_p12, %p60_p10  ;;  %p73_p3 = scmp.eq.s32.totalorder %s71_s5, 0 }
  0x20   : > { %s2465_s29 = smov (%p40_p13, %s2463_s29), 0  ;;  %p88_p0 = scmp.ne.s32.totalorder %s1694_s13, %s1690_s12 }
  0x21   : > { %2440 = sst [smem:[#allocation13_spill]] %s2465_s29  ;;  %s42_s7 = ssub.s32 %s1726_s21, %s2465_s29 }
  0x22   : > { %s1872_s15 = scalar_select %p73_p3, %s1698_s14, %s75_s23  }
  0x23   : > { %p45_p5 = scmp.eq.s32.totalorder %s42_s7, 0  ;;  %s166_s9 = sand.u32 1, %s1710_s17  }
  0x24   : > { %2441 = sst [smem:[#allocation14_spill]] %s1872_s15  ;;  %p1879_p6 = por %p88_p0, %p61_p12 }
  0x25   : > { %s1884_s11 = scalar_select %p45_p5, %s1710_s17, %s47_s30  }
  0x26   : > { %s1422_s5 = sshll.u32 %s166_s9, 5  ;;  %s1431_s27 = sshll.u32 %s1726_s21, 5 }
  0x27   : > { %2443 = sst [smem:[#allocation15_spill]] %s1884_s11  ;;  %s177_s24 = scalar_lea.hbm %s2421_s0, %s1431_s27 }
  0x28   : > { %s179_s23 = sshll.u32 %s177_s24, 4  ;;  %s170_s29 = scalar_lea.vmem [#allocation3], %s1422_s5  ;;  %s180_s23 = int_to_ptr.hbm [resolvable:$true] %s179_s23 }
  0x29   : > { %s181_s15 = sshll.u32 %s170_s29, 4  ;;  %p1445_p8 = pnand %p1454_p2, %p1855_p11  ;;  %s182_s15 = int_to_ptr.vmem [resolvable:$true] %s181_s15 }
  0x2a   : > { %s2444_s12 = sand.u32 1, %s1698_s14   ;;  %s218_s30 = smul.u32 6, %s1722_s20 }
  0x2b   : > { %s1434_s7 = smul.u32 6, %s2444_s12  ;;  %s167_s11 = scalar_lea.sflag [#allocation4], %s166_s9 }
  0x2c   : > { %1447 = dma.hbm_to_vmem [thread:$0]  (!%p1445_p8), %s180_s23, 512, %s182_s15, %s167_s11  }
  0x2d   : > { %s221_s1 = scalar_lea.hbm %s2423_s2, %s218_s30  ;;  %s217_s25 = scalar_lea.vmem [#allocation7], %s1434_s7 }
  0x2e   : > { %s225_s27 = sshll.u32 %s217_s25, 4  ;;  %s223_s24 = sshll.u32 %s221_s1, 4  ;;  %s226_s27 = int_to_ptr.vmem [resolvable:$true] %s225_s27  ;;  %s224_s24 = int_to_ptr.hbm [resolvable:$true] %s223_s24 }
  0x2f   : > { %1453 = dma.hbm_to_vmem [thread:$0]  (!%p1824_p4), %s224_s24, 96, %s226_s27, %s1831_s8  }
  0x30   : > { %234 = sbr.rel (%p1838_p7) target bundleno = 396 (0x18c), region = 32  ;;  %s236_s29 = sand.u32 (!%p1838_p7), 1, %s1706_s16  }
  0x31   : > { %s1427_s4 = sshll.u32 (!%p1838_p7), %s236_s29, 5  ;;  %s237_s9 = scalar_lea.sflag (!%p1838_p7), [#allocation4], %s236_s29 }
  0x32   : > { %s1906_s15 = scalar_lea.vmem (!%p1838_p7), [#allocation3], %s1427_s4 }
  0x35   : > { %1681 = dma.done.wait (%p1863_p1), %s237_s9, 512  }
  0x36   : > { %1683 = vsyncadd (%p1863_p1), %s237_s9, 4294966784  ;;  %s2445_s17 = sadd.s32 4294967295, %s1730_s22   ;;  %s248_s28 = sand.u32 1, %s1694_s13  }
  0x37   : > { %s246_s21 = sand.u32 1, %s2445_s17   ;;  %s1435_s8 = smul.u32 3072, %s248_s28 }
  0x38   : > { %s247_s26 = scalar_lea.sflag [#allocation6], %s246_s21 }
  0x39   : > { %s1917_s11 = scalar_lea.vmem [#allocation5], %s1435_s8 }
  0x3a   : > { %1685 = dma.done.wait (%p1879_p6), %s247_s26, 49248  }
  0x3b   : > { %1687 = vsyncadd (%p1879_p6), %s247_s26, 4294918048  ;;  %v420_v0 = vld [vmem:[%s1917_s11 + $0x2a0] sm:$0xff]  ;;  %v426_v1 = vld [vmem:[%s1917_s11 + $0x2d0] sm:$0xff]  ;;  %p303_p2 = scmp.lt.s32.totalorder %s1718_s19, 1  ;;  %s302_s6 = smul.u32 6, %s1714_s18 }
  0x3c   : > { %v516_v2 = vld [vmem:[%s1917_s11 + $0x5a0] sm:$0xff]  ;;  %v762_v3 = vpack.c.bf16 %v426_v1, %v420_v0  ;;  %v522_v4 = vld [vmem:[%s1917_s11 + $0x5d0] sm:$0xff]  ;;  %s2325_s5 = smul.u32 6, %s248_s28 }
  0x3d   : > { %v612_v5 = vld [vmem:[%s1917_s11 + $0x8a0] sm:$0xff]  ;;  %v618_v6 = vld [vmem:[%s1917_s11 + $0x8d0] sm:$0xff]  ;;  %v810_v7 = vpack.c.bf16 %v522_v4, %v516_v2  ;;  %s2467_s19 = smov (!%p303_p2, %s1718_s19), 1  ;;  %p2316_p4 = scmp.lt.s32.totalorder %s302_s6, 11 }
  0x3e   : > { %v858_v8 = vpack.c.bf16 %v618_v6, %v612_v5  ;;  %v708_v9 = vld [vmem:[%s1917_s11 + $0xba0] sm:$0xff]  ;;  %v714_v10 = vld [vmem:[%s1917_s11 + $0xbd0] sm:$0xff]  ;;  %912 = vmatpush.bf16.msra.mxu0 %v762_v3  ;;  %s1437_s23 = smul.u32 12, %s2467_s19  ;;  %s260_s19 = scalar_lea.vmem [#allocation7], %s2325_s5 }
  0x3f   : > { %v408_v11 = vld [vmem:[%s1917_s11 + $0x240] sm:$0xff]  ;;  %v906_v12 = vpack.c.bf16 %v714_v10, %v708_v9  ;;  %v414_v13 = vld [vmem:[%s1917_s11 + $0x270] sm:$0xff]  ;;  %925 = vmatpush.bf16.msra.mxu1 %v810_v7  ;;  %s2469_s6 = smov (!%p2316_p4, %s302_s6), 11 }
  0x40   : > { %v504_v14 = vld [vmem:[%s1917_s11 + $0x540] sm:$0xff]  ;;  %v510_v15 = vld [vmem:[%s1917_s11 + $0x570] sm:$0xff]  ;;  %938 = vmatpush.bf16.msra.mxu2 %v858_v8  ;;  %v756_v16 = vpack.c.bf16 %v414_v13, %v408_v11  ;;  %s2345_s18 = sadd.s32 %s1437_s23, %s2469_s6 }
  0x41   : > { %v804_v17 = vpack.c.bf16 %v510_v15, %v504_v14  ;;  %v600_v18 = vld [vmem:[%s1917_s11 + $0x840] sm:$0xff]  ;;  %v606_v19 = vld [vmem:[%s1917_s11 + $0x870] sm:$0xff]  ;;  %951 = vmatpush.bf16.msra.mxu3 %v906_v12  ;;  %s1428_s12 = sshll.u32 %s2345_s18, 3 }
  0x42   : > { %v696_v20 = vld [vmem:[%s1917_s11 + $0xb40] sm:$0xff]  ;;  %v852_v21 = vpack.c.bf16 %v606_v19, %v600_v18  ;;  %v702_v22 = vld [vmem:[%s1917_s11 + $0xb70] sm:$0xff]  ;;  %913 = vmatpush.bf16.msra.mxu0 %v756_v16  ;;  %s2369_s1 = scalar_lea.vmem %s2424_s3, %s1428_s12 }
  0x43   : > { %v396_v23 = vld [vmem:[%s1917_s11 + $0x1e0] sm:$0xff]  ;;  %v402_v24 = vld [vmem:[%s1917_s11 + $0x210] sm:$0xff]  ;;  %v900_v25 = vpack.c.bf16 %v702_v22, %v696_v20  ;;  %926 = vmatpush.bf16.msra.mxu1 %v804_v17 }
  0x44   : > { %v492_v26 = vld [vmem:[%s1917_s11 + $0x4e0] sm:$0xff]  ;;  %v498_v27 = vld [vmem:[%s1917_s11 + $0x510] sm:$0xff]  ;;  %v750_v29 = vpack.c.bf16 %v402_v24, %v396_v23  ;;  %939 = vmatpush.bf16.msra.mxu2 %v852_v21 }
  0x45   : > { %v588_v28 = vld [vmem:[%s1917_s11 + $0x7e0] sm:$0xff]  ;;  %v594_v30 = vld [vmem:[%s1917_s11 + $0x810] sm:$0xff]  ;;  %v798_v33 = vpack.c.bf16 %v498_v27, %v492_v26  ;;  %952 = vmatpush.bf16.msra.mxu3 %v900_v25 }
  0x46   : > { %v684_v31 = vld [vmem:[%s1917_s11 + $0xae0] sm:$0xff]  ;;  %v690_v32 = vld [vmem:[%s1917_s11 + $0xb10] sm:$0xff]  ;;  %v846_v34 = vpack.c.bf16 %v594_v30, %v588_v28  ;;  %914 = vmatpush.bf16.msra.mxu0 %v750_v29  ;;  %v421_v28 = vld [vmem:[%s1917_s11 + $0x2a8] sm:$0xff] }
  0x47   : > { %v384_v35 = vld [vmem:[%s1917_s11 + $0x180] sm:$0xff]  ;;  %v390_v36 = vld [vmem:[%s1917_s11 + $0x1b0] sm:$0xff]  ;;  %v894_v38 = vpack.c.bf16 %v690_v32, %v684_v31  ;;  %927 = vmatpush.bf16.msra.mxu1 %v798_v33  ;;  %v427_v29 = vld [vmem:[%s1917_s11 + $0x2d8] sm:$0xff] }
  0x48   : > { %v480_v37 = vld [vmem:[%s1917_s11 + $0x480] sm:$0xff]  ;;  %v486_v39 = vld [vmem:[%s1917_s11 + $0x4b0] sm:$0xff]  ;;  %v744_v44 = vpack.c.bf16 %v390_v36, %v384_v35  ;;  %940 = vmatpush.bf16.msra.mxu2 %v846_v34  ;;  %v517_v30 = vld [vmem:[%s1917_s11 + $0x5a8] sm:$0xff] }
  0x49   : > { %v576_v40 = vld [vmem:[%s1917_s11 + $0x780] sm:$0xff]  ;;  %v582_v41 = vld [vmem:[%s1917_s11 + $0x7b0] sm:$0xff]  ;;  %v792_v45 = vpack.c.bf16 %v486_v39, %v480_v37  ;;  %953 = vmatpush.bf16.msra.mxu3 %v894_v38  ;;  %v523_v32 = vld [vmem:[%s1917_s11 + $0x5d8] sm:$0xff] }
  0x4a   : > { %v672_v42 = vld [vmem:[%s1917_s11 + $0xa80] sm:$0xff]  ;;  %v678_v43 = vld [vmem:[%s1917_s11 + $0xab0] sm:$0xff]  ;;  %v840_v46 = vpack.c.bf16 %v582_v41, %v576_v40  ;;  %915 = vmatpush.bf16.msra.mxu0 %v744_v44  ;;  %v613_v33 = vld [vmem:[%s1917_s11 + $0x8a8] sm:$0xff]  ;;  %v763_v40 = vpack.c.bf16 %v427_v29, %v421_v28  ;;  %v811_v41 = vpack.c.bf16 %v523_v32, %v517_v30 }
  0x4b   : > { %v372_v47 = vld [vmem:[%s1917_s11 + $0x120] sm:$0xff]  ;;  %v378_v48 = vld [vmem:[%s1917_s11 + $0x150] sm:$0xff]  ;;  %v888_v50 = vpack.c.bf16 %v678_v43, %v672_v42  ;;  %928 = vmatpush.bf16.msra.mxu1 %v792_v45  ;;  %v619_v34 = vld [vmem:[%s1917_s11 + $0x8d8] sm:$0xff] }
  0x4c   : > { %v468_v49 = vld [vmem:[%s1917_s11 + $0x420] sm:$0xff]  ;;  %v474_v51 = vld [vmem:[%s1917_s11 + $0x450] sm:$0xff]  ;;  %v738_v56 = vpack.c.bf16 %v378_v48, %v372_v47  ;;  %941 = vmatpush.bf16.msra.mxu2 %v840_v46  ;;  %v709_v37 = vld [vmem:[%s1917_s11 + $0xba8] sm:$0xff]  ;;  %v859_v42 = vpack.c.bf16 %v619_v34, %v613_v33 }
  0x4d   : > { %v564_v52 = vld [vmem:[%s1917_s11 + $0x720] sm:$0xff]  ;;  %v570_v53 = vld [vmem:[%s1917_s11 + $0x750] sm:$0xff]  ;;  %v786_v57 = vpack.c.bf16 %v474_v51, %v468_v49  ;;  %954 = vmatpush.bf16.msra.mxu3 %v888_v50  ;;  %v715_v38 = vld [vmem:[%s1917_s11 + $0xbd8] sm:$0xff] }
  0x4e   : > { %v660_v54 = vld [vmem:[%s1917_s11 + $0xa20] sm:$0xff]  ;;  %v666_v55 = vld [vmem:[%s1917_s11 + $0xa50] sm:$0xff]  ;;  %v834_v58 = vpack.c.bf16 %v570_v53, %v564_v52  ;;  %916 = vmatpush.bf16.msra.mxu0 %v738_v56  ;;  %v409_v43 = vld [vmem:[%s1917_s11 + $0x248] sm:$0xff]  ;;  %v907_v46 = vpack.c.bf16 %v715_v38, %v709_v37 }
  0x4f   : > { %v360_v59 = vld [vmem:[%s1917_s11 + $0xc0] sm:$0xff]  ;;  %v366_v60 = vld [vmem:[%s1917_s11 + $0xf0] sm:$0xff]  ;;  %v882_v62 = vpack.c.bf16 %v666_v55, %v660_v54  ;;  %929 = vmatpush.bf16.msra.mxu1 %v786_v57  ;;  %v415_v44 = vld [vmem:[%s1917_s11 + $0x278] sm:$0xff] }
  0x50   : > { %v456_v61 = vld [vmem:[%s1917_s11 + $0x3c0] sm:$0xff]  ;;  %v462_v63 = vld [vmem:[%s1917_s11 + $0x3f0] sm:$0xff]  ;;  %v732_v4 = vpack.c.bf16 %v366_v60, %v360_v59  ;;  %942 = vmatpush.bf16.msra.mxu2 %v834_v58  ;;  %v505_v45 = vld [vmem:[%s1917_s11 + $0x548] sm:$0xff]  ;;  %v757_v52 = vpack.c.bf16 %v415_v44, %v409_v43 }
  0x51   : > { %v552_v0 = vld [vmem:[%s1917_s11 + $0x6c0] sm:$0xff]  ;;  %v558_v1 = vld [vmem:[%s1917_s11 + $0x6f0] sm:$0xff]  ;;  %v780_v5 = vpack.c.bf16 %v462_v63, %v456_v61  ;;  %955 = vmatpush.bf16.msra.mxu3 %v882_v62  ;;  %v511_v47 = vld [vmem:[%s1917_s11 + $0x578] sm:$0xff] }
  0x52   : > { %v648_v2 = vld [vmem:[%s1917_s11 + $0x9c0] sm:$0xff]  ;;  %v654_v3 = vld [vmem:[%s1917_s11 + $0x9f0] sm:$0xff]  ;;  %v828_v6 = vpack.c.bf16 %v558_v1, %v552_v0  ;;  %917 = vmatpush.bf16.msra.mxu0 %v732_v4  ;;  %v601_v48 = vld [vmem:[%s1917_s11 + $0x848] sm:$0xff]  ;;  %v805_v54 = vpack.c.bf16 %v511_v47, %v505_v45 }
  0x53   : > { %v348_v7 = vld [vmem:[%s1917_s11 + $0x60] sm:$0xff]  ;;  %v354_v8 = vld [vmem:[%s1917_s11 + $0x90] sm:$0xff]  ;;  %v876_v10 = vpack.c.bf16 %v654_v3, %v648_v2  ;;  %930 = vmatpush.bf16.msra.mxu1 %v780_v5  ;;  %v607_v49 = vld [vmem:[%s1917_s11 + $0x878] sm:$0xff] }
  0x54   : > { %v444_v9 = vld [vmem:[%s1917_s11 + $0x360] sm:$0xff]  ;;  %v450_v11 = vld [vmem:[%s1917_s11 + $0x390] sm:$0xff]  ;;  %v726_v16 = vpack.c.bf16 %v354_v8, %v348_v7  ;;  %943 = vmatpush.bf16.msra.mxu2 %v828_v6  ;;  %v697_v50 = vld [vmem:[%s1917_s11 + $0xb48] sm:$0xff]  ;;  %v853_v55 = vpack.c.bf16 %v607_v49, %v601_v48 }
  0x55   : > { %v540_v12 = vld [vmem:[%s1917_s11 + $0x660] sm:$0xff]  ;;  %v546_v13 = vld [vmem:[%s1917_s11 + $0x690] sm:$0xff]  ;;  %v774_v19 = vpack.c.bf16 %v450_v11, %v444_v9  ;;  %956 = vmatpush.bf16.msra.mxu3 %v876_v10  ;;  %v703_v51 = vld [vmem:[%s1917_s11 + $0xb78] sm:$0xff] }
  0x56   : > { %v636_v14 = vld [vmem:[%s1917_s11 + $0x960] sm:$0xff]  ;;  %v642_v15 = vld [vmem:[%s1917_s11 + $0x990] sm:$0xff]  ;;  %v822_v20 = vpack.c.bf16 %v546_v13, %v540_v12  ;;  %918 = vmatpush.bf16.msra.mxu0 %v726_v16  ;;  %v397_v53 = vld [vmem:[%s1917_s11 + $0x1e8] sm:$0xff]  ;;  %v901_v59 = vpack.c.bf16 %v703_v51, %v697_v50 }
  0x57   : > { %v336_v17 = vld [vmem:[%s1917_s11] sm:$0xff]  ;;  %v342_v18 = vld [vmem:[%s1917_s11 + $0x30] sm:$0xff]  ;;  %v870_v24 = vpack.c.bf16 %v642_v15, %v636_v14  ;;  %931 = vmatpush.bf16.msra.mxu1 %v774_v19  ;;  %v403_v56 = vld [vmem:[%s1917_s11 + $0x218] sm:$0xff] }
  0x58   : > { %v432_v21 = vld [vmem:[%s1917_s11 + $0x300] sm:$0xff]  ;;  %v438_v22 = vld [vmem:[%s1917_s11 + $0x330] sm:$0xff]  ;;  %v720_v31 = vpack.c.bf16 %v342_v18, %v336_v17  ;;  %944 = vmatpush.bf16.msra.mxu2 %v822_v20  ;;  %v493_v57 = vld [vmem:[%s1917_s11 + $0x4e8] sm:$0xff]  ;;  %v751_v0 = vpack.c.bf16 %v403_v56, %v397_v53 }
  0x59   : > { %v528_v23 = vld [vmem:[%s1917_s11 + $0x600] sm:$0xff]  ;;  %v534_v25 = vld [vmem:[%s1917_s11 + $0x630] sm:$0xff]  ;;  %v768_v35 = vpack.c.bf16 %v438_v22, %v432_v21  ;;  %957 = vmatpush.bf16.msra.mxu3 %v870_v24  ;;  %v499_v58 = vld [vmem:[%s1917_s11 + $0x518] sm:$0xff] }
  0x5a   : > { %v624_v26 = vld [vmem:[%s1917_s11 + $0x900] sm:$0xff]  ;;  %v630_v27 = vld [vmem:[%s1917_s11 + $0x930] sm:$0xff]  ;;  %v816_v36 = vpack.c.bf16 %v534_v25, %v528_v23  ;;  %919 = vmatpush.bf16.msra.mxu0 %v720_v31  ;;  %v589_v60 = vld [vmem:[%s1917_s11 + $0x7e8] sm:$0xff]  ;;  %v799_v1 = vpack.c.bf16 %v499_v58, %v493_v57 }
  0x5b   : > { %v864_v39 = vpack.c.bf16 %v630_v27, %v624_v26  ;;  %932 = vmatpush.bf16.msra.mxu1 %v768_v35  ;;  %v595_v61 = vld [vmem:[%s1917_s11 + $0x818] sm:$0xff]  ;;  %v685_v62 = vld [vmem:[%s1917_s11 + $0xae8] sm:$0xff]  ;;  %v330_v2 = vld [vmem:[%s1906_s15 + $0x10] sm:$0xff] }
  0x5c   : > { %945 = vmatpush.bf16.msra.mxu2 %v816_v36  ;;  %v691_v63 = vld [vmem:[%s1917_s11 + $0xb18] sm:$0xff]  ;;  %v847_v4 = vpack.c.bf16 %v595_v61, %v589_v60  ;;  %v385_v5 = vld [vmem:[%s1917_s11 + $0x188] sm:$0xff]  ;;  %v2016_v8 = vpack.c.bf16 %v330_v2, %v330_v2  ;;  %v328_v16 = vld [vmem:[%s1906_s15] sm:$0xff] }
  0x5d   : > { %958 = vmatpush.bf16.msra.mxu3 %v864_v39  ;;  %v331_v3 = vld [vmem:[%s1906_s15 + $0x18] sm:$0xff]  ;;  %v481_v7 = vld [vmem:[%s1917_s11 + $0x488] sm:$0xff]  ;;  %v895_v10 = vpack.c.bf16 %v691_v63, %v685_v62  ;;  %v2028_v18 = vpack.c.bf16 %v328_v16, %v328_v16  ;;  %v716_v16 = vld [vmem:[%s1917_s11 + $0xbe0] sm:$0xff] }
  0x5e   : > { %964 = vmatpush.bf16.msrb.mxu0 %v763_v40  ;;  %v391_v6 = vld [vmem:[%s1917_s11 + $0x1b8] sm:$0xff]  ;;  %v2018_v9 = vpack.c.bf16 %v331_v3, %v331_v3  ;;  %v577_v12 = vld [vmem:[%s1917_s11 + $0x788] sm:$0xff] }
  0x5f   : > { %977 = vmatpush.bf16.msrb.mxu1 %v811_v41  ;;  %v487_v11 = vld [vmem:[%s1917_s11 + $0x4b8] sm:$0xff]  ;;  %v673_v14 = vld [vmem:[%s1917_s11 + $0xa88] sm:$0xff]  ;;  %946 = vmatmul.bf16.vlgmr.msra.gmra.mxu2 %v2016_v8  ;;  %v745_v17 = vpack.c.bf16 %v391_v6, %v385_v5  ;;  %v428_v5 = vld [vmem:[%s1917_s11 + $0x2e0] sm:$0xff] }
  0x60   : > { %990 = vmatpush.bf16.msrb.mxu2 %v859_v42  ;;  %v583_v13 = vld [vmem:[%s1917_s11 + $0x7b8] sm:$0xff]  ;;  %959 = vmatmul.bf16.vlgmr.msra.gmra.mxu3 %v2018_v9  ;;  %v329_v19 = vld [vmem:[%s1906_s15 + $0x8] sm:$0xff]  ;;  %v793_v20 = vpack.c.bf16 %v487_v11, %v481_v7  ;;  %v518_v6 = vld [vmem:[%s1917_s11 + $0x5b0] sm:$0xff] }
  0x61   : > { %1003 = vmatpush.bf16.msrb.mxu3 %v907_v46  ;;  %v679_v15 = vld [vmem:[%s1917_s11 + $0xab8] sm:$0xff]  ;;  %v841_v21 = vpack.c.bf16 %v583_v13, %v577_v12  ;;  %v373_v22 = vld [vmem:[%s1917_s11 + $0x128] sm:$0xff]  ;;  %v2034_v25 = vpack.c.bf16 %v329_v19, %v329_v19  ;;  %920 = vmatmul.bf16.vlgmr.msra.gmra.mxu0 %v2028_v18  ;;  %v614_v11 = vld [vmem:[%s1917_s11 + $0x8b0] sm:$0xff] }
  0x62   : > { %965 = vmatpush.bf16.msrb.mxu0 %v757_v52  ;;  %v379_v23 = vld [vmem:[%s1917_s11 + $0x158] sm:$0xff]  ;;  %v469_v24 = vld [vmem:[%s1917_s11 + $0x428] sm:$0xff]  ;;  %v889_v26 = vpack.c.bf16 %v679_v15, %v673_v14  ;;  %v620_v12 = vld [vmem:[%s1917_s11 + $0x8e0] sm:$0xff] }
  0x63   : > { %978 = vmatpush.bf16.msrb.mxu1 %v805_v54  ;;  %v475_v27 = vld [vmem:[%s1917_s11 + $0x458] sm:$0xff]  ;;  %v565_v28 = vld [vmem:[%s1917_s11 + $0x728] sm:$0xff]  ;;  %v739_v32 = vpack.c.bf16 %v379_v23, %v373_v22  ;;  %v710_v15 = vld [vmem:[%s1917_s11 + $0xbb0] sm:$0xff] }
  0x64   : > { %991 = vmatpush.bf16.msrb.mxu2 %v853_v55  ;;  %v571_v29 = vld [vmem:[%s1917_s11 + $0x758] sm:$0xff]  ;;  %v661_v30 = vld [vmem:[%s1917_s11 + $0xa28] sm:$0xff]  ;;  %933 = vmatmul.bf16.vlgmr.msra.gmra.mxu1 %v2034_v25  ;;  %v787_v33 = vpack.c.bf16 %v475_v27, %v469_v24  ;;  %v410_v22 = vld [vmem:[%s1917_s11 + $0x250] sm:$0xff] }
  0x65   : > { %1004 = vmatpush.bf16.msrb.mxu3 %v901_v59  ;;  %v667_v31 = vld [vmem:[%s1917_s11 + $0xa58] sm:$0xff]  ;;  %v835_v34 = vpack.c.bf16 %v571_v29, %v565_v28  ;;  %v361_v35 = vld [vmem:[%s1917_s11 + $0xc8] sm:$0xff]  ;;  %v416_v23 = vld [vmem:[%s1917_s11 + $0x280] sm:$0xff] }
  0x66   : > { %966 = vmatpush.bf16.msrb.mxu0 %v751_v0  ;;  %v367_v36 = vld [vmem:[%s1917_s11 + $0xf8] sm:$0xff]  ;;  %v457_v37 = vld [vmem:[%s1917_s11 + $0x3c8] sm:$0xff]  ;;  %v883_v38 = vpack.c.bf16 %v667_v31, %v661_v30  ;;  %v506_v24 = vld [vmem:[%s1917_s11 + $0x550] sm:$0xff] }
  0x67   : > { %979 = vmatpush.bf16.msrb.mxu1 %v799_v1  ;;  %v463_v39 = vld [vmem:[%s1917_s11 + $0x3f8] sm:$0xff]  ;;  %v553_v40 = vld [vmem:[%s1917_s11 + $0x6c8] sm:$0xff]  ;;  %v733_v44 = vpack.c.bf16 %v367_v36, %v361_v35  ;;  %v512_v27 = vld [vmem:[%s1917_s11 + $0x580] sm:$0xff] }
  0x68   : > { %992 = vmatpush.bf16.msrb.mxu2 %v847_v4  ;;  %v559_v41 = vld [vmem:[%s1917_s11 + $0x6f8] sm:$0xff]  ;;  %v649_v42 = vld [vmem:[%s1917_s11 + $0x9c8] sm:$0xff]  ;;  %v781_v45 = vpack.c.bf16 %v463_v39, %v457_v37  ;;  %v422_v4 = vld [vmem:[%s1917_s11 + $0x2b0] sm:$0xff] }
  0x69   : > { %1005 = vmatpush.bf16.msrb.mxu3 %v895_v10  ;;  %v655_v43 = vld [vmem:[%s1917_s11 + $0x9f8] sm:$0xff]  ;;  %v829_v46 = vpack.c.bf16 %v559_v41, %v553_v40  ;;  %v349_v47 = vld [vmem:[%s1917_s11 + $0x68] sm:$0xff]  ;;  %v524_v10 = vld [vmem:[%s1917_s11 + $0x5e0] sm:$0xff]  ;;  %v764_v19 = vpack.c.bf16 %v428_v5, %v422_v4 }
  0x6a   : > { %967 = vmatpush.bf16.msrb.mxu0 %v745_v17  ;;  %v355_v48 = vld [vmem:[%s1917_s11 + $0x98] sm:$0xff]  ;;  %v445_v49 = vld [vmem:[%s1917_s11 + $0x368] sm:$0xff]  ;;  %v877_v50 = vpack.c.bf16 %v655_v43, %v649_v42  ;;  %v602_v28 = vld [vmem:[%s1917_s11 + $0x850] sm:$0xff] }
  0x6b   : > { %980 = vmatpush.bf16.msrb.mxu1 %v793_v20  ;;  %v451_v51 = vld [vmem:[%s1917_s11 + $0x398] sm:$0xff]  ;;  %v541_v52 = vld [vmem:[%s1917_s11 + $0x668] sm:$0xff]  ;;  %v727_v56 = vpack.c.bf16 %v355_v48, %v349_v47  ;;  %v812_v20 = vpack.c.bf16 %v524_v10, %v518_v6  ;;  %v608_v29 = vld [vmem:[%s1917_s11 + $0x880] sm:$0xff] }
  0x6c   : > { %993 = vmatpush.bf16.msrb.mxu2 %v841_v21  ;;  %v547_v53 = vld [vmem:[%s1917_s11 + $0x698] sm:$0xff]  ;;  %v637_v54 = vld [vmem:[%s1917_s11 + $0x968] sm:$0xff]  ;;  %v775_v59 = vpack.c.bf16 %v451_v51, %v445_v49  ;;  %v860_v21 = vpack.c.bf16 %v620_v12, %v614_v11  ;;  %v698_v30 = vld [vmem:[%s1917_s11 + $0xb50] sm:$0xff] }
  0x6d   : > { %1006 = vmatpush.bf16.msrb.mxu3 %v889_v26  ;;  %v643_v55 = vld [vmem:[%s1917_s11 + $0x998] sm:$0xff]  ;;  %v337_v57 = vld [vmem:[%s1917_s11 + $0x8] sm:$0xff]  ;;  %v823_v60 = vpack.c.bf16 %v547_v53, %v541_v52  ;;  %v908_v26 = vpack.c.bf16 %v716_v16, %v710_v15  ;;  %v704_v31 = vld [vmem:[%s1917_s11 + $0xb80] sm:$0xff] }
  0x6e   : > { %968 = vmatpush.bf16.msrb.mxu0 %v739_v32  ;;  %v343_v58 = vld [vmem:[%s1917_s11 + $0x38] sm:$0xff]  ;;  %v433_v61 = vld [vmem:[%s1917_s11 + $0x308] sm:$0xff]  ;;  %v871_v0 = vpack.c.bf16 %v643_v55, %v637_v54  ;;  %v758_v32 = vpack.c.bf16 %v416_v23, %v410_v22  ;;  %v398_v35 = vld [vmem:[%s1917_s11 + $0x1f0] sm:$0xff] }
  0x6f   : > { %981 = vmatpush.bf16.msrb.mxu1 %v787_v33  ;;  %v439_v62 = vld [vmem:[%s1917_s11 + $0x338] sm:$0xff]  ;;  %v529_v63 = vld [vmem:[%s1917_s11 + $0x608] sm:$0xff]  ;;  %v721_v7 = vpack.c.bf16 %v343_v58, %v337_v57  ;;  %v806_v33 = vpack.c.bf16 %v512_v27, %v506_v24  ;;  %v404_v36 = vld [vmem:[%s1917_s11 + $0x220] sm:$0xff] }
  0x70   : > { %994 = vmatpush.bf16.msrb.mxu2 %v835_v34  ;;  %v535_v1 = vld [vmem:[%s1917_s11 + $0x638] sm:$0xff]  ;;  %v625_v2 = vld [vmem:[%s1917_s11 + $0x908] sm:$0xff]  ;;  %v769_v13 = vpack.c.bf16 %v439_v62, %v433_v61  ;;  %v854_v34 = vpack.c.bf16 %v608_v29, %v602_v28  ;;  %v494_v37 = vld [vmem:[%s1917_s11 + $0x4f0] sm:$0xff] }
  0x71   : > { %1007 = vmatpush.bf16.msrb.mxu3 %v883_v38  ;;  %v631_v3 = vld [vmem:[%s1917_s11 + $0x938] sm:$0xff]  ;;  %v817_v14 = vpack.c.bf16 %v535_v1, %v529_v63  ;;  %v902_v38 = vpack.c.bf16 %v704_v31, %v698_v30  ;;  %v500_v39 = vld [vmem:[%s1917_s11 + $0x520] sm:$0xff]  ;;  %v590_v40 = vld [vmem:[%s1917_s11 + $0x7f0] sm:$0xff] }
  0x72   : > { %969 = vmatpush.bf16.msrb.mxu0 %v733_v44  ;;  %v865_v17 = vpack.c.bf16 %v631_v3, %v625_v2  ;;  %v596_v41 = vld [vmem:[%s1917_s11 + $0x820] sm:$0xff]  ;;  %v686_v42 = vld [vmem:[%s1917_s11 + $0xaf0] sm:$0xff]  ;;  %v752_v44 = vpack.c.bf16 %v404_v36, %v398_v35 }
  0x73   : > { %982 = vmatpush.bf16.msrb.mxu1 %v781_v45  ;;  %v692_v43 = vld [vmem:[%s1917_s11 + $0xb20] sm:$0xff]  ;;  %v800_v45 = vpack.c.bf16 %v500_v39, %v494_v37  ;;  %v386_v47 = vld [vmem:[%s1917_s11 + $0x190] sm:$0xff] }
  0x74   : > { %995 = vmatpush.bf16.msrb.mxu2 %v829_v46  ;;  %v848_v46 = vpack.c.bf16 %v596_v41, %v590_v40  ;;  %v392_v48 = vld [vmem:[%s1917_s11 + $0x1c0] sm:$0xff]  ;;  %v482_v49 = vld [vmem:[%s1917_s11 + $0x490] sm:$0xff] }
  0x75   : > { %1008 = vmatpush.bf16.msrb.mxu3 %v877_v50  ;;  %v896_v50 = vpack.c.bf16 %v692_v43, %v686_v42  ;;  %v488_v51 = vld [vmem:[%s1917_s11 + $0x4c0] sm:$0xff]  ;;  %v578_v52 = vld [vmem:[%s1917_s11 + $0x790] sm:$0xff] }
  0x76   : > { %970 = vmatpush.bf16.msrb.mxu0 %v727_v56  ;;  %v584_v53 = vld [vmem:[%s1917_s11 + $0x7c0] sm:$0xff]  ;;  %v674_v54 = vld [vmem:[%s1917_s11 + $0xa90] sm:$0xff]  ;;  %v746_v56 = vpack.c.bf16 %v392_v48, %v386_v47  ;;  %v794_v57 = vpack.c.bf16 %v488_v51, %v482_v49  ;;  %v525_v48 = vld [vmem:[%s1917_s11 + $0x5e8] sm:$0xff] }
  0x77   : > { %983 = vmatpush.bf16.msrb.mxu1 %v775_v59  ;;  %v680_v55 = vld [vmem:[%s1917_s11 + $0xac0] sm:$0xff]  ;;  %v842_v58 = vpack.c.bf16 %v584_v53, %v578_v52  ;;  %v374_v59 = vld [vmem:[%s1917_s11 + $0x130] sm:$0xff]  ;;  %v615_v49 = vld [vmem:[%s1917_s11 + $0x8b8] sm:$0xff] }
  0x78   : > { %996 = vmatpush.bf16.msrb.mxu2 %v823_v60  ;;  %v380_v60 = vld [vmem:[%s1917_s11 + $0x160] sm:$0xff]  ;;  %v470_v61 = vld [vmem:[%s1917_s11 + $0x430] sm:$0xff]  ;;  %v890_v62 = vpack.c.bf16 %v680_v55, %v674_v54  ;;  %v711_v53 = vld [vmem:[%s1917_s11 + $0xbb8] sm:$0xff] }
  0x79   : > { %1009 = vmatpush.bf16.msrb.mxu3 %v871_v0  ;;  %v476_v63 = vld [vmem:[%s1917_s11 + $0x460] sm:$0xff]  ;;  %v566_v0 = vld [vmem:[%s1917_s11 + $0x730] sm:$0xff]  ;;  %v740_v4 = vpack.c.bf16 %v380_v60, %v374_v59  ;;  %v717_v54 = vld [vmem:[%s1917_s11 + $0xbe8] sm:$0xff] }
  0x7a   : > { %971 = vmatpush.bf16.msrb.mxu0 %v721_v7  ;;  %v572_v1 = vld [vmem:[%s1917_s11 + $0x760] sm:$0xff]  ;;  %v662_v2 = vld [vmem:[%s1917_s11 + $0xa30] sm:$0xff]  ;;  %v788_v5 = vpack.c.bf16 %v476_v63, %v470_v61  ;;  %v411_v59 = vld [vmem:[%s1917_s11 + $0x258] sm:$0xff] }
  0x7b   : > { %984 = vmatpush.bf16.msrb.mxu1 %v769_v13  ;;  %v668_v3 = vld [vmem:[%s1917_s11 + $0xa60] sm:$0xff]  ;;  %v836_v6 = vpack.c.bf16 %v572_v1, %v566_v0  ;;  %v362_v7 = vld [vmem:[%s1917_s11 + $0xd0] sm:$0xff]  ;;  %v417_v60 = vld [vmem:[%s1917_s11 + $0x288] sm:$0xff] }
  0x7c   : > { %997 = vmatpush.bf16.msrb.mxu2 %v817_v14  ;;  %v368_v10 = vld [vmem:[%s1917_s11 + $0x100] sm:$0xff]  ;;  %v458_v11 = vld [vmem:[%s1917_s11 + $0x3d0] sm:$0xff]  ;;  %v884_v12 = vpack.c.bf16 %v668_v3, %v662_v2  ;;  %v507_v61 = vld [vmem:[%s1917_s11 + $0x558] sm:$0xff] }
  0x7d   : > { %1010 = vmatpush.bf16.msrb.mxu3 %v865_v17  ;;  %972 = vmatmul.bf16.vlgmr.msrb.gmra.mxu0 %v2028_v18  ;;  %v464_v13 = vld [vmem:[%s1917_s11 + $0x400] sm:$0xff]  ;;  %v554_v14 = vld [vmem:[%s1917_s11 + $0x6d0] sm:$0xff]  ;;  %v513_v63 = vld [vmem:[%s1917_s11 + $0x588] sm:$0xff] }
  0x7e   : > { %1016 = vmatpush.bf16.msra.mxu0 %v764_v19  ;;  %985 = vmatmul.bf16.vlgmr.msrb.gmra.mxu1 %v2034_v25  ;;  %v560_v15 = vld [vmem:[%s1917_s11 + $0x700] sm:$0xff]  ;;  %v650_v16 = vld [vmem:[%s1917_s11 + $0x9d0] sm:$0xff]  ;;  %v734_v19 = vpack.c.bf16 %v368_v10, %v362_v7  ;;  %v603_v0 = vld [vmem:[%s1917_s11 + $0x858] sm:$0xff] }
  0x7f   : > { %1029 = vmatpush.bf16.msra.mxu1 %v812_v20  ;;  %998 = vmatmul.bf16.vlgmr.msrb.gmra.mxu2 %v2016_v8  ;;  %v656_v17 = vld [vmem:[%s1917_s11 + $0xa00] sm:$0xff]  ;;  %v782_v20 = vpack.c.bf16 %v464_v13, %v458_v11  ;;  %v350_v22 = vld [vmem:[%s1917_s11 + $0x70] sm:$0xff]  ;;  %v609_v1 = vld [vmem:[%s1917_s11 + $0x888] sm:$0xff] }
  0x80   : > { %1042 = vmatpush.bf16.msra.mxu2 %v860_v21  ;;  %1011 = vmatmul.bf16.vlgmr.msrb.gmra.mxu3 %v2018_v9  ;;  %v830_v21 = vpack.c.bf16 %v560_v15, %v554_v14  ;;  %v356_v23 = vld [vmem:[%s1917_s11 + $0xa0] sm:$0xff]  ;;  %v446_v24 = vld [vmem:[%s1917_s11 + $0x370] sm:$0xff]  ;;  %v699_v2 = vld [vmem:[%s1917_s11 + $0xb58] sm:$0xff] }
  0x81   : > { %1055 = vmatpush.bf16.msra.mxu3 %v908_v26  ;;  %v878_v26 = vpack.c.bf16 %v656_v17, %v650_v16  ;;  %v452_v27 = vld [vmem:[%s1917_s11 + $0x3a0] sm:$0xff]  ;;  %v542_v28 = vld [vmem:[%s1917_s11 + $0x670] sm:$0xff]  ;;  %v705_v3 = vld [vmem:[%s1917_s11 + $0xb88] sm:$0xff] }
  0x82   : > { %1017 = vmatpush.bf16.msra.mxu0 %v758_v32  ;;  %v548_v29 = vld [vmem:[%s1917_s11 + $0x6a0] sm:$0xff]  ;;  %v638_v30 = vld [vmem:[%s1917_s11 + $0x970] sm:$0xff]  ;;  %v728_v32 = vpack.c.bf16 %v356_v23, %v350_v22  ;;  %v776_v35 = vpack.c.bf16 %v452_v27, %v446_v24  ;;  %v399_v7 = vld [vmem:[%s1917_s11 + $0x1f8] sm:$0xff] }
  0x83   : > { %1030 = vmatpush.bf16.msra.mxu1 %v806_v33  ;;  %v644_v31 = vld [vmem:[%s1917_s11 + $0x9a0] sm:$0xff]  ;;  %v338_v33 = vld [vmem:[%s1917_s11 + $0x10] sm:$0xff]  ;;  %v824_v36 = vpack.c.bf16 %v548_v29, %v542_v28  ;;  %v405_v10 = vld [vmem:[%s1917_s11 + $0x228] sm:$0xff] }
  0x84   : > { %1043 = vmatpush.bf16.msra.mxu2 %v854_v34  ;;  %v344_v34 = vld [vmem:[%s1917_s11 + $0x40] sm:$0xff]  ;;  %v434_v37 = vld [vmem:[%s1917_s11 + $0x310] sm:$0xff]  ;;  %v872_v40 = vpack.c.bf16 %v644_v31, %v638_v30  ;;  %v495_v11 = vld [vmem:[%s1917_s11 + $0x4f8] sm:$0xff] }
  0x85   : > { %1056 = vmatpush.bf16.msra.mxu3 %v902_v38  ;;  %v440_v38 = vld [vmem:[%s1917_s11 + $0x340] sm:$0xff]  ;;  %v530_v39 = vld [vmem:[%s1917_s11 + $0x610] sm:$0xff]  ;;  %v722_v47 = vpack.c.bf16 %v344_v34, %v338_v33  ;;  %v501_v13 = vld [vmem:[%s1917_s11 + $0x528] sm:$0xff] }
  0x86   : > { %1018 = vmatpush.bf16.msra.mxu0 %v752_v44  ;;  %v536_v41 = vld [vmem:[%s1917_s11 + $0x640] sm:$0xff]  ;;  %v626_v42 = vld [vmem:[%s1917_s11 + $0x910] sm:$0xff]  ;;  %v423_v44 = vld [vmem:[%s1917_s11 + $0x2b8] sm:$0xff]  ;;  %v770_v51 = vpack.c.bf16 %v440_v38, %v434_v37 }
  0x87   : > { %1031 = vmatpush.bf16.msra.mxu1 %v800_v45  ;;  %v632_v43 = vld [vmem:[%s1917_s11 + $0x940] sm:$0xff]  ;;  %v429_v45 = vld [vmem:[%s1917_s11 + $0x2e8] sm:$0xff]  ;;  %v818_v52 = vpack.c.bf16 %v536_v41, %v530_v39  ;;  %v591_v14 = vld [vmem:[%s1917_s11 + $0x7f8] sm:$0xff] }
  0x88   : > { %1044 = vmatpush.bf16.msra.mxu2 %v848_v46  ;;  %v519_v46 = vld [vmem:[%s1917_s11 + $0x5b8] sm:$0xff]  ;;  %v866_v55 = vpack.c.bf16 %v632_v43, %v626_v42  ;;  %v597_v15 = vld [vmem:[%s1917_s11 + $0x828] sm:$0xff] }
  0x89   : > { %1057 = vmatpush.bf16.msra.mxu3 %v896_v50  ;;  %v621_v50 = vld [vmem:[%s1917_s11 + $0x8e8] sm:$0xff]  ;;  %v687_v16 = vld [vmem:[%s1917_s11 + $0xaf8] sm:$0xff] }
  0x8a   : > { %1019 = vmatpush.bf16.msra.mxu0 %v746_v56  ;;  %v765_v56 = vpack.c.bf16 %v429_v45, %v423_v44  ;;  %v693_v17 = vld [vmem:[%s1917_s11 + $0xb28] sm:$0xff]  ;;  %v387_v22 = vld [vmem:[%s1917_s11 + $0x198] sm:$0xff] }
  0x8b   : > { %1032 = vmatpush.bf16.msra.mxu1 %v794_v57  ;;  %v813_v57 = vpack.c.bf16 %v525_v48, %v519_v46  ;;  %v393_v23 = vld [vmem:[%s1917_s11 + $0x1c8] sm:$0xff]  ;;  %v483_v24 = vld [vmem:[%s1917_s11 + $0x498] sm:$0xff] }
  0x8c   : > { %1045 = vmatpush.bf16.msra.mxu2 %v842_v58  ;;  %v861_v58 = vpack.c.bf16 %v621_v50, %v615_v49  ;;  %v489_v27 = vld [vmem:[%s1917_s11 + $0x4c8] sm:$0xff]  ;;  %v579_v28 = vld [vmem:[%s1917_s11 + $0x798] sm:$0xff] }
  0x8d   : > { %1058 = vmatpush.bf16.msra.mxu3 %v890_v62  ;;  %v909_v62 = vpack.c.bf16 %v717_v54, %v711_v53  ;;  %v585_v29 = vld [vmem:[%s1917_s11 + $0x7c8] sm:$0xff]  ;;  %v675_v30 = vld [vmem:[%s1917_s11 + $0xa98] sm:$0xff]  ;;  %v795_v33 = vpack.c.bf16 %v489_v27, %v483_v24  ;;  %v616_v24 = vld [vmem:[%s1917_s11 + $0x8c0] sm:$0xff] }
  0x8e   : > { %1020 = vmatpush.bf16.msra.mxu0 %v740_v4  ;;  %v759_v4 = vpack.c.bf16 %v417_v60, %v411_v59  ;;  %v681_v31 = vld [vmem:[%s1917_s11 + $0xac8] sm:$0xff]  ;;  %v843_v34 = vpack.c.bf16 %v585_v29, %v579_v28  ;;  %v471_v37 = vld [vmem:[%s1917_s11 + $0x438] sm:$0xff]  ;;  %v712_v29 = vld [vmem:[%s1917_s11 + $0xbc0] sm:$0xff] }
  0x8f   : > { %1033 = vmatpush.bf16.msra.mxu1 %v788_v5  ;;  %v807_v5 = vpack.c.bf16 %v513_v63, %v507_v61  ;;  %v891_v38 = vpack.c.bf16 %v681_v31, %v675_v30  ;;  %v477_v39 = vld [vmem:[%s1917_s11 + $0x468] sm:$0xff]  ;;  %v663_v42 = vld [vmem:[%s1917_s11 + $0xa38] sm:$0xff]  ;;  %v718_v30 = vld [vmem:[%s1917_s11 + $0xbf0] sm:$0xff] }
  0x90   : > { %1046 = vmatpush.bf16.msra.mxu2 %v836_v6  ;;  %v855_v6 = vpack.c.bf16 %v609_v1, %v603_v0  ;;  %v573_v41 = vld [vmem:[%s1917_s11 + $0x768] sm:$0xff]  ;;  %v789_v45 = vpack.c.bf16 %v477_v39, %v471_v37  ;;  %v459_v49 = vld [vmem:[%s1917_s11 + $0x3d8] sm:$0xff]  ;;  %v508_v37 = vld [vmem:[%s1917_s11 + $0x560] sm:$0xff] }
  0x91   : > { %1059 = vmatpush.bf16.msra.mxu3 %v884_v12  ;;  %v903_v12 = vpack.c.bf16 %v705_v3, %v699_v2  ;;  %v669_v43 = vld [vmem:[%s1917_s11 + $0xa68] sm:$0xff]  ;;  %v651_v54 = vld [vmem:[%s1917_s11 + $0x9d8] sm:$0xff]  ;;  %v514_v39 = vld [vmem:[%s1917_s11 + $0x590] sm:$0xff] }
  0x92   : > { %1021 = vmatpush.bf16.msra.mxu0 %v734_v19  ;;  %v753_v19 = vpack.c.bf16 %v405_v10, %v399_v7  ;;  %v369_v48 = vld [vmem:[%s1917_s11 + $0x108] sm:$0xff]  ;;  %v885_v50 = vpack.c.bf16 %v669_v43, %v663_v42  ;;  %v351_v59 = vld [vmem:[%s1917_s11 + $0x78] sm:$0xff]  ;;  %v700_v42 = vld [vmem:[%s1917_s11 + $0xb60] sm:$0xff] }
  0x93   : > { %1034 = vmatpush.bf16.msra.mxu1 %v782_v20  ;;  %v801_v20 = vpack.c.bf16 %v501_v13, %v495_v11  ;;  %v561_v53 = vld [vmem:[%s1917_s11 + $0x708] sm:$0xff]  ;;  %v447_v61 = vld [vmem:[%s1917_s11 + $0x378] sm:$0xff]  ;;  %v706_v43 = vld [vmem:[%s1917_s11 + $0xb90] sm:$0xff] }
  0x94   : > { %1047 = vmatpush.bf16.msra.mxu2 %v830_v21  ;;  %v849_v21 = vpack.c.bf16 %v597_v15, %v591_v14  ;;  %v357_v60 = vld [vmem:[%s1917_s11 + $0xa8] sm:$0xff]  ;;  %v543_v0 = vld [vmem:[%s1917_s11 + $0x678] sm:$0xff] }
  0x95   : > { %1060 = vmatpush.bf16.msra.mxu3 %v878_v26  ;;  %v897_v26 = vpack.c.bf16 %v693_v17, %v687_v16  ;;  %v453_v63 = vld [vmem:[%s1917_s11 + $0x3a8] sm:$0xff]  ;;  %v639_v2 = vld [vmem:[%s1917_s11 + $0x978] sm:$0xff] }
  0x96   : > { %1022 = vmatpush.bf16.msra.mxu0 %v728_v32  ;;  %v747_v32 = vpack.c.bf16 %v393_v23, %v387_v22  ;;  %v549_v1 = vld [vmem:[%s1917_s11 + $0x6a8] sm:$0xff]  ;;  %v777_v7 = vpack.c.bf16 %v453_v63, %v447_v61  ;;  %v435_v11 = vld [vmem:[%s1917_s11 + $0x318] sm:$0xff]  ;;  %v526_v23 = vld [vmem:[%s1917_s11 + $0x5f0] sm:$0xff] }
  0x97   : > { %1035 = vmatpush.bf16.msra.mxu1 %v776_v35  ;;  %v375_v35 = vld [vmem:[%s1917_s11 + $0x138] sm:$0xff]  ;;  %v645_v3 = vld [vmem:[%s1917_s11 + $0x9a8] sm:$0xff]  ;;  %v825_v10 = vpack.c.bf16 %v549_v1, %v543_v0  ;;  %v484_v61 = vld [vmem:[%s1917_s11 + $0x4a0] sm:$0xff] }
  0x98   : > { %1048 = vmatpush.bf16.msra.mxu2 %v824_v36  ;;  %v381_v36 = vld [vmem:[%s1917_s11 + $0x168] sm:$0xff]  ;;  %v531_v13 = vld [vmem:[%s1917_s11 + $0x618] sm:$0xff]  ;;  %v873_v14 = vpack.c.bf16 %v645_v3, %v639_v2  ;;  %v490_v63 = vld [vmem:[%s1917_s11 + $0x4d0] sm:$0xff] }
  0x99   : > { %1061 = vmatpush.bf16.msra.mxu3 %v872_v40  ;;  %v567_v40 = vld [vmem:[%s1917_s11 + $0x738] sm:$0xff]  ;;  %v741_v44 = vpack.c.bf16 %v381_v36, %v375_v35  ;;  %v537_v15 = vld [vmem:[%s1917_s11 + $0x648] sm:$0xff]  ;;  %v412_v35 = vld [vmem:[%s1917_s11 + $0x260] sm:$0xff] }
  0x9a   : > { %1023 = vmatpush.bf16.msra.mxu0 %v722_v47  ;;  %v837_v46 = vpack.c.bf16 %v573_v41, %v567_v40  ;;  %v363_v47 = vld [vmem:[%s1917_s11 + $0xd8] sm:$0xff]  ;;  %v633_v17 = vld [vmem:[%s1917_s11 + $0x948] sm:$0xff]  ;;  %v819_v28 = vpack.c.bf16 %v537_v15, %v531_v13  ;;  %v418_v36 = vld [vmem:[%s1917_s11 + $0x290] sm:$0xff] }
  0x9b   : > { %1036 = vmatpush.bf16.msra.mxu1 %v770_v51  ;;  %v465_v51 = vld [vmem:[%s1917_s11 + $0x408] sm:$0xff]  ;;  %v627_v16 = vld [vmem:[%s1917_s11 + $0x918] sm:$0xff]  ;;  %v604_v40 = vld [vmem:[%s1917_s11 + $0x860] sm:$0xff] }
  0x9c   : > { %1049 = vmatpush.bf16.msra.mxu2 %v818_v52  ;;  %v555_v52 = vld [vmem:[%s1917_s11 + $0x6d8] sm:$0xff]  ;;  %v867_v31 = vpack.c.bf16 %v633_v17, %v627_v16  ;;  %v610_v41 = vld [vmem:[%s1917_s11 + $0x890] sm:$0xff]  ;;  %v580_v0 = vld [vmem:[%s1917_s11 + $0x7a0] sm:$0xff] }
  0x9d   : > { %1062 = vmatpush.bf16.msra.mxu3 %v866_v55  ;;  %1024 = vmatmul.bf16.vlgmr.msra.gmra.mxu0 %v2028_v18  ;;  %v657_v55 = vld [vmem:[%s1917_s11 + $0xa08] sm:$0xff]  ;;  %v586_v1 = vld [vmem:[%s1917_s11 + $0x7d0] sm:$0xff]  ;;  %v676_v2 = vld [vmem:[%s1917_s11 + $0xaa0] sm:$0xff] }
  0x9e   : > { %1068 = vmatpush.bf16.msrb.mxu0 %v765_v56  ;;  %1037 = vmatmul.bf16.vlgmr.msra.gmra.mxu1 %v2034_v25  ;;  %v735_v56 = vpack.c.bf16 %v369_v48, %v363_v47  ;;  %v400_v47 = vld [vmem:[%s1917_s11 + $0x200] sm:$0xff]  ;;  %v406_v48 = vld [vmem:[%s1917_s11 + $0x230] sm:$0xff] }
  0x9f   : > { %1081 = vmatpush.bf16.msrb.mxu1 %v813_v57  ;;  %1050 = vmatmul.bf16.vlgmr.msra.gmra.mxu2 %v2016_v8  ;;  %v783_v57 = vpack.c.bf16 %v465_v51, %v459_v49  ;;  %v496_v49 = vld [vmem:[%s1917_s11 + $0x500] sm:$0xff]  ;;  %v502_v51 = vld [vmem:[%s1917_s11 + $0x530] sm:$0xff] }
  0xa0   : > { %1094 = vmatpush.bf16.msrb.mxu2 %v861_v58  ;;  %1063 = vmatmul.bf16.vlgmr.msra.gmra.mxu3 %v2018_v9  ;;  %v831_v58 = vpack.c.bf16 %v561_v53, %v555_v52  ;;  %v592_v52 = vld [vmem:[%s1917_s11 + $0x800] sm:$0xff]  ;;  %v598_v53 = vld [vmem:[%s1917_s11 + $0x830] sm:$0xff] }
  0xa1   : > { %1107 = vmatpush.bf16.msrb.mxu3 %v909_v62  ;;  %v879_v62 = vpack.c.bf16 %v657_v55, %v651_v54  ;;  %v688_v54 = vld [vmem:[%s1917_s11 + $0xb00] sm:$0xff]  ;;  %v694_v55 = vld [vmem:[%s1917_s11 + $0xb30] sm:$0xff] }
  0xa2   : > { %1069 = vmatpush.bf16.msrb.mxu0 %v759_v4  ;;  %v729_v4 = vpack.c.bf16 %v357_v60, %v351_v59  ;;  %v388_v59 = vld [vmem:[%s1917_s11 + $0x1a0] sm:$0xff]  ;;  %v394_v60 = vld [vmem:[%s1917_s11 + $0x1d0] sm:$0xff] }
  0xa3   : > { %1082 = vmatpush.bf16.msrb.mxu1 %v807_v5  ;;  %v339_v5 = vld [vmem:[%s1917_s11 + $0x18] sm:$0xff]  ;;  %v682_v3 = vld [vmem:[%s1917_s11 + $0xad0] sm:$0xff]  ;;  %v664_v16 = vld [vmem:[%s1917_s11 + $0xa40] sm:$0xff] }
  0xa4   : > { %1095 = vmatpush.bf16.msrb.mxu2 %v855_v6  ;;  %v345_v6 = vld [vmem:[%s1917_s11 + $0x48] sm:$0xff]  ;;  %v478_v13 = vld [vmem:[%s1917_s11 + $0x470] sm:$0xff] }
  0xa5   : > { %1108 = vmatpush.bf16.msrb.mxu3 %v903_v12  ;;  %v441_v12 = vld [vmem:[%s1917_s11 + $0x348] sm:$0xff]  ;;  %v723_v22 = vpack.c.bf16 %v345_v6, %v339_v5  ;;  %v796_v5 = vpack.c.bf16 %v490_v63, %v484_v61  ;;  %v844_v6 = vpack.c.bf16 %v586_v1, %v580_v0  ;;  %v574_v15 = vld [vmem:[%s1917_s11 + $0x770] sm:$0xff] }
  0xa6   : > { %1070 = vmatpush.bf16.msrb.mxu0 %v753_v19  ;;  %v424_v19 = vld [vmem:[%s1917_s11 + $0x2c0] sm:$0xff]  ;;  %v771_v27 = vpack.c.bf16 %v441_v12, %v435_v11  ;;  %v892_v12 = vpack.c.bf16 %v682_v3, %v676_v2  ;;  %v670_v17 = vld [vmem:[%s1917_s11 + $0xa70] sm:$0xff]  ;;  %v617_v61 = vld [vmem:[%s1917_s11 + $0x8c8] sm:$0xff] }
  0xa7   : > { %1083 = vmatpush.bf16.msrb.mxu1 %v801_v20  ;;  %v430_v20 = vld [vmem:[%s1917_s11 + $0x2f0] sm:$0xff]  ;;  %v472_v11 = vld [vmem:[%s1917_s11 + $0x440] sm:$0xff]  ;;  %v713_v1 = vld [vmem:[%s1917_s11 + $0xbc8] sm:$0xff] }
  0xa8   : > { %1096 = vmatpush.bf16.msrb.mxu2 %v849_v21  ;;  %v520_v21 = vld [vmem:[%s1917_s11 + $0x5c0] sm:$0xff]  ;;  %v719_v2 = vld [vmem:[%s1917_s11 + $0xbf8] sm:$0xff] }
  0xa9   : > { %1109 = vmatpush.bf16.msrb.mxu3 %v897_v26  ;;  %v622_v26 = vld [vmem:[%s1917_s11 + $0x8f0] sm:$0xff] }
  0xaa   : > { %1071 = vmatpush.bf16.msrb.mxu0 %v747_v32  ;;  %v766_v32 = vpack.c.bf16 %v430_v20, %v424_v19  ;;  %v790_v20 = vpack.c.bf16 %v478_v13, %v472_v11  ;;  %v509_v11 = vld [vmem:[%s1917_s11 + $0x568] sm:$0xff]  ;;  %v515_v13 = vld [vmem:[%s1917_s11 + $0x598] sm:$0xff] }
  0xab   : > { %1084 = vmatpush.bf16.msrb.mxu1 %v795_v33  ;;  %v814_v33 = vpack.c.bf16 %v526_v23, %v520_v21  ;;  %v370_v23 = vld [vmem:[%s1917_s11 + $0x110] sm:$0xff] }
  0xac   : > { %1097 = vmatpush.bf16.msrb.mxu2 %v843_v34  ;;  %v862_v34 = vpack.c.bf16 %v622_v26, %v616_v24  ;;  %v460_v24 = vld [vmem:[%s1917_s11 + $0x3e0] sm:$0xff]  ;;  %v886_v26 = vpack.c.bf16 %v670_v17, %v664_v16  ;;  %v701_v16 = vld [vmem:[%s1917_s11 + $0xb68] sm:$0xff]  ;;  %v707_v17 = vld [vmem:[%s1917_s11 + $0xb98] sm:$0xff] }
  0xad   : > { %1110 = vmatpush.bf16.msrb.mxu3 %v891_v38  ;;  %v910_v38 = vpack.c.bf16 %v718_v30, %v712_v29  ;;  %v562_v29 = vld [vmem:[%s1917_s11 + $0x710] sm:$0xff]  ;;  %v652_v30 = vld [vmem:[%s1917_s11 + $0x9e0] sm:$0xff] }
  0xae   : > { %1072 = vmatpush.bf16.msrb.mxu0 %v741_v44  ;;  %v760_v44 = vpack.c.bf16 %v418_v36, %v412_v35  ;;  %v352_v35 = vld [vmem:[%s1917_s11 + $0x80] sm:$0xff]  ;;  %v358_v36 = vld [vmem:[%s1917_s11 + $0xb0] sm:$0xff] }
  0xaf   : > { %1085 = vmatpush.bf16.msrb.mxu1 %v789_v45  ;;  %v808_v45 = vpack.c.bf16 %v514_v39, %v508_v37  ;;  %v448_v37 = vld [vmem:[%s1917_s11 + $0x380] sm:$0xff]  ;;  %v454_v39 = vld [vmem:[%s1917_s11 + $0x3b0] sm:$0xff] }
  0xb0   : > { %1098 = vmatpush.bf16.msrb.mxu2 %v837_v46  ;;  %v856_v46 = vpack.c.bf16 %v610_v41, %v604_v40  ;;  %v544_v40 = vld [vmem:[%s1917_s11 + $0x680] sm:$0xff]  ;;  %v550_v41 = vld [vmem:[%s1917_s11 + $0x6b0] sm:$0xff] }
  0xb1   : > { %1111 = vmatpush.bf16.msrb.mxu3 %v885_v50  ;;  %v904_v50 = vpack.c.bf16 %v706_v43, %v700_v42  ;;  %v640_v42 = vld [vmem:[%s1917_s11 + $0x980] sm:$0xff]  ;;  %v646_v43 = vld [vmem:[%s1917_s11 + $0x9b0] sm:$0xff] }
  0xb2   : > { %1073 = vmatpush.bf16.msrb.mxu0 %v735_v56  ;;  %v754_v56 = vpack.c.bf16 %v406_v48, %v400_v47  ;;  %v778_v47 = vpack.c.bf16 %v454_v39, %v448_v37  ;;  %v826_v48 = vpack.c.bf16 %v550_v41, %v544_v40  ;;  %v485_v37 = vld [vmem:[%s1917_s11 + $0x4a8] sm:$0xff]  ;;  %v491_v39 = vld [vmem:[%s1917_s11 + $0x4d8] sm:$0xff] }
  0xb3   : > { %1086 = vmatpush.bf16.msrb.mxu1 %v783_v57  ;;  %v802_v57 = vpack.c.bf16 %v502_v51, %v496_v49  ;;  %v436_v49 = vld [vmem:[%s1917_s11 + $0x320] sm:$0xff]  ;;  %v581_v40 = vld [vmem:[%s1917_s11 + $0x7a8] sm:$0xff]  ;;  %v587_v41 = vld [vmem:[%s1917_s11 + $0x7d8] sm:$0xff] }
  0xb4   : > { %1099 = vmatpush.bf16.msrb.mxu2 %v831_v58  ;;  %v850_v58 = vpack.c.bf16 %v598_v53, %v592_v52  ;;  %v532_v51 = vld [vmem:[%s1917_s11 + $0x620] sm:$0xff]  ;;  %v874_v52 = vpack.c.bf16 %v646_v43, %v640_v42  ;;  %v538_v53 = vld [vmem:[%s1917_s11 + $0x650] sm:$0xff]  ;;  %v677_v42 = vld [vmem:[%s1917_s11 + $0xaa8] sm:$0xff] }
  0xb5   : > { %1112 = vmatpush.bf16.msrb.mxu3 %v879_v62  ;;  %v898_v62 = vpack.c.bf16 %v694_v55, %v688_v54  ;;  %v628_v54 = vld [vmem:[%s1917_s11 + $0x920] sm:$0xff]  ;;  %v634_v55 = vld [vmem:[%s1917_s11 + $0x950] sm:$0xff]  ;;  %v820_v0 = vpack.c.bf16 %v538_v53, %v532_v51  ;;  %v683_v43 = vld [vmem:[%s1917_s11 + $0xad8] sm:$0xff] }
  0xb6   : > { %1074 = vmatpush.bf16.msrb.mxu0 %v729_v4  ;;  %v748_v4 = vpack.c.bf16 %v394_v60, %v388_v59  ;;  %v527_v60 = vld [vmem:[%s1917_s11 + $0x5f8] sm:$0xff]  ;;  %v868_v3 = vpack.c.bf16 %v634_v55, %v628_v54  ;;  %v665_v54 = vld [vmem:[%s1917_s11 + $0xa48] sm:$0xff] }
  0xb7   : > { %1087 = vmatpush.bf16.msrb.mxu1 %v777_v7  ;;  %v376_v7 = vld [vmem:[%s1917_s11 + $0x140] sm:$0xff]  ;;  %v479_v51 = vld [vmem:[%s1917_s11 + $0x478] sm:$0xff] }
  0xb8   : > { %1100 = vmatpush.bf16.msrb.mxu2 %v825_v10  ;;  %v382_v10 = vld [vmem:[%s1917_s11 + $0x170] sm:$0xff]  ;;  %v575_v53 = vld [vmem:[%s1917_s11 + $0x778] sm:$0xff] }
  0xb9   : > { %1113 = vmatpush.bf16.msrb.mxu3 %v873_v14  ;;  %v568_v14 = vld [vmem:[%s1917_s11 + $0x740] sm:$0xff]  ;;  %v742_v19 = vpack.c.bf16 %v382_v10, %v376_v7  ;;  %v413_v7 = vld [vmem:[%s1917_s11 + $0x268] sm:$0xff]  ;;  %v419_v10 = vld [vmem:[%s1917_s11 + $0x298] sm:$0xff] }
  0xba   : > { %1075 = vmatpush.bf16.msrb.mxu0 %v723_v22  ;;  %v838_v21 = vpack.c.bf16 %v574_v15, %v568_v14  ;;  %v364_v22 = vld [vmem:[%s1917_s11 + $0xe0] sm:$0xff]  ;;  %v605_v14 = vld [vmem:[%s1917_s11 + $0x868] sm:$0xff]  ;;  %v611_v15 = vld [vmem:[%s1917_s11 + $0x898] sm:$0xff] }
  0xbb   : > { %1088 = vmatpush.bf16.msrb.mxu1 %v771_v27  ;;  %v466_v27 = vld [vmem:[%s1917_s11 + $0x410] sm:$0xff]  ;;  %v671_v55 = vld [vmem:[%s1917_s11 + $0xa78] sm:$0xff] }
  0xbc   : > { %1101 = vmatpush.bf16.msrb.mxu2 %v819_v28  ;;  %v556_v28 = vld [vmem:[%s1917_s11 + $0x6e0] sm:$0xff] }
  0xbd   : > { %1114 = vmatpush.bf16.msrb.mxu3 %v867_v31  ;;  %1076 = vmatmul.bf16.vlgmr.msrb.gmra.mxu0 %v2028_v18  ;;  %v658_v31 = vld [vmem:[%s1917_s11 + $0xa10] sm:$0xff] }
  0xbe   : > { %1120 = vmatpush.bf16.msra.mxu0 %v766_v32  ;;  %1089 = vmatmul.bf16.vlgmr.msrb.gmra.mxu1 %v2034_v25  ;;  %v736_v32 = vpack.c.bf16 %v370_v23, %v364_v22  ;;  %v401_v22 = vld [vmem:[%s1917_s11 + $0x208] sm:$0xff]  ;;  %v407_v23 = vld [vmem:[%s1917_s11 + $0x238] sm:$0xff] }
  0xbf   : > { %1133 = vmatpush.bf16.msra.mxu1 %v814_v33  ;;  %1102 = vmatmul.bf16.vlgmr.msrb.gmra.mxu2 %v2016_v8  ;;  %v784_v33 = vpack.c.bf16 %v466_v27, %v460_v24  ;;  %v497_v24 = vld [vmem:[%s1917_s11 + $0x508] sm:$0xff]  ;;  %v503_v27 = vld [vmem:[%s1917_s11 + $0x538] sm:$0xff] }
  0xc0   : > { %1146 = vmatpush.bf16.msra.mxu2 %v862_v34  ;;  %1115 = vmatmul.bf16.vlgmr.msrb.gmra.mxu3 %v2018_v9  ;;  %v832_v34 = vpack.c.bf16 %v562_v29, %v556_v28  ;;  %v593_v28 = vld [vmem:[%s1917_s11 + $0x808] sm:$0xff]  ;;  %v599_v29 = vld [vmem:[%s1917_s11 + $0x838] sm:$0xff] }
  0xc1   : > { %1159 = vmatpush.bf16.msra.mxu3 %v910_v38  ;;  %v880_v38 = vpack.c.bf16 %v658_v31, %v652_v30  ;;  %v689_v30 = vld [vmem:[%s1917_s11 + $0xb08] sm:$0xff]  ;;  %v695_v31 = vld [vmem:[%s1917_s11 + $0xb38] sm:$0xff] }
  0xc2   : > { %1121 = vmatpush.bf16.msra.mxu0 %v760_v44  ;;  %v730_v44 = vpack.c.bf16 %v358_v36, %v352_v35  ;;  %v389_v35 = vld [vmem:[%s1917_s11 + $0x1a8] sm:$0xff]  ;;  %v395_v36 = vld [vmem:[%s1917_s11 + $0x1d8] sm:$0xff] }
  0xc3   : > { %1134 = vmatpush.bf16.msra.mxu1 %v808_v45  ;;  %v340_v45 = vld [vmem:[%s1917_s11 + $0x20] sm:$0xff] }
  0xc4   : > { %1147 = vmatpush.bf16.msra.mxu2 %v856_v46  ;;  %v346_v46 = vld [vmem:[%s1917_s11 + $0x50] sm:$0xff] }
  0xc5   : > { %1160 = vmatpush.bf16.msra.mxu3 %v904_v50  ;;  %v442_v50 = vld [vmem:[%s1917_s11 + $0x350] sm:$0xff]  ;;  %v724_v59 = vpack.c.bf16 %v346_v46, %v340_v45  ;;  %v797_v45 = vpack.c.bf16 %v491_v39, %v485_v37  ;;  %v845_v46 = vpack.c.bf16 %v587_v41, %v581_v40  ;;  %v533_v37 = vld [vmem:[%s1917_s11 + $0x628] sm:$0xff]  ;;  %v635_v40 = vld [vmem:[%s1917_s11 + $0x958] sm:$0xff] }
  0xc6   : > { %1122 = vmatpush.bf16.msra.mxu0 %v754_v56  ;;  %v425_v56 = vld [vmem:[%s1917_s11 + $0x2c8] sm:$0xff]  ;;  %v772_v63 = vpack.c.bf16 %v442_v50, %v436_v49  ;;  %v893_v50 = vpack.c.bf16 %v683_v43, %v677_v42 }
  0xc7   : > { %1135 = vmatpush.bf16.msra.mxu1 %v802_v57  ;;  %v431_v57 = vld [vmem:[%s1917_s11 + $0x2f8] sm:$0xff]  ;;  %v473_v49 = vld [vmem:[%s1917_s11 + $0x448] sm:$0xff] }
  0xc8   : > { %1148 = vmatpush.bf16.msra.mxu2 %v850_v58  ;;  %v521_v58 = vld [vmem:[%s1917_s11 + $0x5c8] sm:$0xff] }
  0xc9   : > { %1161 = vmatpush.bf16.msra.mxu3 %v898_v62  ;;  %v623_v62 = vld [vmem:[%s1917_s11 + $0x8f8] sm:$0xff]  ;;  %v629_v39 = vld [vmem:[%s1917_s11 + $0x928] sm:$0xff] }
  0xca   : > { %1123 = vmatpush.bf16.msra.mxu0 %v748_v4  ;;  %v767_v4 = vpack.c.bf16 %v431_v57, %v425_v56  ;;  %v791_v57 = vpack.c.bf16 %v479_v51, %v473_v49 }
  0xcb   : > { %1136 = vmatpush.bf16.msra.mxu1 %v796_v5  ;;  %v815_v5 = vpack.c.bf16 %v527_v60, %v521_v58  ;;  %v371_v60 = vld [vmem:[%s1917_s11 + $0x118] sm:$0xff] }
  0xcc   : > { %1149 = vmatpush.bf16.msra.mxu2 %v844_v6  ;;  %v863_v6 = vpack.c.bf16 %v623_v62, %v617_v61  ;;  %v461_v61 = vld [vmem:[%s1917_s11 + $0x3e8] sm:$0xff]  ;;  %v887_v62 = vpack.c.bf16 %v671_v55, %v665_v54 }
  0xcd   : > { %1162 = vmatpush.bf16.msra.mxu3 %v892_v12  ;;  %v911_v12 = vpack.c.bf16 %v719_v2, %v713_v1  ;;  %v563_v1 = vld [vmem:[%s1917_s11 + $0x718] sm:$0xff]  ;;  %v653_v2 = vld [vmem:[%s1917_s11 + $0x9e8] sm:$0xff] }
  0xce   : > { %1124 = vmatpush.bf16.msra.mxu0 %v742_v19  ;;  %v761_v19 = vpack.c.bf16 %v419_v10, %v413_v7  ;;  %v2348_v7 = vld [vmem:[%s260_s19] sm:$0x3f] }
  0xcf   : > { %1137 = vmatpush.bf16.msra.mxu1 %v790_v20  ;;  %v809_v20 = vpack.c.bf16 %v515_v13, %v509_v11  ;;  %v359_v13 = vld [vmem:[%s1917_s11 + $0xb8] sm:$0xff] }
  0xd0   : > { %1150 = vmatpush.bf16.msra.mxu2 %v838_v21  ;;  %v857_v21 = vpack.c.bf16 %v611_v15, %v605_v14  ;;  %v449_v14 = vld [vmem:[%s1917_s11 + $0x388] sm:$0xff] }
  0xd1   : > { %1163 = vmatpush.bf16.msra.mxu3 %v886_v26  ;;  %v905_v26 = vpack.c.bf16 %v707_v17, %v701_v16  ;;  %v455_v17 = vld [vmem:[%s1917_s11 + $0x3b8] sm:$0xff] }
  0xd2   : > { %1125 = vmatpush.bf16.msra.mxu0 %v736_v32  ;;  %v755_v32 = vpack.c.bf16 %v407_v23, %v401_v22  ;;  %v641_v23 = vld [vmem:[%s1917_s11 + $0x988] sm:$0xff] }
  0xd3   : > { %1138 = vmatpush.bf16.msra.mxu1 %v784_v33  ;;  %v803_v33 = vpack.c.bf16 %v503_v27, %v497_v24  ;;  %v647_v24 = vld [vmem:[%s1917_s11 + $0x9b8] sm:$0xff]  ;;  %v1247_v27 = vperm.slane %v2348_v7, 0 }
  0xd4   : > { %1151 = vmatpush.bf16.msra.mxu2 %v832_v34  ;;  %v851_v34 = vpack.c.bf16 %v599_v29, %v593_v28  ;;  %v779_v29 = vpack.c.bf16 %v455_v17, %v449_v14  ;;  %v1250_v17 = vperm.slane %v2348_v7, 3 }
  0xd5   : > { %1164 = vmatpush.bf16.msra.mxu3 %v880_v38  ;;  %v899_v38 = vpack.c.bf16 %v695_v31, %v689_v30  ;;  %v341_v31 = vld [vmem:[%s1917_s11 + $0x28] sm:$0xff] }
  0xd6   : > { %1126 = vmatpush.bf16.msra.mxu0 %v730_v44  ;;  %v749_v44 = vpack.c.bf16 %v395_v36, %v389_v35  ;;  %v875_v35 = vpack.c.bf16 %v647_v24, %v641_v23  ;;  %v443_v36 = vld [vmem:[%s1917_s11 + $0x358] sm:$0xff] }
  0xd7   : > { %1139 = vmatpush.bf16.msra.mxu1 %v778_v47  ;;  %v377_v47 = vld [vmem:[%s1917_s11 + $0x148] sm:$0xff] }
  0xd8   : > { %1152 = vmatpush.bf16.msra.mxu2 %v826_v48  ;;  %v383_v48 = vld [vmem:[%s1917_s11 + $0x178] sm:$0xff] }
  0xd9   : > { %1165 = vmatpush.bf16.msra.mxu3 %v874_v52  ;;  %v569_v52 = vld [vmem:[%s1917_s11 + $0x748] sm:$0xff]  ;;  %v743_v56 = vpack.c.bf16 %v383_v48, %v377_v47  ;;  %v869_v47 = vpack.c.bf16 %v635_v40, %v629_v39 }
  0xda   : > { %1127 = vmatpush.bf16.msra.mxu0 %v724_v59  ;;  %v839_v58 = vpack.c.bf16 %v575_v53, %v569_v52  ;;  %v365_v59 = vld [vmem:[%s1917_s11 + $0xe8] sm:$0xff] }
  0xdb   : > { %1140 = vmatpush.bf16.msra.mxu1 %v772_v63  ;;  %v467_v63 = vld [vmem:[%s1917_s11 + $0x418] sm:$0xff] }
  0xdc   : > { %1153 = vmatpush.bf16.msra.mxu2 %v820_v0  ;;  %v557_v0 = vld [vmem:[%s1917_s11 + $0x6e8] sm:$0xff]  ;;  %v785_v10 = vpack.c.bf16 %v467_v63, %v461_v61 }
  0xdd   : > { %1166 = vmatpush.bf16.msra.mxu3 %v868_v3  ;;  %1128 = vmatmul.bf16.vlgmr.msra.gmra.mxu0 %v2028_v18  ;;  %v659_v3 = vld [vmem:[%s1917_s11 + $0xa18] sm:$0xff]  ;;  %v833_v11 = vpack.c.bf16 %v563_v1, %v557_v0  ;;  %v1249_v1 = vperm.slane %v2348_v7, 2 }
  0xde   : > { %1172 = vmatpush.bf16.msrb.mxu0 %v767_v4  ;;  %1141 = vmatmul.bf16.vlgmr.msra.gmra.mxu1 %v2034_v25  ;;  %v921_v4 = vpop.f32.mrf.mxu0  ;;  %v881_v16 = vpack.c.bf16 %v659_v3, %v653_v2 }
  0xdf   : > { %1185 = vmatpush.bf16.msrb.mxu1 %v815_v5  ;;  %1154 = vmatmul.bf16.vlgmr.msra.gmra.mxu2 %v2016_v8  ;;  %v737_v5 = vpack.c.bf16 %v371_v60, %v365_v59 }
  0xe0   : > { %1198 = vmatpush.bf16.msrb.mxu2 %v863_v6  ;;  %1167 = vmatmul.bf16.vlgmr.msra.gmra.mxu3 %v2018_v9 }
  0xe1   : > { %1211 = vmatpush.bf16.msrb.mxu3 %v911_v12  ;;  %v934_v6 = vpop.f32.mrf.mxu1  ;;  %v353_v12 = vld [vmem:[%s1917_s11 + $0x88] sm:$0xff] }
  0xe2   : > { %1173 = vmatpush.bf16.msrb.mxu0 %v761_v19  ;;  %v935_v15 = vadd.f32 %v934_v6, %v921_v4  ;;  %v545_v19 = vld [vmem:[%s1917_s11 + $0x688] sm:$0xff]  ;;  %v731_v28 = vpack.c.bf16 %v359_v13, %v353_v12 }
  0xe3   : > { %1186 = vmatpush.bf16.msrb.mxu1 %v809_v20  ;;  %v551_v20 = vld [vmem:[%s1917_s11 + $0x6b8] sm:$0xff]  ;;  %v960_v22 = vpop.f32.mrf.mxu3 }
  0xe4   : > { %1199 = vmatpush.bf16.msrb.mxu2 %v857_v21  ;;  %v947_v21 = vpop.f32.mrf.mxu2  ;;  %v827_v30 = vpack.c.bf16 %v551_v20, %v545_v19 }
  0xe5   : > { %1212 = vmatpush.bf16.msrb.mxu3 %v905_v26  ;;  %v948_v26 = vadd.f32 %v947_v21, %v935_v15 }
  0xe6   : > { %1174 = vmatpush.bf16.msrb.mxu0 %v755_v32  ;;  %v347_v32 = vld [vmem:[%s1917_s11 + $0x58] sm:$0xff]  ;;  %v923_v42 = vpop.f32.mrf.mxu0 }
  0xe7   : > { %1187 = vmatpush.bf16.msrb.mxu1 %v803_v33  ;;  %v437_v33 = vld [vmem:[%s1917_s11 + $0x328] sm:$0xff]  ;;  %v725_v43 = vpack.c.bf16 %v347_v32, %v341_v31  ;;  %v1251_v32 = vperm.slane %v2348_v7, 4 }
  0xe8   : > { %1200 = vmatpush.bf16.msrb.mxu2 %v851_v34  ;;  %v961_v34 = vadd.f32 %v960_v22, %v948_v26 }
  0xe9   : > { %1213 = vmatpush.bf16.msrb.mxu3 %v899_v38  ;;  %v539_v38 = vld [vmem:[%s1917_s11 + $0x658] sm:$0xff] }
  0xea   : > { %1175 = vmatpush.bf16.msrb.mxu0 %v749_v44  ;;  %v1259_v41 = vadd.f32 %v1247_v27, %v961_v34  ;;  %v936_v44 = vpop.f32.mrf.mxu1 }
  0xeb   : > { %1188 = vmatpush.bf16.msrb.mxu1 %v797_v45  ;;  %v773_v45 = vpack.c.bf16 %v443_v36, %v437_v33  ;;  %v962_v49 = vpop.f32.mrf.mxu3 }
  0xec   : > { %1201 = vmatpush.bf16.msrb.mxu2 %v845_v46  ;;  %v821_v46 = vpack.c.bf16 %v539_v38, %v533_v37  ;;  %1265 = vst [vmem:[%s2369_s1] sm:$0xff] %v1259_v41  ;;  %v949_v48 = vpop.f32.mrf.mxu2 }
  0xed   : > { %1214 = vmatpush.bf16.msrb.mxu3 %v893_v50 }
  0xee   : > { %1176 = vmatpush.bf16.msrb.mxu0 %v743_v56  ;;  %v1248_v56 = vperm.slane %v2348_v7, 1 }
  0xef   : > { %1189 = vmatpush.bf16.msrb.mxu1 %v791_v57 }
  0xf0   : > { %1202 = vmatpush.bf16.msrb.mxu2 %v839_v58 }
  0xf1   : > { %1215 = vmatpush.bf16.msrb.mxu3 %v887_v62 }
  0xf2   : > { %1177 = vmatpush.bf16.msrb.mxu0 %v737_v5 }
  0xf3   : > { %1190 = vmatpush.bf16.msrb.mxu1 %v785_v10 }
  0xf4   : > { %1203 = vmatpush.bf16.msrb.mxu2 %v833_v11 }
  0xf5   : > { %1216 = vmatpush.bf16.msrb.mxu3 %v881_v16 }
  0xf6   : > { %1178 = vmatpush.bf16.msrb.mxu0 %v731_v28 }
  0xf7   : > { %1191 = vmatpush.bf16.msrb.mxu1 %v779_v29 }
  0xf8   : > { %1204 = vmatpush.bf16.msrb.mxu2 %v827_v30 }
  0xf9   : > { %1217 = vmatpush.bf16.msrb.mxu3 %v875_v35 }
  0xfa   : > { %1179 = vmatpush.bf16.msrb.mxu0 %v725_v43  ;;  %v973_v50 = vpop.f32.mrf.mxu0 }
  0xfb   : > { %1192 = vmatpush.bf16.msrb.mxu1 %v773_v45  ;;  %v986_v51 = vpop.f32.mrf.mxu1  ;;  %v1252_v45 = vperm.slane %v2348_v7, 5 }
  0xfc   : > { %1205 = vmatpush.bf16.msrb.mxu2 %v821_v46  ;;  %v987_v52 = vadd.f32 %v986_v51, %v973_v50 }
  0xfd   : > { %1218 = vmatpush.bf16.msrb.mxu3 %v869_v47  ;;  %1180 = vmatmul.bf16.vlgmr.msrb.gmra.mxu0 %v2028_v18 }
  0xfe   : > { %1193 = vmatmul.bf16.vlgmr.msrb.gmra.mxu1 %v2034_v25 }
  0xff   : > { %1206 = vmatmul.bf16.vlgmr.msrb.gmra.mxu2 %v2016_v8 }
 0x100   : > { %1219 = vmatmul.bf16.vlgmr.msrb.gmra.mxu3 %v2018_v9 }
 0x102   : > { %v999_v53 = vpop.f32.mrf.mxu2  ;;  %v975_v58 = vpop.f32.mrf.mxu0 }
 0x103   : > { %v1000_v54 = vadd.f32 %v999_v53, %v987_v52  ;;  %v1012_v55 = vpop.f32.mrf.mxu3  ;;  %v988_v59 = vpop.f32.mrf.mxu1 }
 0x105   : > { %v1013_v57 = vadd.f32 %v1012_v55, %v1000_v54 }
 0x107   : > { %v1260_v60 = vadd.f32 %v1248_v56, %v1013_v57 }
 0x109   : > { %1266 = vst [vmem:[%s2369_s1 + $0x8] sm:$0xff] %v1260_v60 }
 0x10a   : > { %v1001_v18 = vpop.f32.mrf.mxu2 }
 0x10b   : > { %v1014_v25 = vpop.f32.mrf.mxu3 }
 0x11a   : > { %v1025_v61 = vpop.f32.mrf.mxu0 }
 0x11b   : > { %v1038_v8 = vpop.f32.mrf.mxu1 }
 0x11c   : > { %v1039_v62 = vadd.f32 %v1038_v8, %v1025_v61 }
 0x122   : > { %v1051_v9 = vpop.f32.mrf.mxu2  ;;  %v1027_v3 = vpop.f32.mrf.mxu0 }
 0x123   : > { %v1052_v63 = vadd.f32 %v1051_v9, %v1039_v62  ;;  %v1064_v0 = vpop.f32.mrf.mxu3  ;;  %v1040_v4 = vpop.f32.mrf.mxu1 }
 0x125   : > { %v1065_v2 = vadd.f32 %v1064_v0, %v1052_v63 }
 0x127   : > { %v1261_v5 = vadd.f32 %v1249_v1, %v1065_v2 }
 0x129   : > { %1267 = vst [vmem:[%s2369_s1 + $0x10] sm:$0xff] %v1261_v5 }
 0x12a   : > { %v1053_v6 = vpop.f32.mrf.mxu2 }
 0x12b   : > { %v1066_v10 = vpop.f32.mrf.mxu3 }
 0x13a   : > { %v1077_v11 = vpop.f32.mrf.mxu0 }
 0x13b   : > { %v1090_v12 = vpop.f32.mrf.mxu1 }
 0x13c   : > { %v1091_v13 = vadd.f32 %v1090_v12, %v1077_v11 }
 0x142   : > { %v1103_v14 = vpop.f32.mrf.mxu2  ;;  %v1079_v20 = vpop.f32.mrf.mxu0 }
 0x143   : > { %v1104_v15 = vadd.f32 %v1103_v14, %v1091_v13  ;;  %v1116_v16 = vpop.f32.mrf.mxu3  ;;  %v1092_v21 = vpop.f32.mrf.mxu1 }
 0x145   : > { %v1117_v19 = vadd.f32 %v1116_v16, %v1104_v15 }
 0x147   : > { %v1262_v22 = vadd.f32 %v1250_v17, %v1117_v19 }
 0x149   : > { %1268 = vst [vmem:[%s2369_s1 + $0x18] sm:$0xff] %v1262_v22 }
 0x14a   : > { %v1105_v23 = vpop.f32.mrf.mxu2 }
 0x14b   : > { %v1118_v24 = vpop.f32.mrf.mxu3 }
 0x15a   : > { %v1129_v26 = vpop.f32.mrf.mxu0 }
 0x15b   : > { %v1142_v27 = vpop.f32.mrf.mxu1 }
 0x15c   : > { %v1143_v28 = vadd.f32 %v1142_v27, %v1129_v26 }
 0x162   : > { %v1155_v29 = vpop.f32.mrf.mxu2  ;;  %v1131_v34 = vpop.f32.mrf.mxu0 }
 0x163   : > { %v1156_v30 = vadd.f32 %v1155_v29, %v1143_v28  ;;  %v1168_v31 = vpop.f32.mrf.mxu3  ;;  %v1144_v35 = vpop.f32.mrf.mxu1 }
 0x165   : > { %v1169_v33 = vadd.f32 %v1168_v31, %v1156_v30 }
 0x167   : > { %v1263_v36 = vadd.f32 %v1251_v32, %v1169_v33 }
 0x169   : > { %1269 = vst [vmem:[%s2369_s1 + $0x20] sm:$0xff] %v1263_v36 }
 0x16a   : > { %v1157_v37 = vpop.f32.mrf.mxu2 }
 0x16b   : > { %v1170_v38 = vpop.f32.mrf.mxu3 }
 0x17a   : > { %v1181_v39 = vpop.f32.mrf.mxu0 }
 0x17b   : > { %v1194_v40 = vpop.f32.mrf.mxu1 }
 0x17c   : > { %v1195_v41 = vadd.f32 %v1194_v40, %v1181_v39 }
 0x182   : > { %v1207_v42 = vpop.f32.mrf.mxu2  ;;  %v1183_v46 = vpop.f32.mrf.mxu0 }
 0x183   : > { %v1208_v43 = vadd.f32 %v1207_v42, %v1195_v41  ;;  %v1220_v44 = vpop.f32.mrf.mxu3  ;;  %v1196_v47 = vpop.f32.mrf.mxu1 }
 0x185   : > { %v1221_v48 = vadd.f32 %v1220_v44, %v1208_v43 }
 0x187   : > { %v1264_v49 = vadd.f32 %v1252_v45, %v1221_v48 }
 0x189   : > { %1270 = vst [vmem:[%s2369_s1 + $0x28] sm:$0xff] %v1264_v49 }
 0x18a   : > { %v1209_v50 = vpop.f32.mrf.mxu2 }
 0x18b   : > { %v1222_v51 = vpop.f32.mrf.mxu3 }
 0x18c PF: > { %s19_s22 = sadd.s32 1, %s1730_s22   ;;  %s2447_s25 = sld [smem:[#allocation14_spill]] }
 0x18d   : > { %p16_p7 = scmp.ge.s32.totalorder %s19_s22, 6   ;;  %s2448_s27 = sld [smem:[#allocation10_spill]] }
 0x18e   : > { %s2449_s17 = sld [smem:[#allocation15_spill]]  ;;  %s2453_s12 = smov %s1694_s13 }
 0x18f   : > { %s2450_s19 = sld [smem:[#allocation11_spill]]  ;;  %s2454_s13 = smov %s1698_s14 }
 0x190   : > { %s2451_s24 = sld [smem:[#allocation12_spill]]  ;;  %s2456_s15 = smov %s1706_s16 }
 0x191   : > { %s2452_s21 = sld [smem:[#allocation13_spill]]  ;;  %s2458_s18 = smov %s1722_s20 }
 0x192   : > { %s2455_s14 = smov %s2447_s25  ;;  %18 = sbr.rel (!%p16_p7) target bundleno = 11 (0xb), region = 104 }
 0x193   : > { %s2457_s16 = smov %s2448_s27 }
 0x196   : > { %s2459_s20 = smov %s2451_s24 }
 0x197   :  { %1301 = vsyncpa [#allocation4], 1 }
 0x198   :  { %1303 = vsyncpa [#allocation4 + $0x1], 1 }
 0x199   :  { %1304 = vsyncpa [#allocation6], 1 }
 0x19a   :  { %1306 = vsyncpa [#allocation6 + $0x1], 1 }

// kernel: encoder_forward.5
= control target key start
LH: loop header
LB: loop body
LE: loop exit
PB: predicated region body
PF: predicated region fallthrough
CT: control target
= control target key end

     0   :  { %s756_s6 = smov 0   ;;  %s882_s0 = inlined_call_operand.vmem [shape: f32[2,8,1536], index: 0, kind: input, shape index: {}]   ;;  %s883_s1 = inlined_call_operand.vmem [shape: f32[2,8,512], index: 1, kind: output, shape index: {}]  }
   0x1 LB: > { %s668_s7 = sadd.s32 4294967295, %s743_s6   ;;  %p672_p0 = scmp.ge.s32.totalorder %s743_s6, 1  ;;  %s743_s6 = sphi %s756_s6, %s11_s6  }
   0x2   : > { %p87_p1 = scmp.lt.s32.totalorder %s743_s6, 3 }
   0x4   : > { %p88_p2 = pnand %p672_p0, %p87_p1 }
   0x5   : > { %p107_p3 = scmp.lt.s32.totalorder (!%p88_p2), %s668_s7, 1  ;;  %s745_s12 = smov (!%p88_p2), 64  }
   0x6   : > { %91 = sbr.rel (%p88_p2) target bundleno = 1065 (0x429), region = 24 }
   0xb   : > { %s885_s7 = smov (!%p107_p3, %s668_s7), 1  ;;  %vm133_vm0 = vcmask 523264   ;;  %vm154_vm1 = vcmask 64512   ;;  %vm170_vm2 = vcmask 1043456  }
   0xc   : > { %s695_s8 = smul.u32 96, %s885_s7  ;;  %s694_s13 = sshll.u32 %s885_s7, 5 }
   0xd   : > { %s116_s16 = scalar_lea.vmem %s883_s1, %s694_s13 }
   0xe   : > { %s770_s11 = scalar_lea.vmem %s882_s0, %s695_s8 }
   0xf   : > { %v122_v0 = vld [vmem:[%s770_s11 + $0x20] sm:$0xff]  ;;  %v119_v1 = vld [vmem:[%s770_s11 + $0x8] sm:$0xff]  ;;  %v120_v17 = vld [vmem:[%s770_s11 + $0x10] sm:$0xff] }
  0x10   : > { %v131_v2 = vpack.c.bf16 %v122_v0, %v122_v0  ;;  %v774_v3 = vpack.c.bf16 %v119_v1, %v119_v1  ;;  %v118_v5 = vld [vmem:[%s770_s11] sm:$0xff]  ;;  %v123_v15 = vld [vmem:[%s770_s11 + $0x28] sm:$0xff]  ;;  %v361_v18 = vpack.c.bf16 %v120_v17, %v120_v17  ;;  %v125_v19 = vld [vmem:[%s770_s11 + $0x38] sm:$0xff] }
  0x11   : > { %v130_v6 = vpack.c.bf16 %v118_v5, %v118_v5  ;;  %v248_v16 = vpack.c.bf16 %v123_v15, %v123_v15  ;;  %v121_v20 = vld [vmem:[%s770_s11 + $0x18] sm:$0xff]  ;;  %v476_v21 = vpack.c.bf16 %v125_v19, %v125_v19  ;;  %v124_v32 = vld [vmem:[%s770_s11 + $0x30] sm:$0xff]  ;;  %v126_v36 = vld [vmem:[%s770_s11 + $0x40] sm:$0xff] }
  0x12   : > { %v138_v4 = vsel %vm133_vm0, %v131_v2, 0  ;;  %302 = vrot.lane.b32.xlu1 %v774_v3, %s745_s12  ;;  %v475_v22 = vpack.c.bf16 %v121_v20, %v121_v20  ;;  %v362_v33 = vpack.c.bf16 %v124_v32, %v124_v32  ;;  %v801_v37 = vpack.c.bf16 %v126_v36, %v126_v36  ;;  %v127_v17 = vld [vmem:[%s770_s11 + $0x48] sm:$0xff] }
  0x13   : > { %147 = vmatpush.bf16.xpose.msra.mxu0 %v138_v4  ;;  %v254_v39 = vsel %vm133_vm0, %v248_v16, 0  ;;  %v482_v52 = vsel %vm133_vm0, %v476_v21, 0 }
  0x14   : > { %v172_v38 = vsel %vm170_vm2, %v801_v37, 0  ;;  %v368_v48 = vsel %vm133_vm0, %v362_v33, 0 }
  0x15   : > { %181 = vmatpush.bf16.msra.mxu1 %v172_v38 }
  0x19   : > { %263 = vmatpush.bf16.xpose.msrb.mxu1 %v254_v39 }
  0x1a   : > { %676 = vmatmul.msk.bf16.vlgmr.msra.gmra.mxu0 %vm133_vm0, %v130_v6  ;;  %191 = vrot.lane.b32.xlu1 %v131_v2, %s745_s12 }
  0x22   : > { %188 = vrot.lane.b32.xlu1 %v130_v6, %s745_s12 }
  0x2a   : > { %416 = vrot.lane.b32.xlu1 %v361_v18, %s745_s12 }
  0x32   : > { %530 = vrot.lane.b32.xlu1 %v475_v22, %s745_s12 }
  0x84   : > { %v303_v7 = vpop.permute.xlu1 %302 }
  0x8c   : > { %v192_v9 = vpop.permute.xlu1 %191 }
  0x8d   : > { %v197_v11 = vsel %vm133_vm0, %v192_v9, 0 }
  0x8e   : > { %206 = vmatpush.bf16.xpose.msra.mxu2 %v197_v11 }
  0x94   : > { %v189_v14 = vpop.permute.xlu1 %188 }
  0x95   : > { %678 = vmatmul.msk.bf16.vlgmr.msra.gmra.mxu2 %vm133_vm0, %v189_v14 }
  0x97   : > { %v149_v8 = vpop.f32.mrf.mxu0 }
  0x98   : > { %v153_v10 = vmul.f32 0.125, %v149_v8 }
  0x9a   : > { %v155_v12 = vsel %vm154_vm1, %v153_v10, -inf }
  0x9b   : > { %156 = vmax.xlane.f32.xlu0 %v155_v12 }
  0x9c   : > { %v417_v49 = vpop.permute.xlu1 %416 }
  0x9f   : > { %v151_v13 = vpop.f32.mrf.mxu0 }
  0xa4   : > { %v531_v54 = vpop.permute.xlu1 %530 }
  0xaf   : > { %305 = vrot.lane.b32.xlu0 %v248_v16, %s745_s12 }
  0xb7   : > { %533 = vrot.lane.b32.xlu0 %v476_v21, %s745_s12 }
 0x10e   : > { %v157_v23 = vpop.xlane.xlu0 %156 }
 0x10f   : > { %v158_v24 = vsub.f32 %v153_v10, %v157_v23 }
 0x111   : > { %v159_v25 = vmul.f32 1.442695, %v158_v24 }
 0x113   : > { %705 = vpow2.f32 %v159_v25 }
 0x118   : > { %v208_v30 = vpop.f32.mrf.mxu2 }
 0x119   : > { %v706_v26 = vpop.eup %705  ;;  %v212_v34 = vmul.f32 0.125, %v208_v30 }
 0x11a   : > { %v161_v27 = vsel %vm154_vm1, %v706_v26, 0.0 }
 0x11b   : > { %162 = vadd.xlane.f32.xlu2 %v161_v27  ;;  %v213_v35 = vsel %vm154_vm1, %v212_v34, -inf }
 0x11c   : > { %214 = vmax.xlane.f32.xlu1 %v213_v35 }
 0x120   : > { %v210_v31 = vpop.f32.mrf.mxu2 }
 0x121   : > { %v306_v28 = vpop.permute.xlu0 %305 }
 0x122   : > { %v311_v29 = vsel %vm133_vm0, %v306_v28, 0 }
 0x123   : > { %320 = vmatpush.bf16.xpose.msrb.mxu0 %v311_v29  ;;  %v129_v29 = vld [vmem:[%s770_s11 + $0x58] sm:$0xff] }
 0x124   : > { %v838_v30 = vpack.c.bf16 %v129_v29, %v129_v29 }
 0x129   : > { %v534_v41 = vpop.permute.xlu0 %533 }
 0x12a   : > { %682 = vmatmul.msk.bf16.vlgmr.msrb.gmra.mxu0 %vm133_vm0, %v303_v7  ;;  %v539_v45 = vsel %vm133_vm0, %v534_v41, 0 }
 0x133   : > { %419 = vrot.lane.b32.xlu2 %v362_v33, %s745_s12 }
 0x18e   : > { %v163_v40 = vpop.xlane.xlu2 %162 }
 0x18f   : > { %707 = vrcp.f32 %v163_v40  ;;  %v215_v0 = vpop.xlane.xlu1 %214 }
 0x190   : > { %v216_v2 = vsub.f32 %v212_v34, %v215_v0 }
 0x192   : > { %v217_v6 = vmul.f32 1.442695, %v216_v2 }
 0x195   : > { %v708_v42 = vpop.eup %707 }
 0x196   : > { %v420_v43 = vpop.permute.xlu2 %419  ;;  %v165_v44 = vmul.f32 %v708_v42, %v706_v26 }
 0x197   : > { %v425_v46 = vsel %vm133_vm0, %v420_v43, 0 }
 0x198   : > { %434 = vmatpush.bf16.xpose.msra.mxu0 %v425_v46  ;;  %v166_v47 = vpack.c.bf16 %v165_v44, %v165_v44  ;;  %v128_v46 = vld [vmem:[%s770_s11 + $0x50] sm:$0xff] }
 0x19a   : > { %677 = vmatmul.msk.bf16.vlgmr.msra.gmra.mxu1 %vm154_vm1, %v166_v47 }
 0x19b   : > { %377 = vmatpush.bf16.xpose.msra.mxu1 %v368_v48 }
 0x19f   : > { %686 = vmatmul.msk.bf16.vlgmr.msra.gmra.mxu0 %vm133_vm0, %v417_v49 }
 0x1a0   : > { %548 = vmatpush.bf16.xpose.msrb.mxu0 %v539_v45 }
 0x1a7   : > { %v322_v50 = vpop.f32.mrf.mxu0 }
 0x1a8   : > { %v326_v51 = vmul.f32 0.125, %v322_v50 }
 0x1aa   : > { %680 = vmatmul.msk.bf16.vlgmr.msrb.gmra.mxu1 %vm133_vm0, %v774_v3  ;;  %v327_v53 = vsel %vm154_vm1, %v326_v51, -inf }
 0x1ab   : > { %328 = vmax.xlane.f32.xlu2 %v327_v53  ;;  %491 = vmatpush.bf16.xpose.msrb.mxu1 %v482_v52  ;;  %v363_v52 = vpack.c.bf16 %v128_v46, %v128_v46 }
 0x1af   : > { %690 = vmatmul.msk.bf16.vlgmr.msrb.gmra.mxu0 %vm133_vm0, %v531_v54  ;;  %v324_v55 = vpop.f32.mrf.mxu0 }
 0x1ba   : > { %684 = vmatmul.msk.bf16.vlgmr.msra.gmra.mxu1 %vm133_vm0, %v361_v18  ;;  %v829_v18 = vpack.c.bf16 %v127_v17, %v127_v17 }
 0x1ca   : > { %688 = vmatmul.msk.bf16.vlgmr.msrb.gmra.mxu1 %vm133_vm0, %v475_v22 }
 0x217   : > { %v818_v56 = vpop.f32.mrf.mxu1 }
 0x21c   : > { %v436_v57 = vpop.f32.mrf.mxu0 }
 0x21d   : > { %v440_v58 = vmul.f32 0.125, %v436_v57 }
 0x21e   : > { %v329_v59 = vpop.xlane.xlu2 %328 }
 0x21f   : > { %v330_v60 = vsub.f32 %v326_v51, %v329_v59  ;;  %v185_v61 = vpop.f32.mrf.mxu1  ;;  %v441_v62 = vsel %vm154_vm1, %v440_v58, -inf }
 0x220   : > { %442 = vmax.xlane.f32.xlu0 %v441_v62 }
 0x221   : > { %v331_v63 = vmul.f32 1.442695, %v330_v60 }
 0x223   : > { %709 = vpow2.f32 %v331_v63 }
 0x224   : > { %v438_v1 = vpop.f32.mrf.mxu0  ;;  %711 = vpow2.f32 %v217_v6 }
 0x227   : > { %v265_v3 = vpop.f32.mrf.mxu1 }
 0x228   : > { %v821_v4 = vmul.f32 0.125, %v265_v3 }
 0x229   : > { %v710_v5 = vpop.eup %709 }
 0x22a   : > { %v333_v7 = vsel %vm154_vm1, %v710_v5, 0.0  ;;  %v270_v8 = vsel %vm154_vm1, %v821_v4, -inf  ;;  %v712_v13 = vpop.eup %711 }
 0x22b   : > { %334 = vadd.xlane.f32.xlu1 %v333_v7  ;;  %271 = vmax.xlane.f32.xlu0 %v270_v8  ;;  %v219_v15 = vsel %vm154_vm1, %v712_v13, 0.0 }
 0x22c   : > { %v550_v9 = vpop.f32.mrf.mxu0 }
 0x22d   : > { %v554_v10 = vmul.f32 0.125, %v550_v9 }
 0x22f   : > { %v555_v11 = vsel %vm154_vm1, %v554_v10, -inf  ;;  %v267_v12 = vpop.f32.mrf.mxu1 }
 0x230   : > { %556 = vmax.xlane.f32.xlu2 %v555_v11 }
 0x234   : > { %v552_v14 = vpop.f32.mrf.mxu0 }
 0x237   : > { %v379_v16 = vpop.f32.mrf.mxu1 }
 0x238   : > { %220 = vadd.xlane.f32.xlu2 %v219_v15  ;;  %v383_v22 = vmul.f32 0.125, %v379_v16 }
 0x23a   : > { %v384_v23 = vsel %vm154_vm1, %v383_v22, -inf }
 0x23f   : > { %340 = vrot.lane.b32.xlu0 %v829_v18, %s745_s12  ;;  %v381_v19 = vpop.f32.mrf.mxu1 }
 0x240   : > { %v286_v19 = vsel %vm170_vm2, %v829_v18, 0 }
 0x247   : > { %v493_v20 = vpop.f32.mrf.mxu1 }
 0x248   : > { %v497_v24 = vmul.f32 0.125, %v493_v20 }
 0x24a   : > { %v498_v25 = vsel %vm154_vm1, %v497_v24, -inf }
 0x24f   : > { %v495_v21 = vpop.f32.mrf.mxu1 }
 0x250   : > { %226 = vrot.lane.b32.xlu2 %v801_v37, %s745_s12 }
 0x279   : > { %385 = vmax.xlane.f32.xlu2 %v384_v23 }
 0x281   : > { %499 = vmax.xlane.f32.xlu2 %v498_v25 }
 0x293   : > { %v443_v26 = vpop.xlane.xlu0 %442 }
 0x294   : > { %v444_v27 = vsub.f32 %v440_v58, %v443_v26 }
 0x296   : > { %v445_v28 = vmul.f32 1.442695, %v444_v27  ;;  %v514_v27 = vsel %vm170_vm2, %v838_v30, 0 }
 0x298   : > { %713 = vpow2.f32 %v445_v28 }
 0x299   : > { %568 = vrot.lane.b32.xlu2 %v838_v30, %s745_s12 }
 0x29e   : > { %v714_v31 = vpop.eup %713  ;;  %v335_v34 = vpop.xlane.xlu1 %334 }
 0x29f   : > { %v447_v32 = vsel %vm154_vm1, %v714_v31, 0.0  ;;  %715 = vrcp.f32 %v335_v34  ;;  %v272_v37 = vpop.xlane.xlu0 %271 }
 0x2a0   : > { %448 = vadd.xlane.f32.xlu1 %v447_v32  ;;  %v273_v53 = vsub.f32 %v821_v4, %v272_v37 }
 0x2a2   : > { %v274_v54 = vmul.f32 1.442695, %v273_v53 }
 0x2a3   : > { %v557_v33 = vpop.xlane.xlu2 %556 }
 0x2a4   : > { %v558_v35 = vsub.f32 %v554_v10, %v557_v33 }
 0x2a5   : > { %v716_v39 = vpop.eup %715 }
 0x2a6   : > { %v559_v36 = vmul.f32 1.442695, %v558_v35  ;;  %v337_v42 = vmul.f32 %v716_v39, %v710_v5 }
 0x2a8   : > { %717 = vpow2.f32 %v559_v36  ;;  %v338_v50 = vpack.c.bf16 %v337_v42, %v337_v42 }
 0x2ab   : > { %v221_v38 = vpop.xlane.xlu2 %220 }
 0x2ac   : > { %719 = vrcp.f32 %v221_v38 }
 0x2ad   : > { %721 = vpow2.f32 %v274_v54 }
 0x2ae   : > { %v718_v40 = vpop.eup %717 }
 0x2af   : > { %v561_v41 = vsel %vm154_vm1, %v718_v40, 0.0 }
 0x2b0   : > { %562 = vadd.xlane.f32.xlu0 %v561_v41 }
 0x2b1   : > { %v341_v43 = vpop.permute.xlu0 %340 }
 0x2b2   : > { %v720_v44 = vpop.eup %719  ;;  %v346_v45 = vsel %vm170_vm2, %v341_v43, 0 }
 0x2b3   : > { %355 = vmatpush.bf16.msrb.mxu2 %v346_v45  ;;  %v227_v47 = vpop.permute.xlu2 %226  ;;  %v223_v48 = vmul.f32 %v720_v44, %v712_v13  ;;  %v722_v55 = vpop.eup %721 }
 0x2b4   : > { %v232_v49 = vsel %vm170_vm2, %v227_v47, 0  ;;  %v276_v57 = vsel %vm154_vm1, %v722_v55, 0.0 }
 0x2b5   : > { %241 = vmatpush.bf16.msra.mxu3 %v232_v49  ;;  %v224_v51 = vpack.c.bf16 %v223_v48, %v223_v48 }
 0x2b6   : > { %683 = vmatmul.msk.bf16.vlgmr.msrb.gmra.mxu2 %vm154_vm1, %v338_v50 }
 0x2b8   : > { %679 = vmatmul.msk.bf16.vlgmr.msra.gmra.mxu3 %vm154_vm1, %v224_v51 }
 0x2b9   : > { %454 = vrot.lane.b32.xlu1 %v363_v52, %s745_s12  ;;  %295 = vmatpush.bf16.msrb.mxu3 %v286_v19 }
 0x2e3   : > { %277 = vadd.xlane.f32.xlu1 %v276_v57 }
 0x2ec   : > { %v386_v58 = vpop.xlane.xlu2 %385 }
 0x2ed   : > { %v387_v59 = vsub.f32 %v383_v22, %v386_v58  ;;  %v400_v22 = vsel %vm170_vm2, %v363_v52, 0 }
 0x2ee   : > { %409 = vmatpush.bf16.msra.mxu3 %v400_v22 }
 0x2ef   : > { %v388_v60 = vmul.f32 1.442695, %v387_v59 }
 0x2f1   : > { %723 = vpow2.f32 %v388_v60 }
 0x2f4   : > { %v500_v61 = vpop.xlane.xlu2 %499 }
 0x2f5   : > { %v501_v62 = vsub.f32 %v497_v24, %v500_v61 }
 0x2f7   : > { %v724_v63 = vpop.eup %723  ;;  %v502_v0 = vmul.f32 1.442695, %v501_v62 }
 0x2f8   : > { %v390_v1 = vsel %vm154_vm1, %v724_v63, 0.0 }
 0x2f9   : > { %725 = vpow2.f32 %v502_v0  ;;  %391 = vadd.xlane.f32.xlu2 %v390_v1 }
 0x2fc   : > { %v569_v6 = vpop.permute.xlu2 %568 }
 0x2fd   : > { %v574_v9 = vsel %vm170_vm2, %v569_v6, 0 }
 0x2ff   : > { %v726_v2 = vpop.eup %725 }
 0x300   : > { %v504_v3 = vsel %vm154_vm1, %v726_v2, 0.0 }
 0x301   : > { %505 = vadd.xlane.f32.xlu0 %v504_v3 }
 0x313   : > { %v449_v4 = vpop.xlane.xlu1 %448 }
 0x314   : > { %727 = vrcp.f32 %v449_v4 }
 0x31a   : > { %v728_v5 = vpop.eup %727 }
 0x31b   : > { %v451_v7 = vmul.f32 %v728_v5, %v714_v31 }
 0x31d   : > { %v452_v11 = vpack.c.bf16 %v451_v7, %v451_v7 }
 0x323   : > { %v563_v12 = vpop.xlane.xlu0 %562 }
 0x324   : > { %729 = vrcp.f32 %v563_v12 }
 0x32a   : > { %v730_v13 = vpop.eup %729 }
 0x32b   : > { %v455_v8 = vpop.permute.xlu1 %454  ;;  %v565_v15 = vmul.f32 %v730_v13, %v718_v40 }
 0x32c   : > { %v460_v10 = vsel %vm170_vm2, %v455_v8, 0 }
 0x32d   : > { %469 = vmatpush.bf16.msra.mxu2 %v460_v10  ;;  %v566_v17 = vpack.c.bf16 %v565_v15, %v565_v15 }
 0x330   : > { %687 = vmatmul.msk.bf16.vlgmr.msra.gmra.mxu2 %vm154_vm1, %v452_v11 }
 0x331   : > { %583 = vmatpush.bf16.msrb.mxu2 %v574_v9 }
 0x339   : > { %v357_v14 = vpop.f32.mrf.mxu2 }
 0x33a   : > { %594 = vrot.lane.b32.xlu1 %v357_v14, %s745_s12 }
 0x33b   : > { %v243_v16 = vpop.f32.mrf.mxu3 }
 0x33c   : > { %590 = vrot.lane.b32.xlu0 %v243_v16, %s745_s12 }
 0x340   : > { %691 = vmatmul.msk.bf16.vlgmr.msrb.gmra.mxu2 %vm154_vm1, %v566_v17 }
 0x341   : > { %v359_v20 = vpop.f32.mrf.mxu2 }
 0x343   : > { %v245_v21 = vpop.f32.mrf.mxu3 }
 0x356   : > { %v278_v23 = vpop.xlane.xlu1 %277 }
 0x357   : > { %731 = vrcp.f32 %v278_v23 }
 0x35d   : > { %v732_v24 = vpop.eup %731 }
 0x35e   : > { %v280_v25 = vmul.f32 %v732_v24, %v722_v55 }
 0x360   : > { %v281_v26 = vpack.c.bf16 %v280_v25, %v280_v25 }
 0x362   : > { %681 = vmatmul.msk.bf16.vlgmr.msrb.gmra.mxu3 %vm154_vm1, %v281_v26 }
 0x363   : > { %523 = vmatpush.bf16.msrb.mxu3 %v514_v27 }
 0x36c   : > { %v392_v18 = vpop.xlane.xlu2 %391 }
 0x36d   : > { %733 = vrcp.f32 %v392_v18 }
 0x373   : > { %v734_v28 = vpop.eup %733 }
 0x374   : > { %v394_v29 = vmul.f32 %v734_v28, %v724_v63  ;;  %v506_v32 = vpop.xlane.xlu0 %505 }
 0x375   : > { %735 = vrcp.f32 %v506_v32 }
 0x376   : > { %v395_v31 = vpack.c.bf16 %v394_v29, %v394_v29 }
 0x378   : > { %685 = vmatmul.msk.bf16.vlgmr.msra.gmra.mxu3 %vm154_vm1, %v395_v31 }
 0x37b   : > { %v736_v33 = vpop.eup %735 }
 0x37c   : > { %v508_v34 = vmul.f32 %v736_v33, %v726_v2 }
 0x37e   : > { %v509_v35 = vpack.c.bf16 %v508_v34, %v508_v34 }
 0x388   : > { %689 = vmatmul.msk.bf16.vlgmr.msrb.gmra.mxu3 %vm154_vm1, %v509_v35 }
 0x3ac   : > { %v595_v41 = vpop.permute.xlu1 %594 }
 0x3ae   : > { %v591_v30 = vpop.permute.xlu0 %590 }
 0x3af   : > { %v605_v36 = vsel %vm133_vm0, %v818_v56, %v591_v30 }
 0x3b0   : > { %609 = vst [vmem:[%s116_s16] sm:$0xff] %v605_v36 }
 0x3b3   : > { %v471_v37 = vpop.f32.mrf.mxu2 }
 0x3b4   : > { %598 = vrot.lane.b32.xlu0 %v471_v37, %s745_s12 }
 0x3bb   : > { %v473_v38 = vpop.f32.mrf.mxu2 }
 0x3c3   : > { %v585_v39 = vpop.f32.mrf.mxu2 }
 0x3c4   : > { %602 = vrot.lane.b32.xlu2 %v585_v39, %s745_s12 }
 0x3cb   : > { %v587_v40 = vpop.f32.mrf.mxu2 }
 0x3e5   : > { %v297_v42 = vpop.f32.mrf.mxu3 }
 0x3e6   : > { %v606_v43 = vsel %vm133_vm0, %v297_v42, %v595_v41 }
 0x3e7   : > { %610 = vst [vmem:[%s116_s16 + $0x8] sm:$0xff] %v606_v43 }
 0x3ed   : > { %v299_v44 = vpop.f32.mrf.mxu3 }
 0x3fb   : > { %v411_v45 = vpop.f32.mrf.mxu3 }
 0x403   : > { %v413_v46 = vpop.f32.mrf.mxu3 }
 0x40b   : > { %v525_v47 = vpop.f32.mrf.mxu3 }
 0x413   : > { %v527_v48 = vpop.f32.mrf.mxu3 }
 0x41e   : > { %v603_v56 = vpop.permute.xlu2 %602 }
 0x41f   : > { %v608_v49 = vsel %vm133_vm0, %v525_v47, %v603_v56 }
 0x420   : > { %612 = vst [vmem:[%s116_s16 + $0x18] sm:$0xff] %v608_v49 }
 0x426   : > { %v599_v50 = vpop.permute.xlu0 %598 }
 0x427   : > { %v607_v51 = vsel %vm133_vm0, %v411_v45, %v599_v50 }
 0x428   : > { %611 = vst [vmem:[%s116_s16 + $0x10] sm:$0xff] %v607_v51 }
 0x429 PF: > { %s11_s6 = sadd.s32 1, %s743_s6  }
 0x42a   : > { %p8_p4 = scmp.ge.s32.totalorder %s11_s6, 4  }
 0x42c   :  { %10 = sbr.rel (!%p8_p4) target bundleno = 1 (0x1), region = 54 }

// kernel: encoder_forward.7
= control target key start
LH: loop header
LB: loop body
LE: loop exit
PB: predicated region body
PF: predicated region fallthrough
CT: control target
= control target key end

     0   :  { %s3365_s0 = inlined_call_operand.vmem [shape: f32[16,512], index: 0, kind: input, shape index: {}]   ;;  %s3366_s1 = inlined_call_operand.hbm [shape: f32[512,2048], index: 1, kind: input, shape index: {}]   ;;  %s3367_s2 = inlined_call_operand.hbm [shape: f32[1,2048], index: 2, kind: input, shape index: {}]   ;;  %s3368_s3 = inlined_call_operand.hbm [shape: f32[2048,512], index: 3, kind: input, shape index: {}]   ;;  %s3369_s4 = inlined_call_operand.hbm [shape: f32[1,512], index: 4, kind: input, shape index: {}]   ;;  %s3370_s5 = inlined_call_operand.hbm [shape: f32[1,512], index: 5, kind: input, shape index: {}]   ;;  %s3371_s6 = inlined_call_operand.hbm [shape: f32[1,512], index: 6, kind: input, shape index: {}]   ;;  %s3372_s7 = inlined_call_operand.hbm [shape: f32[16,512], index: 7, kind: output, shape index: {}]  }
   0x1   :  { %3383 = sst [smem:[#allocation31_spill]] %s3365_s0 }
   0x2   :  { %3384 = sst [smem:[#allocation32_spill]] %s3367_s2 }
   0x3   :  { %3385 = sst [smem:[#allocation33_spill]] %s3369_s4 }
   0x4   :  { %3386 = sst [smem:[#allocation34_spill]] %s3370_s5 }
   0x5   :  { %3387 = sst [smem:[#allocation35_spill]] %s3372_s7 }
   0x6   :  { %12 = vsyncpa [#allocation4], 0 }
   0x7   :  { %14 = vsyncpa [#allocation4 + $0x1], 0 }
   0x8   :  { %15 = vsyncpa [#allocation7], 0 }
   0x9   :  { %17 = vsyncpa [#allocation7 + $0x1], 0 }
   0xa   :  { %18 = vsyncpa [#allocation10], 0 }
   0xb   :  { %19 = vsyncpa [#allocation13], 0 }
   0xc   :  { %20 = vsyncpa [#allocation5], 0 }
   0xd   :  { %22 = vsyncpa [#allocation5 + $0x1], 0  ;;  %s2527_s24 = smov 0   ;;  %s2529_s25 = smov 0  }
   0xe   :  { %s2531_s26 = smov 0   ;;  %s2533_s27 = smov 0  }
   0xf   :  { %s2535_s28 = smov 0   ;;  %s2537_s29 = smov 0  }
  0x10   :  { %s2539_s30 = smov 0   ;;  %s2541_s8 = smov 0  }
  0x11   :  { %s2543_s9 = smov 0   ;;  %s2545_s10 = smov 0  }
  0x12   :  { %s2547_s11 = smov 0  }
  0x13 LB: > { %3388 = sst [smem:[#allocation20_spill]] %s2437_s24  ;;  %s2581_s12 = sadd.s32 4294967295, %s2477_s11   ;;  %s2477_s11 = sphi %s2547_s11, %s28_s11   ;;  %s2473_s10 = sphi %s2545_s10, %s3424_s10   ;;  %s2469_s9 = sphi %s2543_s9, %s3431_s9   ;;  %s2465_s8 = sphi %s2541_s8, %s3422_s8   ;;  %s2461_s30 = sphi %s2539_s30, %s3430_s30   ;;  %s2457_s29 = sphi %s2537_s29, %s3421_s29   ;;  %s2453_s28 = sphi %s2535_s28, %s3429_s28   ;;  %s2449_s27 = sphi %s2533_s27, %s3428_s27   ;;  %s2445_s26 = sphi %s2531_s26, %s3427_s26   ;;  %s2441_s25 = sphi %s2529_s25, %s3426_s25   ;;  %s2437_s24 = sphi %s2527_s24, %s3425_s24  }
  0x14   : > { %3389 = sst [smem:[#allocation21_spill]] %s2457_s29  ;;  %s1974_s13 = sadd.s32 4294967294, %s2477_s11  }
  0x15   : > { %3390 = sst [smem:[#allocation22_spill]] %s2461_s30  ;;  %p86_p0 = scmp.ne.s32.totalorder %s2453_s28, %s2449_s27 }
  0x16   : > { %3391 = sst [smem:[#allocation23_spill]] %s2465_s8  ;;  %p87_p1 = scmp.eq.s32.totalorder %s2581_s12, 0 }
  0x17   : > { %3392 = sst [smem:[#allocation24_spill]] %s2473_s10  ;;  %p224_p2 = scmp.ne.s32.totalorder %s2445_s26, %s2441_s25 }
  0x18   : > { %p2591_p3 = por %p87_p1, %p86_p0  ;;  %p225_p4 = scmp.eq.s32.totalorder %s2581_s12, 7 }
  0x19   : > { %p230_p5 = scmp.ne.s32.totalorder %s2441_s25, %s2437_s24  ;;  %p231_p6 = scmp.eq.s32.totalorder %s1974_s13, 7 }
  0x1a   : > { %p2598_p7 = por %p225_p4, %p224_p2  ;;  %p1975_p8 = scmp.ge.s32.totalorder %s2477_s11, 1 }
  0x1b   : > { %p2603_p9 = por %p231_p6, %p230_p5  ;;  %p238_p10 = scmp.lt.s32.totalorder %s2477_s11, 9 }
  0x1c   : > { %s3394_s16 = scalar_select %p2598_p7, 1, 0 }
  0x1d   : > { %s3396_s17 = scalar_select %p2603_p9, 1, 0 }
  0x1e   : > { %3395 = sst [smem:[#allocation25_spill]] %s3394_s16  ;;  %p2611_p11 = pnand %p1975_p8, %p238_p10 }
  0x1f   : > { %3397 = sst [smem:[#allocation26_spill]] %s3396_s17  ;;  %s2479_s22 = smov [#allocation9]  }
  0x20   : > { %s3398_s4 = sld [smem:[#allocation33_spill]]  ;;  %p2031_p12 = pneg %p2611_p11 }
  0x21   : > { %s252_s23 = sshll.u32 %s2479_s22, 4  ;;  %s37_s13 = sadd.s32 1, %s2469_s9  ;;  %s253_s23 = int_to_ptr.vmem [resolvable:$true] %s252_s23 }
  0x22   : > { %p2619_p13 = pnand %p2031_p12, %p87_p1  ;;  %p38_p0 = scmp.ge.s32.totalorder %s37_s13, 4 }
  0x23   : > { %s40_s18 = sadd.s32 1, %s2473_s10  ;;  %s73_s19 = sadd.s32 1, %s2457_s29 }
  0x24   : > { %p80_p2 = scmp.ne.s32.totalorder %s2457_s29, %s2453_s28  ;;  %s3433_s13 = smov (%p38_p0, %s37_s13), 0 }
  0x25   : > { %3401 = sst [smem:[#allocation27_spill]] %s3433_s13  ;;  %s3435_s18 = smov (!%p38_p0, %s40_s18), %s2473_s10 }
  0x26   : > { %s250_s20 = sshll.u32 %s3398_s4, 4  ;;  %s70_s22 = ssub.s32 %s2469_s9, %s3433_s13  ;;  %s251_s20 = int_to_ptr.hbm [resolvable:$true] %s250_s20 }
  0x27   : > { %2034 = dma.hbm_to_vmem [thread:$0]  (!%p2619_p13), %s251_s20, 64, %s253_s23, [#allocation10]  }
  0x28   : > { %p81_p4 = scmp.eq.s32.totalorder %s2477_s11, 0  ;;  %p42_p5 = scmp.ge.s32.totalorder %s3435_s18, 2 }
  0x29   : > { %p71_p6 = scmp.eq.s32.totalorder %s70_s22, 0  ;;  %p2058_p10 = scmp.lt.s32.totalorder %s2477_s11, 8 }
  0x2a   : > { %p82_p8 = por %p81_p4, %p80_p2  ;;  %s3437_s18 = smov (%p42_p5, %s3435_s18), 0 }
  0x2b   : > { %3402 = sst [smem:[#allocation28_spill]] %s3437_s18  ;;  %s211_s23 = ssub.s32 %s2473_s10, %s3437_s18 }
  0x2c   : > { %s2640_s20 = scalar_select %p71_p6, %s2457_s29, %s73_s19  }
  0x2d   : > { %s2645_s14 = sand.u32 1, %s2457_s29   ;;  %p212_p12 = scmp.eq.s32.totalorder %s211_s23, 0 }
  0x2e   : > { %3403 = sst [smem:[#allocation29_spill]] %s2640_s20  ;;  %s1980_s4 = sshll.u32 %s2645_s14, 11 }
  0x2f   : > { %p2648_p0 = pnand %p2058_p10, %p82_p8  ;;  %s3405_s17 = sadd.s32 1, %s2445_s26 }
  0x30   : > { %s2655_s22 = scalar_select %p212_p12, %s2445_s26, %s3405_s17  }
  0x31   : > { %s317_s24 = sand.u32 1, %s2477_s11   ;;  %s299_s7 = scalar_lea.vmem [#allocation3], %s1980_s4 }
  0x32   : > { %3406 = sst [smem:[#allocation30_spill]] %s2655_s22  ;;  %s307_s16 = sshll.u32 %s299_s7, 4  ;;  %s308_s16 = int_to_ptr.vmem [resolvable:$true] %s307_s16 }
  0x33   : > { %s1983_s19 = sshll.u32 %s2645_s14, 2  ;;  %s1984_s20 = sshll.u32 %s2469_s9, 2 }
  0x34   : > { %s3407_s2 = sld [smem:[#allocation32_spill]]  ;;  %s321_s23 = scalar_lea.vmem [#allocation6], %s1983_s19 }
  0x35   : > { %s329_s0 = sshll.u32 %s321_s23, 4  ;;  %s2663_s8 = scalar_lea.sflag [#allocation7], %s317_s24  ;;  %s330_s0 = int_to_ptr.vmem [resolvable:$true] %s329_s0 }
  0x36   : > { %s3408_s5 = sld [smem:[#allocation34_spill]]  ;;  %s340_s10 = scalar_lea.vmem [#allocation8], %s1980_s4 }
  0x37   : > { %s349_s18 = sshll.u32 %s340_s10, 4  ;;  %s274_s24 = sshll.u32 %s3371_s6, 4  ;;  %s275_s24 = int_to_ptr.hbm [resolvable:$true] %s274_s24  ;;  %s350_s18 = int_to_ptr.vmem [resolvable:$true] %s349_s18 }
  0x38   : > { %s296_s19 = scalar_lea.sflag [#allocation4], %s2645_s14  ;;  %s2482_s23 = smov 2048  }
  0x39   : > { %s363_s14 = sand.u32 (!%p2611_p11), 1, %s2453_s28  }
  0x3a   : > { %s325_s29 = scalar_lea.hbm %s3407_s2, %s1984_s20  ;;  %s2483_s2 = smov 512  }
  0x3b   : > { %s327_s30 = sshll.u32 %s325_s29, 4  ;;  %s2480_s29 = smov [#allocation11]   ;;  %s328_s30 = int_to_ptr.hbm [resolvable:$true] %s327_s30 }
  0x3c   : > { %2047 = dma.hbm_to_vmem [thread:$0]  (!%p2648_p0), %s328_s30, 64, %s330_s0, %s2663_s8  }
  0x3d   : > { %s262_s22 = sshll.u32 %s3408_s5, 4  ;;  %s264_s20 = sshll.u32 %s2480_s29, 4  ;;  %s263_s22 = int_to_ptr.hbm [resolvable:$true] %s262_s22  ;;  %s265_s20 = int_to_ptr.vmem [resolvable:$true] %s264_s20 }
  0x3e   : > { %2037 = dma.hbm_to_vmem [thread:$0]  (!%p2619_p13), %s263_s22, 64, %s265_s20, [#allocation10]  }
  0x3f   : > { %s2006_s0 = sshll.u32 %s2469_s9, 5  ;;  %s2481_s30 = smov [#allocation12]  }
  0x40   : > { %s276_s17 = sshll.u32 %s2481_s30, 4  ;;  %s304_s10 = scalar_lea.hbm %s3366_s1, %s2006_s0  ;;  %s277_s17 = int_to_ptr.vmem [resolvable:$true] %s276_s17 }
  0x41   : > { %s305_s29 = sshll.u32 %s304_s10, 4  ;;  %s2484_s5 = smov 32   ;;  %s306_s29 = int_to_ptr.hbm [resolvable:$true] %s305_s29 }
  0x42   : > { %2040 = dma.hbm_to_vmem [thread:$0]  (!%p2619_p13), %s275_s24, 64, %s277_s17, [#allocation13]  }
  0x43   : > { %2044 = dma.hbm_to_vmem [thread:$0]  (!%p2648_p0), %s306_s29, 32768, %s308_s16, %s296_s19, %s2482_s23, %s2483_s2, %s2484_s5  }
  0x44   : > { %s2008_s22 = sshll.u32 %s2469_s9, 11  ;;  %361 = sbr.rel (%p2611_p11) target bundleno = 919 (0x397), region = 48 }
  0x45   : > { %s346_s7 = scalar_lea.hbm %s3368_s3, %s2008_s22  ;;  %s1990_s27 = sshll.u32 (!%p2611_p11), %s363_s14, 11 }
  0x46   : > { %s347_s4 = sshll.u32 %s346_s7, 4  ;;  %s364_s24 = scalar_lea.sflag (!%p2611_p11), [#allocation4], %s363_s14  ;;  %s348_s4 = int_to_ptr.hbm [resolvable:$true] %s347_s4 }
  0x47   : > { %2050 = dma.hbm_to_vmem [thread:$0]  (!%p2648_p0), %s348_s4, 32768, %s350_s18, %s2663_s8, %s2483_s2, %s2483_s2, %s2484_s5  }
  0x48   : > { %s2695_s0 = scalar_lea.vmem (!%p2611_p11), [#allocation3], %s1990_s27 }
  0x49   : > { %2416 = dma.done.wait (%p2591_p3), %s364_s24, 32768  }
  0x4a   : > { %2418 = vsyncadd (%p2591_p3), %s364_s24, 4294934528  ;;  %s373_s16 = sand.u32 1, %s2581_s12   ;;  %s1991_s13 = sshll.u32 %s363_s14, 2 }
  0x4b   : > { %s374_s2 = scalar_lea.sflag [#allocation7], %s373_s16  ;;  %s2702_s5 = scalar_lea.vmem [#allocation6], %s1991_s13 }
  0x4c   : > { %2420 = dma.done.wait (%p2591_p3), %s374_s2, 32832  }
  0x4d   : > { %2422 = vsyncadd (%p2591_p3), %s374_s2, 4294934464  ;;  %s2708_s8 = scalar_lea.vmem [#allocation8], %s1990_s27 }
  0x4e   : > { %2424 = dma.done.wait (%p87_p1), [#allocation10], 128  }
  0x4f   : > { %2426 = vsyncadd (%p87_p1), [#allocation10], 4294967168 }
  0x50   : > { %2428 = dma.done.wait (%p87_p1), [#allocation13], 64  }
  0x51   : > { %2430 = vsyncadd (%p87_p1), [#allocation13], 4294967232  ;;  %s3409_s21 = sld [smem:[#allocation23_spill]]  ;;  %s446_s15 = sand.u32 1, %s2441_s25  }
  0x52   : > { %s1996_s18 = sshll.u32 %s446_s15, 5  ;;  %s3410_s19 = sld [smem:[#allocation31_spill]] }
  0x53   : > { %s2728_s22 = scalar_lea.vmem [#allocation14], %s1996_s18  ;;  %s3411_s20 = sld [smem:[#allocation22_spill]] }
  0x57   : > { %p449_p3 = scmp.lt.s32.totalorder %s3409_s21, 1 }
  0x59   : > { %s3439_s21 = smov (!%p449_p3, %s3409_s21), 1  ;;  %p1999_p11 = scmp.ne.s32.totalorder %s3411_s20, 0 }
  0x5a   : > { %s2009_s17 = sshll.u32 %s3439_s21, 5 }
  0x5b   : > { %s2726_s23 = scalar_lea.vmem %s3410_s19, %s2009_s17  ;;  %460 = sbr.rel (%p1999_p11) target bundleno = 101 (0x65), region = 76 }
  0x60   : > { %v2485_v0 = vmov 0.0  }
  0x61   : > { %461 = vst [vmem:[#allocation2 + $0x10] sm:$0xff] %v2485_v0 }
  0x62   : > { %462 = vst [vmem:[#allocation2] sm:$0xff] %v2485_v0 }
  0x63   : > { %463 = vst [vmem:[#allocation2 + $0x18] sm:$0xff] %v2485_v0 }
  0x64   : > { %464 = vst [vmem:[#allocation2 + $0x8] sm:$0xff] %v2485_v0 }
  0x65 PF: > { %v529_v1 = vld [vmem:[%s2695_s0 + $0x1c0] sm:$0xff]  ;;  %s3412_s12 = sld [smem:[#allocation22_spill]] }
  0x66   : > { %v533_v2 = vld [vmem:[%s2695_s0 + $0x1e0] sm:$0xff] }
  0x67   : > { %v593_v3 = vld [vmem:[%s2695_s0 + $0x3c0] sm:$0xff]  ;;  %v757_v4 = vpack.c.bf16 %v533_v2, %v529_v1 }
  0x68   : > { %v597_v5 = vld [vmem:[%s2695_s0 + $0x3e0] sm:$0xff] }
  0x69   : > { %v657_v6 = vld [vmem:[%s2695_s0 + $0x5c0] sm:$0xff]  ;;  %v789_v8 = vpack.c.bf16 %v597_v5, %v593_v3  ;;  %867 = vmatpush.bf16.msra.mxu0 %v757_v4 }
  0x6a   : > { %v661_v7 = vld [vmem:[%s2695_s0 + $0x5e0] sm:$0xff] }
  0x6b   : > { %v821_v9 = vpack.c.bf16 %v661_v7, %v657_v6  ;;  %v721_v10 = vld [vmem:[%s2695_s0 + $0x7c0] sm:$0xff]  ;;  %880 = vmatpush.bf16.msra.mxu1 %v789_v8  ;;  %p2000_p1 = scmp.ne.s32.totalorder %s3412_s12, 3 }
  0x6c   : > { %v725_v11 = vld [vmem:[%s2695_s0 + $0x7e0] sm:$0xff] }
  0x6d   : > { %v521_v12 = vld [vmem:[%s2695_s0 + $0x180] sm:$0xff]  ;;  %v853_v13 = vpack.c.bf16 %v725_v11, %v721_v10  ;;  %893 = vmatpush.bf16.msra.mxu2 %v821_v9 }
  0x6e   : > { %v525_v14 = vld [vmem:[%s2695_s0 + $0x1a0] sm:$0xff] }
  0x6f   : > { %v585_v15 = vld [vmem:[%s2695_s0 + $0x380] sm:$0xff]  ;;  %v753_v17 = vpack.c.bf16 %v525_v14, %v521_v12  ;;  %906 = vmatpush.bf16.msra.mxu3 %v853_v13 }
  0x70   : > { %v589_v16 = vld [vmem:[%s2695_s0 + $0x3a0] sm:$0xff] }
  0x71   : > { %v785_v18 = vpack.c.bf16 %v589_v16, %v585_v15  ;;  %v649_v19 = vld [vmem:[%s2695_s0 + $0x580] sm:$0xff]  ;;  %868 = vmatpush.bf16.msra.mxu0 %v753_v17 }
  0x72   : > { %v653_v20 = vld [vmem:[%s2695_s0 + $0x5a0] sm:$0xff] }
  0x73   : > { %v713_v21 = vld [vmem:[%s2695_s0 + $0x780] sm:$0xff]  ;;  %v817_v22 = vpack.c.bf16 %v653_v20, %v649_v19  ;;  %881 = vmatpush.bf16.msra.mxu1 %v785_v18 }
  0x74   : > { %v717_v23 = vld [vmem:[%s2695_s0 + $0x7a0] sm:$0xff] }
  0x75   : > { %v513_v24 = vld [vmem:[%s2695_s0 + $0x140] sm:$0xff]  ;;  %v849_v26 = vpack.c.bf16 %v717_v23, %v713_v21  ;;  %894 = vmatpush.bf16.msra.mxu2 %v817_v22 }
  0x76   : > { %v517_v25 = vld [vmem:[%s2695_s0 + $0x160] sm:$0xff] }
  0x77   : > { %v577_v27 = vld [vmem:[%s2695_s0 + $0x340] sm:$0xff]  ;;  %v749_v30 = vpack.c.bf16 %v517_v25, %v513_v24  ;;  %907 = vmatpush.bf16.msra.mxu3 %v849_v26 }
  0x78   : > { %v581_v28 = vld [vmem:[%s2695_s0 + $0x360] sm:$0xff] }
  0x79   : > { %v641_v29 = vld [vmem:[%s2695_s0 + $0x540] sm:$0xff]  ;;  %v781_v34 = vpack.c.bf16 %v581_v28, %v577_v27  ;;  %869 = vmatpush.bf16.msra.mxu0 %v749_v30  ;;  %v534_v30 = vld [vmem:[%s2695_s0 + $0x1e8] sm:$0xff] }
  0x7a   : > { %v645_v31 = vld [vmem:[%s2695_s0 + $0x560] sm:$0xff] }
  0x7b   : > { %v705_v32 = vld [vmem:[%s2695_s0 + $0x740] sm:$0xff]  ;;  %v813_v35 = vpack.c.bf16 %v645_v31, %v641_v29  ;;  %882 = vmatpush.bf16.msra.mxu1 %v781_v34  ;;  %v530_v29 = vld [vmem:[%s2695_s0 + $0x1c8] sm:$0xff] }
  0x7c   : > { %v709_v33 = vld [vmem:[%s2695_s0 + $0x760] sm:$0xff]  ;;  %v594_v31 = vld [vmem:[%s2695_s0 + $0x3c8] sm:$0xff] }
  0x7d   : > { %v505_v36 = vld [vmem:[%s2695_s0 + $0x100] sm:$0xff]  ;;  %v845_v39 = vpack.c.bf16 %v709_v33, %v705_v32  ;;  %895 = vmatpush.bf16.msra.mxu2 %v813_v35  ;;  %v598_v33 = vld [vmem:[%s2695_s0 + $0x3e8] sm:$0xff] }
  0x7e   : > { %v509_v37 = vld [vmem:[%s2695_s0 + $0x120] sm:$0xff]  ;;  %v658_v34 = vld [vmem:[%s2695_s0 + $0x5c8] sm:$0xff] }
  0x7f   : > { %v569_v38 = vld [vmem:[%s2695_s0 + $0x300] sm:$0xff]  ;;  %v745_v45 = vpack.c.bf16 %v509_v37, %v505_v36  ;;  %908 = vmatpush.bf16.msra.mxu3 %v845_v39  ;;  %v662_v35 = vld [vmem:[%s2695_s0 + $0x5e8] sm:$0xff] }
  0x80   : > { %v573_v40 = vld [vmem:[%s2695_s0 + $0x320] sm:$0xff]  ;;  %v726_v39 = vld [vmem:[%s2695_s0 + $0x7e8] sm:$0xff] }
  0x81   : > { %v633_v41 = vld [vmem:[%s2695_s0 + $0x500] sm:$0xff]  ;;  %v777_v46 = vpack.c.bf16 %v573_v40, %v569_v38  ;;  %870 = vmatpush.bf16.msra.mxu0 %v745_v45  ;;  %v722_v38 = vld [vmem:[%s2695_s0 + $0x7c8] sm:$0xff]  ;;  %v467_v40 = vld [vmem:[%s2726_s23 + $0x10] sm:$0xff] }
  0x82   : > { %v637_v42 = vld [vmem:[%s2695_s0 + $0x520] sm:$0xff]  ;;  %v468_v45 = vld [vmem:[%s2726_s23 + $0x18] sm:$0xff] }
  0x83   : > { %v697_v43 = vld [vmem:[%s2695_s0 + $0x700] sm:$0xff]  ;;  %v809_v47 = vpack.c.bf16 %v637_v42, %v633_v41  ;;  %883 = vmatpush.bf16.msra.mxu1 %v777_v46  ;;  %v758_v42 = vpack.c.bf16 %v534_v30, %v530_v29  ;;  %v790_v46 = vpack.c.bf16 %v598_v33, %v594_v31  ;;  %v626_v29 = vld [vmem:[%s2695_s0 + $0x4c8] sm:$0xff] }
  0x84   : > { %v701_v44 = vld [vmem:[%s2695_s0 + $0x720] sm:$0xff]  ;;  %v630_v30 = vld [vmem:[%s2695_s0 + $0x4e8] sm:$0xff] }
  0x85   : > { %v497_v48 = vld [vmem:[%s2695_s0 + $0xc0] sm:$0xff]  ;;  %v841_v51 = vpack.c.bf16 %v701_v44, %v697_v43  ;;  %896 = vmatpush.bf16.msra.mxu2 %v809_v47  ;;  %v522_v43 = vld [vmem:[%s2695_s0 + $0x188] sm:$0xff]  ;;  %v822_v47 = vpack.c.bf16 %v662_v35, %v658_v34  ;;  %v806_v35 = vpack.c.bf16 %v630_v30, %v626_v29  ;;  %v651_v29 = vld [vmem:[%s2695_s0 + $0x590] sm:$0xff] }
  0x86   : > { %v501_v49 = vld [vmem:[%s2695_s0 + $0xe0] sm:$0xff]  ;;  %v690_v31 = vld [vmem:[%s2695_s0 + $0x6c8] sm:$0xff]  ;;  %v655_v30 = vld [vmem:[%s2695_s0 + $0x5b0] sm:$0xff] }
  0x87   : > { %v561_v50 = vld [vmem:[%s2695_s0 + $0x2c0] sm:$0xff]  ;;  %v741_v57 = vpack.c.bf16 %v501_v49, %v497_v48  ;;  %909 = vmatpush.bf16.msra.mxu3 %v841_v51  ;;  %v526_v48 = vld [vmem:[%s2695_s0 + $0x1a8] sm:$0xff]  ;;  %v854_v51 = vpack.c.bf16 %v726_v39, %v722_v38 }
  0x88   : > { %v565_v52 = vld [vmem:[%s2695_s0 + $0x2e0] sm:$0xff]  ;;  %v586_v49 = vld [vmem:[%s2695_s0 + $0x388] sm:$0xff] }
  0x89   : > { %v625_v53 = vld [vmem:[%s2695_s0 + $0x4c0] sm:$0xff]  ;;  %v773_v58 = vpack.c.bf16 %v565_v52, %v561_v50  ;;  %871 = vmatpush.bf16.msra.mxu0 %v741_v57  ;;  %v466_v50 = vld [vmem:[%s2726_s23 + $0x8] sm:$0xff]  ;;  %v2810_v52 = vpack.c.bf16 %v467_v40, %v467_v40 }
  0x8a   : > { %v629_v54 = vld [vmem:[%s2695_s0 + $0x4e0] sm:$0xff]  ;;  %v718_v57 = vld [vmem:[%s2695_s0 + $0x7a8] sm:$0xff] }
  0x8b   : > { %v689_v55 = vld [vmem:[%s2695_s0 + $0x6c0] sm:$0xff]  ;;  %v805_v59 = vpack.c.bf16 %v629_v54, %v625_v53  ;;  %884 = vmatpush.bf16.msra.mxu1 %v773_v58  ;;  %v590_v53 = vld [vmem:[%s2695_s0 + $0x3a8] sm:$0xff] }
  0x8c   : > { %v693_v56 = vld [vmem:[%s2695_s0 + $0x6e0] sm:$0xff]  ;;  %v650_v54 = vld [vmem:[%s2695_s0 + $0x588] sm:$0xff] }
  0x8d   : > { %v489_v60 = vld [vmem:[%s2695_s0 + $0x80] sm:$0xff]  ;;  %v837_v63 = vpack.c.bf16 %v693_v56, %v689_v55  ;;  %897 = vmatpush.bf16.msra.mxu2 %v805_v59  ;;  %v654_v55 = vld [vmem:[%s2695_s0 + $0x5a8] sm:$0xff]  ;;  %v2819_v59 = vpack.c.bf16 %v468_v45, %v468_v45 }
  0x8e   : > { %v493_v61 = vld [vmem:[%s2695_s0 + $0xa0] sm:$0xff]  ;;  %v714_v56 = vld [vmem:[%s2695_s0 + $0x788] sm:$0xff] }
  0x8f   : > { %v553_v62 = vld [vmem:[%s2695_s0 + $0x280] sm:$0xff]  ;;  %v737_v5 = vpack.c.bf16 %v493_v61, %v489_v60  ;;  %910 = vmatpush.bf16.msra.mxu3 %v837_v63  ;;  %v754_v60 = vpack.c.bf16 %v526_v48, %v522_v43  ;;  %v2821_v61 = vpack.c.bf16 %v466_v50, %v466_v50  ;;  %v818_v63 = vpack.c.bf16 %v654_v55, %v650_v54  ;;  %v554_v38 = vld [vmem:[%s2695_s0 + $0x288] sm:$0xff] }
  0x90   : > { %v557_v0 = vld [vmem:[%s2695_s0 + $0x2a0] sm:$0xff]  ;;  %v558_v40 = vld [vmem:[%s2695_s0 + $0x2a8] sm:$0xff] }
  0x91   : > { %v617_v1 = vld [vmem:[%s2695_s0 + $0x480] sm:$0xff]  ;;  %v769_v6 = vpack.c.bf16 %v557_v0, %v553_v62  ;;  %872 = vmatpush.bf16.msra.mxu0 %v737_v5  ;;  %v786_v62 = vpack.c.bf16 %v590_v53, %v586_v49  ;;  %v514_v0 = vld [vmem:[%s2695_s0 + $0x148] sm:$0xff] }
  0x92   : > { %v621_v2 = vld [vmem:[%s2695_s0 + $0x4a0] sm:$0xff]  ;;  %v642_v5 = vld [vmem:[%s2695_s0 + $0x548] sm:$0xff] }
  0x93   : > { %v681_v3 = vld [vmem:[%s2695_s0 + $0x680] sm:$0xff]  ;;  %v801_v7 = vpack.c.bf16 %v621_v2, %v617_v1  ;;  %885 = vmatpush.bf16.msra.mxu1 %v769_v6  ;;  %v518_v1 = vld [vmem:[%s2695_s0 + $0x168] sm:$0xff] }
  0x94   : > { %v685_v4 = vld [vmem:[%s2695_s0 + $0x6a0] sm:$0xff]  ;;  %v578_v2 = vld [vmem:[%s2695_s0 + $0x348] sm:$0xff] }
  0x95   : > { %v481_v8 = vld [vmem:[%s2695_s0 + $0x40] sm:$0xff]  ;;  %v833_v11 = vpack.c.bf16 %v685_v4, %v681_v3  ;;  %898 = vmatpush.bf16.msra.mxu2 %v801_v7  ;;  %v850_v3 = vpack.c.bf16 %v718_v57, %v714_v56  ;;  %v582_v4 = vld [vmem:[%s2695_s0 + $0x368] sm:$0xff] }
  0x96   : > { %v485_v9 = vld [vmem:[%s2695_s0 + $0x60] sm:$0xff]  ;;  %v646_v6 = vld [vmem:[%s2695_s0 + $0x568] sm:$0xff] }
  0x97   : > { %v545_v10 = vld [vmem:[%s2695_s0 + $0x240] sm:$0xff]  ;;  %v733_v17 = vpack.c.bf16 %v485_v9, %v481_v8  ;;  %911 = vmatpush.bf16.msra.mxu3 %v833_v11  ;;  %v706_v7 = vld [vmem:[%s2695_s0 + $0x748] sm:$0xff]  ;;  %v750_v9 = vpack.c.bf16 %v518_v1, %v514_v0  ;;  %v814_v11 = vpack.c.bf16 %v646_v6, %v642_v5 }
  0x98   : > { %v549_v12 = vld [vmem:[%s2695_s0 + $0x260] sm:$0xff]  ;;  %v710_v8 = vld [vmem:[%s2695_s0 + $0x768] sm:$0xff] }
  0x99   : > { %v609_v13 = vld [vmem:[%s2695_s0 + $0x440] sm:$0xff]  ;;  %v765_v20 = vpack.c.bf16 %v549_v12, %v545_v10  ;;  %873 = vmatpush.bf16.msra.mxu0 %v733_v17  ;;  %v782_v10 = vpack.c.bf16 %v582_v4, %v578_v2  ;;  %v506_v12 = vld [vmem:[%s2695_s0 + $0x108] sm:$0xff] }
  0x9a   : > { %v613_v14 = vld [vmem:[%s2695_s0 + $0x460] sm:$0xff]  ;;  %v634_v17 = vld [vmem:[%s2695_s0 + $0x508] sm:$0xff] }
  0x9b   : > { %v673_v15 = vld [vmem:[%s2695_s0 + $0x640] sm:$0xff]  ;;  %v797_v21 = vpack.c.bf16 %v613_v14, %v609_v13  ;;  %886 = vmatpush.bf16.msra.mxu1 %v765_v20  ;;  %v510_v13 = vld [vmem:[%s2695_s0 + $0x128] sm:$0xff] }
  0x9c   : > { %v677_v16 = vld [vmem:[%s2695_s0 + $0x660] sm:$0xff]  ;;  %v570_v14 = vld [vmem:[%s2695_s0 + $0x308] sm:$0xff] }
  0x9d   : > { %v473_v18 = vld [vmem:[%s2695_s0] sm:$0xff]  ;;  %v829_v25 = vpack.c.bf16 %v677_v16, %v673_v15  ;;  %899 = vmatpush.bf16.msra.mxu2 %v797_v21  ;;  %v846_v15 = vpack.c.bf16 %v710_v8, %v706_v7  ;;  %v574_v16 = vld [vmem:[%s2695_s0 + $0x328] sm:$0xff]  ;;  %v746_v21 = vpack.c.bf16 %v510_v13, %v506_v12  ;;  %v599_v13 = vld [vmem:[%s2695_s0 + $0x3f0] sm:$0xff] }
  0x9e   : > { %v477_v19 = vld [vmem:[%s2695_s0 + $0x20] sm:$0xff]  ;;  %v702_v20 = vld [vmem:[%s2695_s0 + $0x728] sm:$0xff] }
  0x9f   : > { %v537_v22 = vld [vmem:[%s2695_s0 + $0x200] sm:$0xff]  ;;  %v729_v32 = vpack.c.bf16 %v477_v19, %v473_v18  ;;  %912 = vmatpush.bf16.msra.mxu3 %v829_v25  ;;  %v638_v18 = vld [vmem:[%s2695_s0 + $0x528] sm:$0xff] }
  0xa0   : > { %v541_v23 = vld [vmem:[%s2695_s0 + $0x220] sm:$0xff]  ;;  %v698_v19 = vld [vmem:[%s2695_s0 + $0x708] sm:$0xff] }
  0xa1   : > { %v601_v24 = vld [vmem:[%s2695_s0 + $0x400] sm:$0xff]  ;;  %v761_v36 = vpack.c.bf16 %v541_v23, %v537_v22  ;;  %874 = vmatpush.bf16.msra.mxu0 %v729_v32  ;;  %v778_v22 = vpack.c.bf16 %v574_v16, %v570_v14  ;;  %v810_v23 = vpack.c.bf16 %v638_v18, %v634_v17  ;;  %v502_v25 = vld [vmem:[%s2695_s0 + $0xe8] sm:$0xff]  ;;  %v659_v14 = vld [vmem:[%s2695_s0 + $0x5d0] sm:$0xff] }
  0xa2   : > { %v605_v26 = vld [vmem:[%s2695_s0 + $0x420] sm:$0xff]  ;;  %v694_v32 = vld [vmem:[%s2695_s0 + $0x6e8] sm:$0xff]  ;;  %v723_v18 = vld [vmem:[%s2695_s0 + $0x7d0] sm:$0xff] }
  0xa3   : > { %v665_v27 = vld [vmem:[%s2695_s0 + $0x600] sm:$0xff]  ;;  %v793_v37 = vpack.c.bf16 %v605_v26, %v601_v24  ;;  %887 = vmatpush.bf16.msra.mxu1 %v761_v36  ;;  %v498_v24 = vld [vmem:[%s2695_s0 + $0xc8] sm:$0xff]  ;;  %v838_v39 = vpack.c.bf16 %v694_v32, %v690_v31  ;;  %v715_v31 = vld [vmem:[%s2695_s0 + $0x790] sm:$0xff] }
  0xa4   : > { %v669_v28 = vld [vmem:[%s2695_s0 + $0x620] sm:$0xff]  ;;  %v562_v26 = vld [vmem:[%s2695_s0 + $0x2c8] sm:$0xff]  ;;  %v742_v33 = vpack.c.bf16 %v502_v25, %v498_v24  ;;  %v523_v24 = vld [vmem:[%s2695_s0 + $0x190] sm:$0xff] }
  0xa5   : > { %v825_v41 = vpack.c.bf16 %v669_v28, %v665_v27  ;;  %v465_v44 = vld [vmem:[%s2726_s23] sm:$0xff]  ;;  %900 = vmatpush.bf16.msra.mxu2 %v793_v37  ;;  %919 = vmatpush.bf16.msrb.mxu0 %v758_v42  ;;  %v842_v27 = vpack.c.bf16 %v702_v20, %v698_v19  ;;  %v566_v28 = vld [vmem:[%s2695_s0 + $0x2e8] sm:$0xff]  ;;  %v727_v19 = vld [vmem:[%s2695_s0 + $0x7f0] sm:$0xff] }
  0xa6   : > { %v2817_v58 = vpack.c.bf16 %v465_v44, %v465_v44  ;;  %888 = vmatmul.bf16.vlgmr.msra.gmra.mxu1 %v2821_v61  ;;  %v774_v34 = vpack.c.bf16 %v566_v28, %v562_v26  ;;  %v490_v36 = vld [vmem:[%s2695_s0 + $0x88] sm:$0xff]  ;;  %v527_v25 = vld [vmem:[%s2695_s0 + $0x1b0] sm:$0xff] }
  0xa7   : > { %913 = vmatpush.bf16.msra.mxu3 %v825_v41  ;;  %932 = vmatpush.bf16.msrb.mxu1 %v790_v46  ;;  %v494_v37 = vld [vmem:[%s2695_s0 + $0xa8] sm:$0xff]  ;;  %v770_v46 = vpack.c.bf16 %v558_v40, %v554_v38  ;;  %v587_v26 = vld [vmem:[%s2695_s0 + $0x390] sm:$0xff] }
  0xa8   : > { %901 = vmatmul.bf16.vlgmr.msra.gmra.mxu2 %v2810_v52  ;;  %875 = vmatmul.bf16.vlgmr.msra.gmra.mxu0 %v2817_v58  ;;  %v618_v41 = vld [vmem:[%s2695_s0 + $0x488] sm:$0xff]  ;;  %v738_v45 = vpack.c.bf16 %v494_v37, %v490_v36  ;;  %v591_v28 = vld [vmem:[%s2695_s0 + $0x3b0] sm:$0xff] }
  0xa9   : > { %945 = vmatpush.bf16.msrb.mxu2 %v822_v47  ;;  %920 = vmatpush.bf16.msrb.mxu0 %v754_v60  ;;  %v622_v42 = vld [vmem:[%s2695_s0 + $0x4a8] sm:$0xff]  ;;  %v719_v32 = vld [vmem:[%s2695_s0 + $0x7b0] sm:$0xff] }
  0xaa   : > { %914 = vmatmul.bf16.vlgmr.msra.gmra.mxu3 %v2819_v59  ;;  %v682_v43 = vld [vmem:[%s2695_s0 + $0x688] sm:$0xff]  ;;  %v802_v47 = vpack.c.bf16 %v622_v42, %v618_v41  ;;  %v515_v36 = vld [vmem:[%s2695_s0 + $0x150] sm:$0xff] }
  0xab   : > { %958 = vmatpush.bf16.msrb.mxu3 %v854_v51  ;;  %933 = vmatpush.bf16.msrb.mxu1 %v786_v62  ;;  %v686_v44 = vld [vmem:[%s2695_s0 + $0x6a8] sm:$0xff]  ;;  %v519_v37 = vld [vmem:[%s2695_s0 + $0x170] sm:$0xff] }
  0xac   : > { %v482_v48 = vld [vmem:[%s2695_s0 + $0x48] sm:$0xff]  ;;  %v834_v51 = vpack.c.bf16 %v686_v44, %v682_v43  ;;  %v579_v38 = vld [vmem:[%s2695_s0 + $0x350] sm:$0xff] }
  0xad   : > { %946 = vmatpush.bf16.msrb.mxu2 %v818_v63  ;;  %921 = vmatpush.bf16.msrb.mxu0 %v750_v9  ;;  %v486_v49 = vld [vmem:[%s2695_s0 + $0x68] sm:$0xff]  ;;  %v531_v9 = vld [vmem:[%s2695_s0 + $0x1d0] sm:$0xff] }
  0xae   : > { %v546_v50 = vld [vmem:[%s2695_s0 + $0x248] sm:$0xff]  ;;  %v734_v60 = vpack.c.bf16 %v486_v49, %v482_v48  ;;  %v583_v40 = vld [vmem:[%s2695_s0 + $0x370] sm:$0xff] }
  0xaf   : > { %959 = vmatpush.bf16.msrb.mxu3 %v850_v3  ;;  %934 = vmatpush.bf16.msrb.mxu1 %v782_v10  ;;  %v550_v53 = vld [vmem:[%s2695_s0 + $0x268] sm:$0xff]  ;;  %v535_v10 = vld [vmem:[%s2695_s0 + $0x1f0] sm:$0xff] }
  0xb0   : > { %v610_v54 = vld [vmem:[%s2695_s0 + $0x448] sm:$0xff]  ;;  %v766_v0 = vpack.c.bf16 %v550_v53, %v546_v50  ;;  %v643_v41 = vld [vmem:[%s2695_s0 + $0x550] sm:$0xff] }
  0xb1   : > { %947 = vmatpush.bf16.msrb.mxu2 %v814_v11  ;;  %922 = vmatpush.bf16.msrb.mxu0 %v746_v21  ;;  %v614_v55 = vld [vmem:[%s2695_s0 + $0x468] sm:$0xff]  ;;  %v595_v11 = vld [vmem:[%s2695_s0 + $0x3d0] sm:$0xff]  ;;  %v759_v21 = vpack.c.bf16 %v535_v10, %v531_v9 }
  0xb2   : > { %v674_v56 = vld [vmem:[%s2695_s0 + $0x648] sm:$0xff]  ;;  %v798_v1 = vpack.c.bf16 %v614_v55, %v610_v54  ;;  %v647_v42 = vld [vmem:[%s2695_s0 + $0x570] sm:$0xff] }
  0xb3   : > { %960 = vmatpush.bf16.msrb.mxu3 %v846_v15  ;;  %935 = vmatpush.bf16.msrb.mxu1 %v778_v22  ;;  %v678_v57 = vld [vmem:[%s2695_s0 + $0x668] sm:$0xff]  ;;  %v663_v15 = vld [vmem:[%s2695_s0 + $0x5f0] sm:$0xff]  ;;  %v791_v22 = vpack.c.bf16 %v599_v13, %v595_v11 }
  0xb4   : > { %v474_v62 = vld [vmem:[%s2695_s0 + $0x8] sm:$0xff]  ;;  %v830_v5 = vpack.c.bf16 %v678_v57, %v674_v56  ;;  %v707_v43 = vld [vmem:[%s2695_s0 + $0x750] sm:$0xff] }
  0xb5   : > { %948 = vmatpush.bf16.msrb.mxu2 %v810_v23  ;;  %923 = vmatpush.bf16.msrb.mxu0 %v742_v33  ;;  %v478_v63 = vld [vmem:[%s2695_s0 + $0x28] sm:$0xff]  ;;  %v823_v23 = vpack.c.bf16 %v663_v15, %v659_v14  ;;  %v755_v33 = vpack.c.bf16 %v527_v25, %v523_v24  ;;  %v711_v44 = vld [vmem:[%s2695_s0 + $0x770] sm:$0xff] }
  0xb6   : > { %v538_v2 = vld [vmem:[%s2695_s0 + $0x208] sm:$0xff]  ;;  %v730_v12 = vpack.c.bf16 %v478_v63, %v474_v62  ;;  %v507_v48 = vld [vmem:[%s2695_s0 + $0x110] sm:$0xff] }
  0xb7   : > { %961 = vmatpush.bf16.msrb.mxu3 %v842_v27  ;;  %936 = vmatpush.bf16.msrb.mxu1 %v774_v34  ;;  %v542_v3 = vld [vmem:[%s2695_s0 + $0x228] sm:$0xff]  ;;  %v855_v27 = vpack.c.bf16 %v727_v19, %v723_v18  ;;  %v787_v34 = vpack.c.bf16 %v591_v28, %v587_v26  ;;  %v511_v49 = vld [vmem:[%s2695_s0 + $0x130] sm:$0xff] }
  0xb8   : > { %v602_v4 = vld [vmem:[%s2695_s0 + $0x408] sm:$0xff]  ;;  %v762_v16 = vpack.c.bf16 %v542_v3, %v538_v2  ;;  %v571_v50 = vld [vmem:[%s2695_s0 + $0x310] sm:$0xff] }
  0xb9   : > { %949 = vmatpush.bf16.msrb.mxu2 %v806_v35  ;;  %924 = vmatpush.bf16.msrb.mxu0 %v738_v45  ;;  %v606_v6 = vld [vmem:[%s2695_s0 + $0x428] sm:$0xff]  ;;  %v819_v35 = vpack.c.bf16 %v655_v30, %v651_v29  ;;  %v751_v45 = vpack.c.bf16 %v519_v37, %v515_v36  ;;  %v575_v53 = vld [vmem:[%s2695_s0 + $0x330] sm:$0xff] }
  0xba   : > { %v666_v7 = vld [vmem:[%s2695_s0 + $0x608] sm:$0xff]  ;;  %v794_v17 = vpack.c.bf16 %v606_v6, %v602_v4  ;;  %v635_v54 = vld [vmem:[%s2695_s0 + $0x510] sm:$0xff]  ;;  %v779_v62 = vpack.c.bf16 %v575_v53, %v571_v50  ;;  %v660_v50 = vld [vmem:[%s2695_s0 + $0x5d8] sm:$0xff] }
  0xbb   : > { %962 = vmatpush.bf16.msrb.mxu3 %v838_v39  ;;  %937 = vmatpush.bf16.msrb.mxu1 %v770_v46  ;;  %v670_v8 = vld [vmem:[%s2695_s0 + $0x628] sm:$0xff]  ;;  %v851_v39 = vpack.c.bf16 %v719_v32, %v715_v31  ;;  %v783_v46 = vpack.c.bf16 %v583_v40, %v579_v38  ;;  %v639_v55 = vld [vmem:[%s2695_s0 + $0x530] sm:$0xff] }
  0xbc   : > { %v826_v20 = vpack.c.bf16 %v670_v8, %v666_v7  ;;  %v699_v56 = vld [vmem:[%s2695_s0 + $0x710] sm:$0xff]  ;;  %v811_v63 = vpack.c.bf16 %v639_v55, %v635_v54  ;;  %v724_v55 = vld [vmem:[%s2695_s0 + $0x7d8] sm:$0xff] }
  0xbd   : > { %950 = vmatpush.bf16.msrb.mxu2 %v802_v47  ;;  %925 = vmatpush.bf16.msrb.mxu0 %v734_v60  ;;  %v815_v47 = vpack.c.bf16 %v647_v42, %v643_v41  ;;  %v703_v57 = vld [vmem:[%s2695_s0 + $0x730] sm:$0xff]  ;;  %v747_v60 = vpack.c.bf16 %v511_v49, %v507_v48  ;;  %v600_v49 = vld [vmem:[%s2695_s0 + $0x3f8] sm:$0xff] }
  0xbe   : > { %v563_v2 = vld [vmem:[%s2695_s0 + $0x2d0] sm:$0xff]  ;;  %v843_v3 = vpack.c.bf16 %v703_v57, %v699_v56  ;;  %v728_v56 = vld [vmem:[%s2695_s0 + $0x7f8] sm:$0xff] }
  0xbf   : > { %963 = vmatpush.bf16.msrb.mxu3 %v834_v51  ;;  %938 = vmatpush.bf16.msrb.mxu1 %v766_v0  ;;  %v847_v51 = vpack.c.bf16 %v711_v44, %v707_v43  ;;  %v499_v0 = vld [vmem:[%s2695_s0 + $0xd0] sm:$0xff] }
  0xc0   : > { %v567_v4 = vld [vmem:[%s2695_s0 + $0x2f0] sm:$0xff] }
  0xc1   : > { %951 = vmatpush.bf16.msrb.mxu2 %v798_v1  ;;  %926 = vmatpush.bf16.msrb.mxu0 %v730_v12  ;;  %v503_v1 = vld [vmem:[%s2695_s0 + $0xf0] sm:$0xff]  ;;  %v775_v10 = vpack.c.bf16 %v567_v4, %v563_v2  ;;  %v588_v2 = vld [vmem:[%s2695_s0 + $0x398] sm:$0xff] }
  0xc2   : > { %v631_v6 = vld [vmem:[%s2695_s0 + $0x4f0] sm:$0xff]  ;;  %v743_v9 = vpack.c.bf16 %v503_v1, %v499_v0  ;;  %v524_v0 = vld [vmem:[%s2695_s0 + $0x198] sm:$0xff] }
  0xc3   : > { %964 = vmatpush.bf16.msrb.mxu3 %v830_v5  ;;  %939 = vmatpush.bf16.msrb.mxu1 %v762_v16  ;;  %v627_v5 = vld [vmem:[%s2695_s0 + $0x4d0] sm:$0xff]  ;;  %v528_v1 = vld [vmem:[%s2695_s0 + $0x1b8] sm:$0xff] }
  0xc4   : > { %927 = vmatmul.bf16.vlgmr.msrb.gmra.mxu0 %v2817_v58  ;;  %v691_v7 = vld [vmem:[%s2695_s0 + $0x6d0] sm:$0xff]  ;;  %v807_v11 = vpack.c.bf16 %v631_v6, %v627_v5  ;;  %v592_v4 = vld [vmem:[%s2695_s0 + $0x3b8] sm:$0xff] }
  0xc5   : > { %952 = vmatpush.bf16.msrb.mxu2 %v794_v17  ;;  %971 = vmatpush.bf16.msra.mxu0 %v759_v21  ;;  %v695_v8 = vld [vmem:[%s2695_s0 + $0x6f0] sm:$0xff]  ;;  %v652_v5 = vld [vmem:[%s2695_s0 + $0x598] sm:$0xff] }
  0xc6   : > { %940 = vmatmul.bf16.vlgmr.msrb.gmra.mxu1 %v2821_v61  ;;  %v491_v12 = vld [vmem:[%s2695_s0 + $0x90] sm:$0xff]  ;;  %v839_v15 = vpack.c.bf16 %v695_v8, %v691_v7  ;;  %v656_v6 = vld [vmem:[%s2695_s0 + $0x5b8] sm:$0xff] }
  0xc7   : > { %965 = vmatpush.bf16.msrb.mxu3 %v826_v20  ;;  %984 = vmatpush.bf16.msra.mxu1 %v791_v22  ;;  %v495_v13 = vld [vmem:[%s2695_s0 + $0xb0] sm:$0xff]  ;;  %v716_v7 = vld [vmem:[%s2695_s0 + $0x798] sm:$0xff] }
  0xc8   : > { %953 = vmatmul.bf16.vlgmr.msrb.gmra.mxu2 %v2810_v52  ;;  %v555_v14 = vld [vmem:[%s2695_s0 + $0x290] sm:$0xff]  ;;  %v739_v21 = vpack.c.bf16 %v495_v13, %v491_v12  ;;  %v720_v8 = vld [vmem:[%s2695_s0 + $0x7b8] sm:$0xff] }
  0xc9   : > { %997 = vmatpush.bf16.msra.mxu2 %v823_v23  ;;  %972 = vmatpush.bf16.msra.mxu0 %v755_v33  ;;  %v559_v16 = vld [vmem:[%s2695_s0 + $0x2b0] sm:$0xff]  ;;  %v516_v12 = vld [vmem:[%s2695_s0 + $0x158] sm:$0xff] }
  0xca   : > { %966 = vmatmul.bf16.vlgmr.msrb.gmra.mxu3 %v2819_v59  ;;  %v619_v17 = vld [vmem:[%s2695_s0 + $0x490] sm:$0xff]  ;;  %v771_v22 = vpack.c.bf16 %v559_v16, %v555_v14  ;;  %v520_v13 = vld [vmem:[%s2695_s0 + $0x178] sm:$0xff] }
  0xcb   : > { %1010 = vmatpush.bf16.msra.mxu3 %v855_v27  ;;  %985 = vmatpush.bf16.msra.mxu1 %v787_v34  ;;  %v623_v18 = vld [vmem:[%s2695_s0 + $0x4b0] sm:$0xff]  ;;  %v580_v14 = vld [vmem:[%s2695_s0 + $0x358] sm:$0xff] }
  0xcc   : > { %v683_v19 = vld [vmem:[%s2695_s0 + $0x690] sm:$0xff]  ;;  %v803_v23 = vpack.c.bf16 %v623_v18, %v619_v17  ;;  %v584_v16 = vld [vmem:[%s2695_s0 + $0x378] sm:$0xff] }
  0xcd   : > { %998 = vmatpush.bf16.msra.mxu2 %v819_v35  ;;  %973 = vmatpush.bf16.msra.mxu0 %v751_v45  ;;  %v687_v20 = vld [vmem:[%s2695_s0 + $0x6b0] sm:$0xff]  ;;  %v532_v45 = vld [vmem:[%s2695_s0 + $0x1d8] sm:$0xff] }
  0xce   : > { %v483_v24 = vld [vmem:[%s2695_s0 + $0x50] sm:$0xff]  ;;  %v835_v27 = vpack.c.bf16 %v687_v20, %v683_v19  ;;  %v644_v17 = vld [vmem:[%s2695_s0 + $0x558] sm:$0xff] }
  0xcf   : > { %1011 = vmatpush.bf16.msra.mxu3 %v851_v39  ;;  %986 = vmatpush.bf16.msra.mxu1 %v783_v46  ;;  %v487_v25 = vld [vmem:[%s2695_s0 + $0x70] sm:$0xff]  ;;  %v536_v46 = vld [vmem:[%s2695_s0 + $0x1f8] sm:$0xff] }
  0xd0   : > { %v547_v26 = vld [vmem:[%s2695_s0 + $0x250] sm:$0xff]  ;;  %v735_v33 = vpack.c.bf16 %v487_v25, %v483_v24  ;;  %v648_v18 = vld [vmem:[%s2695_s0 + $0x578] sm:$0xff] }
  0xd1   : > { %999 = vmatpush.bf16.msra.mxu2 %v815_v47  ;;  %974 = vmatpush.bf16.msra.mxu0 %v747_v60  ;;  %v551_v28 = vld [vmem:[%s2695_s0 + $0x270] sm:$0xff]  ;;  %v596_v47 = vld [vmem:[%s2695_s0 + $0x3d8] sm:$0xff]  ;;  %v760_v60 = vpack.c.bf16 %v536_v46, %v532_v45 }
  0xd2   : > { %v611_v29 = vld [vmem:[%s2695_s0 + $0x450] sm:$0xff]  ;;  %v767_v36 = vpack.c.bf16 %v551_v28, %v547_v26  ;;  %v708_v19 = vld [vmem:[%s2695_s0 + $0x758] sm:$0xff] }
  0xd3   : > { %1012 = vmatpush.bf16.msra.mxu3 %v847_v51  ;;  %987 = vmatpush.bf16.msra.mxu1 %v779_v62  ;;  %v615_v30 = vld [vmem:[%s2695_s0 + $0x470] sm:$0xff]  ;;  %v664_v51 = vld [vmem:[%s2695_s0 + $0x5f8] sm:$0xff]  ;;  %v792_v62 = vpack.c.bf16 %v600_v49, %v596_v47 }
  0xd4   : > { %v675_v31 = vld [vmem:[%s2695_s0 + $0x650] sm:$0xff]  ;;  %v799_v37 = vpack.c.bf16 %v615_v30, %v611_v29  ;;  %v712_v20 = vld [vmem:[%s2695_s0 + $0x778] sm:$0xff] }
  0xd5   : > { %1000 = vmatpush.bf16.msra.mxu2 %v811_v63  ;;  %975 = vmatpush.bf16.msra.mxu0 %v743_v9  ;;  %v679_v32 = vld [vmem:[%s2695_s0 + $0x670] sm:$0xff]  ;;  %v824_v63 = vpack.c.bf16 %v664_v51, %v660_v50  ;;  %v756_v9 = vpack.c.bf16 %v528_v1, %v524_v0  ;;  %v508_v24 = vld [vmem:[%s2695_s0 + $0x118] sm:$0xff] }
  0xd6   : > { %v475_v34 = vld [vmem:[%s2695_s0 + $0x10] sm:$0xff]  ;;  %v831_v41 = vpack.c.bf16 %v679_v32, %v675_v31  ;;  %v512_v25 = vld [vmem:[%s2695_s0 + $0x138] sm:$0xff] }
  0xd7   : > { %1013 = vmatpush.bf16.msra.mxu3 %v843_v3  ;;  %988 = vmatpush.bf16.msra.mxu1 %v775_v10  ;;  %v479_v35 = vld [vmem:[%s2695_s0 + $0x30] sm:$0xff]  ;;  %v856_v3 = vpack.c.bf16 %v728_v56, %v724_v55  ;;  %v788_v10 = vpack.c.bf16 %v592_v4, %v588_v2  ;;  %v572_v26 = vld [vmem:[%s2695_s0 + $0x318] sm:$0xff] }
  0xd8   : > { %v539_v38 = vld [vmem:[%s2695_s0 + $0x210] sm:$0xff]  ;;  %v731_v48 = vpack.c.bf16 %v479_v35, %v475_v34  ;;  %v576_v28 = vld [vmem:[%s2695_s0 + $0x338] sm:$0xff] }
  0xd9   : > { %1001 = vmatpush.bf16.msra.mxu2 %v807_v11  ;;  %976 = vmatpush.bf16.msra.mxu0 %v739_v21  ;;  %v543_v39 = vld [vmem:[%s2695_s0 + $0x230] sm:$0xff]  ;;  %v820_v11 = vpack.c.bf16 %v656_v6, %v652_v5  ;;  %v752_v21 = vpack.c.bf16 %v520_v13, %v516_v12  ;;  %v636_v29 = vld [vmem:[%s2695_s0 + $0x518] sm:$0xff]  ;;  %v780_v34 = vpack.c.bf16 %v576_v28, %v572_v26 }
  0xda   : > { %v603_v40 = vld [vmem:[%s2695_s0 + $0x410] sm:$0xff]  ;;  %v763_v53 = vpack.c.bf16 %v543_v39, %v539_v38  ;;  %v640_v30 = vld [vmem:[%s2695_s0 + $0x538] sm:$0xff] }
  0xdb   : > { %1014 = vmatpush.bf16.msra.mxu3 %v839_v15  ;;  %989 = vmatpush.bf16.msra.mxu1 %v771_v22  ;;  %v607_v42 = vld [vmem:[%s2695_s0 + $0x430] sm:$0xff]  ;;  %v852_v15 = vpack.c.bf16 %v720_v8, %v716_v7  ;;  %v784_v22 = vpack.c.bf16 %v584_v16, %v580_v14  ;;  %v700_v31 = vld [vmem:[%s2695_s0 + $0x718] sm:$0xff]  ;;  %v812_v35 = vpack.c.bf16 %v640_v30, %v636_v29  ;;  %v1135_v30 = vld [vmem:[%s2708_s8 + $0x180] sm:$0xff] }
  0xdc   : > { %v667_v43 = vld [vmem:[%s2695_s0 + $0x610] sm:$0xff]  ;;  %v795_v54 = vpack.c.bf16 %v607_v42, %v603_v40  ;;  %v704_v32 = vld [vmem:[%s2695_s0 + $0x738] sm:$0xff] }
  0xdd   : > { %1002 = vmatpush.bf16.msra.mxu2 %v803_v23  ;;  %v671_v44 = vld [vmem:[%s2695_s0 + $0x630] sm:$0xff]  ;;  %977 = vmatpush.bf16.msra.mxu0 %v735_v33  ;;  %v816_v23 = vpack.c.bf16 %v648_v18, %v644_v17  ;;  %v748_v33 = vpack.c.bf16 %v512_v25, %v508_v24  ;;  %v564_v38 = vld [vmem:[%s2695_s0 + $0x2d8] sm:$0xff]  ;;  %v844_v39 = vpack.c.bf16 %v704_v32, %v700_v31  ;;  %v1207_v24 = vld [vmem:[%s2708_s8 + $0x3c0] sm:$0xff] }
  0xde   : > { %v827_v57 = vpack.c.bf16 %v671_v44, %v667_v43  ;;  %v568_v40 = vld [vmem:[%s2695_s0 + $0x2f8] sm:$0xff]  ;;  %v1211_v25 = vld [vmem:[%s2708_s8 + $0x3e0] sm:$0xff] }
  0xdf   : > { %1015 = vmatpush.bf16.msra.mxu3 %v835_v27  ;;  %990 = vmatpush.bf16.msra.mxu1 %v767_v36  ;;  %v848_v27 = vpack.c.bf16 %v712_v20, %v708_v19  ;;  %v500_v36 = vld [vmem:[%s2695_s0 + $0xd8] sm:$0xff]  ;;  %v776_v46 = vpack.c.bf16 %v568_v40, %v564_v38  ;;  %v1139_v31 = vld [vmem:[%s2708_s8 + $0x1a0] sm:$0xff]  ;;  %v1403_v32 = vpack.c.bf16 %v1211_v25, %v1207_v24  ;;  %v1204_v24 = vld [vmem:[%s2708_s8 + $0x3a8] sm:$0xff] }
  0xe0   : > { %v632_v42 = vld [vmem:[%s2695_s0 + $0x4f8] sm:$0xff]  ;;  %v1195_v40 = vld [vmem:[%s2708_s8 + $0x360] sm:$0xff] }
  0xe1   : > { %1003 = vmatpush.bf16.msra.mxu2 %v799_v37  ;;  %978 = vmatpush.bf16.msra.mxu0 %v731_v48  ;;  %v504_v37 = vld [vmem:[%s2695_s0 + $0xf8] sm:$0xff] }
  0xe2   : > { %v692_v43 = vld [vmem:[%s2695_s0 + $0x6d8] sm:$0xff]  ;;  %v744_v45 = vpack.c.bf16 %v504_v37, %v500_v36  ;;  %v1127_v36 = vld [vmem:[%s2708_s8 + $0x140] sm:$0xff] }
  0xe3   : > { %1016 = vmatpush.bf16.msra.mxu3 %v831_v41  ;;  %991 = vmatpush.bf16.msra.mxu1 %v763_v53  ;;  %v628_v41 = vld [vmem:[%s2695_s0 + $0x4d8] sm:$0xff]  ;;  %v1131_v37 = vld [vmem:[%s2708_s8 + $0x160] sm:$0xff] }
  0xe4   : > { %979 = vmatmul.bf16.vlgmr.msra.gmra.mxu0 %v2817_v58  ;;  %v696_v44 = vld [vmem:[%s2695_s0 + $0x6f8] sm:$0xff]  ;;  %v808_v47 = vpack.c.bf16 %v632_v42, %v628_v41  ;;  %v1119_v41 = vld [vmem:[%s2708_s8 + $0x100] sm:$0xff] }
  0xe5   : > { %1004 = vmatpush.bf16.msra.mxu2 %v795_v54  ;;  %1023 = vmatpush.bf16.msrb.mxu0 %v760_v60  ;;  %v492_v48 = vld [vmem:[%s2695_s0 + $0x98] sm:$0xff]  ;;  %v840_v51 = vpack.c.bf16 %v696_v44, %v692_v43  ;;  %v1123_v42 = vld [vmem:[%s2708_s8 + $0x120] sm:$0xff] }
  0xe6   : > { %992 = vmatmul.bf16.vlgmr.msra.gmra.mxu1 %v2821_v61  ;;  %v496_v49 = vld [vmem:[%s2695_s0 + $0xb8] sm:$0xff]  ;;  %v1183_v44 = vld [vmem:[%s2708_s8 + $0x300] sm:$0xff] }
  0xe7   : > { %1017 = vmatpush.bf16.msra.mxu3 %v827_v57  ;;  %1036 = vmatpush.bf16.msrb.mxu1 %v792_v62  ;;  %v556_v50 = vld [vmem:[%s2695_s0 + $0x298] sm:$0xff]  ;;  %v740_v60 = vpack.c.bf16 %v496_v49, %v492_v48  ;;  %v1179_v48 = vld [vmem:[%s2708_s8 + $0x2e0] sm:$0xff] }
  0xe8   : > { %1005 = vmatmul.bf16.vlgmr.msra.gmra.mxu2 %v2810_v52  ;;  %v560_v53 = vld [vmem:[%s2695_s0 + $0x2b8] sm:$0xff] }
  0xe9   : > { %1049 = vmatpush.bf16.msrb.mxu2 %v824_v63  ;;  %1024 = vmatpush.bf16.msrb.mxu0 %v756_v9  ;;  %v620_v54 = vld [vmem:[%s2695_s0 + $0x498] sm:$0xff]  ;;  %v772_v62 = vpack.c.bf16 %v560_v53, %v556_v50  ;;  %v1103_v50 = vld [vmem:[%s2708_s8 + $0x80] sm:$0xff] }
  0xea   : > { %1018 = vmatmul.bf16.vlgmr.msra.gmra.mxu3 %v2819_v59  ;;  %v624_v55 = vld [vmem:[%s2695_s0 + $0x4b8] sm:$0xff] }
  0xeb   : > { %1062 = vmatpush.bf16.msrb.mxu3 %v856_v3  ;;  %1037 = vmatpush.bf16.msrb.mxu1 %v788_v10  ;;  %v684_v56 = vld [vmem:[%s2695_s0 + $0x698] sm:$0xff]  ;;  %v804_v63 = vpack.c.bf16 %v624_v55, %v620_v54  ;;  %v1167_v54 = vld [vmem:[%s2708_s8 + $0x280] sm:$0xff] }
  0xec   : > { %v688_v57 = vld [vmem:[%s2695_s0 + $0x6b8] sm:$0xff]  ;;  %v1171_v55 = vld [vmem:[%s2708_s8 + $0x2a0] sm:$0xff] }
  0xed   : > { %1050 = vmatpush.bf16.msrb.mxu2 %v820_v11  ;;  %1025 = vmatpush.bf16.msrb.mxu0 %v752_v21  ;;  %v484_v0 = vld [vmem:[%s2695_s0 + $0x58] sm:$0xff]  ;;  %v836_v3 = vpack.c.bf16 %v688_v57, %v684_v56  ;;  %v1143_v21 = vld [vmem:[%s2708_s8 + $0x1c0] sm:$0xff] }
  0xee   : > { %v488_v1 = vld [vmem:[%s2695_s0 + $0x78] sm:$0xff]  ;;  %v1095_v57 = vld [vmem:[%s2708_s8 + $0x40] sm:$0xff] }
  0xef   : > { %1063 = vmatpush.bf16.msrb.mxu3 %v852_v15  ;;  %1038 = vmatpush.bf16.msrb.mxu1 %v784_v22  ;;  %v548_v2 = vld [vmem:[%s2695_s0 + $0x258] sm:$0xff]  ;;  %v736_v9 = vpack.c.bf16 %v488_v1, %v484_v0  ;;  %v1147_v22 = vld [vmem:[%s2708_s8 + $0x1e0] sm:$0xff] }
  0xf0   : > { %v552_v4 = vld [vmem:[%s2695_s0 + $0x278] sm:$0xff]  ;;  %v1371_v29 = vpack.c.bf16 %v1147_v22, %v1143_v21  ;;  %v1163_v0 = vld [vmem:[%s2708_s8 + $0x260] sm:$0xff] }
  0xf1   : > { %1051 = vmatpush.bf16.msrb.mxu2 %v816_v23  ;;  %1026 = vmatpush.bf16.msrb.mxu0 %v748_v33  ;;  %v612_v5 = vld [vmem:[%s2695_s0 + $0x458] sm:$0xff]  ;;  %v768_v11 = vpack.c.bf16 %v552_v4, %v548_v2  ;;  %v1199_v33 = vld [vmem:[%s2708_s8 + $0x380] sm:$0xff]  ;;  %v1144_v4 = vld [vmem:[%s2708_s8 + $0x1c8] sm:$0xff] }
  0xf2   : > { %v616_v6 = vld [vmem:[%s2695_s0 + $0x478] sm:$0xff]  ;;  %v1087_v2 = vld [vmem:[%s2708_s8] sm:$0xff] }
  0xf3   : > { %1064 = vmatpush.bf16.msrb.mxu3 %v848_v27  ;;  %1039 = vmatpush.bf16.msrb.mxu1 %v780_v34  ;;  %v676_v7 = vld [vmem:[%s2695_s0 + $0x658] sm:$0xff]  ;;  %v800_v12 = vpack.c.bf16 %v616_v6, %v612_v5  ;;  %v1203_v34 = vld [vmem:[%s2708_s8 + $0x3a0] sm:$0xff] }
  0xf4   : > { %v680_v8 = vld [vmem:[%s2695_s0 + $0x678] sm:$0xff]  ;;  %v1399_v38 = vpack.c.bf16 %v1203_v34, %v1199_v33  ;;  %v1271_v6 = vld [vmem:[%s2708_s8 + $0x5c0] sm:$0xff]  ;;  %v1196_v33 = vld [vmem:[%s2708_s8 + $0x368] sm:$0xff] }
  0xf5   : > { %1052 = vmatpush.bf16.msrb.mxu2 %v812_v35  ;;  %1027 = vmatpush.bf16.msrb.mxu0 %v744_v45  ;;  %v476_v10 = vld [vmem:[%s2695_s0 + $0x18] sm:$0xff]  ;;  %v832_v16 = vpack.c.bf16 %v680_v8, %v676_v7  ;;  %v1367_v35 = vpack.c.bf16 %v1139_v31, %v1135_v30  ;;  %v1111_v45 = vld [vmem:[%s2708_s8 + $0xc0] sm:$0xff]  ;;  %v1148_v8 = vld [vmem:[%s2708_s8 + $0x1e8] sm:$0xff] }
  0xf6   : > { %v480_v13 = vld [vmem:[%s2695_s0 + $0x38] sm:$0xff]  ;;  %v1275_v7 = vld [vmem:[%s2708_s8 + $0x5e0] sm:$0xff]  ;;  %v3066_v34 = vld [vmem:[%s2702_s5] sm:$0xf] }
  0xf7   : > { %1065 = vmatpush.bf16.msrb.mxu3 %v844_v39  ;;  %1040 = vmatpush.bf16.msrb.mxu1 %v776_v46  ;;  %v540_v14 = vld [vmem:[%s2695_s0 + $0x218] sm:$0xff]  ;;  %v732_v23 = vpack.c.bf16 %v480_v13, %v476_v10  ;;  %v1191_v39 = vld [vmem:[%s2708_s8 + $0x340] sm:$0xff]  ;;  %v1212_v13 = vld [vmem:[%s2708_s8 + $0x3e8] sm:$0xff] }
  0xf8   : > { %v544_v15 = vld [vmem:[%s2695_s0 + $0x238] sm:$0xff]  ;;  %v1395_v43 = vpack.c.bf16 %v1195_v40, %v1191_v39  ;;  %v1115_v46 = vld [vmem:[%s2708_s8 + $0xe0] sm:$0xff]  ;;  %v1124_v39 = vld [vmem:[%s2708_s8 + $0x128] sm:$0xff] }
  0xf9   : > { %1053 = vmatpush.bf16.msrb.mxu2 %v808_v47  ;;  %1028 = vmatpush.bf16.msrb.mxu0 %v740_v60  ;;  %v604_v17 = vld [vmem:[%s2695_s0 + $0x418] sm:$0xff]  ;;  %v764_v26 = vpack.c.bf16 %v544_v15, %v540_v14  ;;  %v1175_v47 = vld [vmem:[%s2708_s8 + $0x2c0] sm:$0xff]  ;;  %v1355_v49 = vpack.c.bf16 %v1115_v46, %v1111_v45  ;;  %v1372_v15 = vpack.c.bf16 %v1148_v8, %v1144_v4  ;;  %v1112_v46 = vld [vmem:[%s2708_s8 + $0xc8] sm:$0xff] }
  0xfa   : > { %v608_v18 = vld [vmem:[%s2695_s0 + $0x438] sm:$0xff]  ;;  %v1387_v53 = vpack.c.bf16 %v1179_v48, %v1175_v47  ;;  %v1099_v60 = vld [vmem:[%s2708_s8 + $0x60] sm:$0xff] }
  0xfb   : > { %1066 = vmatpush.bf16.msrb.mxu3 %v840_v51  ;;  %1041 = vmatpush.bf16.msrb.mxu1 %v772_v62  ;;  %v668_v19 = vld [vmem:[%s2695_s0 + $0x618] sm:$0xff]  ;;  %v796_v27 = vpack.c.bf16 %v608_v18, %v604_v17  ;;  %v1107_v51 = vld [vmem:[%s2708_s8 + $0xa0] sm:$0xff]  ;;  %v1383_v62 = vpack.c.bf16 %v1171_v55, %v1167_v54  ;;  %v1347_v1 = vpack.c.bf16 %v1099_v60, %v1095_v57  ;;  %v1104_v60 = vld [vmem:[%s2708_s8 + $0x88] sm:$0xff] }
  0xfc   : > { %v672_v20 = vld [vmem:[%s2695_s0 + $0x638] sm:$0xff]  ;;  %v1351_v56 = vpack.c.bf16 %v1107_v51, %v1103_v50  ;;  %v1155_v10 = vld [vmem:[%s2708_s8 + $0x220] sm:$0xff]  ;;  %v1176_v51 = vld [vmem:[%s2708_s8 + $0x2c8] sm:$0xff] }
  0xfd   : > { %1054 = vmatpush.bf16.msrb.mxu2 %v804_v63  ;;  %1029 = vmatpush.bf16.msrb.mxu0 %v736_v9  ;;  %v828_v28 = vpack.c.bf16 %v672_v20, %v668_v19  ;;  %v1159_v63 = vld [vmem:[%s2708_s8 + $0x240] sm:$0xff]  ;;  %v1136_v19 = vld [vmem:[%s2708_s8 + $0x188] sm:$0xff] }
  0xfe   : > { %v1379_v5 = vpack.c.bf16 %v1163_v0, %v1159_v63  ;;  %v1151_v9 = vld [vmem:[%s2708_s8 + $0x200] sm:$0xff]  ;;  %v1140_v20 = vld [vmem:[%s2708_s8 + $0x1a8] sm:$0xff] }
  0xff   : > { %1067 = vmatpush.bf16.msrb.mxu3 %v836_v3  ;;  %1042 = vmatpush.bf16.msrb.mxu1 %v768_v11  ;;  %v1091_v3 = vld [vmem:[%s2708_s8 + $0x20] sm:$0xff]  ;;  %v1435_v11 = vpack.c.bf16 %v1275_v7, %v1271_v6  ;;  %v1368_v25 = vpack.c.bf16 %v1140_v20, %v1136_v19  ;;  %v1088_v19 = vld [vmem:[%s2708_s8 + $0x8] sm:$0xff] }
 0x100   : > { %v1343_v14 = vpack.c.bf16 %v1091_v3, %v1087_v2  ;;  %v1263_v17 = vld [vmem:[%s2708_s8 + $0x580] sm:$0xff]  ;;  %v1168_v2 = vld [vmem:[%s2708_s8 + $0x288] sm:$0xff] }
 0x101   : > { %1055 = vmatpush.bf16.msrb.mxu2 %v800_v12  ;;  %1030 = vmatpush.bf16.msrb.mxu0 %v732_v23  ;;  %v1208_v12 = vld [vmem:[%s2708_s8 + $0x3c8] sm:$0xff]  ;;  %v1267_v18 = vld [vmem:[%s2708_s8 + $0x5a0] sm:$0xff] }
 0x102   : > { %v1404_v21 = vpack.c.bf16 %v1212_v13, %v1208_v12  ;;  %v1431_v22 = vpack.c.bf16 %v1267_v18, %v1263_v17  ;;  %v1200_v23 = vld [vmem:[%s2708_s8 + $0x388] sm:$0xff]  ;;  %v1235_v57 = vld [vmem:[%s2708_s8 + $0x4a0] sm:$0xff] }
 0x103   : > { %1068 = vmatpush.bf16.msrb.mxu3 %v832_v16  ;;  %1043 = vmatpush.bf16.msrb.mxu1 %v764_v26  ;;  %v1375_v16 = vpack.c.bf16 %v1155_v10, %v1151_v9  ;;  %v1255_v26 = vld [vmem:[%s2708_s8 + $0x540] sm:$0xff]  ;;  %v1400_v30 = vpack.c.bf16 %v1204_v24, %v1200_v23  ;;  %v1172_v3 = vld [vmem:[%s2708_s8 + $0x2a8] sm:$0xff]  ;;  %v1149_v23 = vld [vmem:[%s2708_s8 + $0x1f0] sm:$0xff] }
 0x104   : > { %1031 = vmatmul.bf16.vlgmr.msrb.gmra.mxu0 %v2817_v58  ;;  %v1363_v58 = vpack.c.bf16 %v1131_v37, %v1127_v36  ;;  %v1247_v36 = vld [vmem:[%s2708_s8 + $0x500] sm:$0xff]  ;;  %v1096_v10 = vld [vmem:[%s2708_s8 + $0x48] sm:$0xff]  ;;  %v1384_v13 = vpack.c.bf16 %v1172_v3, %v1168_v2 }
 0x105   : > { %1056 = vmatpush.bf16.msrb.mxu2 %v796_v27  ;;  %1471 = vmatpush.bf16.msra.mxu0 %v1371_v29  ;;  %v1259_v27 = vld [vmem:[%s2708_s8 + $0x560] sm:$0xff]  ;;  %v1132_v29 = vld [vmem:[%s2708_s8 + $0x168] sm:$0xff] }
 0x106   : > { %1044 = vmatmul.bf16.vlgmr.msrb.gmra.mxu1 %v2821_v61  ;;  %v1187_v61 = vld [vmem:[%s2708_s8 + $0x320] sm:$0xff]  ;;  %v1427_v31 = vpack.c.bf16 %v1259_v27, %v1255_v26  ;;  %v1164_v17 = vld [vmem:[%s2708_s8 + $0x268] sm:$0xff] }
 0x107   : > { %1069 = vmatpush.bf16.msrb.mxu3 %v828_v28  ;;  %1484 = vmatpush.bf16.msra.mxu1 %v1403_v32  ;;  %v1128_v28 = vld [vmem:[%s2708_s8 + $0x148] sm:$0xff]  ;;  %v1251_v37 = vld [vmem:[%s2708_s8 + $0x520] sm:$0xff] }
 0x108   : > { %1057 = vmatmul.bf16.vlgmr.msrb.gmra.mxu2 %v2810_v52  ;;  %v1359_v52 = vpack.c.bf16 %v1123_v42, %v1119_v41  ;;  %v1192_v32 = vld [vmem:[%s2708_s8 + $0x348] sm:$0xff]  ;;  %v859_v41 = vperm.slane %v3066_v34, 0  ;;  %v1223_v7 = vld [vmem:[%s2708_s8 + $0x440] sm:$0xff] }
 0x109   : > { %1472 = vmatpush.bf16.msra.mxu0 %v1367_v35  ;;  %1497 = vmatpush.bf16.msra.mxu2 %v1435_v11  ;;  %v1364_v35 = vpack.c.bf16 %v1132_v29, %v1128_v28  ;;  %v1396_v40 = vpack.c.bf16 %v1196_v33, %v1192_v32  ;;  %v1184_v42 = vld [vmem:[%s2708_s8 + $0x308] sm:$0xff]  ;;  %v1227_v8 = vld [vmem:[%s2708_s8 + $0x460] sm:$0xff] }
 0x10a   : > { %1070 = vmatmul.bf16.vlgmr.msrb.gmra.mxu3 %v2819_v59  ;;  %v1391_v59 = vpack.c.bf16 %v1187_v61, %v1183_v44  ;;  %v1239_v61 = vld [vmem:[%s2708_s8 + $0x4c0] sm:$0xff]  ;;  %v1100_v11 = vld [vmem:[%s2708_s8 + $0x68] sm:$0xff] }
 0x10b   : > { %1485 = vmatpush.bf16.msra.mxu1 %v1399_v38  ;;  %v1120_v38 = vld [vmem:[%s2708_s8 + $0x108] sm:$0xff]  ;;  %v1215_v24 = vld [vmem:[%s2708_s8 + $0x400] sm:$0xff] }
 0x10c   : > { %v1360_v44 = vpack.c.bf16 %v1124_v39, %v1120_v38  ;;  %v1092_v20 = vld [vmem:[%s2708_s8 + $0x28] sm:$0xff] }
 0x10d   : > { %1473 = vmatpush.bf16.msra.mxu0 %v1363_v58  ;;  %1498 = vmatpush.bf16.msra.mxu2 %v1431_v22  ;;  %v1423_v58 = vpack.c.bf16 %v1251_v37, %v1247_v36  ;;  %v1145_v22 = vld [vmem:[%s2708_s8 + $0x1d0] sm:$0xff]  ;;  %v1152_v29 = vld [vmem:[%s2708_s8 + $0x208] sm:$0xff] }
 0x10e   : > { %v1156_v33 = vld [vmem:[%s2708_s8 + $0x228] sm:$0xff] }
 0x10f   : > { %1486 = vmatpush.bf16.msra.mxu1 %v1395_v43  ;;  %v1188_v43 = vld [vmem:[%s2708_s8 + $0x328] sm:$0xff] }
 0x110   : > { %v1392_v47 = vpack.c.bf16 %v1188_v43, %v1184_v42  ;;  %v1272_v36 = vld [vmem:[%s2708_s8 + $0x5c8] sm:$0xff]  ;;  %v1327_v42 = vld [vmem:[%s2708_s8 + $0x780] sm:$0xff] }
 0x111   : > { %1474 = vmatpush.bf16.msra.mxu0 %v1359_v52  ;;  %1499 = vmatpush.bf16.msra.mxu2 %v1427_v31  ;;  %v1243_v52 = vld [vmem:[%s2708_s8 + $0x4e0] sm:$0xff]  ;;  %v1276_v37 = vld [vmem:[%s2708_s8 + $0x5e8] sm:$0xff] }
 0x112   : > { %v1419_v48 = vpack.c.bf16 %v1243_v52, %v1239_v61  ;;  %v1339_v31 = vld [vmem:[%s2708_s8 + $0x7e0] sm:$0xff]  ;;  %v1436_v39 = vpack.c.bf16 %v1276_v37, %v1272_v36  ;;  %v1137_v61 = vld [vmem:[%s2708_s8 + $0x190] sm:$0xff]  ;;  %v1252_v3 = vld [vmem:[%s2708_s8 + $0x528] sm:$0xff] }
 0x113   : > { %1487 = vmatpush.bf16.msra.mxu1 %v1391_v59  ;;  %v1116_v59 = vld [vmem:[%s2708_s8 + $0xe8] sm:$0xff]  ;;  %v1331_v43 = vld [vmem:[%s2708_s8 + $0x7a0] sm:$0xff]  ;;  %v1141_v52 = vld [vmem:[%s2708_s8 + $0x1b0] sm:$0xff] }
 0x114   : > { %v1356_v54 = vpack.c.bf16 %v1116_v59, %v1112_v46  ;;  %v1268_v46 = vld [vmem:[%s2708_s8 + $0x5a8] sm:$0xff]  ;;  %v1097_v37 = vld [vmem:[%s2708_s8 + $0x50] sm:$0xff] }
 0x115   : > { %1475 = vmatpush.bf16.msra.mxu0 %v1355_v49  ;;  %1500 = vmatpush.bf16.msra.mxu2 %v1423_v58  ;;  %v1373_v58 = vpack.c.bf16 %v1149_v23, %v1145_v22  ;;  %v1105_v23 = vld [vmem:[%s2708_s8 + $0x90] sm:$0xff]  ;;  %v1224_v36 = vld [vmem:[%s2708_s8 + $0x448] sm:$0xff] }
 0x117   : > { %1488 = vmatpush.bf16.msra.mxu1 %v1387_v53  ;;  %v1180_v53 = vld [vmem:[%s2708_s8 + $0x2e8] sm:$0xff] }
 0x118   : > { %v1388_v63 = vpack.c.bf16 %v1180_v53, %v1176_v51  ;;  %v1129_v51 = vld [vmem:[%s2708_s8 + $0x150] sm:$0xff] }
 0x119   : > { %1476 = vmatpush.bf16.msra.mxu0 %v1351_v56  ;;  %1501 = vmatpush.bf16.msra.mxu2 %v1419_v48  ;;  %v1231_v56 = vld [vmem:[%s2708_s8 + $0x480] sm:$0xff]  ;;  %v1133_v53 = vld [vmem:[%s2708_s8 + $0x170] sm:$0xff] }
 0x11a   : > { %v1415_v0 = vpack.c.bf16 %v1235_v57, %v1231_v56  ;;  %v1319_v48 = vld [vmem:[%s2708_s8 + $0x740] sm:$0xff]  ;;  %v1365_v57 = vpack.c.bf16 %v1133_v53, %v1129_v51  ;;  %v1150_v53 = vld [vmem:[%s2708_s8 + $0x1f8] sm:$0xff] }
 0x11b   : > { %1489 = vmatpush.bf16.msra.mxu1 %v1383_v62  ;;  %v1108_v62 = vld [vmem:[%s2708_s8 + $0xa8] sm:$0xff] }
 0x11c   : > { %v1352_v6 = vpack.c.bf16 %v1108_v62, %v1104_v60  ;;  %v1311_v60 = vld [vmem:[%s2708_s8 + $0x700] sm:$0xff] }
 0x11d   : > { %1477 = vmatpush.bf16.msra.mxu0 %v1347_v1  ;;  %1502 = vmatpush.bf16.msra.mxu2 %v1415_v0  ;;  %v1315_v62 = vld [vmem:[%s2708_s8 + $0x720] sm:$0xff]  ;;  %v1121_v0 = vld [vmem:[%s2708_s8 + $0x110] sm:$0xff] }
 0x11e   : > { %v1455_v2 = vpack.c.bf16 %v1315_v62, %v1311_v60  ;;  %v1205_v60 = vld [vmem:[%s2708_s8 + $0x3b0] sm:$0xff] }
 0x11f   : > { %1490 = vmatpush.bf16.msra.mxu1 %v1379_v5 }
 0x121   : > { %1478 = vmatpush.bf16.msra.mxu0 %v1343_v14  ;;  %v1411_v14 = vpack.c.bf16 %v1227_v8, %v1223_v7  ;;  %v1303_v7 = vld [vmem:[%s2708_s8 + $0x6c0] sm:$0xff] }
 0x122   : > { %v1307_v8 = vld [vmem:[%s2708_s8 + $0x6e0] sm:$0xff] }
 0x123   : > { %1491 = vmatpush.bf16.msra.mxu1 %v1375_v16  ;;  %v889_v50 = vpop.f32.mrf.mxu1  ;;  %v1160_v16 = vld [vmem:[%s2708_s8 + $0x248] sm:$0xff]  ;;  %1503 = vmatpush.bf16.msra.mxu2 %v1411_v14 }
 0x124   : > { %v1380_v27 = vpack.c.bf16 %v1164_v17, %v1160_v16 }
 0x125   : > { %1523 = vmatpush.bf16.msrb.mxu0 %v1372_v15  ;;  %v876_v45 = vpop.f32.mrf.mxu0 }
 0x126   : > { %v877_v49 = vadd.f32 %v876_v45, %v859_v41  ;;  %v1376_v41 = vpack.c.bf16 %v1156_v33, %v1152_v29  ;;  %v1463_v45 = vpack.c.bf16 %v1331_v43, %v1327_v42  ;;  %v1287_v33 = vld [vmem:[%s2708_s8 + $0x640] sm:$0xff]  ;;  %v1213_v42 = vld [vmem:[%s2708_s8 + $0x3f0] sm:$0xff] }
 0x127   : > { %1536 = vmatpush.bf16.msrb.mxu1 %v1404_v21  ;;  %v1348_v21 = vpack.c.bf16 %v1100_v11, %v1096_v10  ;;  %v1113_v10 = vld [vmem:[%s2708_s8 + $0xd0] sm:$0xff] }
 0x128   : > { %v890_v55 = vadd.f32 %v889_v50, %v877_v49  ;;  %v1323_v49 = vld [vmem:[%s2708_s8 + $0x760] sm:$0xff]  ;;  %v1256_v50 = vld [vmem:[%s2708_s8 + $0x548] sm:$0xff]  ;;  %v1117_v11 = vld [vmem:[%s2708_s8 + $0xf0] sm:$0xff] }
 0x129   : > { %1524 = vmatpush.bf16.msrb.mxu0 %v1368_v25  ;;  %v1219_v25 = vld [vmem:[%s2708_s8 + $0x420] sm:$0xff] }
 0x12a   : > { %v1407_v28 = vpack.c.bf16 %v1219_v25, %v1215_v24  ;;  %v1109_v24 = vld [vmem:[%s2708_s8 + $0xb0] sm:$0xff] }
 0x12b   : > { %1537 = vmatpush.bf16.msrb.mxu1 %v1400_v30  ;;  %v902_v1 = vpop.f32.mrf.mxu2  ;;  %v891_v15 = vpop.f32.mrf.mxu1  ;;  %v1335_v30 = vld [vmem:[%s2708_s8 + $0x7c0] sm:$0xff] }
 0x12c   : > { %v903_v4 = vadd.f32 %v902_v1, %v890_v55  ;;  %1504 = vmatpush.bf16.msra.mxu2 %v1407_v28  ;;  %v1260_v55 = vld [vmem:[%s2708_s8 + $0x568] sm:$0xff]  ;;  %v1125_v1 = vld [vmem:[%s2708_s8 + $0x130] sm:$0xff] }
 0x12d   : > { %1525 = vmatpush.bf16.msrb.mxu0 %v1364_v35  ;;  %v915_v5 = vpop.f32.mrf.mxu3  ;;  %v878_v12 = vpop.f32.mrf.mxu0  ;;  %v1467_v35 = vpack.c.bf16 %v1339_v31, %v1335_v30  ;;  %v1428_v56 = vpack.c.bf16 %v1260_v55, %v1256_v50  ;;  %v1216_v50 = vld [vmem:[%s2708_s8 + $0x408] sm:$0xff] }
 0x12e   : > { %v916_v9 = vadd.f32 %v915_v5, %v903_v4  ;;  %v860_v5 = vperm.slane %v3066_v34, 1  ;;  %v1451_v12 = vpack.c.bf16 %v1307_v8, %v1303_v7  ;;  %v1138_v7 = vld [vmem:[%s2708_s8 + $0x198] sm:$0xff]  ;;  %v1328_v8 = vld [vmem:[%s2708_s8 + $0x788] sm:$0xff] }
 0x12f   : > { %1538 = vmatpush.bf16.msrb.mxu1 %v1396_v40  ;;  %v1344_v40 = vpack.c.bf16 %v1092_v20, %v1088_v19  ;;  %1510 = vmatpush.bf16.msra.mxu3 %v1467_v35  ;;  %v1295_v19 = vld [vmem:[%s2708_s8 + $0x680] sm:$0xff] }
 0x130   : > { %v1075_v18 = vmax.f32 %v916_v9, 0.0  ;;  %1549 = vmatpush.bf16.msrb.mxu2 %v1436_v39  ;;  %v1240_v9 = vld [vmem:[%s2708_s8 + $0x4c8] sm:$0xff]  ;;  %v1299_v20 = vld [vmem:[%s2708_s8 + $0x6a0] sm:$0xff] }
 0x131   : > { %1526 = vmatpush.bf16.msrb.mxu0 %v1360_v44  ;;  %v1264_v44 = vld [vmem:[%s2708_s8 + $0x588] sm:$0xff]  ;;  %v1447_v25 = vpack.c.bf16 %v1299_v20, %v1295_v19  ;;  %v1291_v35 = vld [vmem:[%s2708_s8 + $0x660] sm:$0xff]  ;;  %v1134_v19 = vld [vmem:[%s2708_s8 + $0x178] sm:$0xff] }
 0x132   : > { %v3099_v26 = vpack.c.bf16 %v1075_v18, %v1075_v18  ;;  %v1432_v59 = vpack.c.bf16 %v1268_v46, %v1264_v44  ;;  %v1357_v18 = vpack.c.bf16 %v1117_v11, %v1113_v10  ;;  %v1443_v39 = vpack.c.bf16 %v1291_v35, %v1287_v33  ;;  %v1142_v10 = vld [vmem:[%s2708_s8 + $0x1b8] sm:$0xff]  ;;  %v1193_v11 = vld [vmem:[%s2708_s8 + $0x350] sm:$0xff] }
 0x133   : > { %1539 = vmatpush.bf16.msrb.mxu1 %v1392_v47  ;;  %v904_v32 = vpop.f32.mrf.mxu2  ;;  %1511 = vmatpush.bf16.msra.mxu3 %v1463_v45  ;;  %v1369_v47 = vpack.c.bf16 %v1141_v52, %v1137_v61  ;;  %v1089_v61 = vld [vmem:[%s2708_s8 + $0x10] sm:$0xff]  ;;  %v861_v35 = vperm.slane %v3066_v34, 2 }
 0x134   : > { %1479 = vmatmul.bf16.vlgmr.msra.gmra.mxu0 %v3099_v26  ;;  %1550 = vmatpush.bf16.msrb.mxu2 %v1432_v59  ;;  %v1353_v32 = vpack.c.bf16 %v1109_v24, %v1105_v23  ;;  %v1093_v52 = vld [vmem:[%s2708_s8 + $0x30] sm:$0xff]  ;;  %v1312_v23 = vld [vmem:[%s2708_s8 + $0x708] sm:$0xff] }
 0x135   : > { %1527 = vmatpush.bf16.msrb.mxu0 %v1356_v54  ;;  %v917_v38 = vpop.f32.mrf.mxu3  ;;  %v1459_v54 = vpack.c.bf16 %v1323_v49, %v1319_v48  ;;  %v1279_v48 = vld [vmem:[%s2708_s8 + $0x600] sm:$0xff]  ;;  %v1185_v20 = vld [vmem:[%s2708_s8 + $0x310] sm:$0xff]  ;;  %v1316_v24 = vld [vmem:[%s2708_s8 + $0x728] sm:$0xff] }
 0x136   : > { %v1101_v38 = vld [vmem:[%s2708_s8 + $0x70] sm:$0xff]  ;;  %v1283_v49 = vld [vmem:[%s2708_s8 + $0x620] sm:$0xff] }
 0x137   : > { %1540 = vmatpush.bf16.msrb.mxu1 %v1388_v63  ;;  %1512 = vmatpush.bf16.msra.mxu3 %v1459_v54  ;;  %v1248_v63 = vld [vmem:[%s2708_s8 + $0x508] sm:$0xff]  ;;  %v1349_v59 = vpack.c.bf16 %v1101_v38, %v1097_v37  ;;  %v1201_v54 = vld [vmem:[%s2708_s8 + $0x390] sm:$0xff]  ;;  %v1439_v55 = vpack.c.bf16 %v1283_v49, %v1279_v48  ;;  %v1114_v37 = vld [vmem:[%s2708_s8 + $0xd8] sm:$0xff] }
 0x138   : > { %1551 = vmatpush.bf16.msrb.mxu2 %v1428_v56  ;;  %v1424_v4 = vpack.c.bf16 %v1252_v3, %v1248_v63  ;;  %v1220_v56 = vld [vmem:[%s2708_s8 + $0x428] sm:$0xff]  ;;  %v1345_v3 = vpack.c.bf16 %v1093_v52, %v1089_v61  ;;  %v1110_v48 = vld [vmem:[%s2708_s8 + $0xb8] sm:$0xff]  ;;  %v1161_v49 = vld [vmem:[%s2708_s8 + $0x250] sm:$0xff] }
 0x139   : > { %1528 = vmatpush.bf16.msrb.mxu0 %v1352_v6  ;;  %v1361_v6 = vpack.c.bf16 %v1125_v1, %v1121_v0  ;;  %v1408_v62 = vpack.c.bf16 %v1220_v56, %v1216_v50  ;;  %v1336_v63 = vld [vmem:[%s2708_s8 + $0x7c8] sm:$0xff]  ;;  %v1165_v50 = vld [vmem:[%s2708_s8 + $0x270] sm:$0xff] }
 0x13a   : > { %v1340_v0 = vld [vmem:[%s2708_s8 + $0x7e8] sm:$0xff]  ;;  %v1381_v56 = vpack.c.bf16 %v1165_v50, %v1161_v49  ;;  %v1170_v49 = vld [vmem:[%s2708_s8 + $0x298] sm:$0xff] }
 0x13b   : > { %1541 = vmatpush.bf16.msrb.mxu1 %v1384_v13  ;;  %1513 = vmatpush.bf16.msra.mxu3 %v1455_v2  ;;  %v1244_v13 = vld [vmem:[%s2708_s8 + $0x4e8] sm:$0xff]  ;;  %v1468_v2 = vpack.c.bf16 %v1340_v0, %v1336_v63  ;;  %v1174_v50 = vld [vmem:[%s2708_s8 + $0x2b8] sm:$0xff] }
 0x13c   : > { %1552 = vmatpush.bf16.msrb.mxu2 %v1424_v4  ;;  %v1420_v15 = vpack.c.bf16 %v1244_v13, %v1240_v9  ;;  %v1332_v9 = vld [vmem:[%s2708_s8 + $0x7a8] sm:$0xff] }
 0x13d   : > { %1529 = vmatpush.bf16.msrb.mxu0 %v1348_v21  ;;  %v1232_v21 = vld [vmem:[%s2708_s8 + $0x488] sm:$0xff]  ;;  %v1464_v13 = vpack.c.bf16 %v1332_v9, %v1328_v8 }
 0x13e   : > { %v1304_v38 = vld [vmem:[%s2708_s8 + $0x6c8] sm:$0xff] }
 0x13f   : > { %1542 = vmatpush.bf16.msrb.mxu1 %v1380_v27  ;;  %1514 = vmatpush.bf16.msra.mxu3 %v1451_v12  ;;  %v1236_v27 = vld [vmem:[%s2708_s8 + $0x4a8] sm:$0xff]  ;;  %v1197_v12 = vld [vmem:[%s2708_s8 + $0x370] sm:$0xff] }
 0x140   : > { %1553 = vmatpush.bf16.msrb.mxu2 %v1420_v15  ;;  %v1416_v28 = vpack.c.bf16 %v1236_v27, %v1232_v21  ;;  %v1324_v15 = vld [vmem:[%s2708_s8 + $0x768] sm:$0xff]  ;;  %v1189_v21 = vld [vmem:[%s2708_s8 + $0x330] sm:$0xff] }
 0x141   : > { %1530 = vmatpush.bf16.msrb.mxu0 %v1344_v40  ;;  %v928_v14 = vpop.f32.mrf.mxu0  ;;  %v1228_v40 = vld [vmem:[%s2708_s8 + $0x468] sm:$0xff]  ;;  %v1393_v27 = vpack.c.bf16 %v1189_v21, %v1185_v20  ;;  %v1094_v20 = vld [vmem:[%s2708_s8 + $0x38] sm:$0xff] }
 0x142   : > { %v929_v16 = vadd.f32 %v928_v14, %v860_v5  ;;  %v1412_v44 = vpack.c.bf16 %v1228_v40, %v1224_v36  ;;  %v1320_v14 = vld [vmem:[%s2708_s8 + $0x748] sm:$0xff]  ;;  %v1118_v40 = vld [vmem:[%s2708_s8 + $0xf8] sm:$0xff] }
 0x143   : > { %1543 = vmatpush.bf16.msrb.mxu1 %v1376_v41  ;;  %v941_v17 = vpop.f32.mrf.mxu1  ;;  %1515 = vmatpush.bf16.msra.mxu3 %v1447_v25  ;;  %v1209_v41 = vld [vmem:[%s2708_s8 + $0x3d0] sm:$0xff]  ;;  %v1358_v52 = vpack.c.bf16 %v1118_v40, %v1114_v37  ;;  %v1292_v63 = vld [vmem:[%s2708_s8 + $0x668] sm:$0xff] }
 0x144   : > { %1531 = vmatmul.bf16.vlgmr.msrb.gmra.mxu0 %v3099_v26  ;;  %v942_v22 = vadd.f32 %v941_v17, %v929_v16  ;;  %1554 = vmatpush.bf16.msrb.mxu2 %v1416_v28  ;;  %v1405_v51 = vpack.c.bf16 %v1213_v42, %v1209_v41  ;;  %v1370_v16 = vpack.c.bf16 %v1142_v10, %v1138_v7  ;;  %v1122_v28 = vld [vmem:[%s2708_s8 + $0x118] sm:$0xff]  ;;  %v1173_v41 = vld [vmem:[%s2708_s8 + $0x2b0] sm:$0xff] }
 0x145   : > { %1575 = vmatpush.bf16.msra.mxu0 %v1373_v58  ;;  %v1397_v17 = vpack.c.bf16 %v1197_v12, %v1193_v11  ;;  %v1214_v7 = vld [vmem:[%s2708_s8 + $0x3f8] sm:$0xff]  ;;  %v1273_v10 = vld [vmem:[%s2708_s8 + $0x5d0] sm:$0xff] }
 0x146   : > { %v1277_v11 = vld [vmem:[%s2708_s8 + $0x5f0] sm:$0xff] }
 0x147   : > { %1516 = vmatpush.bf16.msra.mxu3 %v1443_v39  ;;  %v1308_v39 = vld [vmem:[%s2708_s8 + $0x6e8] sm:$0xff]  ;;  %v1437_v21 = vpack.c.bf16 %v1277_v11, %v1273_v10  ;;  %v1257_v37 = vld [vmem:[%s2708_s8 + $0x550] sm:$0xff] }
 0x148   : > { %1555 = vmatpush.bf16.msrb.mxu2 %v1412_v44  ;;  %v1452_v42 = vpack.c.bf16 %v1308_v39, %v1304_v38  ;;  %v1261_v38 = vld [vmem:[%s2708_s8 + $0x570] sm:$0xff] }
 0x149   : > { %1576 = vmatpush.bf16.msra.mxu0 %v1369_v47  ;;  %v930_v43 = vpop.f32.mrf.mxu0  ;;  %v1146_v47 = vld [vmem:[%s2708_s8 + $0x1d8] sm:$0xff]  ;;  %v1429_v40 = vpack.c.bf16 %v1261_v38, %v1257_v37  ;;  %v1217_v11 = vld [vmem:[%s2708_s8 + $0x410] sm:$0xff] }
 0x14a   : > { %v1374_v5 = vpack.c.bf16 %v1150_v53, %v1146_v47  ;;  %v1300_v47 = vld [vmem:[%s2708_s8 + $0x6a8] sm:$0xff]  ;;  %v1262_v37 = vld [vmem:[%s2708_s8 + $0x578] sm:$0xff]  ;;  %v1321_v38 = vld [vmem:[%s2708_s8 + $0x750] sm:$0xff] }
 0x14b   : > { %v954_v29 = vpop.f32.mrf.mxu2  ;;  %v943_v45 = vpop.f32.mrf.mxu1  ;;  %1517 = vmatpush.bf16.msra.mxu3 %v1439_v55 }
 0x14c   : > { %v955_v30 = vadd.f32 %v954_v29, %v942_v22  ;;  %1556 = vmatpush.bf16.msrb.mxu2 %v1408_v62  ;;  %v1460_v22 = vpack.c.bf16 %v1324_v15, %v1320_v14  ;;  %v1126_v29 = vld [vmem:[%s2708_s8 + $0x138] sm:$0xff]  ;;  %v1288_v62 = vld [vmem:[%s2708_s8 + $0x648] sm:$0xff] }
 0x14d   : > { %1577 = vmatpush.bf16.msra.mxu0 %v1365_v57  ;;  %v967_v31 = vpop.f32.mrf.mxu3  ;;  %v1362_v33 = vpack.c.bf16 %v1126_v29, %v1122_v28  ;;  %v1280_v15 = vld [vmem:[%s2708_s8 + $0x608] sm:$0xff]  ;;  %v1269_v28 = vld [vmem:[%s2708_s8 + $0x5b0] sm:$0xff] }
 0x14e   : > { %v968_v58 = vadd.f32 %v967_v31, %v955_v30  ;;  %v1177_v30 = vld [vmem:[%s2708_s8 + $0x2d0] sm:$0xff] }
 0x14f   : > { %1562 = vmatpush.bf16.msrb.mxu3 %v1468_v2  ;;  %v1181_v31 = vld [vmem:[%s2708_s8 + $0x2f0] sm:$0xff]  ;;  %v1102_v2 = vld [vmem:[%s2708_s8 + $0x78] sm:$0xff] }
 0x150   : > { %v1076_v46 = vmax.f32 %v968_v58, 0.0  ;;  %v1389_v36 = vpack.c.bf16 %v1181_v31, %v1177_v30  ;;  %v1169_v58 = vld [vmem:[%s2708_s8 + $0x290] sm:$0xff] }
 0x151   : > { %1578 = vmatpush.bf16.msra.mxu0 %v1361_v6  ;;  %v1401_v6 = vpack.c.bf16 %v1205_v60, %v1201_v54  ;;  %v1385_v45 = vpack.c.bf16 %v1173_v41, %v1169_v58  ;;  %v1098_v60 = vld [vmem:[%s2708_s8 + $0x58] sm:$0xff] }
 0x152   : > { %v3157_v57 = vpack.c.bf16 %v1076_v46, %v1076_v46  ;;  %v1106_v46 = vld [vmem:[%s2708_s8 + $0x98] sm:$0xff]  ;;  %v1350_v12 = vpack.c.bf16 %v1102_v2, %v1098_v60  ;;  %v1229_v2 = vld [vmem:[%s2708_s8 + $0x470] sm:$0xff] }
 0x153   : > { %v956_v1 = vpop.f32.mrf.mxu2  ;;  %1563 = vmatpush.bf16.msrb.mxu3 %v1464_v13  ;;  %v1354_v55 = vpack.c.bf16 %v1110_v48, %v1106_v46  ;;  %v1186_v58 = vld [vmem:[%s2708_s8 + $0x318] sm:$0xff]  ;;  %v1241_v46 = vld [vmem:[%s2708_s8 + $0x4d0] sm:$0xff] }
 0x154   : > { %1492 = vmatmul.bf16.vlgmr.msra.gmra.mxu1 %v3157_v57  ;;  %v1190_v41 = vld [vmem:[%s2708_s8 + $0x338] sm:$0xff] }
 0x155   : > { %1579 = vmatpush.bf16.msra.mxu0 %v1357_v18  ;;  %v969_v4 = vpop.f32.mrf.mxu3  ;;  %1588 = vmatpush.bf16.msra.mxu1 %v1405_v51  ;;  %v1130_v18 = vld [vmem:[%s2708_s8 + $0x158] sm:$0xff] }
 0x156   : > { %v1366_v25 = vpack.c.bf16 %v1134_v19, %v1130_v18  ;;  %v1157_v4 = vld [vmem:[%s2708_s8 + $0x230] sm:$0xff]  ;;  %v1090_v19 = vld [vmem:[%s2708_s8 + $0x18] sm:$0xff] }
 0x157   : > { %1564 = vmatpush.bf16.msrb.mxu3 %v1460_v22  ;;  %v1202_v22 = vld [vmem:[%s2708_s8 + $0x398] sm:$0xff]  ;;  %v1346_v29 = vpack.c.bf16 %v1094_v20, %v1090_v19  ;;  %v1341_v19 = vld [vmem:[%s2708_s8 + $0x7f0] sm:$0xff] }
 0x159   : > { %1580 = vmatpush.bf16.msra.mxu0 %v1353_v32  ;;  %1589 = vmatpush.bf16.msra.mxu1 %v1401_v6  ;;  %v1456_v32 = vpack.c.bf16 %v1316_v24, %v1312_v23  ;;  %v1210_v6 = vld [vmem:[%s2708_s8 + $0x3d8] sm:$0xff] }
 0x15a   : > { %v1406_v18 = vpack.c.bf16 %v1214_v7, %v1210_v6  ;;  %v1206_v23 = vld [vmem:[%s2708_s8 + $0x3b8] sm:$0xff] }
 0x15b   : > { %1565 = vmatpush.bf16.msrb.mxu3 %v1456_v32  ;;  %v1402_v31 = vpack.c.bf16 %v1206_v23, %v1202_v22  ;;  %v1154_v6 = vld [vmem:[%s2708_s8 + $0x218] sm:$0xff] }
 0x15c   : > { %v1158_v7 = vld [vmem:[%s2708_s8 + $0x238] sm:$0xff] }
 0x15d   : > { %1581 = vmatpush.bf16.msra.mxu0 %v1349_v59  ;;  %1590 = vmatpush.bf16.msra.mxu1 %v1397_v17  ;;  %v1296_v59 = vld [vmem:[%s2708_s8 + $0x688] sm:$0xff] }
 0x15e   : > { %v1448_v51 = vpack.c.bf16 %v1300_v47, %v1296_v59  ;;  %v1245_v59 = vld [vmem:[%s2708_s8 + $0x4f0] sm:$0xff]  ;;  %v862_v47 = vperm.slane %v3066_v34, 3  ;;  %v1386_v34 = vpack.c.bf16 %v1174_v50, %v1170_v49  ;;  %v1238_v49 = vld [vmem:[%s2708_s8 + $0x4b8] sm:$0xff] }
 0x15f   : > { %1566 = vmatpush.bf16.msrb.mxu3 %v1452_v42  ;;  %v1249_v42 = vld [vmem:[%s2708_s8 + $0x510] sm:$0xff] }
 0x160   : > { %v1297_v50 = vld [vmem:[%s2708_s8 + $0x690] sm:$0xff] }
 0x161   : > { %1582 = vmatpush.bf16.msra.mxu0 %v1345_v3  ;;  %1591 = vmatpush.bf16.msra.mxu1 %v1393_v27  ;;  %v980_v43 = vpop.f32.mrf.mxu0  ;;  %v1153_v3 = vld [vmem:[%s2708_s8 + $0x210] sm:$0xff] }
 0x162   : > { %v981_v44 = vadd.f32 %v980_v43, %v861_v35  ;;  %v1377_v13 = vpack.c.bf16 %v1157_v4, %v1153_v3  ;;  %v1265_v27 = vld [vmem:[%s2708_s8 + $0x590] sm:$0xff]  ;;  %v1194_v35 = vld [vmem:[%s2708_s8 + $0x358] sm:$0xff] }
 0x163   : > { %v993_v61 = vpop.f32.mrf.mxu1  ;;  %1567 = vmatpush.bf16.msrb.mxu3 %v1448_v51  ;;  %v1253_v43 = vld [vmem:[%s2708_s8 + $0x530] sm:$0xff] }
 0x164   : > { %1583 = vmatmul.bf16.vlgmr.msra.gmra.mxu0 %v3099_v26  ;;  %1544 = vmatmul.bf16.vlgmr.msrb.gmra.mxu1 %v3157_v57  ;;  %v994_v53 = vadd.f32 %v993_v61, %v981_v44  ;;  %v1394_v44 = vpack.c.bf16 %v1190_v41, %v1186_v58  ;;  %v1425_v61 = vpack.c.bf16 %v1253_v43, %v1249_v42  ;;  %v1250_v41 = vld [vmem:[%s2708_s8 + $0x518] sm:$0xff]  ;;  %v1317_v43 = vld [vmem:[%s2708_s8 + $0x730] sm:$0xff] }
 0x165   : > { %1627 = vmatpush.bf16.msrb.mxu0 %v1374_v5  ;;  %1592 = vmatpush.bf16.msra.mxu1 %v1389_v36  ;;  %v1444_v5 = vpack.c.bf16 %v1292_v63, %v1288_v62  ;;  %v1198_v36 = vld [vmem:[%s2708_s8 + $0x378] sm:$0xff] }
 0x166   : > { %v1398_v39 = vpack.c.bf16 %v1198_v36, %v1194_v35  ;;  %v1162_v62 = vld [vmem:[%s2708_s8 + $0x258] sm:$0xff] }
 0x167   : > { %1568 = vmatpush.bf16.msrb.mxu3 %v1444_v5  ;;  %v1166_v63 = vld [vmem:[%s2708_s8 + $0x278] sm:$0xff] }
 0x168   : > { %v1382_v3 = vpack.c.bf16 %v1166_v63, %v1162_v62  ;;  %v1258_v36 = vld [vmem:[%s2708_s8 + $0x558] sm:$0xff] }
 0x169   : > { %1628 = vmatpush.bf16.msrb.mxu0 %v1370_v16  ;;  %1593 = vmatpush.bf16.msra.mxu1 %v1385_v45  ;;  %v982_v9 = vpop.f32.mrf.mxu0  ;;  %v1284_v16 = vld [vmem:[%s2708_s8 + $0x628] sm:$0xff]  ;;  %v1182_v45 = vld [vmem:[%s2708_s8 + $0x2f8] sm:$0xff] }
 0x16a   : > { %v1440_v24 = vpack.c.bf16 %v1284_v16, %v1280_v15  ;;  %v1278_v15 = vld [vmem:[%s2708_s8 + $0x5f8] sm:$0xff] }
 0x16b   : > { %v1006_v54 = vpop.f32.mrf.mxu2  ;;  %v995_v14 = vpop.f32.mrf.mxu1  ;;  %v1254_v42 = vld [vmem:[%s2708_s8 + $0x538] sm:$0xff] }
 0x16c   : > { %v1007_v0 = vadd.f32 %v1006_v54, %v994_v53  ;;  %1569 = vmatpush.bf16.msrb.mxu3 %v1440_v24  ;;  %v1233_v53 = vld [vmem:[%s2708_s8 + $0x490] sm:$0xff]  ;;  %v1274_v14 = vld [vmem:[%s2708_s8 + $0x5d8] sm:$0xff] }
 0x16d   : > { %1629 = vmatpush.bf16.msrb.mxu0 %v1366_v25  ;;  %v1019_v1 = vpop.f32.mrf.mxu3  ;;  %1594 = vmatpush.bf16.msra.mxu1 %v1381_v56  ;;  %v1237_v54 = vld [vmem:[%s2708_s8 + $0x4b0] sm:$0xff]  ;;  %v1438_v22 = vpack.c.bf16 %v1278_v15, %v1274_v14  ;;  %v1266_v24 = vld [vmem:[%s2708_s8 + $0x598] sm:$0xff] }
 0x16e   : > { %v1020_v8 = vadd.f32 %v1019_v1, %v1007_v0  ;;  %v1417_v60 = vpack.c.bf16 %v1237_v54, %v1233_v53  ;;  %v1225_v1 = vld [vmem:[%s2708_s8 + $0x450] sm:$0xff] }
 0x16f   : > { %v1413_v5 = vpack.c.bf16 %v1229_v2, %v1225_v1  ;;  %v1222_v1 = vld [vmem:[%s2708_s8 + $0x438] sm:$0xff]  ;;  %v1281_v2 = vld [vmem:[%s2708_s8 + $0x610] sm:$0xff] }
 0x170   : > { %v1077_v17 = vmax.f32 %v1020_v8, 0.0 }
 0x171   : > { %1630 = vmatpush.bf16.msrb.mxu0 %v1362_v33  ;;  %1595 = vmatpush.bf16.msra.mxu1 %v1377_v13  ;;  %v1433_v33 = vpack.c.bf16 %v1269_v28, %v1265_v27  ;;  %v1270_v27 = vld [vmem:[%s2708_s8 + $0x5b8] sm:$0xff] }
 0x172   : > { %v3212_v25 = vpack.c.bf16 %v1077_v17, %v1077_v17  ;;  %v1378_v17 = vpack.c.bf16 %v1158_v7, %v1154_v6 }
 0x173   : > { %v1008_v30 = vpop.f32.mrf.mxu2 }
 0x174   : > { %1505 = vmatmul.bf16.vlgmr.msra.gmra.mxu2 %v3212_v25  ;;  %1596 = vmatmul.bf16.vlgmr.msra.gmra.mxu1 %v3157_v57  ;;  %v1333_v30 = vld [vmem:[%s2708_s8 + $0x7b0] sm:$0xff] }
 0x175   : > { %1631 = vmatpush.bf16.msrb.mxu0 %v1358_v52  ;;  %1640 = vmatpush.bf16.msrb.mxu1 %v1406_v18  ;;  %v1021_v32 = vpop.f32.mrf.mxu3  ;;  %v1178_v52 = vld [vmem:[%s2708_s8 + $0x2d8] sm:$0xff]  ;;  %v1337_v18 = vld [vmem:[%s2708_s8 + $0x7d0] sm:$0xff] }
 0x176   : > { %1601 = vmatpush.bf16.msra.mxu2 %v1437_v21  ;;  %v1390_v48 = vpack.c.bf16 %v1182_v45, %v1178_v52  ;;  %v1469_v23 = vpack.c.bf16 %v1341_v19, %v1337_v18  ;;  %v1242_v52 = vld [vmem:[%s2708_s8 + $0x4d8] sm:$0xff] }
 0x177   : > { %v1246_v45 = vld [vmem:[%s2708_s8 + $0x4f8] sm:$0xff] }
 0x178   : > { %v1306_v19 = vld [vmem:[%s2708_s8 + $0x6d8] sm:$0xff] }
 0x179   : > { %1632 = vmatpush.bf16.msrb.mxu0 %v1354_v55  ;;  %1641 = vmatpush.bf16.msrb.mxu1 %v1402_v31 }
 0x17a   : > { %1602 = vmatpush.bf16.msra.mxu2 %v1433_v33  ;;  %v1434_v33 = vpack.c.bf16 %v1270_v27, %v1266_v24  ;;  %v1290_v27 = vld [vmem:[%s2708_s8 + $0x658] sm:$0xff] }
 0x17d   : > { %1633 = vmatpush.bf16.msrb.mxu0 %v1350_v12  ;;  %1642 = vmatpush.bf16.msrb.mxu1 %v1398_v39  ;;  %v1221_v12 = vld [vmem:[%s2708_s8 + $0x430] sm:$0xff] }
 0x17e   : > { %1603 = vmatpush.bf16.msra.mxu2 %v1429_v40  ;;  %v1409_v20 = vpack.c.bf16 %v1221_v12, %v1217_v11  ;;  %v1325_v39 = vld [vmem:[%s2708_s8 + $0x770] sm:$0xff]  ;;  %v1430_v40 = vpack.c.bf16 %v1262_v37, %v1258_v36  ;;  %v1322_v12 = vld [vmem:[%s2708_s8 + $0x758] sm:$0xff] }
 0x17f   : > { %v1461_v58 = vpack.c.bf16 %v1325_v39, %v1321_v38 }
 0x181   : > { %1634 = vmatpush.bf16.msrb.mxu0 %v1346_v29  ;;  %1643 = vmatpush.bf16.msrb.mxu1 %v1394_v44  ;;  %v1032_v51 = vpop.f32.mrf.mxu0  ;;  %v1329_v29 = vld [vmem:[%s2708_s8 + $0x790] sm:$0xff]  ;;  %v1426_v44 = vpack.c.bf16 %v1254_v42, %v1250_v41 }
 0x182   : > { %1604 = vmatpush.bf16.msra.mxu2 %v1425_v61  ;;  %v1033_v55 = vadd.f32 %v1032_v51, %v862_v47  ;;  %v1465_v35 = vpack.c.bf16 %v1333_v30, %v1329_v29  ;;  %v1422_v47 = vpack.c.bf16 %v1246_v45, %v1242_v52  ;;  %v1301_v51 = vld [vmem:[%s2708_s8 + $0x6b0] sm:$0xff]  ;;  %v1294_v29 = vld [vmem:[%s2708_s8 + $0x678] sm:$0xff] }
 0x183   : > { %v1045_v56 = vpop.f32.mrf.mxu1  ;;  %v1449_v54 = vpack.c.bf16 %v1301_v51, %v1297_v50  ;;  %v1446_v30 = vpack.c.bf16 %v1294_v29, %v1290_v27 }
 0x184   : > { %1635 = vmatmul.bf16.vlgmr.msrb.gmra.mxu0 %v3099_v26  ;;  %v1421_v26 = vpack.c.bf16 %v1245_v59, %v1241_v46  ;;  %1557 = vmatmul.bf16.vlgmr.msrb.gmra.mxu2 %v3212_v25  ;;  %v1046_v0 = vadd.f32 %v1045_v56, %v1033_v55  ;;  %v1305_v46 = vld [vmem:[%s2708_s8 + $0x6d0] sm:$0xff]  ;;  %v1226_v55 = vld [vmem:[%s2708_s8 + $0x458] sm:$0xff] }
 0x185   : > { %1644 = vmatpush.bf16.msrb.mxu1 %v1390_v48  ;;  %v1309_v59 = vld [vmem:[%s2708_s8 + $0x6f0] sm:$0xff]  ;;  %v1230_v56 = vld [vmem:[%s2708_s8 + $0x478] sm:$0xff] }
 0x186   : > { %1605 = vmatpush.bf16.msra.mxu2 %v1421_v26  ;;  %v1453_v48 = vpack.c.bf16 %v1309_v59, %v1305_v46  ;;  %v1234_v26 = vld [vmem:[%s2708_s8 + $0x498] sm:$0xff]  ;;  %v1414_v62 = vpack.c.bf16 %v1230_v56, %v1226_v55 }
 0x187   : > { %v1418_v53 = vpack.c.bf16 %v1238_v49, %v1234_v26  ;;  %v1079_v26 = vld [vmem:[#allocation2 + $0x10] sm:$0xff] }
 0x189   : > { %1645 = vmatpush.bf16.msrb.mxu1 %v1386_v34  ;;  %v1034_v10 = vpop.f32.mrf.mxu0  ;;  %v1289_v34 = vld [vmem:[%s2708_s8 + $0x650] sm:$0xff] }
 0x18a   : > { %1606 = vmatpush.bf16.msra.mxu2 %v1417_v60  ;;  %v1293_v60 = vld [vmem:[%s2708_s8 + $0x670] sm:$0xff]  ;;  %v1334_v10 = vld [vmem:[%s2708_s8 + $0x7b8] sm:$0xff] }
 0x18b   : > { %v1058_v4 = vpop.f32.mrf.mxu2  ;;  %v1047_v13 = vpop.f32.mrf.mxu1  ;;  %v1445_v63 = vpack.c.bf16 %v1293_v60, %v1289_v34  ;;  %v1080_v60 = vld [vmem:[#allocation2] sm:$0xff] }
 0x18c   : > { %v1059_v8 = vadd.f32 %v1058_v4, %v1046_v0  ;;  %v1218_v0 = vld [vmem:[%s2708_s8 + $0x418] sm:$0xff] }
 0x18d   : > { %v1071_v9 = vpop.f32.mrf.mxu3  ;;  %1646 = vmatpush.bf16.msrb.mxu1 %v1382_v3  ;;  %v1285_v3 = vld [vmem:[%s2708_s8 + $0x630] sm:$0xff]  ;;  %v1338_v4 = vld [vmem:[%s2708_s8 + $0x7d8] sm:$0xff]  ;;  %v1410_v6 = vpack.c.bf16 %v1222_v1, %v1218_v0 }
 0x18e   : > { %v1072_v16 = vadd.f32 %v1071_v9, %v1059_v8  ;;  %1607 = vmatpush.bf16.msra.mxu2 %v1413_v5  ;;  %v1342_v5 = vld [vmem:[%s2708_s8 + $0x7f8] sm:$0xff]  ;;  %v1441_v7 = vpack.c.bf16 %v1285_v3, %v1281_v2 }
 0x18f   : > { %v1470_v8 = vpack.c.bf16 %v1342_v5, %v1338_v4  ;;  %v1330_v9 = vld [vmem:[%s2708_s8 + $0x798] sm:$0xff]  ;;  %v1081_v5 = vld [vmem:[#allocation2 + $0x18] sm:$0xff] }
 0x190   : > { %v1078_v21 = vmax.f32 %v1072_v16, 0.0  ;;  %v1466_v11 = vpack.c.bf16 %v1334_v10, %v1330_v9  ;;  %v1326_v13 = vld [vmem:[%s2708_s8 + $0x778] sm:$0xff] }
 0x191   : > { %1647 = vmatpush.bf16.msrb.mxu1 %v1378_v17  ;;  %v1462_v14 = vpack.c.bf16 %v1326_v13, %v1322_v12  ;;  %v1314_v16 = vld [vmem:[%s2708_s8 + $0x718] sm:$0xff]  ;;  %v1082_v13 = vld [vmem:[#allocation2 + $0x8] sm:$0xff] }
 0x192   : > { %v3251_v28 = vpack.c.bf16 %v1078_v21, %v1078_v21  ;;  %1608 = vmatpush.bf16.msra.mxu2 %v1409_v20  ;;  %v1318_v17 = vld [vmem:[%s2708_s8 + $0x738] sm:$0xff] }
 0x193   : > { %v1060_v31 = vpop.f32.mrf.mxu2  ;;  %v1458_v18 = vpack.c.bf16 %v1318_v17, %v1314_v16  ;;  %v1310_v20 = vld [vmem:[%s2708_s8 + $0x6f8] sm:$0xff] }
 0x194   : > { %1518 = vmatmul.bf16.vlgmr.msra.gmra.mxu3 %v3251_v28  ;;  %1648 = vmatmul.bf16.vlgmr.msrb.gmra.mxu1 %v3157_v57  ;;  %v1313_v57 = vld [vmem:[%s2708_s8 + $0x710] sm:$0xff] }
 0x195   : > { %v1073_v32 = vpop.f32.mrf.mxu3  ;;  %1614 = vmatpush.bf16.msra.mxu3 %v1469_v23  ;;  %1609 = vmatmul.bf16.vlgmr.msra.gmra.mxu2 %v3212_v25  ;;  %v1457_v61 = vpack.c.bf16 %v1317_v43, %v1313_v57  ;;  %v1302_v23 = vld [vmem:[%s2708_s8 + $0x6b8] sm:$0xff] }
 0x196   : > { %1653 = vmatpush.bf16.msrb.mxu2 %v1438_v22  ;;  %v1298_v22 = vld [vmem:[%s2708_s8 + $0x698] sm:$0xff] }
 0x197   : > { %v1450_v24 = vpack.c.bf16 %v1302_v23, %v1298_v22  ;;  %v1282_v32 = vld [vmem:[%s2708_s8 + $0x618] sm:$0xff] }
 0x199   : > { %1615 = vmatpush.bf16.msra.mxu3 %v1465_v35 }
 0x19a   : > { %1654 = vmatpush.bf16.msrb.mxu2 %v1434_v33  ;;  %v1286_v33 = vld [vmem:[%s2708_s8 + $0x638] sm:$0xff] }
 0x19b   : > { %v1442_v35 = vpack.c.bf16 %v1286_v33, %v1282_v32 }
 0x19d   : > { %1616 = vmatpush.bf16.msra.mxu3 %v1461_v58 }
 0x19e   : > { %1655 = vmatpush.bf16.msrb.mxu2 %v1430_v40 }
 0x1a1   : > { %1617 = vmatpush.bf16.msra.mxu3 %v1457_v61 }
 0x1a2   : > { %1656 = vmatpush.bf16.msrb.mxu2 %v1426_v44 }
 0x1a4   : > { %1570 = vmatmul.bf16.vlgmr.msrb.gmra.mxu3 %v3251_v28 }
 0x1a5   : > { %1618 = vmatpush.bf16.msra.mxu3 %v1453_v48 }
 0x1a6   : > { %1657 = vmatpush.bf16.msrb.mxu2 %v1422_v47 }
 0x1a9   : > { %1619 = vmatpush.bf16.msra.mxu3 %v1449_v54 }
 0x1aa   : > { %1658 = vmatpush.bf16.msrb.mxu2 %v1418_v53 }
 0x1ad   : > { %1620 = vmatpush.bf16.msra.mxu3 %v1445_v63 }
 0x1ae   : > { %1659 = vmatpush.bf16.msrb.mxu2 %v1414_v62 }
 0x1b1   : > { %1621 = vmatpush.bf16.msra.mxu3 %v1441_v7  ;;  %v1480_v15 = vpop.f32.mrf.mxu0 }
 0x1b2   : > { %1660 = vmatpush.bf16.msrb.mxu2 %v1410_v6 }
 0x1b4   : > { %1622 = vmatmul.bf16.vlgmr.msra.gmra.mxu3 %v3251_v28 }
 0x1b5   : > { %1666 = vmatpush.bf16.msrb.mxu3 %v1470_v8  ;;  %1661 = vmatmul.bf16.vlgmr.msrb.gmra.mxu2 %v3212_v25  ;;  %v1454_v25 = vpack.c.bf16 %v1310_v20, %v1306_v19 }
 0x1b9   : > { %1667 = vmatpush.bf16.msrb.mxu3 %v1466_v11  ;;  %v1482_v21 = vpop.f32.mrf.mxu0 }
 0x1bd   : > { %1668 = vmatpush.bf16.msrb.mxu3 %v1462_v14 }
 0x1c1   : > { %1669 = vmatpush.bf16.msrb.mxu3 %v1458_v18  ;;  %v1532_v31 = vpop.f32.mrf.mxu0 }
 0x1c5   : > { %1670 = vmatpush.bf16.msrb.mxu3 %v1454_v25 }
 0x1c9   : > { %1671 = vmatpush.bf16.msrb.mxu3 %v1450_v24  ;;  %v1534_v36 = vpop.f32.mrf.mxu0 }
 0x1cd   : > { %1672 = vmatpush.bf16.msrb.mxu3 %v1446_v30 }
 0x1d1   : > { %1673 = vmatpush.bf16.msrb.mxu3 %v1442_v35  ;;  %v1493_v37 = vpop.f32.mrf.mxu1 }
 0x1d2   : > { %v1494_v47 = vadd.f32 %v1493_v37, %v1480_v15 }
 0x1d4   : > { %1674 = vmatmul.bf16.vlgmr.msrb.gmra.mxu3 %v3251_v28 }
 0x1d9   : > { %v1495_v39 = vpop.f32.mrf.mxu1 }
 0x1e1   : > { %v1584_v38 = vpop.f32.mrf.mxu0  ;;  %v1545_v58 = vpop.f32.mrf.mxu1 }
 0x1e2   : > { %v1546_v56 = vadd.f32 %v1545_v58, %v1532_v31 }
 0x1e9   : > { %v1586_v40 = vpop.f32.mrf.mxu0  ;;  %v1547_v41 = vpop.f32.mrf.mxu1 }
 0x1f1   : > { %v1597_v42 = vpop.f32.mrf.mxu1 }
 0x1f2   : > { %v1598_v2 = vadd.f32 %v1597_v42, %v1584_v38 }
 0x1f7   : > { %v1506_v43 = vpop.f32.mrf.mxu2 }
 0x1f8   : > { %v1507_v48 = vadd.f32 %v1506_v43, %v1494_v47 }
 0x1f9   : > { %v1599_v44 = vpop.f32.mrf.mxu1 }
 0x1ff   : > { %v1508_v52 = vpop.f32.mrf.mxu2 }
 0x201   : > { %v1636_v57 = vpop.f32.mrf.mxu0 }
 0x207   : > { %v1558_v45 = vpop.f32.mrf.mxu2 }
 0x208   : > { %v1559_v34 = vadd.f32 %v1558_v45, %v1546_v56 }
 0x209   : > { %v1638_v61 = vpop.f32.mrf.mxu0 }
 0x20f   : > { %v1560_v46 = vpop.f32.mrf.mxu2 }
 0x211   : > { %v1649_v59 = vpop.f32.mrf.mxu1 }
 0x212   : > { %v1650_v11 = vadd.f32 %v1649_v59, %v1636_v57 }
 0x217   : > { %v1519_v49 = vpop.f32.mrf.mxu3 }
 0x218   : > { %v1520_v28 = vadd.f32 %v1519_v49, %v1507_v48  ;;  %v1610_v50 = vpop.f32.mrf.mxu2 }
 0x219   : > { %v1651_v53 = vpop.f32.mrf.mxu1  ;;  %v1611_v3 = vadd.f32 %v1610_v50, %v1598_v2 }
 0x21a   : > { %v1679_v51 = vadd.f32 %v1520_v28, %v1079_v26 }
 0x21c   : > { %1683 = vst [vmem:[#allocation2 + $0x10] sm:$0xff] %v1679_v51 }
 0x21f   : > { %v1521_v54 = vpop.f32.mrf.mxu3 }
 0x220   : > { %v1612_v55 = vpop.f32.mrf.mxu2 }
 0x227   : > { %v1571_v62 = vpop.f32.mrf.mxu3 }
 0x228   : > { %v1572_v63 = vadd.f32 %v1571_v62, %v1559_v34 }
 0x22a   : > { %v1680_v0 = vadd.f32 %v1572_v63, %v1080_v60 }
 0x22c   : > { %1684 = vst [vmem:[#allocation2] sm:$0xff] %v1680_v0 }
 0x22f   : > { %v1573_v1 = vpop.f32.mrf.mxu3 }
 0x237   : > { %v1623_v6 = vpop.f32.mrf.mxu3 }
 0x238   : > { %v1662_v4 = vpop.f32.mrf.mxu2  ;;  %v1624_v7 = vadd.f32 %v1623_v6, %v1611_v3 }
 0x239   : > { %v1663_v12 = vadd.f32 %v1662_v4, %v1650_v11 }
 0x23a   : > { %v1681_v8 = vadd.f32 %v1624_v7, %v1081_v5 }
 0x23c   : > { %1685 = vst [vmem:[#allocation2 + $0x18] sm:$0xff] %v1681_v8 }
 0x23f   : > { %v1625_v10 = vpop.f32.mrf.mxu3 }
 0x240   : > { %v1664_v9 = vpop.f32.mrf.mxu2 }
 0x257   : > { %v1675_v14 = vpop.f32.mrf.mxu3 }
 0x258   : > { %v1676_v15 = vadd.f32 %v1675_v14, %v1663_v12 }
 0x25a   : > { %v1682_v16 = vadd.f32 %v1676_v15, %v1082_v13 }
 0x25b   : > { %1690 = sbr.rel (%p2000_p1) target bundleno = 898 (0x382), region = 80 }
 0x25c   : > { %1686 = vst [vmem:[#allocation2 + $0x8] sm:$0xff] %v1682_v16 }
 0x25f   : > { %v1677_v17 = vpop.f32.mrf.mxu3 }
 0x260   : > { %v1691_v18 = vld [vmem:[#allocation2 + $0x10] sm:$0xff]  ;;  %v1692_v19 = vld [vmem:[#allocation2] sm:$0xff]  ;;  %v1693_v20 = vld [vmem:[#allocation2 + $0x18] sm:$0xff]  ;;  %v2486_v43 = vmov 512.0  }
 0x261   : > { %v1695_v21 = vld [vmem:[#allocation9] sm:$0xf]  ;;  %v1709_v29 = vld [vmem:[%s2726_s23] sm:$0xff]  ;;  %v1711_v31 = vld [vmem:[%s2726_s23 + $0x10] sm:$0xff]  ;;  %2159 = vrcp.f32 %v2486_v43 }
 0x262   : > { %v1697_v22 = vperm.slane %v1695_v21, 0  ;;  %v1698_v23 = vperm.slane %v1695_v21, 1  ;;  %v1699_v24 = vperm.slane %v1695_v21, 2  ;;  %v1700_v27 = vperm.slane %v1695_v21, 3  ;;  %v1710_v30 = vld [vmem:[%s2726_s23 + $0x8] sm:$0xff]  ;;  %v1712_v37 = vld [vmem:[%s2726_s23 + $0x18] sm:$0xff] }
 0x263   : > { %v1694_v25 = vld [vmem:[#allocation2 + $0x8] sm:$0xff]  ;;  %v1773_v7 = vld [vmem:[#allocation12] sm:$0xf] }
 0x264   : > { %v1705_v32 = vadd.f32 %v1697_v22, %v1691_v18  ;;  %v1706_v33 = vadd.f32 %v1698_v23, %v1692_v19  ;;  %v1707_v35 = vadd.f32 %v1699_v24, %v1693_v20  ;;  %v1708_v36 = vadd.f32 %v1700_v27, %v1694_v25  ;;  %v1759_v5 = vld [vmem:[#allocation11] sm:$0xf] }
 0x265   : > { %v1761_v9 = vperm.slane %v1759_v5, 0  ;;  %v1762_v10 = vperm.slane %v1759_v5, 1  ;;  %v1763_v11 = vperm.slane %v1759_v5, 2  ;;  %v1764_v12 = vperm.slane %v1759_v5, 3 }
 0x266   : > { %v1713_v38 = vadd.f32 %v1709_v29, %v1705_v32  ;;  %v1714_v39 = vadd.f32 %v1710_v30, %v1706_v33  ;;  %v1715_v40 = vadd.f32 %v1711_v31, %v1707_v35  ;;  %v1716_v58 = vadd.f32 %v1712_v37, %v1708_v36 }
 0x267   : > { %v2160_v44 = vpop.eup %2159  ;;  %v1775_v13 = vperm.slane %v1773_v7, 0  ;;  %v1776_v14 = vperm.slane %v1773_v7, 1  ;;  %v1777_v15 = vperm.slane %v1773_v7, 2  ;;  %v1778_v25 = vperm.slane %v1773_v7, 3 }
 0x268   : > { %v1717_v41 = vadd.f32 %v1714_v39, %v1713_v38  ;;  %v1723_v61 = vmul.f32 512.0, %v2160_v44  ;;  %vm1727_vm0 = vweird.f32 %v2160_v44 }
 0x26a   : > { %v1718_v42 = vadd.f32 %v1717_v41, %v1715_v40  ;;  %v1724_v52 = vsub.f32 1.0, %v1723_v61 }
 0x26c   : > { %v1719_v57 = vadd.f32 %v1718_v42, %v1716_v58  ;;  %v1725_v45 = vmul.f32 %v2160_v44, %v1724_v52 }
 0x26e   : > { %1720 = vadd.xlane.f32.xlu0 %v1719_v57  ;;  %v1726_v46 = vadd.f32 %v2160_v44, %v1725_v45 }
 0x270   : > { %v1728_v59 = vsel %vm1727_vm0, %v2160_v44, %v1726_v46 }
 0x2e1   : > { %v1721_v47 = vpop.xlane.xlu0 %1720 }
 0x2e2   : > { %v1729_v48 = vmul.f32 %v1728_v59, %v1721_v47 }
 0x2e4   : > { %v1730_v26 = vsub.f32 %v1713_v38, %v1729_v48  ;;  %v1731_v49 = vsub.f32 %v1714_v39, %v1729_v48  ;;  %v1732_v28 = vsub.f32 %v1715_v40, %v1729_v48  ;;  %v1733_v50 = vsub.f32 %v1716_v58, %v1729_v48 }
 0x2e6   : > { %v1734_v51 = vmul.f32 %v1730_v26, %v1730_v26  ;;  %v1735_v53 = vmul.f32 %v1731_v49, %v1731_v49  ;;  %v1736_v54 = vmul.f32 %v1732_v28, %v1732_v28  ;;  %v1737_v56 = vmul.f32 %v1733_v50, %v1733_v50 }
 0x2e8   : > { %v1738_v55 = vadd.f32 %v1735_v53, %v1734_v51 }
 0x2ea   : > { %v1739_v34 = vadd.f32 %v1738_v55, %v1736_v54 }
 0x2ec   : > { %v1740_v60 = vadd.f32 %v1739_v34, %v1737_v56 }
 0x2ee   : > { %1741 = vadd.xlane.f32.xlu0 %v1740_v60 }
 0x361   : > { %v1742_v62 = vpop.xlane.xlu0 %1741 }
 0x362   : > { %v1743_v63 = vmul.f32 %v1742_v62, %v1728_v59 }
 0x364   : > { %v1744_v0 = vadd.f32 1e-05, %v1743_v63 }
 0x366   : > { %2161 = vrsqrt.f32 %v1744_v0  ;;  %vm1751_vm2 = vweird.f32 %v1744_v0 }
 0x36c   : > { %v2162_v1 = vpop.eup %2161 }
 0x36d   : > { %v1746_v2 = vmul.f32 %v2162_v1, %v1744_v0  ;;  %vm1752_vm1 = vweird.f32 %v2162_v1 }
 0x36e   : > { %vm1753_vm3 = vmor %vm1751_vm2, %vm1752_vm1 }
 0x36f   : > { %v1747_v3 = vmul.f32 %v2162_v1, %v1746_v2 }
 0x371   : > { %v1748_v4 = vmul.f32 0.5, %v1747_v3 }
 0x373   : > { %v1749_v6 = vsub.f32 1.5, %v1748_v4 }
 0x375   : > { %v1750_v8 = vmul.f32 %v2162_v1, %v1749_v6 }
 0x377   : > { %v1754_v16 = vsel %vm1753_vm3, %v2162_v1, %v1750_v8 }
 0x378   : > { %v1755_v17 = vmul.f32 %v1754_v16, %v1730_v26  ;;  %v1756_v18 = vmul.f32 %v1754_v16, %v1731_v49  ;;  %v1757_v19 = vmul.f32 %v1754_v16, %v1732_v28  ;;  %v1758_v20 = vmul.f32 %v1754_v16, %v1733_v50 }
 0x37a   : > { %v1769_v21 = vmul.f32 %v1761_v9, %v1755_v17  ;;  %v1770_v22 = vmul.f32 %v1762_v10, %v1756_v18  ;;  %v1771_v23 = vmul.f32 %v1763_v11, %v1757_v19  ;;  %v1772_v24 = vmul.f32 %v1764_v12, %v1758_v20 }
 0x37c   : > { %v1783_v27 = vadd.f32 %v1775_v13, %v1769_v21  ;;  %v1784_v29 = vadd.f32 %v1776_v14, %v1770_v22  ;;  %v1785_v30 = vadd.f32 %v1777_v15, %v1771_v23  ;;  %v1786_v31 = vadd.f32 %v1778_v25, %v1772_v24 }
 0x37e   : > { %1787 = vst [vmem:[%s2728_s22] sm:$0xff] %v1783_v27 }
 0x37f   : > { %1788 = vst [vmem:[%s2728_s22 + $0x8] sm:$0xff] %v1784_v29 }
 0x380   : > { %1789 = vst [vmem:[%s2728_s22 + $0x10] sm:$0xff] %v1785_v30 }
 0x381   : > { %1790 = vst [vmem:[%s2728_s22 + $0x18] sm:$0xff] %v1786_v31 }
 0x382 PF: > { %s3413_s30 = sld [smem:[#allocation23_spill]]  ;;  %s1805_s13 = sshll.u32 %s2728_s22, 4  ;;  %s1806_s13 = int_to_ptr.vmem [resolvable:$true] %s1805_s13 }
 0x383   : > { %s3415_s24 = sld [smem:[#allocation35_spill]]  ;;  %s1792_s5 = scalar_lea.sflag [#allocation5], %s446_s15 }
 0x388   : > { %s2010_s4 = sshll.u32 %s3413_s30, 5 }
 0x389   : > { %s3416_s0 = smov %s3415_s24  ;;  %s1803_s16 = scalar_lea.hbm %s3415_s24, %s2010_s4 }
 0x38a   : > { %s1807_s2 = sshll.u32 %s1803_s16, 4  ;;  %s2363_s10 = scalar_lea.hbm %s3416_s0, 64  ;;  %s1808_s2 = int_to_ptr.hbm [resolvable:$true] %s1807_s2 }
 0x38b   : > { %s2357_s8 = sshra.s32 %s1808_s2, 4  ;;  %s2358_s8 = int_to_ptr.hbm [resolvable:$true] %s2357_s8 }
 0x38c   : > { %s2359_s21 = scalar_lea.hbm %s2358_s8, 32  ;;  %p2364_p5 = scmp.lt.s32.totalorder %s2358_s8, %s3416_s0 }
 0x38d   : > { %p2360_p13 = scmp.ne.s32.totalorder %s2358_s8, %s2359_s21  ;;  %p2365_p6 = scmp.lt.s32.totalorder %s2363_s10, %s2359_s21 }
 0x38f   : > { %p2361_p2 = pnand %p2360_p13, %p2598_p7  ;;  %p2366_p8 = por %p2365_p6, %p2364_p5 }
 0x391   : > { %p2362_p4 = pneg %p2361_p2 }
 0x393   : > { %p2367_p10 = pnand %p2366_p8, %p2362_p4 }
 0x395   : > { %2370 = shalt.err (!%p2367_p10)
}
 0x396   : > { %2029 = dma.vmem_to_hbm [thread:$0]  (%p2598_p7), %s1806_s13, 512, %s1808_s2, %s1792_s5  }
 0x397 PF: > { %s3417_s15 = sld [smem:[#allocation20_spill]]  ;;  %p2062_p12 = scmp.ge.s32.totalorder %s2477_s11, 2 }
 0x399   : > { %p2052_p0 = pnand %p2062_p12, %p2603_p9 }
 0x39b   : > { %p2053_p3 = pneg %p2052_p0 }
 0x39d   : > { %s1819_s22 = sand.u32 1, %s3417_s15  }
 0x39e   : > { %s1820_s20 = scalar_lea.sflag [#allocation5], %s1819_s22 }
 0x39f   : > { %2432 = dma.done.wait (%p2053_p3), %s1820_s20, 512  }
 0x3a0   : > { %2434 = vsyncadd (%p2053_p3), %s1820_s20, 4294966784  ;;  %s28_s11 = sadd.s32 1, %s2477_s11   ;;  %s3419_s12 = sld [smem:[#allocation30_spill]] }
 0x3a1   : > { %p25_p11 = scmp.ge.s32.totalorder %s28_s11, 10   ;;  %s3420_s30 = sld [smem:[#allocation21_spill]] }
 0x3a2   : > { %s3421_s29 = sld [smem:[#allocation29_spill]]  ;;  %s3425_s24 = smov %s2441_s25 }
 0x3a3   : > { %s3422_s8 = sld [smem:[#allocation24_spill]]  ;;  %s3426_s25 = smov %s2445_s26 }
 0x3a4   : > { %s3423_s7 = sld [smem:[#allocation27_spill]]  ;;  %s3428_s27 = smov %s2453_s28 }
 0x3a5   : > { %s3424_s10 = sld [smem:[#allocation28_spill]] }
 0x3a6   : > { %s3427_s26 = smov %s3419_s12  ;;  %27 = sbr.rel (!%p25_p11) target bundleno = 19 (0x13), region = 140 }
 0x3a7   : > { %s3429_s28 = smov %s3420_s30  ;;  %s3430_s30 = smov %s2469_s9 }
 0x3aa   : > { %s3431_s9 = smov %s3423_s7 }
 0x3ab   :  { %1826 = vsyncpa [#allocation4], 1 }
 0x3ac   :  { %1828 = vsyncpa [#allocation4 + $0x1], 1 }
 0x3ad   :  { %1829 = vsyncpa [#allocation7], 1 }
 0x3ae   :  { %1831 = vsyncpa [#allocation7 + $0x1], 1 }
 0x3af   :  { %1832 = vsyncpa [#allocation10], 1 }
 0x3b0   :  { %1833 = vsyncpa [#allocation13], 1 }
 0x3b1   :  { %1834 = vsyncpa [#allocation5], 1 }
 0x3b2   :  { %1836 = vsyncpa [#allocation5 + $0x1], 1 }

// kernel: encoder_forward.6
= control target key start
LH: loop header
LB: loop body
LE: loop exit
PB: predicated region body
PF: predicated region fallthrough
CT: control target
= control target key end

     0   :  { %11 = vsyncpa [#allocation4], 0  ;;  %s1833_s0 = inlined_call_operand.vmem [shape: f32[16,512], index: 0, kind: input, shape index: {}]   ;;  %s1834_s1 = inlined_call_operand.hbm [shape: f32[512,512], index: 1, kind: input, shape index: {}]   ;;  %s1835_s2 = inlined_call_operand.hbm [shape: f32[1,512], index: 2, kind: input, shape index: {}]   ;;  %s1836_s3 = inlined_call_operand.hbm [shape: f32[16,512], index: 3, kind: input, shape index: {}]   ;;  %s1837_s4 = inlined_call_operand.hbm [shape: f32[1,512], index: 4, kind: input, shape index: {}]   ;;  %s1838_s5 = inlined_call_operand.hbm [shape: f32[1,512], index: 5, kind: input, shape index: {}]   ;;  %s1839_s6 = inlined_call_operand.vmem [shape: f32[16,512], index: 6, kind: output, shape index: {}]  }
   0x1   :  { %12 = vsyncpa [#allocation6], 0 }
   0x2   :  { %13 = vsyncpa [#allocation10], 0  ;;  %s1633_s21 = smov 0   ;;  %s1635_s22 = smov 0  }
   0x3   :  { %s1637_s23 = smov 0   ;;  %s1639_s24 = smov 0  }
   0x4   :  { %s1641_s25 = smov 0   ;;  %s1643_s26 = smov 0  }
   0x5 LB: > { %s1840_s27 = sadd.s32 4294967295, %s1589_s26   ;;  %p1246_p0 = scmp.ge.s32.totalorder %s1589_s26, 1  ;;  %s1589_s26 = sphi %s1643_s26, %s19_s26   ;;  %s1585_s25 = sphi %s1641_s25, %s1852_s25   ;;  %s1581_s24 = sphi %s1639_s24, %s1851_s24   ;;  %s1577_s23 = sphi %s1637_s23, %s1850_s23   ;;  %s1573_s22 = sphi %s1635_s22, %s1849_s22   ;;  %s1569_s21 = sphi %s1633_s21, %s1848_s21  }
   0x6   : > { %p1667_p1 = scmp.eq.s32.totalorder %s1840_s27, 0  ;;  %p205_p2 = scmp.lt.s32.totalorder %s1589_s26, 3 }
   0x7   : > { %s220_s7 = sshll.u32 %s1834_s1, 4  ;;  %s1591_s9 = smov [#allocation3]   ;;  %s221_s7 = int_to_ptr.hbm [resolvable:$true] %s220_s7 }
   0x8   : > { %p1675_p3 = pnand %p1246_p0, %p205_p2  ;;  %s222_s10 = sshll.u32 %s1591_s9, 4  ;;  %s223_s10 = int_to_ptr.vmem [resolvable:$true] %s222_s10 }
   0x9   : > { %s235_s14 = sshll.u32 %s1835_s2, 4  ;;  %s1592_s15 = smov 512   ;;  %s236_s14 = int_to_ptr.hbm [resolvable:$true] %s235_s14 }
   0xa   : > { %p1288_p4 = pneg %p1675_p3  ;;  %s1593_s16 = smov 32  }
   0xb   : > { %s1594_s17 = smov [#allocation5]   ;;  %s247_s29 = sshll.u32 %s1837_s4, 4  ;;  %s248_s29 = int_to_ptr.hbm [resolvable:$true] %s247_s29 }
   0xc   : > { %p1683_p5 = pnand %p1288_p4, %p1667_p1  ;;  %s237_s18 = sshll.u32 %s1594_s17, 4  ;;  %s238_s18 = int_to_ptr.vmem [resolvable:$true] %s237_s18 }
   0xd   : > { %s1596_s13 = smov [#allocation9]   ;;  %p120_p7 = scmp.ne.s32.totalorder %s1577_s23, %s1573_s22 }
   0xe   : > { %1291 = dma.hbm_to_vmem [thread:$0]  (!%p1683_p5), %s221_s7, 32768, %s223_s10, [#allocation4], %s1592_s15, %s1592_s15, %s1593_s16  }
   0xf   : > { %1294 = dma.hbm_to_vmem [thread:$0]  (!%p1683_p5), %s236_s14, 64, %s238_s18, [#allocation6]  }
  0x10   : > { %s259_s7 = sshll.u32 %s1838_s5, 4  ;;  %s1595_s10 = smov [#allocation8]   ;;  %s260_s7 = int_to_ptr.hbm [resolvable:$true] %s259_s7 }
  0x11   : > { %s249_s12 = sshll.u32 %s1595_s10, 4  ;;  %s261_s15 = sshll.u32 %s1596_s13, 4  ;;  %s250_s12 = int_to_ptr.vmem [resolvable:$true] %s249_s12  ;;  %s262_s15 = int_to_ptr.vmem [resolvable:$true] %s261_s15 }
  0x12   : > { %1297 = dma.hbm_to_vmem [thread:$0]  (!%p1683_p5), %s248_s29, 64, %s250_s12, [#allocation6]  }
  0x13   : > { %1300 = dma.hbm_to_vmem [thread:$0]  (!%p1683_p5), %s260_s7, 64, %s262_s15, [#allocation10]  }
  0x14   : > { %s31_s14 = sadd.s32 1, %s1585_s25  ;;  %p121_p8 = scmp.eq.s32.totalorder %s1589_s26, 0 }
  0x15   : > { %p33_p6 = scmp.ge.s32.totalorder %s31_s14, 2  ;;  %p126_p9 = scmp.ne.s32.totalorder %s1573_s22, %s1569_s21 }
  0x16   : > { %s113_s16 = sadd.s32 1, %s1577_s23  ;;  %p1721_p11 = por %p121_p8, %p120_p7 }
  0x17   : > { %s1854_s14 = smov (%p33_p6, %s31_s14), 0  ;;  %p1715_p10 = por %p1667_p1, %p126_p9 }
  0x18   : > { %s110_s18 = ssub.s32 %s1585_s25, %s1854_s14  ;;  %p1309_p13 = scmp.lt.s32.totalorder %s1589_s26, 2 }
  0x19   : > { %p111_p12 = scmp.eq.s32.totalorder %s110_s18, 0  ;;  %s285_s19 = sand.u32 1, %s1589_s26  }
  0x1a   : > { %s287_s20 = sand.u32 1, %s1577_s23   ;;  %s1267_s30 = sshll.u32 %s1585_s25, 5 }
  0x1b   : > { %s1729_s21 = scalar_select %p111_p12, %s1577_s23, %s113_s16  }
  0x1c   : > { %s1252_s29 = sshll.u32 %s287_s20, 5  ;;  %s294_s10 = scalar_lea.hbm %s1836_s3, %s1267_s30 }
  0x1d   : > { %s296_s12 = sshll.u32 %s294_s10, 4  ;;  %s289_s13 = scalar_lea.vmem [#allocation7], %s1252_s29  ;;  %s297_s12 = int_to_ptr.hbm [resolvable:$true] %s296_s12 }
  0x1e   : > { %s298_s15 = sshll.u32 %s289_s13, 4  ;;  %p1302_p0 = pnand %p1309_p13, %p1721_p11  ;;  %s299_s15 = int_to_ptr.vmem [resolvable:$true] %s298_s15 }
  0x1f   : > { %s286_s27 = scalar_lea.sflag [#allocation4], %s285_s19  ;;  %307 = sbr.rel (%p1675_p3) target bundleno = 628 (0x274), region = 44 }
  0x20   : > { %1304 = dma.hbm_to_vmem [thread:$0]  (!%p1302_p0), %s297_s12, 512, %s299_s15, %s286_s27  }
  0x24   : > { %1548 = dma.done.wait (%p1667_p1), [#allocation4], 32768  }
  0x25   : > { %1550 = vsyncadd (%p1667_p1), [#allocation4], 4294934528 }
  0x26   : > { %1552 = dma.done.wait (%p1667_p1), [#allocation6], 64  }
  0x27   : > { %1554 = vsyncadd (%p1667_p1), [#allocation6], 4294967232  ;;  %s1846_s16 = sadd.s32 4294967295, %s1589_s26   ;;  %s321_s18 = sand.u32 1, %s1573_s22  }
  0x28   : > { %s319_s27 = sand.u32 1, %s1846_s16   ;;  %s1258_s8 = sshll.u32 %s321_s18, 5 }
  0x29   : > { %s320_s11 = scalar_lea.sflag [#allocation4], %s319_s27  ;;  %s1750_s19 = scalar_lea.vmem [#allocation7], %s1258_s8 }
  0x2a   : > { %1556 = dma.done.wait (%p1715_p10), %s320_s11, 512  }
  0x2b   : > { %1558 = vsyncadd (%p1715_p10), %s320_s11, 4294966784 }
  0x2c   : > { %1560 = dma.done.wait (%p1667_p1), [#allocation6], 64  }
  0x2d   : > { %1562 = vsyncadd (%p1667_p1), [#allocation6], 4294967232 }
  0x2e   : > { %1564 = dma.done.wait (%p1667_p1), [#allocation10], 64  }
  0x2f   : > { %1566 = vsyncadd (%p1667_p1), [#allocation10], 4294967232  ;;  %v464_v0 = vld [vmem:[#allocation3 + $0x1c0] sm:$0xff]  ;;  %p373_p1 = scmp.lt.s32.totalorder %s1581_s24, 1 }
  0x30   : > { %v468_v1 = vld [vmem:[#allocation3 + $0x1e0] sm:$0xff] }
  0x31   : > { %v528_v2 = vld [vmem:[#allocation3 + $0x3c0] sm:$0xff]  ;;  %v692_v3 = vpack.c.bf16 %v468_v1, %v464_v0  ;;  %s1856_s24 = smov (!%p373_p1, %s1581_s24), 1 }
  0x32   : > { %v532_v4 = vld [vmem:[#allocation3 + $0x3e0] sm:$0xff]  ;;  %s1268_s28 = sshll.u32 %s1856_s24, 5 }
  0x33   : > { %v592_v5 = vld [vmem:[#allocation3 + $0x5c0] sm:$0xff]  ;;  %v724_v7 = vpack.c.bf16 %v532_v4, %v528_v2  ;;  %792 = vmatpush.bf16.msra.mxu0 %v692_v3  ;;  %s1776_s29 = scalar_lea.vmem %s1833_s0, %s1268_s28  ;;  %s387_s7 = scalar_lea.vmem %s1839_s6, %s1268_s28 }
  0x34   : > { %v596_v6 = vld [vmem:[#allocation3 + $0x5e0] sm:$0xff] }
  0x35   : > { %v756_v8 = vpack.c.bf16 %v596_v6, %v592_v5  ;;  %v656_v9 = vld [vmem:[#allocation3 + $0x7c0] sm:$0xff]  ;;  %805 = vmatpush.bf16.msra.mxu1 %v724_v7 }
  0x36   : > { %v660_v10 = vld [vmem:[#allocation3 + $0x7e0] sm:$0xff] }
  0x37   : > { %v456_v11 = vld [vmem:[#allocation3 + $0x180] sm:$0xff]  ;;  %v788_v12 = vpack.c.bf16 %v660_v10, %v656_v9  ;;  %818 = vmatpush.bf16.msra.mxu2 %v756_v8 }
  0x38   : > { %v460_v13 = vld [vmem:[#allocation3 + $0x1a0] sm:$0xff] }
  0x39   : > { %v520_v14 = vld [vmem:[#allocation3 + $0x380] sm:$0xff]  ;;  %v688_v16 = vpack.c.bf16 %v460_v13, %v456_v11  ;;  %831 = vmatpush.bf16.msra.mxu3 %v788_v12 }
  0x3a   : > { %v524_v15 = vld [vmem:[#allocation3 + $0x3a0] sm:$0xff] }
  0x3b   : > { %v720_v17 = vpack.c.bf16 %v524_v15, %v520_v14  ;;  %v584_v18 = vld [vmem:[#allocation3 + $0x580] sm:$0xff]  ;;  %793 = vmatpush.bf16.msra.mxu0 %v688_v16 }
  0x3c   : > { %v588_v19 = vld [vmem:[#allocation3 + $0x5a0] sm:$0xff] }
  0x3d   : > { %v648_v20 = vld [vmem:[#allocation3 + $0x780] sm:$0xff]  ;;  %v752_v21 = vpack.c.bf16 %v588_v19, %v584_v18  ;;  %806 = vmatpush.bf16.msra.mxu1 %v720_v17 }
  0x3e   : > { %v652_v22 = vld [vmem:[#allocation3 + $0x7a0] sm:$0xff] }
  0x3f   : > { %v448_v23 = vld [vmem:[#allocation3 + $0x140] sm:$0xff]  ;;  %v784_v25 = vpack.c.bf16 %v652_v22, %v648_v20  ;;  %819 = vmatpush.bf16.msra.mxu2 %v752_v21 }
  0x40   : > { %v452_v24 = vld [vmem:[#allocation3 + $0x160] sm:$0xff] }
  0x41   : > { %v512_v26 = vld [vmem:[#allocation3 + $0x340] sm:$0xff]  ;;  %v684_v29 = vpack.c.bf16 %v452_v24, %v448_v23  ;;  %832 = vmatpush.bf16.msra.mxu3 %v784_v25 }
  0x42   : > { %v516_v27 = vld [vmem:[#allocation3 + $0x360] sm:$0xff] }
  0x43   : > { %v576_v28 = vld [vmem:[#allocation3 + $0x540] sm:$0xff]  ;;  %v716_v33 = vpack.c.bf16 %v516_v27, %v512_v26  ;;  %794 = vmatpush.bf16.msra.mxu0 %v684_v29  ;;  %v469_v29 = vld [vmem:[#allocation3 + $0x1e8] sm:$0xff] }
  0x44   : > { %v580_v30 = vld [vmem:[#allocation3 + $0x560] sm:$0xff] }
  0x45   : > { %v640_v31 = vld [vmem:[#allocation3 + $0x740] sm:$0xff]  ;;  %v748_v34 = vpack.c.bf16 %v580_v30, %v576_v28  ;;  %807 = vmatpush.bf16.msra.mxu1 %v716_v33  ;;  %v465_v28 = vld [vmem:[#allocation3 + $0x1c8] sm:$0xff] }
  0x46   : > { %v644_v32 = vld [vmem:[#allocation3 + $0x760] sm:$0xff]  ;;  %v529_v30 = vld [vmem:[#allocation3 + $0x3c8] sm:$0xff] }
  0x47   : > { %v440_v35 = vld [vmem:[#allocation3 + $0x100] sm:$0xff]  ;;  %v780_v38 = vpack.c.bf16 %v644_v32, %v640_v31  ;;  %820 = vmatpush.bf16.msra.mxu2 %v748_v34  ;;  %v533_v32 = vld [vmem:[#allocation3 + $0x3e8] sm:$0xff] }
  0x48   : > { %v444_v36 = vld [vmem:[#allocation3 + $0x120] sm:$0xff]  ;;  %v593_v33 = vld [vmem:[#allocation3 + $0x5c8] sm:$0xff] }
  0x49   : > { %v504_v37 = vld [vmem:[#allocation3 + $0x300] sm:$0xff]  ;;  %v680_v44 = vpack.c.bf16 %v444_v36, %v440_v35  ;;  %833 = vmatpush.bf16.msra.mxu3 %v780_v38  ;;  %v597_v34 = vld [vmem:[#allocation3 + $0x5e8] sm:$0xff] }
  0x4a   : > { %v508_v39 = vld [vmem:[#allocation3 + $0x320] sm:$0xff]  ;;  %v661_v38 = vld [vmem:[#allocation3 + $0x7e8] sm:$0xff] }
  0x4b   : > { %v568_v40 = vld [vmem:[#allocation3 + $0x500] sm:$0xff]  ;;  %v712_v45 = vpack.c.bf16 %v508_v39, %v504_v37  ;;  %795 = vmatpush.bf16.msra.mxu0 %v680_v44  ;;  %v657_v37 = vld [vmem:[#allocation3 + $0x7c8] sm:$0xff] }
  0x4c   : > { %v572_v41 = vld [vmem:[#allocation3 + $0x520] sm:$0xff]  ;;  %v461_v44 = vld [vmem:[#allocation3 + $0x1a8] sm:$0xff] }
  0x4d   : > { %v632_v42 = vld [vmem:[#allocation3 + $0x700] sm:$0xff]  ;;  %v744_v46 = vpack.c.bf16 %v572_v41, %v568_v40  ;;  %808 = vmatpush.bf16.msra.mxu1 %v712_v45  ;;  %v693_v40 = vpack.c.bf16 %v469_v29, %v465_v28  ;;  %v725_v41 = vpack.c.bf16 %v533_v32, %v529_v30  ;;  %v521_v45 = vld [vmem:[#allocation3 + $0x388] sm:$0xff] }
  0x4e   : > { %v636_v43 = vld [vmem:[#allocation3 + $0x720] sm:$0xff]  ;;  %v561_v28 = vld [vmem:[#allocation3 + $0x4c8] sm:$0xff] }
  0x4f   : > { %v432_v47 = vld [vmem:[#allocation3 + $0xc0] sm:$0xff]  ;;  %v776_v50 = vpack.c.bf16 %v636_v43, %v632_v42  ;;  %821 = vmatpush.bf16.msra.mxu2 %v744_v46  ;;  %v757_v42 = vpack.c.bf16 %v597_v34, %v593_v33  ;;  %v457_v43 = vld [vmem:[#allocation3 + $0x188] sm:$0xff]  ;;  %v789_v46 = vpack.c.bf16 %v661_v38, %v657_v37 }
  0x50   : > { %v436_v48 = vld [vmem:[#allocation3 + $0xe0] sm:$0xff]  ;;  %v565_v29 = vld [vmem:[#allocation3 + $0x4e8] sm:$0xff] }
  0x51   : > { %v496_v49 = vld [vmem:[#allocation3 + $0x2c0] sm:$0xff]  ;;  %v676_v56 = vpack.c.bf16 %v436_v48, %v432_v47  ;;  %834 = vmatpush.bf16.msra.mxu3 %v776_v50  ;;  %v525_v47 = vld [vmem:[#allocation3 + $0x3a8] sm:$0xff]  ;;  %v741_v34 = vpack.c.bf16 %v565_v29, %v561_v28  ;;  %v586_v28 = vld [vmem:[#allocation3 + $0x590] sm:$0xff] }
  0x52   : > { %v500_v51 = vld [vmem:[#allocation3 + $0x2e0] sm:$0xff]  ;;  %v585_v48 = vld [vmem:[#allocation3 + $0x588] sm:$0xff]  ;;  %v590_v29 = vld [vmem:[#allocation3 + $0x5b0] sm:$0xff] }
  0x53   : > { %v560_v52 = vld [vmem:[#allocation3 + $0x4c0] sm:$0xff]  ;;  %v708_v57 = vpack.c.bf16 %v500_v51, %v496_v49  ;;  %796 = vmatpush.bf16.msra.mxu0 %v676_v56  ;;  %v589_v49 = vld [vmem:[#allocation3 + $0x5a8] sm:$0xff] }
  0x54   : > { %v564_v53 = vld [vmem:[#allocation3 + $0x4e0] sm:$0xff]  ;;  %v649_v50 = vld [vmem:[#allocation3 + $0x788] sm:$0xff] }
  0x55   : > { %v624_v54 = vld [vmem:[#allocation3 + $0x6c0] sm:$0xff]  ;;  %v740_v58 = vpack.c.bf16 %v564_v53, %v560_v52  ;;  %809 = vmatpush.bf16.msra.mxu1 %v708_v57  ;;  %v653_v51 = vld [vmem:[#allocation3 + $0x7a8] sm:$0xff]  ;;  %v402_v52 = vld [vmem:[%s1776_s29 + $0x10] sm:$0xff]  ;;  %v689_v53 = vpack.c.bf16 %v461_v44, %v457_v43 }
  0x56   : > { %v628_v55 = vld [vmem:[#allocation3 + $0x6e0] sm:$0xff]  ;;  %v513_v56 = vld [vmem:[#allocation3 + $0x348] sm:$0xff]  ;;  %v1779_v57 = vpack.c.bf16 %v402_v52, %v402_v52 }
  0x57   : > { %v424_v59 = vld [vmem:[#allocation3 + $0x80] sm:$0xff]  ;;  %v772_v62 = vpack.c.bf16 %v628_v55, %v624_v54  ;;  %822 = vmatpush.bf16.msra.mxu2 %v740_v58  ;;  %v449_v54 = vld [vmem:[#allocation3 + $0x148] sm:$0xff]  ;;  %v721_v58 = vpack.c.bf16 %v525_v47, %v521_v45 }
  0x58   : > { %v428_v60 = vld [vmem:[#allocation3 + $0xa0] sm:$0xff]  ;;  %v453_v55 = vld [vmem:[#allocation3 + $0x168] sm:$0xff] }
  0x59   : > { %v488_v61 = vld [vmem:[#allocation3 + $0x280] sm:$0xff]  ;;  %v672_v4 = vpack.c.bf16 %v428_v60, %v424_v59  ;;  %835 = vmatpush.bf16.msra.mxu3 %v772_v62  ;;  %v753_v59 = vpack.c.bf16 %v589_v49, %v585_v48  ;;  %v517_v60 = vld [vmem:[#allocation3 + $0x368] sm:$0xff] }
  0x5a   : > { %v492_v63 = vld [vmem:[#allocation3 + $0x2a0] sm:$0xff]  ;;  %v581_v62 = vld [vmem:[#allocation3 + $0x568] sm:$0xff] }
  0x5b   : > { %v552_v0 = vld [vmem:[#allocation3 + $0x480] sm:$0xff]  ;;  %v704_v5 = vpack.c.bf16 %v492_v63, %v488_v61  ;;  %797 = vmatpush.bf16.msra.mxu0 %v672_v4  ;;  %v577_v61 = vld [vmem:[#allocation3 + $0x548] sm:$0xff]  ;;  %v785_v63 = vpack.c.bf16 %v653_v51, %v649_v50 }
  0x5c   : > { %v556_v1 = vld [vmem:[#allocation3 + $0x4a0] sm:$0xff]  ;;  %v645_v4 = vld [vmem:[#allocation3 + $0x768] sm:$0xff] }
  0x5d   : > { %v616_v2 = vld [vmem:[#allocation3 + $0x680] sm:$0xff]  ;;  %v736_v6 = vpack.c.bf16 %v556_v1, %v552_v0  ;;  %810 = vmatpush.bf16.msra.mxu1 %v704_v5  ;;  %v403_v0 = vld [vmem:[%s1776_s29 + $0x18] sm:$0xff]  ;;  %v625_v30 = vld [vmem:[#allocation3 + $0x6c8] sm:$0xff] }
  0x5e   : > { %v620_v3 = vld [vmem:[#allocation3 + $0x6a0] sm:$0xff]  ;;  %v1785_v5 = vpack.c.bf16 %v403_v0, %v403_v0  ;;  %v489_v37 = vld [vmem:[#allocation3 + $0x288] sm:$0xff] }
  0x5f   : > { %v416_v7 = vld [vmem:[#allocation3 + $0x40] sm:$0xff]  ;;  %v768_v10 = vpack.c.bf16 %v620_v3, %v616_v2  ;;  %823 = vmatpush.bf16.msra.mxu2 %v736_v6  ;;  %v401_v2 = vld [vmem:[%s1776_s29 + $0x8] sm:$0xff] }
  0x60   : > { %v420_v8 = vld [vmem:[#allocation3 + $0x60] sm:$0xff]  ;;  %v641_v3 = vld [vmem:[#allocation3 + $0x748] sm:$0xff] }
  0x61   : > { %v480_v9 = vld [vmem:[#allocation3 + $0x240] sm:$0xff]  ;;  %v668_v16 = vpack.c.bf16 %v420_v8, %v416_v7  ;;  %836 = vmatpush.bf16.msra.mxu3 %v768_v10  ;;  %v1789_v7 = vpack.c.bf16 %v401_v2, %v401_v2  ;;  %v685_v8 = vpack.c.bf16 %v453_v55, %v449_v54  ;;  %v749_v10 = vpack.c.bf16 %v581_v62, %v577_v61  ;;  %v621_v43 = vld [vmem:[#allocation3 + $0x6a8] sm:$0xff] }
  0x62   : > { %v484_v11 = vld [vmem:[#allocation3 + $0x260] sm:$0xff]  ;;  %v417_v47 = vld [vmem:[#allocation3 + $0x48] sm:$0xff] }
  0x63   : > { %v544_v12 = vld [vmem:[#allocation3 + $0x440] sm:$0xff]  ;;  %v700_v19 = vpack.c.bf16 %v484_v11, %v480_v9  ;;  %798 = vmatpush.bf16.msra.mxu0 %v668_v16  ;;  %v717_v9 = vpack.c.bf16 %v517_v60, %v513_v56  ;;  %v441_v11 = vld [vmem:[#allocation3 + $0x108] sm:$0xff] }
  0x64   : > { %v548_v13 = vld [vmem:[#allocation3 + $0x460] sm:$0xff]  ;;  %v569_v16 = vld [vmem:[#allocation3 + $0x508] sm:$0xff] }
  0x65   : > { %v608_v14 = vld [vmem:[#allocation3 + $0x640] sm:$0xff]  ;;  %v732_v20 = vpack.c.bf16 %v548_v13, %v544_v12  ;;  %811 = vmatpush.bf16.msra.mxu1 %v700_v19  ;;  %v445_v12 = vld [vmem:[#allocation3 + $0x128] sm:$0xff] }
  0x66   : > { %v612_v15 = vld [vmem:[#allocation3 + $0x660] sm:$0xff]  ;;  %v505_v13 = vld [vmem:[#allocation3 + $0x308] sm:$0xff] }
  0x67   : > { %v408_v17 = vld [vmem:[#allocation3] sm:$0xff]  ;;  %v764_v24 = vpack.c.bf16 %v612_v15, %v608_v14  ;;  %824 = vmatpush.bf16.msra.mxu2 %v732_v20  ;;  %v781_v14 = vpack.c.bf16 %v645_v4, %v641_v3  ;;  %v509_v15 = vld [vmem:[#allocation3 + $0x328] sm:$0xff]  ;;  %v681_v20 = vpack.c.bf16 %v445_v12, %v441_v11  ;;  %v534_v12 = vld [vmem:[#allocation3 + $0x3f0] sm:$0xff] }
  0x68   : > { %v412_v18 = vld [vmem:[#allocation3 + $0x20] sm:$0xff]  ;;  %v637_v19 = vld [vmem:[#allocation3 + $0x728] sm:$0xff] }
  0x69   : > { %v472_v21 = vld [vmem:[#allocation3 + $0x200] sm:$0xff]  ;;  %v664_v31 = vpack.c.bf16 %v412_v18, %v408_v17  ;;  %837 = vmatpush.bf16.msra.mxu3 %v764_v24  ;;  %v573_v17 = vld [vmem:[#allocation3 + $0x528] sm:$0xff] }
  0x6a   : > { %v476_v22 = vld [vmem:[#allocation3 + $0x220] sm:$0xff]  ;;  %v633_v18 = vld [vmem:[#allocation3 + $0x708] sm:$0xff] }
  0x6b   : > { %v536_v23 = vld [vmem:[#allocation3 + $0x400] sm:$0xff]  ;;  %v696_v35 = vpack.c.bf16 %v476_v22, %v472_v21  ;;  %799 = vmatpush.bf16.msra.mxu0 %v664_v31  ;;  %v713_v21 = vpack.c.bf16 %v509_v15, %v505_v13  ;;  %v745_v22 = vpack.c.bf16 %v573_v17, %v569_v16  ;;  %v437_v24 = vld [vmem:[#allocation3 + $0xe8] sm:$0xff]  ;;  %v594_v13 = vld [vmem:[#allocation3 + $0x5d0] sm:$0xff] }
  0x6c   : > { %v540_v25 = vld [vmem:[#allocation3 + $0x420] sm:$0xff]  ;;  %v629_v31 = vld [vmem:[#allocation3 + $0x6e8] sm:$0xff]  ;;  %v658_v17 = vld [vmem:[#allocation3 + $0x7d0] sm:$0xff] }
  0x6d   : > { %v600_v26 = vld [vmem:[#allocation3 + $0x600] sm:$0xff]  ;;  %v728_v36 = vpack.c.bf16 %v540_v25, %v536_v23  ;;  %812 = vmatpush.bf16.msra.mxu1 %v696_v35  ;;  %v433_v23 = vld [vmem:[#allocation3 + $0xc8] sm:$0xff]  ;;  %v773_v38 = vpack.c.bf16 %v629_v31, %v625_v30  ;;  %v650_v30 = vld [vmem:[#allocation3 + $0x790] sm:$0xff] }
  0x6e   : > { %v604_v27 = vld [vmem:[#allocation3 + $0x620] sm:$0xff]  ;;  %v497_v25 = vld [vmem:[#allocation3 + $0x2c8] sm:$0xff]  ;;  %v677_v32 = vpack.c.bf16 %v437_v24, %v433_v23  ;;  %v458_v23 = vld [vmem:[#allocation3 + $0x190] sm:$0xff] }
  0x6f   : > { %v760_v39 = vpack.c.bf16 %v604_v27, %v600_v26  ;;  %825 = vmatpush.bf16.msra.mxu2 %v728_v36  ;;  %844 = vmatpush.bf16.msrb.mxu0 %v693_v40  ;;  %v400_v1 = vld [vmem:[%s1776_s29] sm:$0xff]  ;;  %v777_v26 = vpack.c.bf16 %v637_v19, %v633_v18  ;;  %v501_v27 = vld [vmem:[#allocation3 + $0x2e8] sm:$0xff]  ;;  %v662_v18 = vld [vmem:[#allocation3 + $0x7f0] sm:$0xff] }
  0x70   : > { %v1787_v6 = vpack.c.bf16 %v400_v1, %v400_v1  ;;  %813 = vmatmul.bf16.vlgmr.msra.gmra.mxu1 %v1789_v7  ;;  %v709_v33 = vpack.c.bf16 %v501_v27, %v497_v25  ;;  %v425_v35 = vld [vmem:[#allocation3 + $0x88] sm:$0xff]  ;;  %v462_v24 = vld [vmem:[#allocation3 + $0x1b0] sm:$0xff] }
  0x71   : > { %838 = vmatpush.bf16.msra.mxu3 %v760_v39  ;;  %857 = vmatpush.bf16.msrb.mxu1 %v725_v41  ;;  %v429_v36 = vld [vmem:[#allocation3 + $0xa8] sm:$0xff]  ;;  %v522_v25 = vld [vmem:[#allocation3 + $0x390] sm:$0xff] }
  0x72   : > { %826 = vmatmul.bf16.vlgmr.msra.gmra.mxu2 %v1779_v57  ;;  %800 = vmatmul.bf16.vlgmr.msra.gmra.mxu0 %v1787_v6  ;;  %v493_v39 = vld [vmem:[#allocation3 + $0x2a8] sm:$0xff]  ;;  %v673_v44 = vpack.c.bf16 %v429_v36, %v425_v35  ;;  %v526_v27 = vld [vmem:[#allocation3 + $0x3b0] sm:$0xff] }
  0x73   : > { %870 = vmatpush.bf16.msrb.mxu2 %v757_v42  ;;  %845 = vmatpush.bf16.msrb.mxu0 %v689_v53  ;;  %v553_v40 = vld [vmem:[#allocation3 + $0x488] sm:$0xff]  ;;  %v705_v45 = vpack.c.bf16 %v493_v39, %v489_v37  ;;  %v654_v31 = vld [vmem:[#allocation3 + $0x7b0] sm:$0xff] }
  0x74   : > { %839 = vmatmul.bf16.vlgmr.msra.gmra.mxu3 %v1785_v5  ;;  %v557_v41 = vld [vmem:[#allocation3 + $0x4a8] sm:$0xff]  ;;  %v450_v35 = vld [vmem:[#allocation3 + $0x150] sm:$0xff] }
  0x75   : > { %883 = vmatpush.bf16.msrb.mxu3 %v789_v46  ;;  %858 = vmatpush.bf16.msrb.mxu1 %v721_v58  ;;  %v617_v42 = vld [vmem:[#allocation3 + $0x688] sm:$0xff]  ;;  %v737_v46 = vpack.c.bf16 %v557_v41, %v553_v40  ;;  %v454_v36 = vld [vmem:[#allocation3 + $0x170] sm:$0xff] }
  0x76   : > { %v421_v48 = vld [vmem:[#allocation3 + $0x68] sm:$0xff]  ;;  %v769_v50 = vpack.c.bf16 %v621_v43, %v617_v42  ;;  %v514_v37 = vld [vmem:[#allocation3 + $0x350] sm:$0xff] }
  0x77   : > { %871 = vmatpush.bf16.msrb.mxu2 %v753_v59  ;;  %846 = vmatpush.bf16.msrb.mxu0 %v685_v8  ;;  %v481_v49 = vld [vmem:[#allocation3 + $0x248] sm:$0xff]  ;;  %v669_v56 = vpack.c.bf16 %v421_v48, %v417_v47  ;;  %v466_v8 = vld [vmem:[#allocation3 + $0x1d0] sm:$0xff] }
  0x78   : > { %v485_v51 = vld [vmem:[#allocation3 + $0x268] sm:$0xff]  ;;  %v518_v39 = vld [vmem:[#allocation3 + $0x370] sm:$0xff] }
  0x79   : > { %884 = vmatpush.bf16.msrb.mxu3 %v785_v63  ;;  %859 = vmatpush.bf16.msrb.mxu1 %v717_v9  ;;  %v545_v52 = vld [vmem:[#allocation3 + $0x448] sm:$0xff]  ;;  %v701_v60 = vpack.c.bf16 %v485_v51, %v481_v49  ;;  %v470_v9 = vld [vmem:[#allocation3 + $0x1f0] sm:$0xff] }
  0x7a   : > { %v549_v53 = vld [vmem:[#allocation3 + $0x468] sm:$0xff]  ;;  %v578_v40 = vld [vmem:[#allocation3 + $0x550] sm:$0xff] }
  0x7b   : > { %872 = vmatpush.bf16.msrb.mxu2 %v749_v10  ;;  %847 = vmatpush.bf16.msrb.mxu0 %v681_v20  ;;  %v609_v54 = vld [vmem:[#allocation3 + $0x648] sm:$0xff]  ;;  %v733_v61 = vpack.c.bf16 %v549_v53, %v545_v52  ;;  %v530_v10 = vld [vmem:[#allocation3 + $0x3d0] sm:$0xff]  ;;  %v694_v20 = vpack.c.bf16 %v470_v9, %v466_v8 }
  0x7c   : > { %v613_v55 = vld [vmem:[#allocation3 + $0x668] sm:$0xff]  ;;  %v582_v41 = vld [vmem:[#allocation3 + $0x570] sm:$0xff] }
  0x7d   : > { %885 = vmatpush.bf16.msrb.mxu3 %v781_v14  ;;  %860 = vmatpush.bf16.msrb.mxu1 %v713_v21  ;;  %v409_v58 = vld [vmem:[#allocation3 + $0x8] sm:$0xff]  ;;  %v765_v1 = vpack.c.bf16 %v613_v55, %v609_v54  ;;  %v598_v14 = vld [vmem:[#allocation3 + $0x5f0] sm:$0xff]  ;;  %v726_v21 = vpack.c.bf16 %v534_v12, %v530_v10 }
  0x7e   : > { %v413_v59 = vld [vmem:[#allocation3 + $0x28] sm:$0xff]  ;;  %v642_v42 = vld [vmem:[#allocation3 + $0x750] sm:$0xff] }
  0x7f   : > { %873 = vmatpush.bf16.msrb.mxu2 %v745_v22  ;;  %848 = vmatpush.bf16.msrb.mxu0 %v677_v32  ;;  %v473_v62 = vld [vmem:[#allocation3 + $0x208] sm:$0xff]  ;;  %v665_v11 = vpack.c.bf16 %v413_v59, %v409_v58  ;;  %v758_v22 = vpack.c.bf16 %v598_v14, %v594_v13  ;;  %v690_v32 = vpack.c.bf16 %v462_v24, %v458_v23  ;;  %v646_v43 = vld [vmem:[#allocation3 + $0x770] sm:$0xff] }
  0x80   : > { %v477_v63 = vld [vmem:[#allocation3 + $0x228] sm:$0xff]  ;;  %v442_v47 = vld [vmem:[#allocation3 + $0x110] sm:$0xff] }
  0x81   : > { %886 = vmatpush.bf16.msrb.mxu3 %v777_v26  ;;  %861 = vmatpush.bf16.msrb.mxu1 %v709_v33  ;;  %v537_v0 = vld [vmem:[#allocation3 + $0x408] sm:$0xff]  ;;  %v697_v15 = vpack.c.bf16 %v477_v63, %v473_v62  ;;  %v790_v26 = vpack.c.bf16 %v662_v18, %v658_v17  ;;  %v722_v33 = vpack.c.bf16 %v526_v27, %v522_v25  ;;  %v446_v48 = vld [vmem:[#allocation3 + $0x130] sm:$0xff] }
  0x82   : > { %v541_v2 = vld [vmem:[#allocation3 + $0x428] sm:$0xff]  ;;  %v506_v49 = vld [vmem:[#allocation3 + $0x310] sm:$0xff] }
  0x83   : > { %874 = vmatpush.bf16.msrb.mxu2 %v741_v34  ;;  %849 = vmatpush.bf16.msrb.mxu0 %v673_v44  ;;  %v601_v3 = vld [vmem:[#allocation3 + $0x608] sm:$0xff]  ;;  %v729_v16 = vpack.c.bf16 %v541_v2, %v537_v0  ;;  %v754_v34 = vpack.c.bf16 %v590_v29, %v586_v28  ;;  %v686_v44 = vpack.c.bf16 %v454_v36, %v450_v35  ;;  %v510_v51 = vld [vmem:[#allocation3 + $0x330] sm:$0xff] }
  0x84   : > { %v605_v4 = vld [vmem:[#allocation3 + $0x628] sm:$0xff]  ;;  %v570_v52 = vld [vmem:[#allocation3 + $0x510] sm:$0xff]  ;;  %v714_v58 = vpack.c.bf16 %v510_v51, %v506_v49  ;;  %v595_v49 = vld [vmem:[#allocation3 + $0x5d8] sm:$0xff] }
  0x85   : > { %887 = vmatpush.bf16.msrb.mxu3 %v773_v38  ;;  %862 = vmatpush.bf16.msrb.mxu1 %v705_v45  ;;  %v761_v19 = vpack.c.bf16 %v605_v4, %v601_v3  ;;  %v786_v38 = vpack.c.bf16 %v654_v31, %v650_v30  ;;  %v718_v45 = vpack.c.bf16 %v518_v39, %v514_v37  ;;  %v574_v53 = vld [vmem:[#allocation3 + $0x530] sm:$0xff] }
  0x86   : > { %v634_v54 = vld [vmem:[#allocation3 + $0x710] sm:$0xff]  ;;  %v746_v59 = vpack.c.bf16 %v574_v53, %v570_v52  ;;  %v659_v53 = vld [vmem:[#allocation3 + $0x7d8] sm:$0xff] }
  0x87   : > { %875 = vmatpush.bf16.msrb.mxu2 %v737_v46  ;;  %850 = vmatpush.bf16.msrb.mxu0 %v669_v56  ;;  %v750_v46 = vpack.c.bf16 %v582_v41, %v578_v40  ;;  %v638_v55 = vld [vmem:[#allocation3 + $0x730] sm:$0xff]  ;;  %v682_v56 = vpack.c.bf16 %v446_v48, %v442_v47  ;;  %v535_v48 = vld [vmem:[#allocation3 + $0x3f8] sm:$0xff] }
  0x88   : > { %v498_v62 = vld [vmem:[#allocation3 + $0x2d0] sm:$0xff]  ;;  %v778_v63 = vpack.c.bf16 %v638_v55, %v634_v54  ;;  %v663_v54 = vld [vmem:[#allocation3 + $0x7f8] sm:$0xff] }
  0x89   : > { %888 = vmatpush.bf16.msrb.mxu3 %v769_v50  ;;  %863 = vmatpush.bf16.msrb.mxu1 %v701_v60  ;;  %v782_v50 = vpack.c.bf16 %v646_v43, %v642_v42  ;;  %v434_v60 = vld [vmem:[#allocation3 + $0xd0] sm:$0xff] }
  0x8a   : > { %v502_v0 = vld [vmem:[#allocation3 + $0x2f0] sm:$0xff] }
  0x8b   : > { %876 = vmatpush.bf16.msrb.mxu2 %v733_v61  ;;  %851 = vmatpush.bf16.msrb.mxu0 %v665_v11  ;;  %v438_v61 = vld [vmem:[#allocation3 + $0xf0] sm:$0xff]  ;;  %v710_v9 = vpack.c.bf16 %v502_v0, %v498_v62  ;;  %v523_v62 = vld [vmem:[#allocation3 + $0x398] sm:$0xff] }
  0x8c   : > { %v566_v2 = vld [vmem:[#allocation3 + $0x4f0] sm:$0xff]  ;;  %v678_v8 = vpack.c.bf16 %v438_v61, %v434_v60  ;;  %v459_v60 = vld [vmem:[#allocation3 + $0x198] sm:$0xff] }
  0x8d   : > { %889 = vmatpush.bf16.msrb.mxu3 %v765_v1  ;;  %864 = vmatpush.bf16.msrb.mxu1 %v697_v15  ;;  %v562_v1 = vld [vmem:[#allocation3 + $0x4d0] sm:$0xff]  ;;  %v463_v61 = vld [vmem:[#allocation3 + $0x1b8] sm:$0xff] }
  0x8e   : > { %852 = vmatmul.bf16.vlgmr.msrb.gmra.mxu0 %v1787_v6  ;;  %v626_v3 = vld [vmem:[#allocation3 + $0x6d0] sm:$0xff]  ;;  %v742_v10 = vpack.c.bf16 %v566_v2, %v562_v1  ;;  %v527_v0 = vld [vmem:[#allocation3 + $0x3b8] sm:$0xff] }
  0x8f   : > { %877 = vmatpush.bf16.msrb.mxu2 %v729_v16  ;;  %896 = vmatpush.bf16.msra.mxu0 %v694_v20  ;;  %v630_v4 = vld [vmem:[#allocation3 + $0x6f0] sm:$0xff]  ;;  %v587_v1 = vld [vmem:[#allocation3 + $0x598] sm:$0xff] }
  0x90   : > { %865 = vmatmul.bf16.vlgmr.msrb.gmra.mxu1 %v1789_v7  ;;  %v426_v11 = vld [vmem:[#allocation3 + $0x90] sm:$0xff]  ;;  %v774_v14 = vpack.c.bf16 %v630_v4, %v626_v3  ;;  %v591_v2 = vld [vmem:[#allocation3 + $0x5b8] sm:$0xff] }
  0x91   : > { %890 = vmatpush.bf16.msrb.mxu3 %v761_v19  ;;  %909 = vmatpush.bf16.msra.mxu1 %v726_v21  ;;  %v430_v12 = vld [vmem:[#allocation3 + $0xb0] sm:$0xff]  ;;  %v651_v3 = vld [vmem:[#allocation3 + $0x798] sm:$0xff] }
  0x92   : > { %878 = vmatmul.bf16.vlgmr.msrb.gmra.mxu2 %v1779_v57  ;;  %v490_v13 = vld [vmem:[#allocation3 + $0x290] sm:$0xff]  ;;  %v674_v20 = vpack.c.bf16 %v430_v12, %v426_v11  ;;  %v655_v4 = vld [vmem:[#allocation3 + $0x7b8] sm:$0xff] }
  0x93   : > { %922 = vmatpush.bf16.msra.mxu2 %v758_v22  ;;  %897 = vmatpush.bf16.msra.mxu0 %v690_v32  ;;  %v494_v15 = vld [vmem:[#allocation3 + $0x2b0] sm:$0xff]  ;;  %v451_v11 = vld [vmem:[#allocation3 + $0x158] sm:$0xff] }
  0x94   : > { %891 = vmatmul.bf16.vlgmr.msrb.gmra.mxu3 %v1785_v5  ;;  %v554_v16 = vld [vmem:[#allocation3 + $0x490] sm:$0xff]  ;;  %v706_v21 = vpack.c.bf16 %v494_v15, %v490_v13  ;;  %v455_v12 = vld [vmem:[#allocation3 + $0x178] sm:$0xff] }
  0x95   : > { %935 = vmatpush.bf16.msra.mxu3 %v790_v26  ;;  %910 = vmatpush.bf16.msra.mxu1 %v722_v33  ;;  %v558_v17 = vld [vmem:[#allocation3 + $0x4b0] sm:$0xff]  ;;  %v515_v13 = vld [vmem:[#allocation3 + $0x358] sm:$0xff] }
  0x96   : > { %v618_v18 = vld [vmem:[#allocation3 + $0x690] sm:$0xff]  ;;  %v738_v22 = vpack.c.bf16 %v558_v17, %v554_v16  ;;  %v519_v15 = vld [vmem:[#allocation3 + $0x378] sm:$0xff] }
  0x97   : > { %923 = vmatpush.bf16.msra.mxu2 %v754_v34  ;;  %898 = vmatpush.bf16.msra.mxu0 %v686_v44  ;;  %v622_v19 = vld [vmem:[#allocation3 + $0x6b0] sm:$0xff]  ;;  %v467_v44 = vld [vmem:[#allocation3 + $0x1d8] sm:$0xff] }
  0x98   : > { %v418_v23 = vld [vmem:[#allocation3 + $0x50] sm:$0xff]  ;;  %v770_v26 = vpack.c.bf16 %v622_v19, %v618_v18  ;;  %v579_v16 = vld [vmem:[#allocation3 + $0x558] sm:$0xff] }
  0x99   : > { %936 = vmatpush.bf16.msra.mxu3 %v786_v38  ;;  %911 = vmatpush.bf16.msra.mxu1 %v718_v45  ;;  %v422_v24 = vld [vmem:[#allocation3 + $0x70] sm:$0xff]  ;;  %v471_v45 = vld [vmem:[#allocation3 + $0x1f8] sm:$0xff] }
  0x9a   : > { %v482_v25 = vld [vmem:[#allocation3 + $0x250] sm:$0xff]  ;;  %v670_v32 = vpack.c.bf16 %v422_v24, %v418_v23  ;;  %v583_v17 = vld [vmem:[#allocation3 + $0x578] sm:$0xff] }
  0x9b   : > { %924 = vmatpush.bf16.msra.mxu2 %v750_v46  ;;  %899 = vmatpush.bf16.msra.mxu0 %v682_v56  ;;  %v486_v27 = vld [vmem:[#allocation3 + $0x270] sm:$0xff]  ;;  %v531_v46 = vld [vmem:[#allocation3 + $0x3d8] sm:$0xff]  ;;  %v695_v56 = vpack.c.bf16 %v471_v45, %v467_v44 }
  0x9c   : > { %v546_v28 = vld [vmem:[#allocation3 + $0x450] sm:$0xff]  ;;  %v702_v35 = vpack.c.bf16 %v486_v27, %v482_v25  ;;  %v643_v18 = vld [vmem:[#allocation3 + $0x758] sm:$0xff] }
  0x9d   : > { %937 = vmatpush.bf16.msra.mxu3 %v782_v50  ;;  %912 = vmatpush.bf16.msra.mxu1 %v714_v58  ;;  %v550_v29 = vld [vmem:[#allocation3 + $0x470] sm:$0xff]  ;;  %v599_v50 = vld [vmem:[#allocation3 + $0x5f8] sm:$0xff]  ;;  %v727_v58 = vpack.c.bf16 %v535_v48, %v531_v46 }
  0x9e   : > { %v610_v30 = vld [vmem:[#allocation3 + $0x650] sm:$0xff]  ;;  %v734_v36 = vpack.c.bf16 %v550_v29, %v546_v28  ;;  %v647_v19 = vld [vmem:[#allocation3 + $0x778] sm:$0xff] }
  0x9f   : > { %925 = vmatpush.bf16.msra.mxu2 %v746_v59  ;;  %900 = vmatpush.bf16.msra.mxu0 %v678_v8  ;;  %v614_v31 = vld [vmem:[#allocation3 + $0x670] sm:$0xff]  ;;  %v759_v59 = vpack.c.bf16 %v599_v50, %v595_v49  ;;  %v691_v8 = vpack.c.bf16 %v463_v61, %v459_v60  ;;  %v443_v23 = vld [vmem:[#allocation3 + $0x118] sm:$0xff] }
  0xa0   : > { %v410_v33 = vld [vmem:[#allocation3 + $0x10] sm:$0xff]  ;;  %v766_v40 = vpack.c.bf16 %v614_v31, %v610_v30  ;;  %v447_v24 = vld [vmem:[#allocation3 + $0x138] sm:$0xff] }
  0xa1   : > { %938 = vmatpush.bf16.msra.mxu3 %v778_v63  ;;  %913 = vmatpush.bf16.msra.mxu1 %v710_v9  ;;  %v414_v34 = vld [vmem:[#allocation3 + $0x30] sm:$0xff]  ;;  %v791_v63 = vpack.c.bf16 %v663_v54, %v659_v53  ;;  %v723_v9 = vpack.c.bf16 %v527_v0, %v523_v62  ;;  %v507_v25 = vld [vmem:[#allocation3 + $0x318] sm:$0xff] }
  0xa2   : > { %v474_v37 = vld [vmem:[#allocation3 + $0x210] sm:$0xff]  ;;  %v666_v47 = vpack.c.bf16 %v414_v34, %v410_v33  ;;  %v511_v27 = vld [vmem:[#allocation3 + $0x338] sm:$0xff] }
  0xa3   : > { %926 = vmatpush.bf16.msra.mxu2 %v742_v10  ;;  %901 = vmatpush.bf16.msra.mxu0 %v674_v20  ;;  %v478_v38 = vld [vmem:[#allocation3 + $0x230] sm:$0xff]  ;;  %v755_v10 = vpack.c.bf16 %v591_v2, %v587_v1  ;;  %v687_v20 = vpack.c.bf16 %v455_v12, %v451_v11  ;;  %v571_v28 = vld [vmem:[#allocation3 + $0x518] sm:$0xff]  ;;  %v715_v33 = vpack.c.bf16 %v511_v27, %v507_v25 }
  0xa4   : > { %v538_v39 = vld [vmem:[#allocation3 + $0x410] sm:$0xff]  ;;  %v698_v51 = vpack.c.bf16 %v478_v38, %v474_v37  ;;  %v575_v29 = vld [vmem:[#allocation3 + $0x538] sm:$0xff] }
  0xa5   : > { %939 = vmatpush.bf16.msra.mxu3 %v774_v14  ;;  %914 = vmatpush.bf16.msra.mxu1 %v706_v21  ;;  %v542_v41 = vld [vmem:[#allocation3 + $0x430] sm:$0xff]  ;;  %v787_v14 = vpack.c.bf16 %v655_v4, %v651_v3  ;;  %v719_v21 = vpack.c.bf16 %v519_v15, %v515_v13  ;;  %v635_v30 = vld [vmem:[#allocation3 + $0x718] sm:$0xff]  ;;  %v747_v34 = vpack.c.bf16 %v575_v29, %v571_v28 }
  0xa6   : > { %v602_v42 = vld [vmem:[#allocation3 + $0x610] sm:$0xff]  ;;  %v730_v52 = vpack.c.bf16 %v542_v41, %v538_v39  ;;  %v639_v31 = vld [vmem:[#allocation3 + $0x738] sm:$0xff] }
  0xa7   : > { %927 = vmatpush.bf16.msra.mxu2 %v738_v22  ;;  %v606_v43 = vld [vmem:[#allocation3 + $0x630] sm:$0xff]  ;;  %902 = vmatpush.bf16.msra.mxu0 %v670_v32  ;;  %v751_v22 = vpack.c.bf16 %v583_v17, %v579_v16  ;;  %v683_v32 = vpack.c.bf16 %v447_v24, %v443_v23  ;;  %v499_v37 = vld [vmem:[#allocation3 + $0x2d8] sm:$0xff]  ;;  %v779_v38 = vpack.c.bf16 %v639_v31, %v635_v30 }
  0xa8   : > { %v762_v55 = vpack.c.bf16 %v606_v43, %v602_v42  ;;  %v503_v39 = vld [vmem:[#allocation3 + $0x2f8] sm:$0xff] }
  0xa9   : > { %940 = vmatpush.bf16.msra.mxu3 %v770_v26  ;;  %915 = vmatpush.bf16.msra.mxu1 %v702_v35  ;;  %v783_v26 = vpack.c.bf16 %v647_v19, %v643_v18  ;;  %v435_v35 = vld [vmem:[#allocation3 + $0xd8] sm:$0xff]  ;;  %v711_v45 = vpack.c.bf16 %v503_v39, %v499_v37 }
  0xaa   : > { %v567_v41 = vld [vmem:[#allocation3 + $0x4f8] sm:$0xff] }
  0xab   : > { %928 = vmatpush.bf16.msra.mxu2 %v734_v36  ;;  %903 = vmatpush.bf16.msra.mxu0 %v666_v47  ;;  %v439_v36 = vld [vmem:[#allocation3 + $0xf8] sm:$0xff] }
  0xac   : > { %v627_v42 = vld [vmem:[#allocation3 + $0x6d8] sm:$0xff]  ;;  %v679_v44 = vpack.c.bf16 %v439_v36, %v435_v35 }
  0xad   : > { %941 = vmatpush.bf16.msra.mxu3 %v766_v40  ;;  %916 = vmatpush.bf16.msra.mxu1 %v698_v51  ;;  %v563_v40 = vld [vmem:[#allocation3 + $0x4d8] sm:$0xff] }
  0xae   : > { %904 = vmatmul.bf16.vlgmr.msra.gmra.mxu0 %v1787_v6  ;;  %v631_v43 = vld [vmem:[#allocation3 + $0x6f8] sm:$0xff]  ;;  %v743_v46 = vpack.c.bf16 %v567_v41, %v563_v40 }
  0xaf   : > { %929 = vmatpush.bf16.msra.mxu2 %v730_v52  ;;  %948 = vmatpush.bf16.msrb.mxu0 %v695_v56  ;;  %v427_v47 = vld [vmem:[#allocation3 + $0x98] sm:$0xff]  ;;  %v775_v50 = vpack.c.bf16 %v631_v43, %v627_v42 }
  0xb0   : > { %917 = vmatmul.bf16.vlgmr.msra.gmra.mxu1 %v1789_v7  ;;  %v431_v48 = vld [vmem:[#allocation3 + $0xb8] sm:$0xff] }
  0xb1   : > { %942 = vmatpush.bf16.msra.mxu3 %v762_v55  ;;  %961 = vmatpush.bf16.msrb.mxu1 %v727_v58  ;;  %v491_v49 = vld [vmem:[#allocation3 + $0x298] sm:$0xff]  ;;  %v675_v56 = vpack.c.bf16 %v431_v48, %v427_v47 }
  0xb2   : > { %930 = vmatmul.bf16.vlgmr.msra.gmra.mxu2 %v1779_v57  ;;  %v495_v51 = vld [vmem:[#allocation3 + $0x2b8] sm:$0xff] }
  0xb3   : > { %974 = vmatpush.bf16.msrb.mxu2 %v759_v59  ;;  %949 = vmatpush.bf16.msrb.mxu0 %v691_v8  ;;  %v555_v52 = vld [vmem:[#allocation3 + $0x498] sm:$0xff]  ;;  %v707_v58 = vpack.c.bf16 %v495_v51, %v491_v49  ;;  %v1015_v51 = vld [vmem:[#allocation5] sm:$0xf] }
  0xb4   : > { %943 = vmatmul.bf16.vlgmr.msra.gmra.mxu3 %v1785_v5  ;;  %v559_v53 = vld [vmem:[#allocation3 + $0x4b8] sm:$0xff] }
  0xb5   : > { %987 = vmatpush.bf16.msrb.mxu3 %v791_v63  ;;  %962 = vmatpush.bf16.msrb.mxu1 %v723_v9  ;;  %v619_v54 = vld [vmem:[#allocation3 + $0x698] sm:$0xff]  ;;  %v739_v59 = vpack.c.bf16 %v559_v53, %v555_v52  ;;  %v1018_v53 = vperm.slane %v1015_v51, 1 }
  0xb6   : > { %v623_v55 = vld [vmem:[#allocation3 + $0x6b8] sm:$0xff] }
  0xb7   : > { %975 = vmatpush.bf16.msrb.mxu2 %v755_v10  ;;  %950 = vmatpush.bf16.msrb.mxu0 %v687_v20  ;;  %v419_v60 = vld [vmem:[#allocation3 + $0x58] sm:$0xff]  ;;  %v771_v63 = vpack.c.bf16 %v623_v55, %v619_v54 }
  0xb8   : > { %v423_v61 = vld [vmem:[#allocation3 + $0x78] sm:$0xff] }
  0xb9   : > { %988 = vmatpush.bf16.msrb.mxu3 %v787_v14  ;;  %963 = vmatpush.bf16.msrb.mxu1 %v719_v21  ;;  %v483_v62 = vld [vmem:[#allocation3 + $0x258] sm:$0xff]  ;;  %v671_v8 = vpack.c.bf16 %v423_v61, %v419_v60 }
  0xba   : > { %v487_v0 = vld [vmem:[#allocation3 + $0x278] sm:$0xff] }
  0xbb   : > { %976 = vmatpush.bf16.msrb.mxu2 %v751_v22  ;;  %951 = vmatpush.bf16.msrb.mxu0 %v683_v32  ;;  %v547_v1 = vld [vmem:[#allocation3 + $0x458] sm:$0xff]  ;;  %v703_v9 = vpack.c.bf16 %v487_v0, %v483_v62  ;;  %v1030_v62 = vld [vmem:[%s1750_s19 + $0x8] sm:$0xff] }
  0xbc   : > { %v551_v2 = vld [vmem:[#allocation3 + $0x478] sm:$0xff] }
  0xbd   : > { %989 = vmatpush.bf16.msrb.mxu3 %v783_v26  ;;  %964 = vmatpush.bf16.msrb.mxu1 %v715_v33  ;;  %v611_v3 = vld [vmem:[#allocation3 + $0x658] sm:$0xff]  ;;  %v735_v10 = vpack.c.bf16 %v551_v2, %v547_v1  ;;  %v1029_v1 = vld [vmem:[%s1750_s19] sm:$0xff] }
  0xbe   : > { %v615_v4 = vld [vmem:[#allocation3 + $0x678] sm:$0xff] }
  0xbf   : > { %977 = vmatpush.bf16.msrb.mxu2 %v747_v34  ;;  %952 = vmatpush.bf16.msrb.mxu0 %v679_v44  ;;  %v411_v11 = vld [vmem:[#allocation3 + $0x18] sm:$0xff]  ;;  %v767_v14 = vpack.c.bf16 %v615_v4, %v611_v3 }
  0xc0   : > { %v415_v12 = vld [vmem:[#allocation3 + $0x38] sm:$0xff] }
  0xc1   : > { %990 = vmatpush.bf16.msrb.mxu3 %v779_v38  ;;  %965 = vmatpush.bf16.msrb.mxu1 %v711_v45  ;;  %v475_v13 = vld [vmem:[#allocation3 + $0x218] sm:$0xff]  ;;  %v667_v20 = vpack.c.bf16 %v415_v12, %v411_v11 }
  0xc2   : > { %v479_v15 = vld [vmem:[#allocation3 + $0x238] sm:$0xff] }
  0xc3   : > { %978 = vmatpush.bf16.msrb.mxu2 %v743_v46  ;;  %953 = vmatpush.bf16.msrb.mxu0 %v675_v56  ;;  %v539_v16 = vld [vmem:[#allocation3 + $0x418] sm:$0xff]  ;;  %v699_v21 = vpack.c.bf16 %v479_v15, %v475_v13  ;;  %v1017_v56 = vperm.slane %v1015_v51, 0 }
  0xc4   : > { %v543_v17 = vld [vmem:[#allocation3 + $0x438] sm:$0xff] }
  0xc5   : > { %991 = vmatpush.bf16.msrb.mxu3 %v775_v50  ;;  %966 = vmatpush.bf16.msrb.mxu1 %v707_v58  ;;  %v603_v18 = vld [vmem:[#allocation3 + $0x618] sm:$0xff]  ;;  %v731_v22 = vpack.c.bf16 %v543_v17, %v539_v16 }
  0xc6   : > { %v607_v19 = vld [vmem:[#allocation3 + $0x638] sm:$0xff] }
  0xc7   : > { %979 = vmatpush.bf16.msrb.mxu2 %v739_v59  ;;  %954 = vmatpush.bf16.msrb.mxu0 %v671_v8  ;;  %v763_v23 = vpack.c.bf16 %v607_v19, %v603_v18  ;;  %v1019_v59 = vperm.slane %v1015_v51, 2  ;;  %v1031_v3 = vld [vmem:[%s1750_s19 + $0x10] sm:$0xff]  ;;  %v1032_v16 = vld [vmem:[%s1750_s19 + $0x18] sm:$0xff] }
  0xc9   : > { %992 = vmatpush.bf16.msrb.mxu3 %v771_v63  ;;  %967 = vmatpush.bf16.msrb.mxu1 %v703_v9 }
  0xcb   : > { %980 = vmatpush.bf16.msrb.mxu2 %v735_v10  ;;  %955 = vmatpush.bf16.msrb.mxu0 %v667_v20  ;;  %v1020_v10 = vperm.slane %v1015_v51, 3 }
  0xcd   : > { %993 = vmatpush.bf16.msrb.mxu3 %v767_v14  ;;  %968 = vmatpush.bf16.msrb.mxu1 %v699_v21 }
  0xce   : > { %956 = vmatmul.bf16.vlgmr.msrb.gmra.mxu0 %v1787_v6 }
  0xcf   : > { %981 = vmatpush.bf16.msrb.mxu2 %v731_v22 }
  0xd0   : > { %969 = vmatmul.bf16.vlgmr.msrb.gmra.mxu1 %v1789_v7 }
  0xd1   : > { %994 = vmatpush.bf16.msrb.mxu3 %v763_v23 }
  0xd2   : > { %982 = vmatmul.bf16.vlgmr.msrb.gmra.mxu2 %v1779_v57 }
  0xd4   : > { %995 = vmatmul.bf16.vlgmr.msrb.gmra.mxu3 %v1785_v5 }
  0xed   : > { %v814_v25 = vpop.f32.mrf.mxu1 }
  0xef   : > { %v801_v24 = vpop.f32.mrf.mxu0 }
  0xf0   : > { %v815_v26 = vadd.f32 %v814_v25, %v801_v24  ;;  %v1597_v24 = vmov 512.0  }
  0xf1   : > { %1369 = vrcp.f32 %v1597_v24 }
  0xf5   : > { %v827_v27 = vpop.f32.mrf.mxu2  ;;  %v816_v32 = vpop.f32.mrf.mxu1 }
  0xf6   : > { %v828_v28 = vadd.f32 %v827_v27, %v815_v26 }
  0xf7   : > { %v840_v29 = vpop.f32.mrf.mxu3  ;;  %v803_v31 = vpop.f32.mrf.mxu0 }
  0xf8   : > { %v841_v30 = vadd.f32 %v840_v29, %v828_v28  ;;  %v1370_v25 = vpop.eup %1369 }
  0xf9   : > { %v1043_v26 = vmul.f32 512.0, %v1370_v25  ;;  %vm1047_vm0 = vweird.f32 %v1370_v25 }
  0xfa   : > { %v1025_v63 = vadd.f32 %v1017_v56, %v841_v30 }
  0xfb   : > { %v1044_v27 = vsub.f32 1.0, %v1043_v26 }
  0xfc   : > { %v1033_v13 = vadd.f32 %v1029_v1, %v1025_v63 }
  0xfd   : > { %v829_v33 = vpop.f32.mrf.mxu2  ;;  %v1045_v28 = vmul.f32 %v1370_v25, %v1044_v27 }
  0xff   : > { %v842_v34 = vpop.f32.mrf.mxu3  ;;  %v1046_v29 = vadd.f32 %v1370_v25, %v1045_v28 }
 0x101   : > { %v1048_v30 = vsel %vm1047_vm0, %v1370_v25, %v1046_v29 }
 0x10b   : > { %v853_v35 = vpop.f32.mrf.mxu0 }
 0x10d   : > { %v866_v36 = vpop.f32.mrf.mxu1 }
 0x10e   : > { %v867_v47 = vadd.f32 %v866_v36, %v853_v35 }
 0x113   : > { %v855_v7 = vpop.f32.mrf.mxu0 }
 0x115   : > { %v879_v6 = vpop.f32.mrf.mxu2  ;;  %v868_v38 = vpop.f32.mrf.mxu1 }
 0x116   : > { %v880_v49 = vadd.f32 %v879_v6, %v867_v47  ;;  %v1079_v47 = vld [vmem:[#allocation8] sm:$0xf] }
 0x117   : > { %v892_v37 = vpop.f32.mrf.mxu3  ;;  %v1081_v51 = vperm.slane %v1079_v47, 0 }
 0x118   : > { %v893_v52 = vadd.f32 %v892_v37, %v880_v49  ;;  %v1093_v49 = vld [vmem:[#allocation9] sm:$0xf] }
 0x119   : > { %v1096_v56 = vperm.slane %v1093_v49, 1 }
 0x11a   : > { %v1026_v60 = vadd.f32 %v1018_v53, %v893_v52  ;;  %v1082_v52 = vperm.slane %v1079_v47, 1  ;;  %v1083_v53 = vperm.slane %v1079_v47, 2 }
 0x11c   : > { %v1034_v4 = vadd.f32 %v1030_v62, %v1026_v60 }
 0x11d   : > { %v881_v57 = vpop.f32.mrf.mxu2 }
 0x11e   : > { %v1037_v18 = vadd.f32 %v1034_v4, %v1033_v13 }
 0x11f   : > { %v894_v39 = vpop.f32.mrf.mxu3 }
 0x12b   : > { %v905_v5 = vpop.f32.mrf.mxu0 }
 0x12d   : > { %v918_v40 = vpop.f32.mrf.mxu1 }
 0x12e   : > { %v919_v48 = vadd.f32 %v918_v40, %v905_v5 }
 0x133   : > { %v907_v43 = vpop.f32.mrf.mxu0 }
 0x135   : > { %v931_v41 = vpop.f32.mrf.mxu2  ;;  %v920_v44 = vpop.f32.mrf.mxu1 }
 0x136   : > { %v932_v50 = vadd.f32 %v931_v41, %v919_v48 }
 0x137   : > { %v944_v42 = vpop.f32.mrf.mxu3 }
 0x138   : > { %v945_v58 = vadd.f32 %v944_v42, %v932_v50 }
 0x13a   : > { %v1027_v0 = vadd.f32 %v1019_v59, %v945_v58  ;;  %v1097_v58 = vperm.slane %v1093_v49, 2 }
 0x13c   : > { %v1035_v15 = vadd.f32 %v1031_v3, %v1027_v0  ;;  %v1098_v0 = vperm.slane %v1093_v49, 3 }
 0x13d   : > { %v933_v45 = vpop.f32.mrf.mxu2 }
 0x13e   : > { %v1038_v20 = vadd.f32 %v1037_v18, %v1035_v15 }
 0x13f   : > { %v946_v46 = vpop.f32.mrf.mxu3 }
 0x14b   : > { %v957_v54 = vpop.f32.mrf.mxu0 }
 0x14d   : > { %v970_v55 = vpop.f32.mrf.mxu1 }
 0x14e   : > { %v971_v61 = vadd.f32 %v970_v55, %v957_v54  ;;  %v1084_v54 = vperm.slane %v1079_v47, 3  ;;  %v1095_v55 = vperm.slane %v1093_v49, 0 }
 0x153   : > { %v959_v11 = vpop.f32.mrf.mxu0 }
 0x155   : > { %v983_v2 = vpop.f32.mrf.mxu2  ;;  %v972_v12 = vpop.f32.mrf.mxu1 }
 0x156   : > { %v984_v8 = vadd.f32 %v983_v2, %v971_v61 }
 0x157   : > { %v996_v9 = vpop.f32.mrf.mxu3 }
 0x158   : > { %v997_v14 = vadd.f32 %v996_v9, %v984_v8 }
 0x15a   : > { %v1028_v17 = vadd.f32 %v1020_v10, %v997_v14 }
 0x15c   : > { %v1036_v19 = vadd.f32 %v1032_v16, %v1028_v17 }
 0x15d   : > { %v985_v21 = vpop.f32.mrf.mxu2 }
 0x15e   : > { %v1039_v23 = vadd.f32 %v1038_v20, %v1036_v19 }
 0x15f   : > { %v998_v22 = vpop.f32.mrf.mxu3 }
 0x160   : > { %1040 = vadd.xlane.f32.xlu0 %v1039_v23 }
 0x1d3   : > { %v1041_v31 = vpop.xlane.xlu0 %1040 }
 0x1d4   : > { %v1049_v32 = vmul.f32 %v1048_v30, %v1041_v31 }
 0x1d6   : > { %v1050_v33 = vsub.f32 %v1033_v13, %v1049_v32  ;;  %v1051_v34 = vsub.f32 %v1034_v4, %v1049_v32  ;;  %v1052_v35 = vsub.f32 %v1035_v15, %v1049_v32  ;;  %v1053_v36 = vsub.f32 %v1036_v19, %v1049_v32 }
 0x1d8   : > { %v1054_v6 = vmul.f32 %v1050_v33, %v1050_v33  ;;  %v1055_v37 = vmul.f32 %v1051_v34, %v1051_v34  ;;  %v1056_v7 = vmul.f32 %v1052_v35, %v1052_v35  ;;  %v1057_v57 = vmul.f32 %v1053_v36, %v1053_v36 }
 0x1da   : > { %v1058_v38 = vadd.f32 %v1055_v37, %v1054_v6 }
 0x1dc   : > { %v1059_v39 = vadd.f32 %v1058_v38, %v1056_v7 }
 0x1de   : > { %v1060_v5 = vadd.f32 %v1059_v39, %v1057_v57 }
 0x1e0   : > { %1061 = vadd.xlane.f32.xlu0 %v1060_v5 }
 0x253   : > { %v1062_v40 = vpop.xlane.xlu0 %1061 }
 0x254   : > { %v1063_v41 = vmul.f32 %v1062_v40, %v1048_v30 }
 0x256   : > { %v1064_v42 = vadd.f32 1e-05, %v1063_v41 }
 0x258   : > { %1371 = vrsqrt.f32 %v1064_v42  ;;  %vm1071_vm2 = vweird.f32 %v1064_v42 }
 0x25e   : > { %v1372_v43 = vpop.eup %1371 }
 0x25f   : > { %v1066_v44 = vmul.f32 %v1372_v43, %v1064_v42  ;;  %vm1072_vm1 = vweird.f32 %v1372_v43 }
 0x260   : > { %vm1073_vm3 = vmor %vm1071_vm2, %vm1072_vm1 }
 0x261   : > { %v1067_v45 = vmul.f32 %v1372_v43, %v1066_v44 }
 0x263   : > { %v1068_v46 = vmul.f32 0.5, %v1067_v45 }
 0x265   : > { %v1069_v48 = vsub.f32 1.5, %v1068_v46 }
 0x267   : > { %v1070_v50 = vmul.f32 %v1372_v43, %v1069_v48 }
 0x269   : > { %v1074_v59 = vsel %vm1073_vm3, %v1372_v43, %v1070_v50 }
 0x26a   : > { %v1075_v60 = vmul.f32 %v1074_v59, %v1050_v33  ;;  %v1076_v61 = vmul.f32 %v1074_v59, %v1051_v34  ;;  %v1077_v62 = vmul.f32 %v1074_v59, %v1052_v35  ;;  %v1078_v63 = vmul.f32 %v1074_v59, %v1053_v36 }
 0x26c   : > { %v1089_v1 = vmul.f32 %v1081_v51, %v1075_v60  ;;  %v1090_v2 = vmul.f32 %v1082_v52, %v1076_v61  ;;  %v1091_v3 = vmul.f32 %v1083_v53, %v1077_v62  ;;  %v1092_v4 = vmul.f32 %v1084_v54, %v1078_v63 }
 0x26e   : > { %v1103_v8 = vadd.f32 %v1095_v55, %v1089_v1  ;;  %v1104_v9 = vadd.f32 %v1096_v56, %v1090_v2  ;;  %v1105_v10 = vadd.f32 %v1097_v58, %v1091_v3  ;;  %v1106_v11 = vadd.f32 %v1098_v0, %v1092_v4 }
 0x270   : > { %1107 = vst [vmem:[%s387_s7] sm:$0xff] %v1103_v8 }
 0x271   : > { %1108 = vst [vmem:[%s387_s7 + $0x8] sm:$0xff] %v1104_v9 }
 0x272   : > { %1109 = vst [vmem:[%s387_s7 + $0x10] sm:$0xff] %v1105_v10 }
 0x273   : > { %1110 = vst [vmem:[%s387_s7 + $0x18] sm:$0xff] %v1106_v11 }
 0x274 PF: > { %s19_s26 = sadd.s32 1, %s1589_s26   ;;  %s1847_s10 = smov %s1729_s21 }
 0x275   : > { %p16_p2 = scmp.ge.s32.totalorder %s19_s26, 4   ;;  %s1848_s21 = smov %s1573_s22 }
 0x276   : > { %s1849_s22 = smov %s1577_s23  ;;  %s1850_s23 = smov %s1847_s10 }
 0x277   : > { %s1851_s24 = smov %s1585_s25  ;;  %s1852_s25 = smov %s1854_s14 }
 0x278   :  { %18 = sbr.rel (!%p16_p2) target bundleno = 5 (0x5), region = 111 }
 0x27d   :  { %1132 = vsyncpa [#allocation4], 1 }
 0x27e   :  { %1134 = vsyncpa [#allocation4 + $0x1], 1 }
 0x27f   :  { %1135 = vsyncpa [#allocation6], 1 }
 0x280   :  { %1136 = vsyncpa [#allocation10], 1 }

</bundles_post_ra>
